<compile_context>
chip_gen: v7x
topology: tpu7x:2x2x1
jax: 0.10.0
libtpu: 0.0.40
codegen_flags: <defaults>
</compile_context>

<pallas_src>
import jax
import jax.numpy as jnp
from jax.experimental import pallas as pl
from jax.experimental.pallas import tpu as pltpu


# ----------------------------------------------------------------------------
# tiling knobs / helpers
# ----------------------------------------------------------------------------
CONV_TM_CAP = 512   # conv M-tile cap: keeps double-buffered conv tiles small
                    # enough for v5e's scoped VMEM while staying on the
                    # tile-size knee (review item 5).
DENSE_TK = 4096     # dense1 K-tile: 8 MiB bf16 W1 tile double-buffered fits
                    # v5e/v7x; v6e could be bumped to 8192 (review item 4).
DENSE_TN = 512      # dense1 H-tile: 2 "parallel" tiles feed both v7x cores.


def _round_up(x, m):
    return (x + m - 1) // m * m


def _vmem_limit(block_bytes):
    # Double-buffered pipeline blocks + headroom for in-kernel temporaries,
    # capped below v7x's 64 MiB physical VMEM (review item 6).
    return int(min(4 * block_bytes + (16 << 20), 48 << 20))


def _dense_k_tiling(kd):
    """(tk, padded_K) for the dense1 reduction."""
    if kd <= DENSE_TK:
        kdp = _round_up(kd, 512)
        return kdp, kdp
    return DENSE_TK, _round_up(kd, DENSE_TK)


# ----------------------------------------------------------------------------
# Pallas kernel 1: fused im2col + conv matmul + bias + ReLU.
#   out[t] = relu( g[t] @ W_lo + g[t+1] @ W_hi + b ),   g[t] = xp[4t:4t+4, :]
# Grid: (batch, M-tiles), both "parallel".
# ----------------------------------------------------------------------------
def _conv_mm_kernel(gm_ref, gn_ref, wlo_ref, whi_ref, b_ref, o_ref):
    tm = gm_ref.shape[1]
    # (tm+8, 4*Cin): tm main rows + 8 look-ahead rows (only row tm is used).
    g = jnp.concatenate([gm_ref[0], gn_ref[0]], axis=0)
    acc = jnp.dot(g[:tm], wlo_ref[...], preferred_element_type=jnp.float32)
    acc = acc + jnp.dot(g[1:tm + 1], whi_ref[...],
                        preferred_element_type=jnp.float32)
    o_ref[0] = jnp.maximum(acc + b_ref[...], 0.0).astype(o_ref.dtype)


def conv1d_relu(x_cl, w_lo, w_hi, b):
    """Conv1d(kernel=8, stride=4, padding=1) + ReLU, channels-last.

    x_cl: (B, L, Cin) bf16; w_lo/w_hi: (4*Cin, Cout) bf16 (taps 0-3 / 4-7);
    b: (Cout,) f32.  Returns (B, Lout, Cout) bf16.
    """
    B, L, Cin = x_cl.shape
    C4 = 4 * Cin
    Cout = w_lo.shape[1]
    Lout = (L + 2 - 8) // 4 + 1

    # cdiv-based M tiling (review item 2); padding folded into the single
    # activation pad below (review item 8).
    nt = pl.cdiv(Lout, CONV_TM_CAP)
    tm = _round_up(pl.cdiv(Lout, nt), 8)
    Tp = nt * tm

    # One pad of the activation builds the grouped view g = (B, Tp+8, 4*Cin):
    # front zero (conv padding=1), back zeros cover conv padding + tile
    # rounding + the 8-row look-ahead window of the last tile.
    rows = 4 * (Tp + 8)
    g = jnp.pad(x_cl, ((0, 0), (1, rows - 1 - L), (0, 0)))
    g = g.reshape(B, Tp + 8, C4)

    blk = (tm * C4 + 8 * C4 + tm * Cout) * 2 + 2 * C4 * Cout * 2 + Cout * 4
    out = pl.pallas_call(
        _conv_mm_kernel,
        out_shape=jax.ShapeDtypeStruct((B, Tp, Cout), jnp.bfloat16),
        grid_spec=pltpu.PrefetchScalarGridSpec(
            num_scalar_prefetch=0,
            grid=(B, nt),
            in_specs=[
                pl.BlockSpec((1, tm, C4), lambda bi, i: (bi, i, 0)),
                # 8-row look-ahead block starting exactly at row (i+1)*tm.
                pl.BlockSpec((1, 8, C4),
                             lambda bi, i: (bi, (i + 1) * (tm // 8), 0)),
                pl.BlockSpec((C4, Cout), lambda bi, i: (0, 0)),
                pl.BlockSpec((C4, Cout), lambda bi, i: (0, 0)),
                pl.BlockSpec((1, Cout), lambda bi, i: (0, 0)),
            ],
            out_specs=pl.BlockSpec((1, tm, Cout), lambda bi, i: (bi, i, 0)),
        ),
        compiler_params=pltpu.CompilerParams(
            dimension_semantics=("parallel", "parallel"),
            vmem_limit_bytes=_vmem_limit(blk)),
    )(g, g, w_lo, w_hi, b.reshape(1, Cout).astype(jnp.float32))
    # Rows >= Lout come from zero padding and are discarded (fused with the
    # next layer's pad by XLA).
    return out[:, :Lout, :]
    # TODO(synk): conv1's contraction depth is only 4*Cin=8 per half; it is
    # HBM-bound, so per the review we leave it rather than padding the MXU.


# ----------------------------------------------------------------------------
# Pallas kernel 2: fused dense1 + dense2.
#   Grid (H-tiles "parallel", K-tiles "arbitrary"); f32 accumulator in VMEM.
#   Each H-tile emits its partial dense2 output; partials are summed in JAX
#   (a (nj, Bp, 1) array -- negligible).
# ----------------------------------------------------------------------------
def _dense_fused_kernel(x_ref, w1_ref, b1_ref, w2_ref, o_ref, acc_ref):
    k = pl.program_id(1)

    @pl.when(k == 0)
    def _():
        acc_ref[...] = jnp.zeros_like(acc_ref)

    acc_ref[...] += jnp.dot(x_ref[...], w1_ref[...],
                            preferred_element_type=jnp.float32)

    @pl.when(k == pl.num_programs(1) - 1)
    def _():
        h = jnp.maximum(acc_ref[...] + b1_ref[...], 0.0)        # (Bp, tn) f32
        o_ref[0] = jnp.dot(h.astype(w2_ref.dtype), w2_ref[...],
                           preferred_element_type=jnp.float32)   # (Bp, 1)


def dense_fused(x, w1, b1, w2, b2):
    """x: (Bp, Kdp) bf16, w1: (Kdp, H) bf16 (padded rows zero), b1: (H,),
    w2: (H, 1) bf16, b2: (1,).  Returns (Bp, 1) f32."""
    Bp, Kdp = x.shape
    H = w1.shape[1]
    tn = min(DENSE_TN, H)
    tk = min(DENSE_TK, Kdp)
    assert H % tn == 0 and Kdp % tk == 0
    nj, nk = H // tn, Kdp // tk

    blk = (Bp * tk + tk * tn + tn + Bp) * 2 + tn * 4 + Bp * tn * 4
    part = pl.pallas_call(
        _dense_fused_kernel,
        out_shape=jax.ShapeDtypeStruct((nj, Bp, 1), jnp.float32),
        grid_spec=pltpu.PrefetchScalarGridSpec(
            num_scalar_prefetch=0,
            grid=(nj, nk),
            in_specs=[
                pl.BlockSpec((Bp, tk), lambda j, k: (0, k)),
                pl.BlockSpec((tk, tn), lambda j, k: (k, j)),
                pl.BlockSpec((1, tn), lambda j, k: (0, j)),
                pl.BlockSpec((tn, 1), lambda j, k: (j, 0)),
            ],
            out_specs=pl.BlockSpec((1, Bp, 1), lambda j, k: (j, 0, 0)),
            scratch_shapes=[pltpu.VMEM((Bp, tn), jnp.float32)],
        ),
        compiler_params=pltpu.CompilerParams(
            dimension_semantics=("parallel", "arbitrary"),
            vmem_limit_bytes=_vmem_limit(blk)),
    )(x, w1, b1.reshape(1, H).astype(jnp.float32), w2)
    return part.sum(axis=0) + b2.reshape(1, 1).astype(jnp.float32)


# ----------------------------------------------------------------------------
# Parameter init (deterministic, PyTorch-style uniform(-1/sqrt(fan_in), ...)),
# in the ORIGINAL PyTorch layouts/shapes.
# ----------------------------------------------------------------------------
def _uniform(key, shape, fan_in):
    bound = 1.0 / jnp.sqrt(jnp.float32(fan_in))
    return jax.random.uniform(key, shape, jnp.float32, -bound, bound)


def init_params(key, flat_dim):
    ks = jax.random.split(key, 12)
    conv_shapes = [(96, 2, 8), (128, 96, 8), (256, 128, 8), (512, 256, 8)]
    params = {}
    for i, (co, ci, k) in enumerate(conv_shapes, start=1):
        fan_in = ci * k
        params[f"conv{i}_w"] = _uniform(ks[2 * (i - 1)], (co, ci, k), fan_in)
        params[f"conv{i}_b"] = _uniform(ks[2 * (i - 1) + 1], (co,), fan_in)
    params["dense1_w"] = _uniform(ks[8], (1024, flat_dim), flat_dim)   # (out, in)
    params["dense1_b"] = _uniform(ks[9], (1024,), flat_dim)
    params["dense2_w"] = _uniform(ks[10], (1, 1024), 1024)
    params["dense2_b"] = _uniform(ks[11], (1,), 1024)
    return params


# ----------------------------------------------------------------------------
# One-time weight preparation for the Pallas path:
#   * conv1 Cout 96 -> 128 zero-pad (lane alignment); conv2 Cin padded to match
#   * conv weights split into tap-0..3 / tap-4..7 halves of shape (4*Cin, Cout)
#   * dense1 weight permuted from PyTorch channel-major flatten (c*L4 + t) to
#     the channels-last flatten (t*C + c), transposed to (Kd, H), then
#     zero-padded to Kdp rows (padded rows are zero -> reduction unchanged)
# ----------------------------------------------------------------------------
def _split_conv_w(w):
    Cout, Cin, K = w.shape
    lo = w[:, :, :4].transpose(2, 1, 0).reshape(4 * Cin, Cout)
    hi = w[:, :, 4:].transpose(2, 1, 0).reshape(4 * Cin, Cout)
    return lo.astype(jnp.bfloat16), hi.astype(jnp.bfloat16)


def prepare_params(params, l4):
    p = {}
    c1w, c1b, c2w = params["conv1_w"], params["conv1_b"], params["conv2_w"]
    co1 = c1w.shape[0]
    co1p = _round_up(co1, 128)
    c1w = jnp.pad(c1w, ((0, co1p - co1), (0, 0), (0, 0)))
    c1b = jnp.pad(c1b, ((0, co1p - co1),))
    c2w = jnp.pad(c2w, ((0, 0), (0, co1p - co1), (0, 0)))
    for name, w, b in (("conv1", c1w, c1b),
                       ("conv2", c2w, params["conv2_b"]),
                       ("conv3", params["conv3_w"], params["conv3_b"]),
                       ("conv4", params["conv4_w"], params["conv4_b"])):
        lo, hi = _split_conv_w(w)
        p[f"{name}_wlo"], p[f"{name}_whi"], p[f"{name}_b"] = lo, hi, b

    w1 = params["dense1_w"]                      # (H, C*l4), channel-major cols
    H = w1.shape[0]
    C = w1.shape[1] // l4
    kd = C * l4
    _, kdp = _dense_k_tiling(kd)
    w1 = w1.reshape(H, C, l4).transpose(2, 1, 0).reshape(kd, H)
    w1 = jnp.pad(w1, ((0, kdp - kd), (0, 0)))    # zero rows: padded K is inert
    p["dense1_w"] = w1.astype(jnp.bfloat16)      # (Kdp, H)
    p["dense1_b"] = params["dense1_b"]
    p["dense2_w"] = params["dense2_w"].T.astype(jnp.bfloat16)   # (H, 1)
    p["dense2_b"] = params["dense2_b"]
    return p


# ----------------------------------------------------------------------------
# Full forward pass (mirrors AudioLocationNN.forward; Dropout inactive in fwd)
# ----------------------------------------------------------------------------
def audio_location_forward(prepared, x):
    # x: (B, 2, L0) f32 in PyTorch NCL layout -> channels-last bf16.
    h = x.transpose(0, 2, 1).astype(jnp.bfloat16)
    for name in ("conv1", "conv2", "conv3", "conv4"):
        h = conv1d_relu(h, prepared[f"{name}_wlo"], prepared[f"{name}_whi"],
                        prepared[f"{name}_b"])
    B, L4, C = h.shape
    kd = L4 * C
    _, kdp = _dense_k_tiling(kd)
    Bp = _round_up(B, 16)
    hf = jnp.pad(h.reshape(B, kd), ((0, Bp - B), (0, kdp - kd)))
    y = dense_fused(hf, prepared["dense1_w"], prepared["dense1_b"],
                    prepared["dense2_w"], prepared["dense2_b"])
    return y[:B]


# ----------------------------------------------------------------------------
# Pure-JAX reference: PyTorch layouts/semantics with the same bf16-in /
# f32-accumulate precision policy the Pallas path uses.
# ----------------------------------------------------------------------------
def _ref_forward(params, x):
    def conv(h, w, b):
        y = jax.lax.conv_general_dilated(
            h.astype(jnp.bfloat16), w.astype(jnp.bfloat16),
            window_strides=(4,), padding=[(1, 1)],
            dimension_numbers=("NCH", "OIH", "NCH"),
            preferred_element_type=jnp.float32)
        return jax.nn.relu(y + b[None, :, None])
    h = conv(x, params["conv1_w"], params["conv1_b"])
    h = conv(h, params["conv2_w"], params["conv2_b"])
    h = conv(h, params["conv3_w"], params["conv3_b"])
    h = conv(h, params["conv4_w"], params["conv4_b"])
    h = h.reshape(h.shape[0], -1)                      # channel-major flatten
    h = jnp.dot(h.astype(jnp.bfloat16),
                params["dense1_w"].T.astype(jnp.bfloat16),
                preferred_element_type=jnp.float32)
    h = jax.nn.relu(h + params["dense1_b"])
    y = jnp.dot(h.astype(jnp.bfloat16),
                params["dense2_w"].T.astype(jnp.bfloat16),
                preferred_element_type=jnp.float32)
    return y + params["dense2_b"]


if __name__ == "__main__":
    B, Cin, L0 = 2, 2, 1024   # small stand-in for the ~192.5k-sample waveform
    key = jax.random.PRNGKey(0)
    k_x, k_p = jax.random.split(key)
    x = jax.random.normal(k_x, (B, Cin, L0), jnp.float32)

    # conv output lengths for kernel=8, stride=4, padding=1
    L = L0
    for _ in range(4):
        L = (L + 2 - 8) // 4 + 1
    L4 = L
    flat_dim = 512 * L4       # analogue of 512 * 751 in the original module

    params = init_params(k_p, flat_dim)
    prepared = prepare_params(params, L4)

    fwd = jax.jit(audio_location_forward)
    out = jax.block_until_ready(fwd(prepared, x))
    assert out.shape == (B, 1), out.shape

    ref = jax.block_until_ready(_ref_forward(params, x))
    assert jnp.allclose(out, ref, rtol=1e-3, atol=1e-3), (out, ref)

    print("KERNEL_OK")
</pallas_src>

<mosaic_0001>
module attributes {stable_mosaic.version = 11 : i64} {
  func.func @_conv_mm_kernel(%arg0: i32, %arg1: i32, %arg2: memref<1x256x8xbf16, #tpu.memory_space<vmem>>, %arg3: memref<1x8x8xbf16, #tpu.memory_space<vmem>>, %arg4: memref<8x128xbf16, #tpu.memory_space<vmem>>, %arg5: memref<8x128xbf16, #tpu.memory_space<vmem>>, %arg6: memref<1x128xf32, #tpu.memory_space<vmem>>, %arg7: memref<1x256x128xbf16, #tpu.memory_space<vmem>>) attributes {dimension_semantics = [#tpu.dimension_semantics<parallel>, #tpu.dimension_semantics<parallel>], iteration_bounds = array<i64: 2, 1>, scalar_prefetch = 0 : i64, scratch_operands = 0 : i64, tpu.core_type = #tpu.core_type<tc>, window_params = [{transform_indices = @transform_0, window_bounds = array<i64: 1, 256, 8>}, {transform_indices = @transform_1, window_bounds = array<i64: 1, 8, 8>}, {pipeline_mode = #tpu.pipeline_mode<synchronous>, transform_indices = @transform_2, window_bounds = array<i64: 8, 128>}, {pipeline_mode = #tpu.pipeline_mode<synchronous>, transform_indices = @transform_3, window_bounds = array<i64: 8, 128>}, {pipeline_mode = #tpu.pipeline_mode<synchronous>, transform_indices = @transform_4, window_bounds = array<i64: 1, 128>}, {transform_indices = @transform_5, window_bounds = array<i64: 1, 256, 128>}]} {
    %c0 = arith.constant 0 : index
    %c0_0 = arith.constant 0 : index
    %c0_1 = arith.constant 0 : index
    %0 = vector.load %arg2[%c0, %c0_0, %c0_1] : memref<1x256x8xbf16, #tpu.memory_space<vmem>>, vector<1x256x8xbf16>
    %1 = vector.shape_cast %0 : vector<1x256x8xbf16> to vector<256x8xbf16>
    %c0_2 = arith.constant 0 : index
    %c0_3 = arith.constant 0 : index
    %c0_4 = arith.constant 0 : index
    %2 = vector.load %arg3[%c0_2, %c0_3, %c0_4] : memref<1x8x8xbf16, #tpu.memory_space<vmem>>, vector<1x8x8xbf16>
    %3 = vector.shape_cast %2 : vector<1x8x8xbf16> to vector<8x8xbf16>
    %4 = tpu.concatenate %1, %3 in 0 : vector<256x8xbf16>, vector<8x8xbf16> -> vector<264x8xbf16>
    %5 = vector.extract_strided_slice %4 {offsets = [0, 0], sizes = [256, 8], strides = [1, 1]} : vector<264x8xbf16> to vector<256x8xbf16>
    %c0_5 = arith.constant 0 : index
    %c0_6 = arith.constant 0 : index
    %6 = vector.load %arg4[%c0_5, %c0_6] : memref<8x128xbf16, #tpu.memory_space<vmem>>, vector<8x128xbf16>
    %cst = arith.constant dense<0.000000e+00> : vector<256x128xf32>
    %7 = tpu.matmul %5, %6, %cst {dimension_numbers = #tpu.dot_dimension_numbers<[1], [0], [0], [1], [0, 0, 1, 1], [], []>} : vector<256x8xbf16>, vector<8x128xbf16>, vector<256x128xf32> -> vector<256x128xf32>
    %8 = vector.extract_strided_slice %4 {offsets = [1, 0], sizes = [256, 8], strides = [1, 1]} : vector<264x8xbf16> to vector<256x8xbf16>
    %c0_7 = arith.constant 0 : index
    %c0_8 = arith.constant 0 : index
    %9 = vector.load %arg5[%c0_7, %c0_8] : memref<8x128xbf16, #tpu.memory_space<vmem>>, vector<8x128xbf16>
    %cst_9 = arith.constant dense<0.000000e+00> : vector<256x128xf32>
    %10 = tpu.matmul %8, %9, %cst_9 {dimension_numbers = #tpu.dot_dimension_numbers<[1], [0], [0], [1], [0, 0, 1, 1], [], []>} : vector<256x8xbf16>, vector<8x128xbf16>, vector<256x128xf32> -> vector<256x128xf32>
    %11 = arith.addf %7, %10 : vector<256x128xf32>
    %c0_10 = arith.constant 0 : index
    %c0_11 = arith.constant 0 : index
    %12 = vector.load %arg6[%c0_10, %c0_11] : memref<1x128xf32, #tpu.memory_space<vmem>>, vector<1x128xf32>
    %13 = vector.broadcast %12 : vector<1x128xf32> to vector<256x128xf32>
    %14 = arith.addf %11, %13 : vector<256x128xf32>
    %cst_12 = arith.constant 0.000000e+00 : f32
    %15 = vector.broadcast %cst_12 : f32 to vector<256x128xf32>
    %16 = arith.maximumf %14, %15 : vector<256x128xf32>
    %17 = arith.truncf %16 : vector<256x128xf32> to vector<256x128xbf16>
    %c0_13 = arith.constant 0 : index
    %c0_14 = arith.constant 0 : index
    %c0_15 = arith.constant 0 : index
    %18 = vector.load %arg7[%c0_13, %c0_14, %c0_15] : memref<1x256x128xbf16, #tpu.memory_space<vmem>>, vector<1x256x128xbf16>
    %19 = vector.shape_cast %18 : vector<1x256x128xbf16> to vector<256x128xbf16>
    %20 = vector.shape_cast %17 : vector<256x128xbf16> to vector<1x256x128xbf16>
    tpu.vector_store %arg7[%c0_13, %c0_14, %c0_15], %20 {strides = array<i32>} : memref<1x256x128xbf16, #tpu.memory_space<vmem>>, vector<1x256x128xbf16>,
    return
  }
  func.func @transform_0(%arg0: i32, %arg1: i32) -> (i32, i32, i32) {
    %c0_i32 = arith.constant 0 : i32
    %c0_i32_0 = arith.constant 0 : i32
    return %arg0, %arg1, %c0_i32 : i32, i32, i32
  }
  func.func @transform_1(%arg0: i32, %arg1: i32) -> (i32, i32, i32) {
    %c1_i32 = arith.constant 1 : i32
    %0 = arith.addi %arg1, %c1_i32 : i32
    %c32_i32 = arith.constant 32 : i32
    %1 = arith.muli %0, %c32_i32 : i32
    %c0_i32 = arith.constant 0 : i32
    %c0_i32_0 = arith.constant 0 : i32
    return %arg0, %1, %c0_i32 : i32, i32, i32
  }
  func.func @transform_2(%arg0: i32, %arg1: i32) -> (i32, i32) {
    %c0_i32 = arith.constant 0 : i32
    %c0_i32_0 = arith.constant 0 : i32
    %c0_i32_1 = arith.constant 0 : i32
    return %c0_i32, %c0_i32_0 : i32, i32
  }
  func.func @transform_3(%arg0: i32, %arg1: i32) -> (i32, i32) {
    %c0_i32 = arith.constant 0 : i32
    %c0_i32_0 = arith.constant 0 : i32
    %c0_i32_1 = arith.constant 0 : i32
    return %c0_i32, %c0_i32_0 : i32, i32
  }
  func.func @transform_4(%arg0: i32, %arg1: i32) -> (i32, i32) {
    %c0_i32 = arith.constant 0 : i32
    %c0_i32_0 = arith.constant 0 : i32
    %c0_i32_1 = arith.constant 0 : i32
    return %c0_i32, %c0_i32_0 : i32, i32
  }
  func.func @transform_5(%arg0: i32, %arg1: i32) -> (i32, i32, i32) {
    %c0_i32 = arith.constant 0 : i32
    %c0_i32_0 = arith.constant 0 : i32
    return %arg0, %arg1, %c0_i32 : i32, i32, i32
  }
}

module attributes {stable_mosaic.version = 11 : i64} {
  func.func @_conv_mm_kernel(%arg0: i32, %arg1: i32, %arg2: memref<1x64x512xbf16, #tpu.memory_space<vmem>>, %arg3: memref<1x8x512xbf16, #tpu.memory_space<vmem>>, %arg4: memref<512x128xbf16, #tpu.memory_space<vmem>>, %arg5: memref<512x128xbf16, #tpu.memory_space<vmem>>, %arg6: memref<1x128xf32, #tpu.memory_space<vmem>>, %arg7: memref<1x64x128xbf16, #tpu.memory_space<vmem>>) attributes {dimension_semantics = [#tpu.dimension_semantics<parallel>, #tpu.dimension_semantics<parallel>], iteration_bounds = array<i64: 2, 1>, scalar_prefetch = 0 : i64, scratch_operands = 0 : i64, tpu.core_type = #tpu.core_type<tc>, window_params = [{transform_indices = @transform_0, window_bounds = array<i64: 1, 64, 512>}, {transform_indices = @transform_1, window_bounds = array<i64: 1, 8, 512>}, {pipeline_mode = #tpu.pipeline_mode<synchronous>, transform_indices = @transform_2, window_bounds = array<i64: 512, 128>}, {pipeline_mode = #tpu.pipeline_mode<synchronous>, transform_indices = @transform_3, window_bounds = array<i64: 512, 128>}, {pipeline_mode = #tpu.pipeline_mode<synchronous>, transform_indices = @transform_4, window_bounds = array<i64: 1, 128>}, {transform_indices = @transform_5, window_bounds = array<i64: 1, 64, 128>}]} {
    %c0 = arith.constant 0 : index
    %c0_0 = arith.constant 0 : index
    %c0_1 = arith.constant 0 : index
    %0 = vector.load %arg2[%c0, %c0_0, %c0_1] : memref<1x64x512xbf16, #tpu.memory_space<vmem>>, vector<1x64x512xbf16>
    %1 = vector.shape_cast %0 : vector<1x64x512xbf16> to vector<64x512xbf16>
    %c0_2 = arith.constant 0 : index
    %c0_3 = arith.constant 0 : index
    %c0_4 = arith.constant 0 : index
    %2 = vector.load %arg3[%c0_2, %c0_3, %c0_4] : memref<1x8x512xbf16, #tpu.memory_space<vmem>>, vector<1x8x512xbf16>
    %3 = vector.shape_cast %2 : vector<1x8x512xbf16> to vector<8x512xbf16>
    %4 = tpu.concatenate %1, %3 in 0 : vector<64x512xbf16>, vector<8x512xbf16> -> vector<72x512xbf16>
    %5 = vector.extract_strided_slice %4 {offsets = [0, 0], sizes = [64, 512], strides = [1, 1]} : vector<72x512xbf16> to vector<64x512xbf16>
    %c0_5 = arith.constant 0 : index
    %c0_6 = arith.constant 0 : index
    %6 = vector.load %arg4[%c0_5, %c0_6] : memref<512x128xbf16, #tpu.memory_space<vmem>>, vector<512x128xbf16>
    %cst = arith.constant dense<0.000000e+00> : vector<64x128xf32>
    %7 = tpu.matmul %5, %6, %cst {dimension_numbers = #tpu.dot_dimension_numbers<[1], [0], [0], [1], [0, 0, 1, 1], [], []>} : vector<64x512xbf16>, vector<512x128xbf16>, vector<64x128xf32> -> vector<64x128xf32>
    %8 = vector.extract_strided_slice %4 {offsets = [1, 0], sizes = [64, 512], strides = [1, 1]} : vector<72x512xbf16> to vector<64x512xbf16>
    %c0_7 = arith.constant 0 : index
    %c0_8 = arith.constant 0 : index
    %9 = vector.load %arg5[%c0_7, %c0_8] : memref<512x128xbf16, #tpu.memory_space<vmem>>, vector<512x128xbf16>
    %cst_9 = arith.constant dense<0.000000e+00> : vector<64x128xf32>
    %10 = tpu.matmul %8, %9, %cst_9 {dimension_numbers = #tpu.dot_dimension_numbers<[1], [0], [0], [1], [0, 0, 1, 1], [], []>} : vector<64x512xbf16>, vector<512x128xbf16>, vector<64x128xf32> -> vector<64x128xf32>
    %11 = arith.addf %7, %10 : vector<64x128xf32>
    %c0_10 = arith.constant 0 : index
    %c0_11 = arith.constant 0 : index
    %12 = vector.load %arg6[%c0_10, %c0_11] : memref<1x128xf32, #tpu.memory_space<vmem>>, vector<1x128xf32>
    %13 = vector.broadcast %12 : vector<1x128xf32> to vector<64x128xf32>
    %14 = arith.addf %11, %13 : vector<64x128xf32>
    %cst_12 = arith.constant 0.000000e+00 : f32
    %15 = vector.broadcast %cst_12 : f32 to vector<64x128xf32>
    %16 = arith.maximumf %14, %15 : vector<64x128xf32>
    %17 = arith.truncf %16 : vector<64x128xf32> to vector<64x128xbf16>
    %c0_13 = arith.constant 0 : index
    %c0_14 = arith.constant 0 : index
    %c0_15 = arith.constant 0 : index
    %18 = vector.load %arg7[%c0_13, %c0_14, %c0_15] : memref<1x64x128xbf16, #tpu.memory_space<vmem>>, vector<1x64x128xbf16>
    %19 = vector.shape_cast %18 : vector<1x64x128xbf16> to vector<64x128xbf16>
    %20 = vector.shape_cast %17 : vector<64x128xbf16> to vector<1x64x128xbf16>
    tpu.vector_store %arg7[%c0_13, %c0_14, %c0_15], %20 {strides = array<i32>} : memref<1x64x128xbf16, #tpu.memory_space<vmem>>, vector<1x64x128xbf16>,
    return
  }
  func.func @transform_0(%arg0: i32, %arg1: i32) -> (i32, i32, i32) {
    %c0_i32 = arith.constant 0 : i32
    %c0_i32_0 = arith.constant 0 : i32
    return %arg0, %arg1, %c0_i32 : i32, i32, i32
  }
  func.func @transform_1(%arg0: i32, %arg1: i32) -> (i32, i32, i32) {
    %c1_i32 = arith.constant 1 : i32
    %0 = arith.addi %arg1, %c1_i32 : i32
    %c8_i32 = arith.constant 8 : i32
    %1 = arith.muli %0, %c8_i32 : i32
    %c0_i32 = arith.constant 0 : i32
    %c0_i32_0 = arith.constant 0 : i32
    return %arg0, %1, %c0_i32 : i32, i32, i32
  }
  func.func @transform_2(%arg0: i32, %arg1: i32) -> (i32, i32) {
    %c0_i32 = arith.constant 0 : i32
    %c0_i32_0 = arith.constant 0 : i32
    %c0_i32_1 = arith.constant 0 : i32
    return %c0_i32, %c0_i32_0 : i32, i32
  }
  func.func @transform_3(%arg0: i32, %arg1: i32) -> (i32, i32) {
    %c0_i32 = arith.constant 0 : i32
    %c0_i32_0 = arith.constant 0 : i32
    %c0_i32_1 = arith.constant 0 : i32
    return %c0_i32, %c0_i32_0 : i32, i32
  }
  func.func @transform_4(%arg0: i32, %arg1: i32) -> (i32, i32) {
    %c0_i32 = arith.constant 0 : i32
    %c0_i32_0 = arith.constant 0 : i32
    %c0_i32_1 = arith.constant 0 : i32
    return %c0_i32, %c0_i32_0 : i32, i32
  }
  func.func @transform_5(%arg0: i32, %arg1: i32) -> (i32, i32, i32) {
    %c0_i32 = arith.constant 0 : i32
    %c0_i32_0 = arith.constant 0 : i32
    return %arg0, %arg1, %c0_i32 : i32, i32, i32
  }
}

module attributes {stable_mosaic.version = 11 : i64} {
  func.func @_conv_mm_kernel(%arg0: i32, %arg1: i32, %arg2: memref<1x16x512xbf16, #tpu.memory_space<vmem>>, %arg3: memref<1x8x512xbf16, #tpu.memory_space<vmem>>, %arg4: memref<512x256xbf16, #tpu.memory_space<vmem>>, %arg5: memref<512x256xbf16, #tpu.memory_space<vmem>>, %arg6: memref<1x256xf32, #tpu.memory_space<vmem>>, %arg7: memref<1x16x256xbf16, #tpu.memory_space<vmem>>) attributes {dimension_semantics = [#tpu.dimension_semantics<parallel>, #tpu.dimension_semantics<parallel>], iteration_bounds = array<i64: 2, 1>, scalar_prefetch = 0 : i64, scratch_operands = 0 : i64, tpu.core_type = #tpu.core_type<tc>, window_params = [{transform_indices = @transform_0, window_bounds = array<i64: 1, 16, 512>}, {transform_indices = @transform_1, window_bounds = array<i64: 1, 8, 512>}, {pipeline_mode = #tpu.pipeline_mode<synchronous>, transform_indices = @transform_2, window_bounds = array<i64: 512, 256>}, {pipeline_mode = #tpu.pipeline_mode<synchronous>, transform_indices = @transform_3, window_bounds = array<i64: 512, 256>}, {pipeline_mode = #tpu.pipeline_mode<synchronous>, transform_indices = @transform_4, window_bounds = array<i64: 1, 256>}, {transform_indices = @transform_5, window_bounds = array<i64: 1, 16, 256>}]} {
    %c0 = arith.constant 0 : index
    %c0_0 = arith.constant 0 : index
    %c0_1 = arith.constant 0 : index
    %0 = vector.load %arg2[%c0, %c0_0, %c0_1] : memref<1x16x512xbf16, #tpu.memory_space<vmem>>, vector<1x16x512xbf16>
    %1 = vector.shape_cast %0 : vector<1x16x512xbf16> to vector<16x512xbf16>
    %c0_2 = arith.constant 0 : index
    %c0_3 = arith.constant 0 : index
    %c0_4 = arith.constant 0 : index
    %2 = vector.load %arg3[%c0_2, %c0_3, %c0_4] : memref<1x8x512xbf16, #tpu.memory_space<vmem>>, vector<1x8x512xbf16>
    %3 = vector.shape_cast %2 : vector<1x8x512xbf16> to vector<8x512xbf16>
    %4 = tpu.concatenate %1, %3 in 0 : vector<16x512xbf16>, vector<8x512xbf16> -> vector<24x512xbf16>
    %5 = vector.extract_strided_slice %4 {offsets = [0, 0], sizes = [16, 512], strides = [1, 1]} : vector<24x512xbf16> to vector<16x512xbf16>
    %c0_5 = arith.constant 0 : index
    %c0_6 = arith.constant 0 : index
    %6 = vector.load %arg4[%c0_5, %c0_6] : memref<512x256xbf16, #tpu.memory_space<vmem>>, vector<512x256xbf16>
    %cst = arith.constant dense<0.000000e+00> : vector<16x256xf32>
    %7 = tpu.matmul %5, %6, %cst {dimension_numbers = #tpu.dot_dimension_numbers<[1], [0], [0], [1], [0, 0, 1, 1], [], []>} : vector<16x512xbf16>, vector<512x256xbf16>, vector<16x256xf32> -> vector<16x256xf32>
    %8 = vector.extract_strided_slice %4 {offsets = [1, 0], sizes = [16, 512], strides = [1, 1]} : vector<24x512xbf16> to vector<16x512xbf16>
    %c0_7 = arith.constant 0 : index
    %c0_8 = arith.constant 0 : index
    %9 = vector.load %arg5[%c0_7, %c0_8] : memref<512x256xbf16, #tpu.memory_space<vmem>>, vector<512x256xbf16>
    %cst_9 = arith.constant dense<0.000000e+00> : vector<16x256xf32>
    %10 = tpu.matmul %8, %9, %cst_9 {dimension_numbers = #tpu.dot_dimension_numbers<[1], [0], [0], [1], [0, 0, 1, 1], [], []>} : vector<16x512xbf16>, vector<512x256xbf16>, vector<16x256xf32> -> vector<16x256xf32>
    %11 = arith.addf %7, %10 : vector<16x256xf32>
    %c0_10 = arith.constant 0 : index
    %c0_11 = arith.constant 0 : index
    %12 = vector.load %arg6[%c0_10, %c0_11] : memref<1x256xf32, #tpu.memory_space<vmem>>, vector<1x256xf32>
    %13 = vector.broadcast %12 : vector<1x256xf32> to vector<16x256xf32>
    %14 = arith.addf %11, %13 : vector<16x256xf32>
    %cst_12 = arith.constant 0.000000e+00 : f32
    %15 = vector.broadcast %cst_12 : f32 to vector<16x256xf32>
    %16 = arith.maximumf %14, %15 : vector<16x256xf32>
    %17 = arith.truncf %16 : vector<16x256xf32> to vector<16x256xbf16>
    %c0_13 = arith.constant 0 : index
    %c0_14 = arith.constant 0 : index
    %c0_15 = arith.constant 0 : index
    %18 = vector.load %arg7[%c0_13, %c0_14, %c0_15] : memref<1x16x256xbf16, #tpu.memory_space<vmem>>, vector<1x16x256xbf16>
    %19 = vector.shape_cast %18 : vector<1x16x256xbf16> to vector<16x256xbf16>
    %20 = vector.shape_cast %17 : vector<16x256xbf16> to vector<1x16x256xbf16>
    tpu.vector_store %arg7[%c0_13, %c0_14, %c0_15], %20 {strides = array<i32>} : memref<1x16x256xbf16, #tpu.memory_space<vmem>>, vector<1x16x256xbf16>,
    return
  }
  func.func @transform_0(%arg0: i32, %arg1: i32) -> (i32, i32, i32) {
    %c0_i32 = arith.constant 0 : i32
    %c0_i32_0 = arith.constant 0 : i32
    return %arg0, %arg1, %c0_i32 : i32, i32, i32
  }
  func.func @transform_1(%arg0: i32, %arg1: i32) -> (i32, i32, i32) {
    %c1_i32 = arith.constant 1 : i32
    %0 = arith.addi %arg1, %c1_i32 : i32
    %c2_i32 = arith.constant 2 : i32
    %1 = arith.muli %0, %c2_i32 : i32
    %c0_i32 = arith.constant 0 : i32
    %c0_i32_0 = arith.constant 0 : i32
    return %arg0, %1, %c0_i32 : i32, i32, i32
  }
  func.func @transform_2(%arg0: i32, %arg1: i32) -> (i32, i32) {
    %c0_i32 = arith.constant 0 : i32
    %c0_i32_0 = arith.constant 0 : i32
    %c0_i32_1 = arith.constant 0 : i32
    return %c0_i32, %c0_i32_0 : i32, i32
  }
  func.func @transform_3(%arg0: i32, %arg1: i32) -> (i32, i32) {
    %c0_i32 = arith.constant 0 : i32
    %c0_i32_0 = arith.constant 0 : i32
    %c0_i32_1 = arith.constant 0 : i32
    return %c0_i32, %c0_i32_0 : i32, i32
  }
  func.func @transform_4(%arg0: i32, %arg1: i32) -> (i32, i32) {
    %c0_i32 = arith.constant 0 : i32
    %c0_i32_0 = arith.constant 0 : i32
    %c0_i32_1 = arith.constant 0 : i32
    return %c0_i32, %c0_i32_0 : i32, i32
  }
  func.func @transform_5(%arg0: i32, %arg1: i32) -> (i32, i32, i32) {
    %c0_i32 = arith.constant 0 : i32
    %c0_i32_0 = arith.constant 0 : i32
    return %arg0, %arg1, %c0_i32 : i32, i32, i32
  }
}

module attributes {stable_mosaic.version = 11 : i64} {
  func.func @_conv_mm_kernel(%arg0: i32, %arg1: i32, %arg2: memref<1x8x1024xbf16, #tpu.memory_space<vmem>>, %arg3: memref<1x8x1024xbf16, #tpu.memory_space<vmem>>, %arg4: memref<1024x512xbf16, #tpu.memory_space<vmem>>, %arg5: memref<1024x512xbf16, #tpu.memory_space<vmem>>, %arg6: memref<1x512xf32, #tpu.memory_space<vmem>>, %arg7: memref<1x8x512xbf16, #tpu.memory_space<vmem>>) attributes {dimension_semantics = [#tpu.dimension_semantics<parallel>, #tpu.dimension_semantics<parallel>], iteration_bounds = array<i64: 2, 1>, scalar_prefetch = 0 : i64, scratch_operands = 0 : i64, tpu.core_type = #tpu.core_type<tc>, window_params = [{transform_indices = @transform_0, window_bounds = array<i64: 1, 8, 1024>}, {transform_indices = @transform_1, window_bounds = array<i64: 1, 8, 1024>}, {pipeline_mode = #tpu.pipeline_mode<synchronous>, transform_indices = @transform_2, window_bounds = array<i64: 1024, 512>}, {pipeline_mode = #tpu.pipeline_mode<synchronous>, transform_indices = @transform_3, window_bounds = array<i64: 1024, 512>}, {pipeline_mode = #tpu.pipeline_mode<synchronous>, transform_indices = @transform_4, window_bounds = array<i64: 1, 512>}, {transform_indices = @transform_5, window_bounds = array<i64: 1, 8, 512>}]} {
    %c0 = arith.constant 0 : index
    %c0_0 = arith.constant 0 : index
    %c0_1 = arith.constant 0 : index
    %0 = vector.load %arg2[%c0, %c0_0, %c0_1] : memref<1x8x1024xbf16, #tpu.memory_space<vmem>>, vector<1x8x1024xbf16>
    %1 = vector.shape_cast %0 : vector<1x8x1024xbf16> to vector<8x1024xbf16>
    %c0_2 = arith.constant 0 : index
    %c0_3 = arith.constant 0 : index
    %c0_4 = arith.constant 0 : index
    %2 = vector.load %arg3[%c0_2, %c0_3, %c0_4] : memref<1x8x1024xbf16, #tpu.memory_space<vmem>>, vector<1x8x1024xbf16>
    %3 = vector.shape_cast %2 : vector<1x8x1024xbf16> to vector<8x1024xbf16>
    %4 = tpu.concatenate %1, %3 in 0 : vector<8x1024xbf16>, vector<8x1024xbf16> -> vector<16x1024xbf16>
    %5 = vector.extract_strided_slice %4 {offsets = [0, 0], sizes = [8, 1024], strides = [1, 1]} : vector<16x1024xbf16> to vector<8x1024xbf16>
    %c0_5 = arith.constant 0 : index
    %c0_6 = arith.constant 0 : index
    %6 = vector.load %arg4[%c0_5, %c0_6] : memref<1024x512xbf16, #tpu.memory_space<vmem>>, vector<1024x512xbf16>
    %cst = arith.constant dense<0.000000e+00> : vector<8x512xf32>
    %7 = tpu.matmul %5, %6, %cst {dimension_numbers = #tpu.dot_dimension_numbers<[1], [0], [0], [1], [0, 0, 1, 1], [], []>} : vector<8x1024xbf16>, vector<1024x512xbf16>, vector<8x512xf32> -> vector<8x512xf32>
    %8 = vector.extract_strided_slice %4 {offsets = [1, 0], sizes = [8, 1024], strides = [1, 1]} : vector<16x1024xbf16> to vector<8x1024xbf16>
    %c0_7 = arith.constant 0 : index
    %c0_8 = arith.constant 0 : index
    %9 = vector.load %arg5[%c0_7, %c0_8] : memref<1024x512xbf16, #tpu.memory_space<vmem>>, vector<1024x512xbf16>
    %cst_9 = arith.constant dense<0.000000e+00> : vector<8x512xf32>
    %10 = tpu.matmul %8, %9, %cst_9 {dimension_numbers = #tpu.dot_dimension_numbers<[1], [0], [0], [1], [0, 0, 1, 1], [], []>} : vector<8x1024xbf16>, vector<1024x512xbf16>, vector<8x512xf32> -> vector<8x512xf32>
    %11 = arith.addf %7, %10 : vector<8x512xf32>
    %c0_10 = arith.constant 0 : index
    %c0_11 = arith.constant 0 : index
    %12 = vector.load %arg6[%c0_10, %c0_11] : memref<1x512xf32, #tpu.memory_space<vmem>>, vector<1x512xf32>
    %13 = vector.broadcast %12 : vector<1x512xf32> to vector<8x512xf32>
    %14 = arith.addf %11, %13 : vector<8x512xf32>
    %cst_12 = arith.constant 0.000000e+00 : f32
    %15 = vector.broadcast %cst_12 : f32 to vector<8x512xf32>
    %16 = arith.maximumf %14, %15 : vector<8x512xf32>
    %17 = arith.truncf %16 : vector<8x512xf32> to vector<8x512xbf16>
    %c0_13 = arith.constant 0 : index
    %c0_14 = arith.constant 0 : index
    %c0_15 = arith.constant 0 : index
    %18 = vector.load %arg7[%c0_13, %c0_14, %c0_15] : memref<1x8x512xbf16, #tpu.memory_space<vmem>>, vector<1x8x512xbf16>
    %19 = vector.shape_cast %18 : vector<1x8x512xbf16> to vector<8x512xbf16>
    %20 = vector.shape_cast %17 : vector<8x512xbf16> to vector<1x8x512xbf16>
    tpu.vector_store %arg7[%c0_13, %c0_14, %c0_15], %20 {strides = array<i32>} : memref<1x8x512xbf16, #tpu.memory_space<vmem>>, vector<1x8x512xbf16>,
    return
  }
  func.func @transform_0(%arg0: i32, %arg1: i32) -> (i32, i32, i32) {
    %c0_i32 = arith.constant 0 : i32
    %c0_i32_0 = arith.constant 0 : i32
    return %arg0, %arg1, %c0_i32 : i32, i32, i32
  }
  func.func @transform_1(%arg0: i32, %arg1: i32) -> (i32, i32, i32) {
    %c1_i32 = arith.constant 1 : i32
    %0 = arith.addi %arg1, %c1_i32 : i32
    %c1_i32_0 = arith.constant 1 : i32
    %1 = arith.muli %0, %c1_i32_0 : i32
    %c0_i32 = arith.constant 0 : i32
    %c0_i32_1 = arith.constant 0 : i32
    return %arg0, %1, %c0_i32 : i32, i32, i32
  }
  func.func @transform_2(%arg0: i32, %arg1: i32) -> (i32, i32) {
    %c0_i32 = arith.constant 0 : i32
    %c0_i32_0 = arith.constant 0 : i32
    %c0_i32_1 = arith.constant 0 : i32
    return %c0_i32, %c0_i32_0 : i32, i32
  }
  func.func @transform_3(%arg0: i32, %arg1: i32) -> (i32, i32) {
    %c0_i32 = arith.constant 0 : i32
    %c0_i32_0 = arith.constant 0 : i32
    %c0_i32_1 = arith.constant 0 : i32
    return %c0_i32, %c0_i32_0 : i32, i32
  }
  func.func @transform_4(%arg0: i32, %arg1: i32) -> (i32, i32) {
    %c0_i32 = arith.constant 0 : i32
    %c0_i32_0 = arith.constant 0 : i32
    %c0_i32_1 = arith.constant 0 : i32
    return %c0_i32, %c0_i32_0 : i32, i32
  }
  func.func @transform_5(%arg0: i32, %arg1: i32) -> (i32, i32, i32) {
    %c0_i32 = arith.constant 0 : i32
    %c0_i32_0 = arith.constant 0 : i32
    return %arg0, %arg1, %c0_i32 : i32, i32, i32
  }
}

module attributes {stable_mosaic.version = 11 : i64} {
  func.func @_dense_fused_kernel(%arg0: i32, %arg1: i32, %arg2: memref<16x1536xbf16, #tpu.memory_space<vmem>>, %arg3: memref<1536x512xbf16, #tpu.memory_space<vmem>>, %arg4: memref<1x512xf32, #tpu.memory_space<vmem>>, %arg5: memref<512x1xbf16, #tpu.memory_space<vmem>>, %arg6: memref<1x16x1xf32, #tpu.memory_space<vmem>>, %arg7: memref<16x512xf32, #tpu.memory_space<vmem>>) attributes {dimension_semantics = [#tpu.dimension_semantics<parallel>, #tpu.dimension_semantics<arbitrary>], iteration_bounds = array<i64: 2, 1>, scalar_prefetch = 0 : i64, scratch_operands = 1 : i64, tpu.core_type = #tpu.core_type<tc>, window_params = [{transform_indices = @transform_0, window_bounds = array<i64: 16, 1536>}, {transform_indices = @transform_1, window_bounds = array<i64: 1536, 512>}, {transform_indices = @transform_2, window_bounds = array<i64: 1, 512>}, {transform_indices = @transform_3, window_bounds = array<i64: 512, 1>}, {transform_indices = @transform_4, window_bounds = array<i64: 1, 16, 1>}]} {
    %c0_i32 = arith.constant 0 : i32
    %0 = arith.cmpi eq, %arg1, %c0_i32 : i32
    %1 = arith.extui %0 : i1 to i32
    %c0_i32_0 = arith.constant 0 : i32
    %2 = arith.cmpi ne, %1, %c0_i32_0 : i32
    scf.if %2 {
      %cst_10 = arith.constant 0.000000e+00 : f32
      %12 = vector.broadcast %cst_10 : f32 to vector<16x512xf32>
      %c0_11 = arith.constant 0 : index
      %c0_12 = arith.constant 0 : index
      %13 = vector.load %arg7[%c0_11, %c0_12] : memref<16x512xf32, #tpu.memory_space<vmem>>, vector<16x512xf32>
      tpu.vector_store %arg7[%c0_11, %c0_12], %12 {strides = array<i32>} : memref<16x512xf32, #tpu.memory_space<vmem>>, vector<16x512xf32>,
    } else {
    }
    %c0 = arith.constant 0 : index
    %c0_1 = arith.constant 0 : index
    %3 = vector.load %arg7[%c0, %c0_1] : memref<16x512xf32, #tpu.memory_space<vmem>>, vector<16x512xf32>
    %c0_2 = arith.constant 0 : index
    %c0_3 = arith.constant 0 : index
    %4 = vector.load %arg2[%c0_2, %c0_3] : memref<16x1536xbf16, #tpu.memory_space<vmem>>, vector<16x1536xbf16>
    %c0_4 = arith.constant 0 : index
    %c0_5 = arith.constant 0 : index
    %5 = vector.load %arg3[%c0_4, %c0_5] : memref<1536x512xbf16, #tpu.memory_space<vmem>>, vector<1536x512xbf16>
    %cst = arith.constant dense<0.000000e+00> : vector<16x512xf32>
    %6 = tpu.matmul %4, %5, %cst {dimension_numbers = #tpu.dot_dimension_numbers<[1], [0], [0], [1], [0, 0, 1, 1], [], []>} : vector<16x1536xbf16>, vector<1536x512xbf16>, vector<16x512xf32> -> vector<16x512xf32>
    %7 = arith.addf %3, %6 : vector<16x512xf32>
    %c0_6 = arith.constant 0 : index
    %c0_7 = arith.constant 0 : index
    %8 = vector.load %arg7[%c0_6, %c0_7] : memref<16x512xf32, #tpu.memory_space<vmem>>, vector<16x512xf32>
    tpu.vector_store %arg7[%c0_6, %c0_7], %7 {strides = array<i32>} : memref<16x512xf32, #tpu.memory_space<vmem>>, vector<16x512xf32>,
    %c0_i32_8 = arith.constant 0 : i32
    %9 = arith.cmpi eq, %arg1, %c0_i32_8 : i32
    %10 = arith.extui %9 : i1 to i32
    %c0_i32_9 = arith.constant 0 : i32
    %11 = arith.cmpi ne, %10, %c0_i32_9 : i32
    scf.if %11 {
      %c0_10 = arith.constant 0 : index
      %c0_11 = arith.constant 0 : index
      %12 = vector.load %arg7[%c0_10, %c0_11] : memref<16x512xf32, #tpu.memory_space<vmem>>, vector<16x512xf32>
      %c0_12 = arith.constant 0 : index
      %c0_13 = arith.constant 0 : index
      %13 = vector.load %arg4[%c0_12, %c0_13] : memref<1x512xf32, #tpu.memory_space<vmem>>, vector<1x512xf32>
      %14 = vector.broadcast %13 : vector<1x512xf32> to vector<16x512xf32>
      %15 = arith.addf %12, %14 : vector<16x512xf32>
      %cst_14 = arith.constant 0.000000e+00 : f32
      %16 = vector.broadcast %cst_14 : f32 to vector<16x512xf32>
      %17 = arith.maximumf %15, %16 : vector<16x512xf32>
      %18 = arith.truncf %17 : vector<16x512xf32> to vector<16x512xbf16>
      %c0_15 = arith.constant 0 : index
      %c0_16 = arith.constant 0 : index
      %19 = vector.load %arg5[%c0_15, %c0_16] : memref<512x1xbf16, #tpu.memory_space<vmem>>, vector<512x1xbf16>
      %cst_17 = arith.constant dense<0.000000e+00> : vector<16x1xf32>
      %20 = tpu.matmul %18, %19, %cst_17 {dimension_numbers = #tpu.dot_dimension_numbers<[1], [0], [0], [1], [0, 0, 1, 1], [], []>} : vector<16x512xbf16>, vector<512x1xbf16>, vector<16x1xf32> -> vector<16x1xf32>
      %c0_18 = arith.constant 0 : index
      %c0_19 = arith.constant 0 : index
      %c0_20 = arith.constant 0 : index
      %21 = vector.load %arg6[%c0_18, %c0_19, %c0_20] : memref<1x16x1xf32, #tpu.memory_space<vmem>>, vector<1x16x1xf32>
      %22 = vector.shape_cast %21 : vector<1x16x1xf32> to vector<16x1xf32>
      %23 = vector.shape_cast %20 : vector<16x1xf32> to vector<1x16x1xf32>
      tpu.vector_store %arg6[%c0_18, %c0_19, %c0_20], %23 {strides = array<i32>} : memref<1x16x1xf32, #tpu.memory_space<vmem>>, vector<1x16x1xf32>,
    } else {
    }
    return
  }
  func.func @transform_0(%arg0: i32, %arg1: i32) -> (i32, i32) {
    %c0_i32 = arith.constant 0 : i32
    %c0_i32_0 = arith.constant 0 : i32
    return %c0_i32, %arg1 : i32, i32
  }
  func.func @transform_1(%arg0: i32, %arg1: i32) -> (i32, i32) {
    %c0_i32 = arith.constant 0 : i32
    return %arg1, %arg0 : i32, i32
  }
  func.func @transform_2(%arg0: i32, %arg1: i32) -> (i32, i32) {
    %c0_i32 = arith.constant 0 : i32
    %c0_i32_0 = arith.constant 0 : i32
    return %c0_i32, %arg0 : i32, i32
  }
  func.func @transform_3(%arg0: i32, %arg1: i32) -> (i32, i32) {
    %c0_i32 = arith.constant 0 : i32
    %c0_i32_0 = arith.constant 0 : i32
    return %arg0, %c0_i32 : i32, i32
  }
  func.func @transform_4(%arg0: i32, %arg1: i32) -> (i32, i32, i32) {
    %c0_i32 = arith.constant 0 : i32
    %c0_i32_0 = arith.constant 0 : i32
    %c0_i32_1 = arith.constant 0 : i32
    return %arg0, %c0_i32, %c0_i32_0 : i32, i32, i32
  }
}

</mosaic_0001>

<bundles_post_ra>
// kernel: audio_location_forward.5
= control target key start
LH: loop header
LB: loop body
LE: loop exit
PB: predicated region body
PF: predicated region fallthrough
CT: control target
= control target key end

     0   :  { %10 = vsyncpa [#allocation3], 0  ;;  %s2246_s0 = inlined_call_operand.vmem [shape: bf16[2,264,8], index: 0, kind: input, shape index: {}, may-alias: {0,1}]   ;;  %s2247_s1 = inlined_call_operand.vmem [shape: bf16[2,264,8], index: 1, kind: input, shape index: {}, may-alias: {0,1}]   ;;  %s2248_s2 = inlined_call_operand.hbm [shape: bf16[8,128], index: 2, kind: input, shape index: {}]   ;;  %s2249_s3 = inlined_call_operand.hbm [shape: bf16[8,128], index: 3, kind: input, shape index: {}]   ;;  %s2250_s4 = inlined_call_operand.hbm [shape: f32[1,128], index: 4, kind: input, shape index: {}]   ;;  %s2251_s5 = inlined_call_operand.vmem [shape: bf16[2,256,128], index: 5, kind: output, shape index: {}]  }
   0x1   :  { %11 = vsyncpa [#allocation5], 0  ;;  %s1980_s18 = smov 0   ;;  %s1982_s19 = smov 0  }
   0x2   :  { %s1984_s20 = smov 0  }
   0x3 LB: > { %s1947_s21 = smov [#allocation4]   ;;  %s1393_s23 = sadd.s32 4294967295, %s1945_s20   ;;  %s1945_s20 = sphi %s1984_s20, %s17_s20   ;;  %s1941_s19 = sphi %s1982_s19, %s2264_s19   ;;  %s1937_s18 = sphi %s1980_s18, %s2263_s18  }
   0x4   : > { %s209_s22 = sshll.u32 %s1947_s21, 4  ;;  %p1395_p0 = scmp.ge.s32.totalorder %s1945_s20, 1  ;;  %s210_s22 = int_to_ptr.vmem [resolvable:$true] %s209_s22 }
   0x5   : > { %p185_p1 = scmp.lt.s32.totalorder %s1945_s20, 3  ;;  %p1998_p2 = scmp.eq.s32.totalorder %s1393_s23, 0 }
   0x6   : > { %s29_s26 = sadd.s32 1, %s1941_s19  ;;  %s1948_s29 = smov [#allocation2]  }
   0x7   : > { %s2255_s24 = scalar_select %p1998_p2, 1, 0 }
   0x8   : > { %p2002_p3 = pnand %p1395_p0, %p185_p1  ;;  %p2015_p6 = scmp.ge.s32.totalorder %s29_s26, 2 }
   0x9   : > { %s198_s30 = sshll.u32 %s1948_s29, 4  ;;  %s1831_s8 = scalar_lea.hbm %s2249_s3, 64  ;;  %s2019_s30 = int_to_ptr.vmem [resolvable:$true] %s198_s30 }
   0xa   : > { %s2256_s25 = scalar_select %p2002_p3, 1, 0 }
   0xb   : > { %p1771_p4 = pneg %p2002_p3  ;;  %p1832_p7 = scmp.ne.s32.totalorder %s2249_s3, %s1831_s8 }
   0xc   : > { %s2258_s28 = scalar_select %p2015_p6, 1, 0 }
   0xd   : > { %p2011_p5 = pnand %p1998_p2, %p1771_p4  ;;  %p1838_p11 = scmp.lt.u32.totalorder %s1831_s8, %s2249_s3 }
   0xf   : > { %p2029_p8 = pneg %p2011_p5 }
  0x11   : > { %p1834_p9 = pnand %p2029_p8, %p1832_p7 }
  0x13   : > { %p1835_p10 = pneg %p1834_p9 }
  0x15   : > { %p1840_p12 = pnand %p1838_p11, %p1835_p10 }
  0x17   : > { %1843 = shalt.err (!%p1840_p12)
}
  0x18   : > { %s1844_s14 = scalar_lea.vmem %s210_s22, 64  ;;  %p1852_p4 = scmp.lt.s32.totalorder %s210_s22, %s210_s22 }
  0x19   : > { %p1845_p13 = scmp.ne.s32.totalorder %s210_s22, %s1844_s14  ;;  %p1853_p2 = scmp.lt.s32.totalorder %s1844_s14, %s1844_s14 }
  0x1b   : > { %p1847_p0 = pnand %p1845_p13, %p2029_p8  ;;  %p1854_p3 = por %p1853_p2, %p1852_p4 }
  0x1d   : > { %p1848_p1 = pneg %p1847_p0 }
  0x1f   : > { %p1855_p6 = pnand %p1854_p3, %p1848_p1 }
  0x21   : > { %1858 = shalt.err (!%p1855_p6)
}
  0x22   : > { %1777 = dma.hbm_to_vmem [thread:$0]  (!%p2011_p5), %s2249_s3, 64, %s210_s22, [#allocation5]  }
  0x23   : > { %p2260_p7 = scmp.ne.s32.totalorder %s2258_s28, 0  ;;  %s1859_s23 = scalar_lea.hbm %s2248_s2, 64 }
  0x24   : > { %p1860_p2 = scmp.ne.s32.totalorder %s2248_s2, %s1859_s23  ;;  %p1866_p9 = scmp.lt.u32.totalorder %s1859_s23, %s2248_s2 }
  0x25   : > { %s2266_s26 = smov (%p2260_p7, %s29_s26), 0 }
  0x26   : > { %p1862_p3 = pnand %p1860_p2, %p2029_p8 }
  0x28   : > { %p1863_p6 = pneg %p1862_p3 }
  0x2a   : > { %p1868_p10 = pnand %p1866_p9, %p1863_p6 }
  0x2c   : > { %1871 = shalt.err (!%p1868_p10)
}
  0x2d   : > { %s1872_s22 = scalar_lea.vmem %s2019_s30, 64  ;;  %p1880_p0 = scmp.lt.s32.totalorder %s2019_s30, %s2019_s30 }
  0x2e   : > { %p1873_p11 = scmp.ne.s32.totalorder %s2019_s30, %s1872_s22  ;;  %p1881_p1 = scmp.lt.s32.totalorder %s1872_s22, %s1872_s22 }
  0x30   : > { %p1875_p12 = pnand %p1873_p11, %p2029_p8  ;;  %p1882_p4 = por %p1881_p1, %p1880_p0 }
  0x32   : > { %p1876_p13 = pneg %p1875_p12 }
  0x34   : > { %p1883_p7 = pnand %p1882_p4, %p1876_p13 }
  0x36   : > { %1886 = shalt.err (!%p1883_p7)
}
  0x37   : > { %1774 = dma.hbm_to_vmem [thread:$0]  (!%p2011_p5), %s2248_s2, 64, %s2019_s30, [#allocation3]  }
  0x38   : > { %s1949_s10 = smov [#allocation6]   ;;  %s1887_s15 = scalar_lea.hbm %s2250_s4, 16 }
  0x39   : > { %s220_s12 = sshll.u32 %s1949_s10, 4  ;;  %p1888_p2 = scmp.ne.s32.totalorder %s2250_s4, %s1887_s15  ;;  %s221_s12 = int_to_ptr.vmem [resolvable:$true] %s220_s12 }
  0x3a   : > { %p1894_p9 = scmp.lt.u32.totalorder %s1887_s15, %s2250_s4 }
  0x3b   : > { %p1890_p3 = pnand %p1888_p2, %p2029_p8 }
  0x3d   : > { %p1891_p6 = pneg %p1890_p3 }
  0x3f   : > { %p1896_p10 = pnand %p1894_p9, %p1891_p6 }
  0x41   : > { %1899 = shalt.err (!%p1896_p10)
}
  0x42   : > { %s1900_s30 = scalar_lea.vmem %s221_s12, 16  ;;  %s1907_s29 = scalar_lea.vmem %s221_s12, 32 }
  0x43   : > { %p1901_p11 = scmp.ne.s32.totalorder %s221_s12, %s1900_s30  ;;  %p1908_p0 = scmp.lt.s32.totalorder %s221_s12, %s221_s12 }
  0x44   : > { %p1909_p1 = scmp.lt.s32.totalorder %s1907_s29, %s1900_s30 }
  0x45   : > { %p1903_p12 = pnand %p1901_p11, %p2029_p8 }
  0x46   : > { %p1910_p4 = por %p1909_p1, %p1908_p0 }
  0x47   : > { %p1904_p13 = pneg %p1903_p12 }
  0x49   : > { %p1911_p7 = pnand %p1910_p4, %p1904_p13 }
  0x4b   : > { %1914 = shalt.err (!%p1911_p7)
}
  0x4c   : > { %1780 = dma.hbm_to_vmem [thread:$0]  (!%p2011_p5), %s2250_s4, 16, %s221_s12, [#allocation5]  }
  0x4d   : > { %p2261_p2 = scmp.ne.s32.totalorder %s2256_s25, 0 }
  0x4e   : > { %p2262_p3 = scmp.ne.s32.totalorder (!%p2261_p2), %s2255_s24, 0 }
  0x4f   : > { %269 = sbr.rel (%p2261_p2) target bundleno = 384 (0x180), region = 40 }
  0x56   : > { %1928 = dma.done.wait (%p2262_p3), [#allocation3], 64  }
  0x57   : > { %1930 = vsyncadd (%p2262_p3), [#allocation3], 4294967232 }
  0x58   : > { %1932 = dma.done.wait (%p2262_p3), [#allocation5], 80  }
  0x59   : > { %1934 = vsyncadd (%p2262_p3), [#allocation5], 4294967216  ;;  %p332_p8 = scmp.lt.s32.totalorder %s1937_s18, 1  ;;  %vm665_vm0 = vcmask 1043456   ;;  %vm616_vm1 = vcmask 64512  }
  0x5a   : > { %vm483_vm2 = vsmask.f32 7424  ;;  %v481_v0 = vld [vmem:[#allocation2] sm:$0xf]  ;;  %v482_v1 = vld [vmem:[#allocation4] sm:$0xf] }
  0x5b   : > { %s2268_s18 = smov (!%p332_p8, %s1937_s18), 1  ;;  %1756 = vmatprep.subr.msk.bf16.mxu0 %vm665_vm0, %v481_v0  ;;  %v863_v2 = vsel %vm665_vm0, %v481_v0, 0  ;;  %1755 = vmatprep.subr.msk.bf16.mxu1 %vm665_vm0, %v482_v1  ;;  %v667_v4 = vsel %vm665_vm0, %v482_v1, 0 }
  0x5c   : > { %s1757_s25 = smul.u32 132, %s2268_s18  ;;  %1690 = vmatpush3.bf16.msra.mxu0 %v863_v2  ;;  %1656 = vmatpush3.bf16.msra.mxu1 %v667_v4  ;;  %s1493_s10 = sshll.u32 %s2268_s18, 7 }
  0x5d   : > { %s2191_s14 = scalar_lea.vmem %s2251_s5, %s1493_s10 }
  0x5e   : > { %s2110_s8 = scalar_lea.vmem %s2246_s0, %s1757_s25  ;;  %s1492_s24 = sadd.s32 128, %s1757_s25 }
  0x5f   : > { %v1815_v3 = vld [vmem:[%s2110_s8] sm:$0xff]   ;;  %v1816_v5 = vld [vmem:[%s2110_s8 + $0x8] sm:$0xff]   ;;  %v1817_v10 = vld [vmem:[%s2110_s8 + $0x10] sm:$0xff]   ;;  %s354_s9 = scalar_lea.vmem %s2247_s1, %s1492_s24 }
  0x60   : > { %1691 = vmatprep.mubr.msk.bf16.mxu0 %vm616_vm1, %v1815_v3  ;;  %v485_v6 = vshrl.u32 %v1815_v3, 16  ;;  %v487_v7 = vshll.u32 %v1815_v3, 16  ;;  %v492_v8 = vshll.u32 %v1816_v5, 16  ;;  %v496_v9 = vshrl.u32 %v1816_v5, 16  ;;  %v1818_v13 = vld [vmem:[%s2110_s8 + $0x18] sm:$0xff]   ;;  %v1819_v14 = vld [vmem:[%s2110_s8 + $0x20] sm:$0xff]  }
  0x61   : > { %1692 = vmatmul.mubr.msk.bf16.vlgmr.msra.gmra.mrb[0].mxu0 %vm616_vm1, %v1816_v5  ;;  %v500_v15 = vshll.u32 %v1817_v10, 16  ;;  %v504_v16 = vshrl.u32 %v1817_v10, 16  ;;  %v508_v19 = vshll.u32 %v1818_v13, 16  ;;  %v1820_v20 = vld [vmem:[%s2110_s8 + $0x28] sm:$0xff]   ;;  %v512_v22 = vshrl.u32 %v1818_v13, 16  ;;  %v1821_v31 = vld [vmem:[%s2110_s8 + $0x30] sm:$0xff]  }
  0x62   : > { %v489_v11 = vrot.slane %v487_v7, 1  ;;  %v494_v12 = vrot.slane %v492_v8, 1  ;;  %1695 = vmatprep.mubr.msk.bf16.mxu0 %vm616_vm1, %v1817_v10  ;;  %v516_v23 = vshll.u32 %v1819_v14, 16  ;;  %v520_v26 = vshrl.u32 %v1819_v14, 16  ;;  %v1822_v36 = vld [vmem:[%s2110_s8 + $0x38] sm:$0xff]   ;;  %v1823_v44 = vld [vmem:[%s2110_s8 + $0x40] sm:$0xff]  }
  0x63   : > { %v502_v21 = vrot.slane %v500_v15, 1  ;;  %v510_v25 = vrot.slane %v508_v19, 1  ;;  %v524_v27 = vshll.u32 %v1820_v20, 16  ;;  %v532_v37 = vshll.u32 %v1821_v31, 16  ;;  %v1824_v48 = vld [vmem:[%s2110_s8 + $0x48] sm:$0xff]   ;;  %v1825_v56 = vld [vmem:[%s2110_s8 + $0x50] sm:$0xff]  }
  0x64   : > { %v490_v17 = vor.u32 %v489_v11, %v485_v6  ;;  %v498_v18 = vor.u32 %v496_v9, %v494_v12  ;;  %v518_v30 = vrot.slane %v516_v23, 1  ;;  %v528_v39 = vshrl.u32 %v1820_v20, 16  ;;  %v1826_v60 = vld [vmem:[%s2110_s8 + $0x58] sm:$0xff]   ;;  %v1827_v4 = vld [vmem:[%s2110_s8 + $0x60] sm:$0xff]   ;;  %v1828_v8 = vld [vmem:[%s2110_s8 + $0x68] sm:$0xff]  }
  0x65   : > { %v506_v29 = vor.u32 %v504_v16, %v502_v21  ;;  %v514_v33 = vor.u32 %v512_v22, %v510_v25  ;;  %v526_v35 = vrot.slane %v524_v27, 1  ;;  %v536_v41 = vshrl.u32 %v1821_v31, 16  ;;  %v1829_v16 = vld [vmem:[%s2110_s8 + $0x70] sm:$0xff]  }
  0x66   : > { %v495_v24 = vsel %vm483_vm2, %v490_v17, %v494_v12  ;;  %v503_v28 = vsel %vm483_vm2, %v498_v18, %v502_v21  ;;  %v522_v34 = vor.u32 %v520_v26, %v518_v30  ;;  %v540_v42 = vshll.u32 %v1822_v36, 16 }
  0x67   : > { %1657 = vmatprep.mubr.msk.bf16.mxu1 %vm616_vm1, %v495_v24  ;;  %v511_v32 = vsel %vm483_vm2, %v506_v29, %v510_v25  ;;  %v519_v38 = vsel %vm483_vm2, %v514_v33, %v518_v30  ;;  %v534_v43 = vrot.slane %v532_v37, 1  ;;  %v530_v45 = vor.u32 %v528_v39, %v526_v35 }
  0x68   : > { %1658 = vmatmul.mubr.msk.bf16.vlgmr.msra.gmra.mrb[0].mxu1 %vm616_vm1, %v503_v28  ;;  %v527_v40 = vsel %vm483_vm2, %v522_v34, %v526_v35  ;;  %v542_v47 = vrot.slane %v540_v42, 1  ;;  %v548_v49 = vshll.u32 %v1823_v44, 16  ;;  %v544_v51 = vshrl.u32 %v1822_v36, 16 }
  0x69   : > { %1696 = vmatmul.mubr.msk.bf16.gmra.mrb[4].mxu0 %vm616_vm1, %v1818_v13  ;;  %1661 = vmatprep.mubr.msk.bf16.mxu1 %vm616_vm1, %v511_v32  ;;  %v538_v46 = vor.u32 %v536_v41, %v534_v43  ;;  %v535_v50 = vsel %vm483_vm2, %v530_v45, %v534_v43  ;;  %v552_v53 = vshrl.u32 %v1823_v44, 16  ;;  %v556_v54 = vshll.u32 %v1824_v48, 16 }
  0x6a   : > { %1699 = vmatprep.mubr.msk.bf16.mxu0 %vm616_vm1, %v1819_v14  ;;  %v550_v55 = vrot.slane %v548_v49, 1  ;;  %v546_v57 = vor.u32 %v544_v51, %v542_v47  ;;  %v564_v61 = vshll.u32 %v1825_v56, 16  ;;  %v560_v63 = vshrl.u32 %v1824_v48, 16 }
  0x6b   : > { %v543_v52 = vsel %vm483_vm2, %v538_v46, %v542_v47  ;;  %v558_v59 = vrot.slane %v556_v54, 1  ;;  %v568_v1 = vshrl.u32 %v1825_v56, 16  ;;  %v572_v2 = vshll.u32 %v1826_v60, 16 }
  0x6c   : > { %v554_v58 = vor.u32 %v552_v53, %v550_v55  ;;  %v551_v62 = vsel %vm483_vm2, %v546_v57, %v550_v55  ;;  %v566_v3 = vrot.slane %v564_v61, 1  ;;  %v580_v9 = vshll.u32 %v1827_v4, 16 }
  0x6d   : > { %v562_v5 = vor.u32 %v560_v63, %v558_v59  ;;  %v574_v7 = vrot.slane %v572_v2, 1  ;;  %v576_v11 = vshrl.u32 %v1826_v60, 16  ;;  %v584_v13 = vshrl.u32 %v1827_v4, 16 }
  0x6e   : > { %v559_v0 = vsel %vm483_vm2, %v554_v58, %v558_v59  ;;  %v570_v6 = vor.u32 %v568_v1, %v566_v3  ;;  %v588_v14 = vshll.u32 %v1828_v8, 16  ;;  %v582_v15 = vrot.slane %v580_v9, 1 }
  0x6f   : > { %v567_v10 = vsel %vm483_vm2, %v562_v5, %v566_v3  ;;  %v578_v17 = vor.u32 %v576_v11, %v574_v7  ;;  %v596_v21 = vshll.u32 %v1829_v16, 16  ;;  %v592_v23 = vshrl.u32 %v1828_v8, 16 }
  0x70   : > { %1662 = vmatmul.mubr.msk.bf16.gmra.mrb[4].mxu1 %vm616_vm1, %v519_v38  ;;  %v575_v12 = vsel %vm483_vm2, %v570_v6, %v574_v7  ;;  %v586_v18 = vor.u32 %v584_v13, %v582_v15  ;;  %v590_v19 = vrot.slane %v588_v14, 1  ;;  %v600_v25 = vshrl.u32 %v1829_v16, 16 }
  0x71   : > { %1665 = vmatprep.mubr.msk.bf16.mxu1 %vm616_vm1, %v527_v40  ;;  %1700 = vmatmul.mubr.msk.bf16.gmra.mrb[8].mxu0 %vm616_vm1, %v1820_v20  ;;  %v1830_v20 = vld [vmem:[%s2110_s8 + $0x78] sm:$0xff]   ;;  %v583_v22 = vsel %vm483_vm2, %v578_v17, %v582_v15  ;;  %v598_v27 = vrot.slane %v596_v21, 1 }
  0x72   : > { %1703 = vmatprep.mubr.msk.bf16.mxu0 %vm616_vm1, %v1821_v31  ;;  %v591_v24 = vsel %vm483_vm2, %v586_v18, %v590_v19  ;;  %v604_v26 = vshll.u32 %v1830_v20, 16  ;;  %v594_v28 = vor.u32 %v592_v23, %v590_v19  ;;  %v400_v31 = vld [vmem:[%s354_s9] sm:$0xf]  ;;  %v608_v33 = vshrl.u32 %v1830_v20, 16 }
  0x73   : > { %v602_v29 = vor.u32 %v600_v25, %v598_v27  ;;  %v612_v34 = vshll.u32 %v400_v31, 16 }
  0x74   : > { %v606_v30 = vrot.slane %v604_v26, 1  ;;  %v599_v32 = vsel %vm483_vm2, %v594_v28, %v598_v27 }
  0x75   : > { %v614_v37 = vrot.slane %v612_v34, 1 }
  0x76   : > { %v607_v35 = vsel %vm483_vm2, %v602_v29, %v606_v30 }
  0x78   : > { %1666 = vmatmul.mubr.msk.bf16.gmra.mrb[8].mxu1 %vm616_vm1, %v535_v50 }
  0x79   : > { %1669 = vmatprep.mubr.msk.bf16.mxu1 %vm616_vm1, %v543_v52  ;;  %1704 = vmatmul.mubr.msk.bf16.gmra.mrb[12].mxu0 %vm616_vm1, %v1822_v36  ;;  %v610_v36 = vor.u32 %v608_v33, %v606_v30 }
  0x7a   : > { %1707 = vmatprep.mubr.msk.bf16.mxu0 %vm616_vm1, %v1823_v44  ;;  %v2181_v44 = vld [vmem:[#allocation6] ss:$0 sm:$0xff] }
  0x7b   : > { %v615_v38 = vsel %vm483_vm2, %v610_v36, %v614_v37 }
  0x80   : > { %1670 = vmatmul.mubr.msk.bf16.gmra.mrb[12].mxu1 %vm616_vm1, %v551_v62 }
  0x81   : > { %1673 = vmatprep.mubr.msk.bf16.mxu1 %vm616_vm1, %v559_v0  ;;  %1708 = vmatmul.mubr.msk.bf16.gmra.mrb[16].mxu0 %vm616_vm1, %v1824_v48 }
  0x82   : > { %1711 = vmatprep.mubr.msk.bf16.mxu0 %vm616_vm1, %v1825_v56 }
  0x88   : > { %1674 = vmatmul.mubr.msk.bf16.gmra.mrb[16].mxu1 %vm616_vm1, %v567_v10 }
  0x89   : > { %1677 = vmatprep.mubr.msk.bf16.mxu1 %vm616_vm1, %v575_v12  ;;  %1712 = vmatmul.mubr.msk.bf16.gmra.mrb[20].mxu0 %vm616_vm1, %v1826_v60 }
  0x8a   : > { %1715 = vmatprep.mubr.msk.bf16.mxu0 %vm616_vm1, %v1827_v4 }
  0x90   : > { %1678 = vmatmul.mubr.msk.bf16.gmra.mrb[20].mxu1 %vm616_vm1, %v583_v22 }
  0x91   : > { %1681 = vmatprep.mubr.msk.bf16.mxu1 %vm616_vm1, %v591_v24  ;;  %1716 = vmatmul.mubr.msk.bf16.gmra.mrb[24].mxu0 %vm616_vm1, %v1828_v8 }
  0x92   : > { %1719 = vmatprep.mubr.msk.bf16.mxu0 %vm616_vm1, %v1829_v16 }
  0x98   : > { %1682 = vmatmul.mubr.msk.bf16.gmra.mrb[24].mxu1 %vm616_vm1, %v599_v32 }
  0x99   : > { %1685 = vmatprep.mubr.msk.bf16.mxu1 %vm616_vm1, %v607_v35  ;;  %1720 = vmatmul.mubr.msk.bf16.gmra.mrb[28].mxu0 %vm616_vm1, %v1830_v20 }
  0xa0   : > { %1686 = vmatmul.mubr.msk.bf16.gmra.mrb[28].mxu1 %vm616_vm1, %v615_v38 }
 0x134   : > { %v1693_v39 = vpop.f32.mrb[0].mxu0 }
 0x135   : > { %v899_v40 = vpop.f32.mrb[1].mxu0 }
 0x136   : > { %v1694_v41 = vpop.f32.mrb[2].mxu0 }
 0x137   : > { %v902_v42 = vpop.f32.mrb[3].mxu0 }
 0x13b   : > { %v1659_v43 = vpop.f32.mrb[0].mxu1 }
 0x13c   : > { %v908_v45 = vadd.f32 %v1693_v39, %v1659_v43  ;;  %v703_v46 = vpop.f32.mrb[1].mxu1  ;;  %v1697_v49 = vpop.f32.mrb[4].mxu0 }
 0x13d   : > { %v900_v47 = vadd.f32 %v899_v40, %v703_v46  ;;  %v1660_v48 = vpop.f32.mrb[2].mxu1  ;;  %v915_v53 = vpop.f32.mrb[5].mxu0 }
 0x13e   : > { %v1035_v50 = vadd.f32 %v2181_v44, %v908_v45  ;;  %v911_v51 = vadd.f32 %v1694_v41, %v1660_v48  ;;  %v706_v52 = vpop.f32.mrb[3].mxu1  ;;  %v1698_v56 = vpop.f32.mrb[6].mxu0 }
 0x13f   : > { %v1033_v54 = vadd.f32 %v2181_v44, %v900_v47  ;;  %v903_v55 = vadd.f32 %v902_v42, %v706_v52  ;;  %v918_v58 = vpop.f32.mrb[7].mxu0 }
 0x140   : > { %v1036_v57 = vadd.f32 %v2181_v44, %v911_v51  ;;  %v1067_v60 = vmax.f32 %v1035_v50, 0.0 }
 0x141   : > { %v1034_v59 = vadd.f32 %v2181_v44, %v903_v55  ;;  %v1065_v62 = vmax.f32 %v1033_v54, 0.0 }
 0x142   : > { %v1068_v61 = vmax.f32 %v1036_v57, 0.0 }
 0x143   : > { %v1066_v63 = vmax.f32 %v1034_v59, 0.0  ;;  %v1663_v0 = vpop.f32.mrb[4].mxu1 }
 0x144   : > { %v1534_v1 = vpack.c.bf16 %v1068_v61, %v1067_v60  ;;  %v924_v2 = vadd.f32 %v1697_v49, %v1663_v0  ;;  %v719_v3 = vpop.f32.mrb[5].mxu1  ;;  %v1701_v7 = vpop.f32.mrb[8].mxu0 }
 0x145   : > { %v1529_v4 = vpack.c.bf16 %v1066_v63, %v1065_v62  ;;  %v916_v5 = vadd.f32 %v915_v53, %v719_v3  ;;  %v1664_v6 = vpop.f32.mrb[6].mxu1  ;;  %v931_v11 = vpop.f32.mrb[9].mxu0 }
 0x146   : > { %1606 = vst [vmem:[%s2191_s14 + $0x8] sm:$0xff] %v1534_v1   ;;  %v1039_v8 = vadd.f32 %v2181_v44, %v924_v2  ;;  %v927_v9 = vadd.f32 %v1698_v56, %v1664_v6  ;;  %v722_v10 = vpop.f32.mrb[7].mxu1  ;;  %v1702_v14 = vpop.f32.mrb[10].mxu0 }
 0x147   : > { %1530 = vst [vmem:[%s2191_s14] sm:$0xff] %v1529_v4   ;;  %v1037_v12 = vadd.f32 %v2181_v44, %v916_v5  ;;  %v919_v13 = vadd.f32 %v918_v58, %v722_v10  ;;  %v934_v16 = vpop.f32.mrb[11].mxu0 }
 0x148   : > { %v1040_v15 = vadd.f32 %v2181_v44, %v927_v9  ;;  %v1071_v18 = vmax.f32 %v1039_v8, 0.0 }
 0x149   : > { %v1038_v17 = vadd.f32 %v2181_v44, %v919_v13  ;;  %v1069_v20 = vmax.f32 %v1037_v12, 0.0 }
 0x14a   : > { %v1072_v19 = vmax.f32 %v1040_v15, 0.0 }
 0x14b   : > { %v1070_v21 = vmax.f32 %v1038_v17, 0.0  ;;  %v1667_v22 = vpop.f32.mrb[8].mxu1 }
 0x14c   : > { %v1544_v23 = vpack.c.bf16 %v1072_v19, %v1071_v18  ;;  %v940_v24 = vadd.f32 %v1701_v7, %v1667_v22  ;;  %v735_v25 = vpop.f32.mrb[9].mxu1  ;;  %v1705_v29 = vpop.f32.mrb[12].mxu0 }
 0x14d   : > { %v1539_v26 = vpack.c.bf16 %v1070_v21, %v1069_v20  ;;  %v932_v27 = vadd.f32 %v931_v11, %v735_v25  ;;  %v1668_v28 = vpop.f32.mrb[10].mxu1  ;;  %v947_v33 = vpop.f32.mrb[13].mxu0 }
 0x14e   : > { %1608 = vst [vmem:[%s2191_s14 + $0x18] sm:$0xff] %v1544_v23   ;;  %v1043_v30 = vadd.f32 %v2181_v44, %v940_v24  ;;  %v943_v31 = vadd.f32 %v1702_v14, %v1668_v28  ;;  %v738_v32 = vpop.f32.mrb[11].mxu1  ;;  %v1706_v36 = vpop.f32.mrb[14].mxu0 }
 0x14f   : > { %1607 = vst [vmem:[%s2191_s14 + $0x10] sm:$0xff] %v1539_v26   ;;  %v1041_v34 = vadd.f32 %v2181_v44, %v932_v27  ;;  %v935_v35 = vadd.f32 %v934_v16, %v738_v32  ;;  %v950_v38 = vpop.f32.mrb[15].mxu0 }
 0x150   : > { %v1044_v37 = vadd.f32 %v2181_v44, %v943_v31  ;;  %v1075_v40 = vmax.f32 %v1043_v30, 0.0 }
 0x151   : > { %v1042_v39 = vadd.f32 %v2181_v44, %v935_v35  ;;  %v1073_v42 = vmax.f32 %v1041_v34, 0.0 }
 0x152   : > { %v1076_v41 = vmax.f32 %v1044_v37, 0.0 }
 0x153   : > { %v1074_v43 = vmax.f32 %v1042_v39, 0.0  ;;  %v1671_v45 = vpop.f32.mrb[12].mxu1 }
 0x154   : > { %v1554_v46 = vpack.c.bf16 %v1076_v41, %v1075_v40  ;;  %v956_v47 = vadd.f32 %v1705_v29, %v1671_v45  ;;  %v751_v48 = vpop.f32.mrb[13].mxu1  ;;  %v1709_v52 = vpop.f32.mrb[16].mxu0 }
 0x155   : > { %v1549_v49 = vpack.c.bf16 %v1074_v43, %v1073_v42  ;;  %v948_v50 = vadd.f32 %v947_v33, %v751_v48  ;;  %v1672_v51 = vpop.f32.mrb[14].mxu1  ;;  %v963_v56 = vpop.f32.mrb[17].mxu0 }
 0x156   : > { %1610 = vst [vmem:[%s2191_s14 + $0x28] sm:$0xff] %v1554_v46   ;;  %v1047_v53 = vadd.f32 %v2181_v44, %v956_v47  ;;  %v959_v54 = vadd.f32 %v1706_v36, %v1672_v51  ;;  %v754_v55 = vpop.f32.mrb[15].mxu1  ;;  %v1710_v59 = vpop.f32.mrb[18].mxu0 }
 0x157   : > { %1609 = vst [vmem:[%s2191_s14 + $0x20] sm:$0xff] %v1549_v49   ;;  %v1045_v57 = vadd.f32 %v2181_v44, %v948_v50  ;;  %v951_v58 = vadd.f32 %v950_v38, %v754_v55  ;;  %v966_v61 = vpop.f32.mrb[19].mxu0 }
 0x158   : > { %v1048_v60 = vadd.f32 %v2181_v44, %v959_v54  ;;  %v1079_v63 = vmax.f32 %v1047_v53, 0.0 }
 0x159   : > { %v1046_v62 = vadd.f32 %v2181_v44, %v951_v58  ;;  %v1077_v1 = vmax.f32 %v1045_v57, 0.0 }
 0x15a   : > { %v1080_v0 = vmax.f32 %v1048_v60, 0.0 }
 0x15b   : > { %v1078_v2 = vmax.f32 %v1046_v62, 0.0  ;;  %v1675_v3 = vpop.f32.mrb[16].mxu1 }
 0x15c   : > { %v1564_v4 = vpack.c.bf16 %v1080_v0, %v1079_v63  ;;  %v972_v5 = vadd.f32 %v1709_v52, %v1675_v3  ;;  %v767_v6 = vpop.f32.mrb[17].mxu1  ;;  %v1713_v10 = vpop.f32.mrb[20].mxu0 }
 0x15d   : > { %v1559_v7 = vpack.c.bf16 %v1078_v2, %v1077_v1  ;;  %v964_v8 = vadd.f32 %v963_v56, %v767_v6  ;;  %v1676_v9 = vpop.f32.mrb[18].mxu1  ;;  %v979_v14 = vpop.f32.mrb[21].mxu0 }
 0x15e   : > { %1612 = vst [vmem:[%s2191_s14 + $0x38] sm:$0xff] %v1564_v4   ;;  %v1051_v11 = vadd.f32 %v2181_v44, %v972_v5  ;;  %v975_v12 = vadd.f32 %v1710_v59, %v1676_v9  ;;  %v770_v13 = vpop.f32.mrb[19].mxu1  ;;  %v1714_v17 = vpop.f32.mrb[22].mxu0 }
 0x15f   : > { %1611 = vst [vmem:[%s2191_s14 + $0x30] sm:$0xff] %v1559_v7   ;;  %v1049_v15 = vadd.f32 %v2181_v44, %v964_v8  ;;  %v967_v16 = vadd.f32 %v966_v61, %v770_v13  ;;  %v982_v19 = vpop.f32.mrb[23].mxu0 }
 0x160   : > { %v1052_v18 = vadd.f32 %v2181_v44, %v975_v12  ;;  %v1083_v21 = vmax.f32 %v1051_v11, 0.0 }
 0x161   : > { %v1050_v20 = vadd.f32 %v2181_v44, %v967_v16  ;;  %v1081_v23 = vmax.f32 %v1049_v15, 0.0 }
 0x162   : > { %v1084_v22 = vmax.f32 %v1052_v18, 0.0 }
 0x163   : > { %v1082_v24 = vmax.f32 %v1050_v20, 0.0  ;;  %v1679_v25 = vpop.f32.mrb[20].mxu1 }
 0x164   : > { %v1574_v26 = vpack.c.bf16 %v1084_v22, %v1083_v21  ;;  %v988_v27 = vadd.f32 %v1713_v10, %v1679_v25  ;;  %v783_v28 = vpop.f32.mrb[21].mxu1  ;;  %v1717_v32 = vpop.f32.mrb[24].mxu0 }
 0x165   : > { %v1569_v29 = vpack.c.bf16 %v1082_v24, %v1081_v23  ;;  %v980_v30 = vadd.f32 %v979_v14, %v783_v28  ;;  %v1680_v31 = vpop.f32.mrb[22].mxu1  ;;  %v995_v36 = vpop.f32.mrb[25].mxu0 }
 0x166   : > { %1614 = vst [vmem:[%s2191_s14 + $0x48] sm:$0xff] %v1574_v26   ;;  %v1055_v33 = vadd.f32 %v2181_v44, %v988_v27  ;;  %v991_v34 = vadd.f32 %v1714_v17, %v1680_v31  ;;  %v786_v35 = vpop.f32.mrb[23].mxu1  ;;  %v1718_v39 = vpop.f32.mrb[26].mxu0 }
 0x167   : > { %1613 = vst [vmem:[%s2191_s14 + $0x40] sm:$0xff] %v1569_v29   ;;  %v1053_v37 = vadd.f32 %v2181_v44, %v980_v30  ;;  %v983_v38 = vadd.f32 %v982_v19, %v786_v35  ;;  %v998_v41 = vpop.f32.mrb[27].mxu0 }
 0x168   : > { %v1056_v40 = vadd.f32 %v2181_v44, %v991_v34  ;;  %v1087_v43 = vmax.f32 %v1055_v33, 0.0 }
 0x169   : > { %v1054_v42 = vadd.f32 %v2181_v44, %v983_v38  ;;  %v1085_v46 = vmax.f32 %v1053_v37, 0.0 }
 0x16a   : > { %v1088_v45 = vmax.f32 %v1056_v40, 0.0 }
 0x16b   : > { %v1086_v47 = vmax.f32 %v1054_v42, 0.0  ;;  %v1683_v48 = vpop.f32.mrb[24].mxu1 }
 0x16c   : > { %v1584_v49 = vpack.c.bf16 %v1088_v45, %v1087_v43  ;;  %v1004_v50 = vadd.f32 %v1717_v32, %v1683_v48  ;;  %v799_v51 = vpop.f32.mrb[25].mxu1  ;;  %v1721_v55 = vpop.f32.mrb[28].mxu0 }
 0x16d   : > { %v1579_v52 = vpack.c.bf16 %v1086_v47, %v1085_v46  ;;  %v996_v53 = vadd.f32 %v995_v36, %v799_v51  ;;  %v1684_v54 = vpop.f32.mrb[26].mxu1  ;;  %v1011_v59 = vpop.f32.mrb[29].mxu0 }
 0x16e   : > { %1616 = vst [vmem:[%s2191_s14 + $0x58] sm:$0xff] %v1584_v49   ;;  %v1059_v56 = vadd.f32 %v2181_v44, %v1004_v50  ;;  %v1007_v57 = vadd.f32 %v1718_v39, %v1684_v54  ;;  %v802_v58 = vpop.f32.mrb[27].mxu1  ;;  %v1722_v62 = vpop.f32.mrb[30].mxu0 }
 0x16f   : > { %1615 = vst [vmem:[%s2191_s14 + $0x50] sm:$0xff] %v1579_v52   ;;  %v1057_v60 = vadd.f32 %v2181_v44, %v996_v53  ;;  %v999_v61 = vadd.f32 %v998_v41, %v802_v58  ;;  %v1014_v0 = vpop.f32.mrb[31].mxu0 }
 0x170   : > { %v1060_v63 = vadd.f32 %v2181_v44, %v1007_v57  ;;  %v1091_v2 = vmax.f32 %v1059_v56, 0.0 }
 0x171   : > { %v1058_v1 = vadd.f32 %v2181_v44, %v999_v61  ;;  %v1089_v4 = vmax.f32 %v1057_v60, 0.0 }
 0x172   : > { %v1092_v3 = vmax.f32 %v1060_v63, 0.0 }
 0x173   : > { %v1090_v5 = vmax.f32 %v1058_v1, 0.0  ;;  %v1687_v6 = vpop.f32.mrb[28].mxu1 }
 0x174   : > { %v1594_v7 = vpack.c.bf16 %v1092_v3, %v1091_v2  ;;  %v1020_v8 = vadd.f32 %v1721_v55, %v1687_v6  ;;  %v815_v9 = vpop.f32.mrb[29].mxu1 }
 0x175   : > { %v1589_v10 = vpack.c.bf16 %v1090_v5, %v1089_v4  ;;  %v1012_v11 = vadd.f32 %v1011_v59, %v815_v9  ;;  %v1688_v12 = vpop.f32.mrb[30].mxu1 }
 0x176   : > { %1618 = vst [vmem:[%s2191_s14 + $0x68] sm:$0xff] %v1594_v7   ;;  %v1063_v13 = vadd.f32 %v2181_v44, %v1020_v8  ;;  %v1023_v14 = vadd.f32 %v1722_v62, %v1688_v12  ;;  %v818_v15 = vpop.f32.mrb[31].mxu1 }
 0x177   : > { %1617 = vst [vmem:[%s2191_s14 + $0x60] sm:$0xff] %v1589_v10   ;;  %v1061_v16 = vadd.f32 %v2181_v44, %v1012_v11  ;;  %v1015_v17 = vadd.f32 %v1014_v0, %v818_v15 }
 0x178   : > { %v1064_v18 = vadd.f32 %v2181_v44, %v1023_v14  ;;  %v1095_v20 = vmax.f32 %v1063_v13, 0.0 }
 0x179   : > { %v1062_v19 = vadd.f32 %v2181_v44, %v1015_v17  ;;  %v1093_v22 = vmax.f32 %v1061_v16, 0.0 }
 0x17a   : > { %v1096_v21 = vmax.f32 %v1064_v18, 0.0 }
 0x17b   : > { %v1094_v23 = vmax.f32 %v1062_v19, 0.0 }
 0x17c   : > { %v1604_v24 = vpack.c.bf16 %v1096_v21, %v1095_v20 }
 0x17d   : > { %v1599_v25 = vpack.c.bf16 %v1094_v23, %v1093_v22 }
 0x17e   : > { %1620 = vst [vmem:[%s2191_s14 + $0x78] sm:$0xff] %v1604_v24  }
 0x17f   : > { %1619 = vst [vmem:[%s2191_s14 + $0x70] sm:$0xff] %v1599_v25  }
 0x180 PF: > { %s17_s20 = sadd.s32 1, %s1945_s20   ;;  %s2263_s18 = smov %s1941_s19 }
 0x181   : > { %p14_p5 = scmp.ge.s32.totalorder %s17_s20, 4   ;;  %s2264_s19 = smov %s2266_s26 }
 0x183   :  { %16 = sbr.rel (!%p14_p5) target bundleno = 3 (0x3), region = 86 }
 0x18a   :  { %1287 = vsyncpa [#allocation3], 1 }
 0x18b   :  { %1289 = vsyncpa [#allocation3 + $0x1], 1 }
 0x18c   :  { %1290 = vsyncpa [#allocation5], 1 }

// kernel: audio_location_forward.6
= control target key start
LH: loop header
LB: loop body
LE: loop exit
PB: predicated region body
PF: predicated region fallthrough
CT: control target
= control target key end

     0   :  { %s2027_s18 = smov 0   ;;  %s2029_s19 = smov 0   ;;  %s2417_s0 = inlined_call_operand.vmem [shape: bf16[2,72,512], index: 0, kind: input, shape index: {}, may-alias: {0,1}]   ;;  %s2418_s1 = inlined_call_operand.vmem [shape: bf16[2,72,512], index: 1, kind: input, shape index: {}, may-alias: {0,1}]   ;;  %s2419_s2 = inlined_call_operand.vmem [shape: bf16[512,128], index: 2, kind: input, shape index: {}]   ;;  %s2420_s3 = inlined_call_operand.vmem [shape: bf16[512,128], index: 3, kind: input, shape index: {}]   ;;  %s2421_s4 = inlined_call_operand.vmem [shape: f32[1,128], index: 4, kind: input, shape index: {}]   ;;  %s2422_s5 = inlined_call_operand.vmem [shape: bf16[2,64,128], index: 5, kind: output, shape index: {}]  }
   0x1   :  { %s2031_s20 = smov 0  }
   0x2 LB: > { %s27_s21 = sadd.s32 1, %s1991_s19  ;;  %p1560_p0 = scmp.ge.s32.totalorder %s1995_s20, 1  ;;  %s1995_s20 = sphi %s2031_s20, %s15_s20   ;;  %s1991_s19 = sphi %s2029_s19, %s2424_s19   ;;  %s1987_s18 = sphi %s2027_s18, %s2423_s18  }
   0x3   : > { %p29_p1 = scmp.ge.s32.totalorder %s27_s21, 2  ;;  %p243_p2 = scmp.lt.s32.totalorder %s1995_s20, 3 }
   0x5   : > { %s2426_s21 = smov (%p29_p1, %s27_s21), 0  ;;  %p244_p3 = pnand %p1560_p0, %p243_p2 }
   0x6   : > { %v1881_v0 = vld [vmem:[%s2420_s3 + $0x40] sm:$0xff] (!%p244_p3)   ;;  %p302_p4 = scmp.lt.s32.totalorder (!%p244_p3), %s1987_s18, 1  ;;  %v1885_v4 = vld [vmem:[%s2420_s3 + $0x48] sm:$0xff] (!%p244_p3)   ;;  %v1889_v8 = vld [vmem:[%s2420_s3 + $0x50] sm:$0xff] (!%p244_p3)   ;;  %vm577_vm0 = vsmask.f32 (!%p244_p3), 7424 }
   0x7   : > { %247 = sbr.rel (%p244_p3) target bundleno = 324 (0x144), region = 40  ;;  %v1882_v1 = vld [vmem:[%s2420_s3 + $0xc0] sm:$0xff] (!%p244_p3)   ;;  %1694 = vmatprep.subr.bf16.mxu0 (!%p244_p3), %v1881_v0  ;;  %v1886_v5 = vld [vmem:[%s2420_s3 + $0xc8] sm:$0xff] (!%p244_p3)   ;;  %v1890_v9 = vld [vmem:[%s2420_s3 + $0xd0] sm:$0xff] (!%p244_p3)  }
   0x8   : > { %v1883_v2 = vld [vmem:[%s2420_s3] sm:$0xff] (!%p244_p3)   ;;  %1734 = vmatprep.subr.bf16.mxu1 (!%p244_p3), %v1882_v1  ;;  %v1887_v6 = vld [vmem:[%s2420_s3 + $0x8] sm:$0xff] (!%p244_p3)   ;;  %v1891_v10 = vld [vmem:[%s2420_s3 + $0x10] sm:$0xff] (!%p244_p3)  }
   0x9   : > { %v1884_v3 = vld [vmem:[%s2420_s3 + $0x80] sm:$0xff] (!%p244_p3)   ;;  %1695 = vmatpush3.bf16.msra.mxu0 (!%p244_p3), %v1883_v2  ;;  %v1888_v7 = vld [vmem:[%s2420_s3 + $0x88] sm:$0xff] (!%p244_p3)   ;;  %v1892_v11 = vld [vmem:[%s2420_s3 + $0x90] sm:$0xff] (!%p244_p3)  }
   0xa   : > { %1735 = vmatpush3.bf16.msra.mxu1 (!%p244_p3), %v1884_v3  ;;  %1696 = vmatprep.subr.bf16.mxu0 (!%p244_p3), %v1885_v4  ;;  %v1893_v12 = vld [vmem:[%s2420_s3 + $0x58] sm:$0xff] (!%p244_p3)   ;;  %v1897_v16 = vld [vmem:[%s2420_s3 + $0x60] sm:$0xff] (!%p244_p3)   ;;  %v1901_v20 = vld [vmem:[%s2420_s3 + $0x68] sm:$0xff] (!%p244_p3)  }
   0xb   : > { %1736 = vmatprep.subr.bf16.mxu1 (!%p244_p3), %v1886_v5  ;;  %v1894_v13 = vld [vmem:[%s2420_s3 + $0xd8] sm:$0xff] (!%p244_p3)   ;;  %v1898_v17 = vld [vmem:[%s2420_s3 + $0xe0] sm:$0xff] (!%p244_p3)   ;;  %v1902_v21 = vld [vmem:[%s2420_s3 + $0xe8] sm:$0xff] (!%p244_p3)  }
   0xc   : > { %v1895_v14 = vld [vmem:[%s2420_s3 + $0x18] sm:$0xff] (!%p244_p3)   ;;  %v1899_v18 = vld [vmem:[%s2420_s3 + $0x20] sm:$0xff] (!%p244_p3)   ;;  %v1903_v22 = vld [vmem:[%s2420_s3 + $0x28] sm:$0xff] (!%p244_p3)  }
   0xd   : > { %1697 = vmatpush3.bf16.msra.mxu0 (!%p244_p3), %v1887_v6  ;;  %v1896_v15 = vld [vmem:[%s2420_s3 + $0x98] sm:$0xff] (!%p244_p3)   ;;  %v1900_v19 = vld [vmem:[%s2420_s3 + $0xa0] sm:$0xff] (!%p244_p3)   ;;  %v1904_v23 = vld [vmem:[%s2420_s3 + $0xa8] sm:$0xff] (!%p244_p3)  }
   0xe   : > { %s2428_s18 = smov (!%p302_p4, %s1987_s18), 1  ;;  %1737 = vmatpush3.bf16.msra.mxu1 %v1888_v7  ;;  %1698 = vmatprep.subr.bf16.mxu0 %v1889_v8  ;;  %v1905_v24 = vld [vmem:[%s2420_s3 + $0x70] sm:$0xff]   ;;  %v1909_v28 = vld [vmem:[%s2420_s3 + $0x78] sm:$0xff]   ;;  %v1925_v55 = vld [vmem:[%s2419_s2 + $0x40] sm:$0xff]  }
   0xf   : > { %1738 = vmatprep.subr.bf16.mxu1 %v1890_v9  ;;  %v1906_v25 = vld [vmem:[%s2420_s3 + $0xf0] sm:$0xff]   ;;  %s1854_s9 = smul.u32 144, %s2428_s18  ;;  %v1910_v29 = vld [vmem:[%s2420_s3 + $0xf8] sm:$0xff]   ;;  %v1926_v63 = vld [vmem:[%s2419_s2 + $0xc0] sm:$0xff]   ;;  %s1662_s12 = sshll.u32 %s2428_s18, 5 }
  0x10   : > { %v1907_v26 = vld [vmem:[%s2420_s3 + $0x30] sm:$0xff]   ;;  %v1911_v30 = vld [vmem:[%s2420_s3 + $0x38] sm:$0xff]   ;;  %v1927_v2 = vld [vmem:[%s2419_s2] sm:$0xff]   ;;  %s2391_s15 = scalar_lea.vmem %s2422_s5, %s1662_s12 }
  0x11   : > { %1699 = vmatpush3.bf16.msra.mxu0 %v1891_v10  ;;  %v1908_v27 = vld [vmem:[%s2420_s3 + $0xb0] sm:$0xff]   ;;  %s2146_s24 = scalar_lea.vmem %s2417_s0, %s1854_s9  ;;  %v1912_v31 = vld [vmem:[%s2420_s3 + $0xb8] sm:$0xff]   ;;  %v1928_v5 = vld [vmem:[%s2419_s2 + $0x80] sm:$0xff]   ;;  %s2272_s16 = sadd.s32 128, %s1854_s9 }
  0x12   : > { %1739 = vmatpush3.bf16.msra.mxu1 %v1892_v11  ;;  %1700 = vmatprep.subr.bf16.mxu0 %v1893_v12  ;;  %v2152_v32 = vld [vmem:[%s2146_s24 + $0x4] ss:$16 sps:$4 sm:$0xff]   ;;  %v2161_v37 = vld [vmem:[%s2146_s24 + $0xc] ss:$16 sps:$4 sm:$0xff]   ;;  %v2167_v39 = vld [vmem:[%s2146_s24] ss:$16 sps:$4 sm:$0xff]   ;;  %s327_s7 = scalar_lea.vmem %s2418_s1, %s2272_s16 }
  0x13   : > { %1740 = vmatprep.subr.bf16.mxu1 %v1894_v13  ;;  %v2155_v33 = vld [vmem:[%s2146_s24 + $0x24] ss:$16 sps:$4 sm:$0xff]   ;;  %v591_v34 = vshrl.u32 %v2152_v32, 16  ;;  %v593_v35 = vshll.u32 %v2152_v32, 16  ;;  %v2164_v38 = vld [vmem:[%s2146_s24 + $0x2c] ss:$16 sps:$4 sm:$0xff]  }
  0x14   : > { %v598_v36 = vshll.u32 %v2155_v33, 16  ;;  %v2170_v40 = vld [vmem:[%s2146_s24 + $0x20] ss:$16 sps:$4 sm:$0xff]   ;;  %v615_v43 = vshrl.u32 %v2161_v37, 16  ;;  %v617_v44 = vshll.u32 %v2161_v37, 16  ;;  %v622_v46 = vshll.u32 %v2164_v38, 16 }
  0x15   : > { %1701 = vmatpush3.bf16.msra.mxu0 %v1895_v14  ;;  %v595_v41 = vrot.slane %v593_v35, 1  ;;  %v2175_v45 = vld [vmem:[%s2146_s24 + $0x8] ss:$16 sps:$4 sm:$0xff]   ;;  %v579_v47 = vshrl.u32 %v2167_v39, 16  ;;  %v581_v48 = vshll.u32 %v2167_v39, 16  ;;  %v586_v49 = vshll.u32 %v2170_v40, 16 }
  0x16   : > { %1741 = vmatpush3.bf16.msra.mxu1 %v1896_v15  ;;  %1702 = vmatprep.subr.bf16.mxu0 %v1897_v16  ;;  %v600_v42 = vrot.slane %v598_v36, 1  ;;  %v2182_v50 = vld [vmem:[%s2146_s24 + $0x28] ss:$16 sps:$4 sm:$0xff]   ;;  %v619_v52 = vrot.slane %v617_v44, 1  ;;  %v603_v53 = vshrl.u32 %v2175_v45, 16  ;;  %v605_v54 = vshll.u32 %v2175_v45, 16 }
  0x17   : > { %1742 = vmatprep.subr.bf16.mxu1 %v1898_v17  ;;  %v596_v51 = vor.u32 %v595_v41, %v591_v34  ;;  %v624_v56 = vrot.slane %v622_v46, 1  ;;  %v583_v57 = vrot.slane %v581_v48, 1  ;;  %v588_v58 = vrot.slane %v586_v49, 1  ;;  %v1929_v7 = vld [vmem:[%s2419_s2 + $0x48] sm:$0xff]   ;;  %v2219_v15 = vld [vmem:[%s2146_s24 + $0x44] ss:$16 sps:$4 sm:$0xff]  }
  0x18   : > { %v610_v59 = vshll.u32 %v2182_v50, 16  ;;  %v620_v61 = vor.u32 %v619_v52, %v615_v43  ;;  %v607_v62 = vrot.slane %v605_v54, 1  ;;  %v1930_v9 = vld [vmem:[%s2419_s2 + $0xc8] sm:$0xff]   ;;  %v634_v10 = vshrl.u32 %v2155_v33, 16  ;;  %v1942_v35 = vld [vmem:[%s2419_s2 + $0x90] sm:$0xff]   ;;  %v1944_v49 = vld [vmem:[%s2419_s2 + $0xd8] sm:$0xff]  }
  0x19   : > { %1703 = vmatpush3.bf16.msra.mxu0 %v1899_v18  ;;  %v601_v60 = vsel %vm577_vm0, %v596_v51, %v600_v42  ;;  %v584_v0 = vor.u32 %v583_v57, %v579_v47  ;;  %v1931_v11 = vld [vmem:[%s2419_s2 + $0x8] sm:$0xff]   ;;  %v650_v12 = vshrl.u32 %v2164_v38, 16  ;;  %v626_v14 = vshrl.u32 %v2170_v40, 16  ;;  %v1943_v47 = vld [vmem:[%s2419_s2 + $0x58] sm:$0xff]  }
  0x1a   : > { %1743 = vmatpush3.bf16.msra.mxu1 %v1900_v19  ;;  %1704 = vmatprep.subr.bf16.mxu0 %v1901_v20  ;;  %v612_v1 = vrot.slane %v610_v59, 1  ;;  %v625_v3 = vsel %vm577_vm0, %v620_v61, %v624_v56  ;;  %v608_v4 = vor.u32 %v607_v62, %v603_v53  ;;  %v1932_v13 = vld [vmem:[%s2419_s2 + $0x88] sm:$0xff]   ;;  %v642_v16 = vshrl.u32 %v2182_v50, 16  ;;  %v2227_v20 = vld [vmem:[%s2146_s24 + $0x40] ss:$16 sps:$4 sm:$0xff]   ;;  %v1945_v52 = vld [vmem:[%s2419_s2 + $0x18] sm:$0xff]  }
  0x1b   : > { %1744 = vmatprep.subr.bf16.mxu1 %v1902_v21  ;;  %962 = vmatprep.mubr.bf16.mxu0 %v601_v60  ;;  %v589_v6 = vsel %vm577_vm0, %v584_v0, %v588_v58  ;;  %v2223_v17 = vld [vmem:[%s2146_s24 + $0x4c] ss:$16 sps:$4 sm:$0xff]   ;;  %v636_v18 = vor.u32 %v634_v10, %v600_v42  ;;  %v638_v19 = vshll.u32 %v2219_v15, 16  ;;  %v2230_v21 = vld [vmem:[%s2146_s24 + $0x48] ss:$16 sps:$4 sm:$0xff]   ;;  %v666_v48 = vshrl.u32 %v2219_v15, 16 }
  0x1c   : > { %1027 = vmatprep.mubr.bf16.mxu1 %v625_v3  ;;  %v613_v8 = vsel %vm577_vm0, %v608_v4, %v612_v1  ;;  %v682_v51 = vshrl.u32 %v2223_v17, 16  ;;  %v658_v53 = vshrl.u32 %v2227_v20, 16  ;;  %v1946_v54 = vld [vmem:[%s2419_s2 + $0x98] sm:$0xff]   ;;  %v1953_v0 = vld [vmem:[%s2419_s2 + $0x60] sm:$0xff]  }
  0x1d   : > { %1705 = vmatpush3.bf16.msra.mxu0 %v1903_v22  ;;  %v1939_v22 = vld [vmem:[%s2419_s2 + $0x50] sm:$0xff]   ;;  %v2275_v57 = vld [vmem:[%s2146_s24 + $0x6c] ss:$16 sps:$4 sm:$0xff]   ;;  %v2281_v59 = vld [vmem:[%s2146_s24 + $0x68] ss:$16 sps:$4 sm:$0xff]  }
  0x1e   : > { %1745 = vmatpush3.bf16.msra.mxu1 %v1904_v23  ;;  %1706 = vmatprep.subr.bf16.mxu0 %v1905_v24  ;;  %v652_v23 = vor.u32 %v650_v12, %v624_v56  ;;  %v654_v24 = vshll.u32 %v2223_v17, 16  ;;  %v2268_v56 = vld [vmem:[%s2146_s24 + $0x64] ss:$16 sps:$4 sm:$0xff]   ;;  %v678_v4 = vshll.u32 %v2281_v59, 16 }
  0x1f   : > { %1746 = vmatprep.subr.bf16.mxu1 %v1906_v25  ;;  %v628_v25 = vor.u32 %v626_v14, %v588_v58  ;;  %v2278_v58 = vld [vmem:[%s2146_s24 + $0x60] ss:$16 sps:$4 sm:$0xff]   ;;  %v670_v61 = vshll.u32 %v2268_v56, 16 }
  0x20   : > { %v656_v34 = vrot.slane %v654_v24, 1  ;;  %v680_v10 = vrot.slane %v678_v4, 1  ;;  %v690_v24 = vshrl.u32 %v2278_v58, 16  ;;  %v1971_v4 = vld [vmem:[%s2419_s2 + $0x38] sm:$0xff]  }
  0x21   : > { %1707 = vmatpush3.bf16.msra.mxu0 %v1907_v26  ;;  %v1940_v26 = vld [vmem:[%s2419_s2 + $0xd0] sm:$0xff]  }
  0x22   : > { %1747 = vmatpush3.bf16.msra.mxu1 %v1908_v27  ;;  %1708 = vmatprep.subr.bf16.mxu0 %v1909_v28  ;;  %v640_v27 = vrot.slane %v638_v19, 1  ;;  %v630_v28 = vshll.u32 %v2227_v20, 16  ;;  %v657_v43 = vsel %vm577_vm0, %v652_v23, %v656_v34  ;;  %v684_v62 = vor.u32 %v682_v51, %v656_v34  ;;  %v1958_v19 = vld [vmem:[%s2419_s2 + $0xe8] sm:$0xff]  }
  0x23   : > { %1748 = vmatprep.subr.bf16.mxu1 %v1910_v29  ;;  %v644_v29 = vor.u32 %v642_v16, %v612_v1  ;;  %v686_v1 = vshll.u32 %v2275_v57, 16  ;;  %v1959_v23 = vld [vmem:[%s2419_s2 + $0x28] sm:$0xff]  }
  0x24   : > { %v641_v36 = vsel %vm577_vm0, %v636_v18, %v640_v27  ;;  %v632_v41 = vrot.slane %v630_v28, 1  ;;  %v668_v60 = vor.u32 %v666_v48, %v640_v27  ;;  %v1957_v18 = vld [vmem:[%s2419_s2 + $0x68] sm:$0xff]   ;;  %v714_v27 = vshrl.u32 %v2275_v57, 16 }
  0x25   : > { %1709 = vmatpush3.bf16.msra.mxu0 %v1911_v30  ;;  %v646_v30 = vshll.u32 %v2230_v21, 16  ;;  %v706_v28 = vshrl.u32 %v2281_v59, 16 }
  0x26   : > { %1749 = vmatpush3.bf16.msra.mxu1 %v1912_v31  ;;  %1774 = vmatprep.subr.bf16.mxu0 %v1925_v55  ;;  %v1941_v31 = vld [vmem:[%s2419_s2 + $0x10] sm:$0xff]   ;;  %v633_v44 = vsel %vm577_vm0, %v628_v25, %v632_v41  ;;  %v674_v55 = vshrl.u32 %v2230_v21, 16  ;;  %v1960_v25 = vld [vmem:[%s2419_s2 + $0xa8] sm:$0xff]  }
  0x27   : > { %1814 = vmatprep.subr.bf16.mxu1 %v1926_v63  ;;  %v648_v42 = vrot.slane %v646_v30, 1  ;;  %v660_v63 = vor.u32 %v658_v53, %v632_v41  ;;  %v358_v30 = vld [vmem:[%s327_s7 + $0x8] sm:$0xff]  ;;  %v708_v51 = vor.u32 %v706_v28, %v680_v10 }
  0x28   : > { %963 = vmatmul.mubr.bf16.vlgmr.msra.gmra.mrb[0].mxu0 %v589_v6  ;;  %v672_v6 = vrot.slane %v670_v61, 1  ;;  %v1584_v34 = vcombine.high %v358_v30, %v358_v30 }
  0x29   : > { %1028 = vmatmul.mubr.bf16.vlgmr.msra.gmra.mrb[0].mxu1 %v613_v8  ;;  %1775 = vmatpush3.bf16.msra.mxu0 %v1927_v2  ;;  %v649_v46 = vsel %vm577_vm0, %v644_v29, %v648_v42  ;;  %v662_v2 = vshll.u32 %v2278_v58, 16  ;;  %v676_v3 = vor.u32 %v674_v55, %v648_v42  ;;  %v688_v8 = vrot.slane %v686_v1, 1  ;;  %v1968_v55 = vld [vmem:[%s2419_s2 + $0xb0] sm:$0xff]   ;;  %v1970_v1 = vld [vmem:[%s2419_s2 + $0xf8] sm:$0xff]  }
  0x2a   : > { %1815 = vmatpush3.bf16.msra.mxu1 %v1928_v5  ;;  %1776 = vmatprep.subr.bf16.mxu0 %v1929_v7  ;;  %v1954_v5 = vld [vmem:[%s2419_s2 + $0xe0] sm:$0xff]   ;;  %v673_v12 = vsel %vm577_vm0, %v668_v60, %v672_v6  ;;  %v1969_v60 = vld [vmem:[%s2419_s2 + $0x78] sm:$0xff]  }
  0x2b   : > { %1816 = vmatprep.subr.bf16.mxu1 %v1930_v9  ;;  %970 = vmatprep.mubr.bf16.mxu0 %v641_v36  ;;  %v1955_v7 = vld [vmem:[%s2419_s2 + $0x20] sm:$0xff]   ;;  %v664_v9 = vrot.slane %v662_v2, 1  ;;  %v681_v16 = vsel %vm577_vm0, %v676_v3, %v680_v10  ;;  %v1965_v36 = vld [vmem:[%s2419_s2 + $0x70] sm:$0xff]   ;;  %v716_v48 = vor.u32 %v714_v27, %v688_v8 }
  0x2c   : > { %1035 = vmatprep.mubr.bf16.mxu1 %v657_v43 }
  0x2d   : > { %1777 = vmatpush3.bf16.msra.mxu0 %v1931_v11  ;;  %v1956_v11 = vld [vmem:[%s2419_s2 + $0xa0] sm:$0xff]   ;;  %v665_v14 = vsel %vm577_vm0, %v660_v63, %v664_v9  ;;  %v692_v43 = vor.u32 %v690_v24, %v664_v9 }
  0x2e   : > { %1817 = vmatpush3.bf16.msra.mxu1 %v1932_v13  ;;  %1778 = vmatprep.subr.bf16.mxu0 %v1939_v22  ;;  %v689_v13 = vsel %vm577_vm0, %v684_v62, %v688_v8  ;;  %v698_v22 = vshrl.u32 %v2268_v56, 16 }
  0x2f   : > { %1818 = vmatprep.subr.bf16.mxu1 %v1940_v26  ;;  %v357_v26 = vld [vmem:[%s327_s7] sm:$0xff] }
  0x30   : > { %971 = vmatmul.mubr.bf16.gmra.mrb[4].mxu0 %v633_v44  ;;  %v1582_v29 = vcombine.high %v357_v26, %v357_v26  ;;  %v700_v41 = vor.u32 %v698_v22, %v672_v6 }
  0x31   : > { %1779 = vmatpush3.bf16.msra.mxu0 %v1941_v31  ;;  %1036 = vmatmul.mubr.bf16.gmra.mrb[4].mxu1 %v649_v46  ;;  %v1581_v31 = vcombine.low %v357_v26, %v357_v26  ;;  %v1966_v46 = vld [vmem:[%s2419_s2 + $0xf0] sm:$0xff]  }
  0x32   : > { %1819 = vmatpush3.bf16.msra.mxu1 %v1942_v35  ;;  %1780 = vmatprep.subr.bf16.mxu0 %v1943_v47  ;;  %v1583_v35 = vcombine.low %v358_v30, %v358_v30  ;;  %v702_v42 = vshll.u32 %v1582_v29, 16  ;;  %v1967_v47 = vld [vmem:[%s2419_s2 + $0x30] sm:$0xff]  }
  0x33   : > { %1820 = vmatprep.subr.bf16.mxu1 %v1944_v49  ;;  %978 = vmatprep.mubr.bf16.mxu0 %v673_v12  ;;  %v694_v44 = vshll.u32 %v1581_v31, 16  ;;  %v718_v49 = vshll.u32 %v1584_v34, 16 }
  0x34   : > { %1043 = vmatprep.mubr.bf16.mxu1 %v689_v13  ;;  %v704_v53 = vrot.slane %v702_v42, 1 }
  0x35   : > { %1781 = vmatpush3.bf16.msra.mxu0 %v1945_v52  ;;  %v710_v52 = vshll.u32 %v1583_v35, 16  ;;  %v720_v61 = vrot.slane %v718_v49, 1 }
  0x36   : > { %1821 = vmatpush3.bf16.msra.mxu1 %v1946_v54  ;;  %1782 = vmatprep.subr.bf16.mxu0 %v1953_v0  ;;  %v696_v54 = vrot.slane %v694_v44, 1  ;;  %v705_v63 = vsel %vm577_vm0, %v700_v41, %v704_v53 }
  0x37   : > { %1822 = vmatprep.subr.bf16.mxu1 %v1954_v5  ;;  %v712_v62 = vrot.slane %v710_v52, 1  ;;  %v721_v2 = vsel %vm577_vm0, %v716_v48, %v720_v61  ;;  %v1972_v5 = vld [vmem:[%s2419_s2 + $0xb8] sm:$0xff]  }
  0x38   : > { %979 = vmatmul.mubr.bf16.gmra.mrb[8].mxu0 %v665_v14  ;;  %v697_v0 = vsel %vm577_vm0, %v692_v43, %v696_v54 }
  0x39   : > { %1783 = vmatpush3.bf16.msra.mxu0 %v1955_v7  ;;  %1044 = vmatmul.mubr.bf16.gmra.mrb[8].mxu1 %v681_v16  ;;  %v713_v3 = vsel %vm577_vm0, %v708_v51, %v712_v62 }
  0x3a   : > { %1823 = vmatpush3.bf16.msra.mxu1 %v1956_v11  ;;  %1784 = vmatprep.subr.bf16.mxu0 %v1957_v18 }
  0x3b   : > { %1824 = vmatprep.subr.bf16.mxu1 %v1958_v19  ;;  %986 = vmatprep.mubr.bf16.mxu0 %v705_v63 }
  0x3c   : > { %1051 = vmatprep.mubr.bf16.mxu1 %v721_v2 }
  0x3d   : > { %1785 = vmatpush3.bf16.msra.mxu0 %v1959_v23 }
  0x3e   : > { %1825 = vmatpush3.bf16.msra.mxu1 %v1960_v25  ;;  %1786 = vmatprep.subr.bf16.mxu0 %v1965_v36 }
  0x3f   : > { %1826 = vmatprep.subr.bf16.mxu1 %v1966_v46 }
  0x40   : > { %987 = vmatmul.mubr.bf16.gmra.mrb[12].mxu0 %v697_v0 }
  0x41   : > { %1787 = vmatpush3.bf16.msra.mxu0 %v1967_v47  ;;  %1052 = vmatmul.mubr.bf16.gmra.mrb[12].mxu1 %v713_v3 }
  0x42   : > { %1827 = vmatpush3.bf16.msra.mxu1 %v1968_v55  ;;  %1788 = vmatprep.subr.bf16.mxu0 %v1969_v60 }
  0x43   : > { %1828 = vmatprep.subr.bf16.mxu1 %v1970_v1  ;;  %1284 = vmatprep.mubr.bf16.mxu0 %v2152_v32 }
  0x44   : > { %1349 = vmatprep.mubr.bf16.mxu1 %v2161_v37 }
  0x45   : > { %1789 = vmatpush3.bf16.msra.mxu0 %v1971_v4 }
  0x46   : > { %1829 = vmatpush3.bf16.msra.mxu1 %v1972_v5 }
  0x48   : > { %1285 = vmatmul.mubr.bf16.vlgmr.msra.gmra.mrb[16].mxu0 %v2167_v39 }
  0x49   : > { %1350 = vmatmul.mubr.bf16.vlgmr.msra.gmra.mrb[16].mxu1 %v2175_v45  ;;  %1292 = vmatprep.mubr.bf16.mxu0 %v2155_v33 }
  0x4a   : > { %1357 = vmatprep.mubr.bf16.mxu1 %v2164_v38 }
  0x50   : > { %1293 = vmatmul.mubr.bf16.gmra.mrb[20].mxu0 %v2170_v40 }
  0x51   : > { %1358 = vmatmul.mubr.bf16.gmra.mrb[20].mxu1 %v2182_v50  ;;  %1300 = vmatprep.mubr.bf16.mxu0 %v2219_v15 }
  0x52   : > { %1365 = vmatprep.mubr.bf16.mxu1 %v2223_v17 }
  0x58   : > { %1301 = vmatmul.mubr.bf16.gmra.mrb[24].mxu0 %v2227_v20 }
  0x59   : > { %1366 = vmatmul.mubr.bf16.gmra.mrb[24].mxu1 %v2230_v21  ;;  %1308 = vmatprep.mubr.bf16.mxu0 %v2268_v56 }
  0x5a   : > { %1373 = vmatprep.mubr.bf16.mxu1 %v2275_v57 }
  0x60   : > { %1309 = vmatmul.mubr.bf16.gmra.mrb[28].mxu0 %v2278_v58 }
  0x61   : > { %1374 = vmatmul.mubr.bf16.gmra.mrb[28].mxu1 %v2281_v59 }
  0xfb   : > { %v1710_v32 = vpop.f32.mrb[0].mxu0 }
  0xfc   : > { %v1750_v33 = vpop.f32.mrb[0].mxu1  ;;  %v1711_v37 = vpop.f32.mrb[1].mxu0 }
  0xfd   : > { %v1712_v38 = vadd.f32 %v1711_v37, %v1710_v32  ;;  %v1751_v39 = vpop.f32.mrb[1].mxu1  ;;  %v1713_v40 = vpop.f32.mrb[2].mxu0 }
  0xfe   : > { %v1752_v45 = vadd.f32 %v1751_v39, %v1750_v33  ;;  %v1753_v50 = vpop.f32.mrb[2].mxu1  ;;  %v1714_v15 = vpop.f32.mrb[3].mxu0  ;;  %v2382_v39 = vld [vmem:[%s2421_s4] ss:$0 sm:$0xff] }
  0xff   : > { %v1715_v17 = vadd.f32 %v1714_v15, %v1713_v40  ;;  %v1754_v20 = vpop.f32.mrb[3].mxu1 }
 0x100   : > { %v1030_v21 = vadd.f32 %v1752_v45, %v1712_v38  ;;  %v1755_v6 = vadd.f32 %v1754_v20, %v1753_v50 }
 0x102   : > { %v1033_v56 = vadd.f32 %v1755_v6, %v1715_v17 }
 0x103   : > { %v1716_v7 = vpop.f32.mrb[4].mxu0 }
 0x104   : > { %v1756_v57 = vpop.f32.mrb[4].mxu1  ;;  %v1717_v8 = vpop.f32.mrb[5].mxu0 }
 0x105   : > { %v1757_v58 = vpop.f32.mrb[5].mxu1  ;;  %v1718_v9 = vadd.f32 %v1717_v8, %v1716_v7  ;;  %v1719_v10 = vpop.f32.mrb[6].mxu0 }
 0x106   : > { %v1758_v59 = vadd.f32 %v1757_v58, %v1756_v57  ;;  %v1759_v11 = vpop.f32.mrb[6].mxu1  ;;  %v1720_v12 = vpop.f32.mrb[7].mxu0 }
 0x107   : > { %v1760_v13 = vpop.f32.mrb[7].mxu1  ;;  %v1721_v16 = vadd.f32 %v1720_v12, %v1719_v10 }
 0x108   : > { %v2367_v14 = vadd.f32 %v1758_v59, %v1718_v9  ;;  %v1761_v18 = vadd.f32 %v1760_v13, %v1759_v11 }
 0x10a   : > { %v2369_v19 = vadd.f32 %v1761_v18, %v1721_v16 }
 0x10b   : > { %v1722_v22 = vpop.f32.mrb[8].mxu0 }
 0x10c   : > { %v1762_v23 = vpop.f32.mrb[8].mxu1  ;;  %v1723_v24 = vpop.f32.mrb[9].mxu0 }
 0x10d   : > { %v1724_v25 = vadd.f32 %v1723_v24, %v1722_v22  ;;  %v1763_v26 = vpop.f32.mrb[9].mxu1  ;;  %v1725_v27 = vpop.f32.mrb[10].mxu0 }
 0x10e   : > { %v1764_v28 = vadd.f32 %v1763_v26, %v1762_v23  ;;  %v1765_v29 = vpop.f32.mrb[10].mxu1  ;;  %v1726_v30 = vpop.f32.mrb[11].mxu0 }
 0x10f   : > { %v1727_v31 = vadd.f32 %v1726_v30, %v1725_v27  ;;  %v1766_v34 = vpop.f32.mrb[11].mxu1 }
 0x110   : > { %v2371_v35 = vadd.f32 %v1764_v28, %v1724_v25  ;;  %v1767_v36 = vadd.f32 %v1766_v34, %v1765_v29 }
 0x112   : > { %v2373_v41 = vadd.f32 %v1767_v36, %v1727_v31 }
 0x113   : > { %v1728_v42 = vpop.f32.mrb[12].mxu0 }
 0x114   : > { %v1768_v43 = vpop.f32.mrb[12].mxu1  ;;  %v1729_v44 = vpop.f32.mrb[13].mxu0 }
 0x115   : > { %v1730_v46 = vadd.f32 %v1729_v44, %v1728_v42  ;;  %v1769_v47 = vpop.f32.mrb[13].mxu1  ;;  %v1731_v48 = vpop.f32.mrb[14].mxu0 }
 0x116   : > { %v1770_v49 = vadd.f32 %v1769_v47, %v1768_v43  ;;  %v1771_v51 = vpop.f32.mrb[14].mxu1  ;;  %v1732_v52 = vpop.f32.mrb[15].mxu0 }
 0x117   : > { %v1733_v53 = vadd.f32 %v1732_v52, %v1731_v48  ;;  %v1772_v54 = vpop.f32.mrb[15].mxu1 }
 0x118   : > { %v2375_v55 = vadd.f32 %v1770_v49, %v1730_v46  ;;  %v1773_v60 = vadd.f32 %v1772_v54, %v1771_v51 }
 0x11a   : > { %v2377_v61 = vadd.f32 %v1773_v60, %v1733_v53 }
 0x11b   : > { %v1790_v62 = vpop.f32.mrb[16].mxu0 }
 0x11c   : > { %v1830_v63 = vpop.f32.mrb[16].mxu1  ;;  %v1791_v0 = vpop.f32.mrb[17].mxu0 }
 0x11d   : > { %v1792_v1 = vadd.f32 %v1791_v0, %v1790_v62  ;;  %v1831_v2 = vpop.f32.mrb[17].mxu1  ;;  %v1793_v3 = vpop.f32.mrb[18].mxu0 }
 0x11e   : > { %v1832_v4 = vadd.f32 %v1831_v2, %v1830_v63  ;;  %v1833_v5 = vpop.f32.mrb[18].mxu1  ;;  %v1794_v32 = vpop.f32.mrb[19].mxu0 }
 0x11f   : > { %v1287_v33 = vadd.f32 %v1792_v1, %v1030_v21  ;;  %v1795_v37 = vadd.f32 %v1794_v32, %v1793_v3  ;;  %v1834_v38 = vpop.f32.mrb[19].mxu1 }
 0x120   : > { %v1835_v40 = vadd.f32 %v1834_v38, %v1833_v5 }
 0x121   : > { %v1352_v45 = vadd.f32 %v1832_v4, %v1287_v33  ;;  %v1290_v50 = vadd.f32 %v1795_v37, %v1033_v56 }
 0x123   : > { %v1389_v15 = vadd.f32 %v2382_v39, %v1352_v45  ;;  %v1355_v17 = vadd.f32 %v1835_v40, %v1290_v50  ;;  %v1796_v20 = vpop.f32.mrb[20].mxu0 }
 0x124   : > { %v1836_v6 = vpop.f32.mrb[20].mxu1  ;;  %v1797_v7 = vpop.f32.mrb[21].mxu0 }
 0x125   : > { %v1390_v57 = vadd.f32 %v2382_v39, %v1355_v17  ;;  %v1798_v21 = vadd.f32 %v1797_v7, %v1796_v20  ;;  %v1837_v8 = vpop.f32.mrb[21].mxu1  ;;  %v1799_v58 = vpop.f32.mrb[22].mxu0  ;;  %v1397_v11 = vmax.f32 %v1389_v15, 0.0 }
 0x126   : > { %v1838_v9 = vadd.f32 %v1837_v8, %v1836_v6  ;;  %v1839_v59 = vpop.f32.mrb[22].mxu1  ;;  %v1800_v10 = vpop.f32.mrb[23].mxu0 }
 0x127   : > { %v1398_v12 = vmax.f32 %v1390_v57, 0.0  ;;  %v1295_v13 = vadd.f32 %v1798_v21, %v2367_v14  ;;  %v1801_v56 = vadd.f32 %v1800_v10, %v1799_v58  ;;  %v1840_v16 = vpop.f32.mrb[23].mxu1 }
 0x128   : > { %v1841_v18 = vadd.f32 %v1840_v16, %v1839_v59 }
 0x129   : > { %v1674_v22 = vpack.c.bf16 %v1398_v12, %v1397_v11  ;;  %v1360_v23 = vadd.f32 %v1838_v9, %v1295_v13  ;;  %v1298_v24 = vadd.f32 %v1801_v56, %v2369_v19 }
 0x12b   : > { %1675 = vst [vmem:[%s2391_s15] sm:$0xff] %v1674_v22   ;;  %v1391_v25 = vadd.f32 %v2382_v39, %v1360_v23  ;;  %v1363_v26 = vadd.f32 %v1841_v18, %v1298_v24  ;;  %v1802_v27 = vpop.f32.mrb[24].mxu0 }
 0x12c   : > { %v1842_v28 = vpop.f32.mrb[24].mxu1  ;;  %v1803_v14 = vpop.f32.mrb[25].mxu0 }
 0x12d   : > { %v1392_v29 = vadd.f32 %v2382_v39, %v1363_v26  ;;  %v1804_v30 = vadd.f32 %v1803_v14, %v1802_v27  ;;  %v1843_v31 = vpop.f32.mrb[25].mxu1  ;;  %v1805_v34 = vpop.f32.mrb[26].mxu0  ;;  %v1399_v44 = vmax.f32 %v1391_v25, 0.0 }
 0x12e   : > { %v1844_v36 = vadd.f32 %v1843_v31, %v1842_v28  ;;  %v1845_v42 = vpop.f32.mrb[26].mxu1  ;;  %v1806_v43 = vpop.f32.mrb[27].mxu0 }
 0x12f   : > { %v1400_v46 = vmax.f32 %v1392_v29, 0.0  ;;  %v1303_v19 = vadd.f32 %v1804_v30, %v2371_v35  ;;  %v1807_v47 = vadd.f32 %v1806_v43, %v1805_v34  ;;  %v1846_v48 = vpop.f32.mrb[27].mxu1 }
 0x130   : > { %v1847_v49 = vadd.f32 %v1846_v48, %v1845_v42 }
 0x131   : > { %v1679_v51 = vpack.c.bf16 %v1400_v46, %v1399_v44  ;;  %v1368_v52 = vadd.f32 %v1844_v36, %v1303_v19  ;;  %v1306_v53 = vadd.f32 %v1807_v47, %v2373_v41 }
 0x133   : > { %1691 = vst [vmem:[%s2391_s15 + $0x8] sm:$0xff] %v1679_v51   ;;  %v1393_v54 = vadd.f32 %v2382_v39, %v1368_v52  ;;  %v1371_v60 = vadd.f32 %v1847_v49, %v1306_v53  ;;  %v1808_v62 = vpop.f32.mrb[28].mxu0 }
 0x134   : > { %v1848_v63 = vpop.f32.mrb[28].mxu1  ;;  %v1809_v0 = vpop.f32.mrb[29].mxu0 }
 0x135   : > { %v1394_v1 = vadd.f32 %v2382_v39, %v1371_v60  ;;  %v1810_v2 = vadd.f32 %v1809_v0, %v1808_v62  ;;  %v1849_v3 = vpop.f32.mrb[29].mxu1  ;;  %v1811_v35 = vpop.f32.mrb[30].mxu0  ;;  %v1401_v33 = vmax.f32 %v1393_v54, 0.0 }
 0x136   : > { %v1850_v4 = vadd.f32 %v1849_v3, %v1848_v63  ;;  %v1851_v5 = vpop.f32.mrb[30].mxu1  ;;  %v1812_v32 = vpop.f32.mrb[31].mxu0 }
 0x137   : > { %v1402_v37 = vmax.f32 %v1394_v1, 0.0  ;;  %v1311_v41 = vadd.f32 %v1810_v2, %v2375_v55  ;;  %v1813_v38 = vadd.f32 %v1812_v32, %v1811_v35  ;;  %v1852_v40 = vpop.f32.mrb[31].mxu1 }
 0x138   : > { %v1853_v45 = vadd.f32 %v1852_v40, %v1851_v5 }
 0x139   : > { %v1684_v50 = vpack.c.bf16 %v1402_v37, %v1401_v33  ;;  %v1376_v15 = vadd.f32 %v1850_v4, %v1311_v41  ;;  %v1314_v17 = vadd.f32 %v1813_v38, %v2377_v61 }
 0x13b   : > { %1692 = vst [vmem:[%s2391_s15 + $0x10] sm:$0xff] %v1684_v50   ;;  %v1395_v20 = vadd.f32 %v2382_v39, %v1376_v15  ;;  %v1379_v6 = vadd.f32 %v1853_v45, %v1314_v17 }
 0x13d   : > { %v1396_v7 = vadd.f32 %v2382_v39, %v1379_v6  ;;  %v1403_v57 = vmax.f32 %v1395_v20, 0.0 }
 0x13f   : > { %v1404_v21 = vmax.f32 %v1396_v7, 0.0 }
 0x141   : > { %v1689_v8 = vpack.c.bf16 %v1404_v21, %v1403_v57 }
 0x143   : > { %1693 = vst [vmem:[%s2391_s15 + $0x18] sm:$0xff] %v1689_v8  }
 0x144 PF: > { %s15_s20 = sadd.s32 1, %s1995_s20   ;;  %s2423_s18 = smov %s1991_s19 }
 0x145   : > { %p12_p5 = scmp.ge.s32.totalorder %s15_s20, 4   ;;  %s2424_s19 = smov %s2426_s21 }
 0x147   :  { %14 = sbr.rel (!%p12_p5) target bundleno = 2 (0x2), region = 73 }

// kernel: audio_location_forward.7
= control target key start
LH: loop header
LB: loop body
LE: loop exit
PB: predicated region body
PF: predicated region fallthrough
CT: control target
= control target key end

     0   :  { %s1971_s18 = smov 0   ;;  %s1973_s19 = smov 0   ;;  %s2417_s0 = inlined_call_operand.vmem [shape: bf16[2,24,512], index: 0, kind: input, shape index: {}, may-alias: {0,1}]   ;;  %s2418_s1 = inlined_call_operand.vmem [shape: bf16[2,24,512], index: 1, kind: input, shape index: {}, may-alias: {0,1}]   ;;  %s2419_s2 = inlined_call_operand.vmem [shape: bf16[512,256], index: 2, kind: input, shape index: {}]   ;;  %s2420_s3 = inlined_call_operand.vmem [shape: bf16[512,256], index: 3, kind: input, shape index: {}]   ;;  %s2421_s4 = inlined_call_operand.vmem [shape: f32[1,256], index: 4, kind: input, shape index: {}]   ;;  %s2422_s5 = inlined_call_operand.vmem [shape: bf16[2,16,256], index: 5, kind: output, shape index: {}]  }
   0x1   :  { %s1975_s20 = smov 0  }
   0x2 LB: > { %s27_s21 = sadd.s32 1, %s1935_s19  ;;  %p1526_p0 = scmp.ge.s32.totalorder %s1939_s20, 1  ;;  %s1939_s20 = sphi %s1975_s20, %s15_s20   ;;  %s1935_s19 = sphi %s1973_s19, %s2424_s19   ;;  %s1931_s18 = sphi %s1971_s18, %s2423_s18  }
   0x3   : > { %p29_p1 = scmp.ge.s32.totalorder %s27_s21, 2  ;;  %p243_p2 = scmp.lt.s32.totalorder %s1939_s20, 3 }
   0x5   : > { %s2426_s21 = smov (%p29_p1, %s27_s21), 0  ;;  %p244_p3 = pnand %p1526_p0, %p243_p2 }
   0x6   : > { %v1715_v0 = vld [vmem:[%s2420_s3 + $0x4] ss:$8 sps:$4 sm:$0xff] (!%p244_p3)   ;;  %p303_p4 = scmp.lt.s32.totalorder (!%p244_p3), %s1931_s18, 1  ;;  %v1719_v2 = vld [vmem:[%s2420_s3] ss:$8 sps:$4 sm:$0xff] (!%p244_p3)  }
   0x7   : > { %247 = sbr.rel (%p244_p3) target bundleno = 360 (0x168), region = 40  ;;  %v1717_v1 = vld [vmem:[%s2419_s2 + $0x4] ss:$8 sps:$4 sm:$0xff] (!%p244_p3)   ;;  %879 = vmatprep.subr.bf16.mxu1 (!%p244_p3), %v1715_v0  ;;  %v1720_v3 = vld [vmem:[%s2419_s2] ss:$8 sps:$4 sm:$0xff] (!%p244_p3)  }
   0x8   : > { %1285 = vmatprep.subr.bf16.mxu0 (!%p244_p3), %v1717_v1  ;;  %v1721_v4 = vld [vmem:[%s2420_s3 + $0x14] ss:$8 sps:$4 sm:$0xff] (!%p244_p3)   ;;  %880 = vmatpush1.bf16.msra.mxu1 (!%p244_p3), %v1719_v2  ;;  %v1725_v6 = vld [vmem:[%s2420_s3 + $0x10] ss:$8 sps:$4 sm:$0xff] (!%p244_p3)   ;;  %v1727_v8 = vld [vmem:[%s2420_s3 + $0x24] ss:$8 sps:$4 sm:$0xff] (!%p244_p3)  }
   0x9   : > { %1286 = vmatpush1.bf16.msra.mxu0 (!%p244_p3), %v1720_v3  ;;  %v1723_v5 = vld [vmem:[%s2419_s2 + $0x14] ss:$8 sps:$4 sm:$0xff] (!%p244_p3)   ;;  %881 = vmatprep.subr.bf16.mxu1 (!%p244_p3), %v1721_v4  ;;  %v1726_v7 = vld [vmem:[%s2419_s2 + $0x10] ss:$8 sps:$4 sm:$0xff] (!%p244_p3)   ;;  %v1729_v9 = vld [vmem:[%s2419_s2 + $0x24] ss:$8 sps:$4 sm:$0xff] (!%p244_p3)  }
   0xa   : > { %1287 = vmatprep.subr.bf16.mxu0 (!%p244_p3), %v1723_v5  ;;  %v1731_v10 = vld [vmem:[%s2420_s3 + $0x20] ss:$8 sps:$4 sm:$0xff] (!%p244_p3)   ;;  %v1733_v12 = vld [vmem:[%s2420_s3 + $0x34] ss:$8 sps:$4 sm:$0xff] (!%p244_p3)   ;;  %v1737_v14 = vld [vmem:[%s2420_s3 + $0x30] ss:$8 sps:$4 sm:$0xff] (!%p244_p3)  }
   0xb   : > { %v1732_v11 = vld [vmem:[%s2419_s2 + $0x20] ss:$8 sps:$4 sm:$0xff] (!%p244_p3)   ;;  %v1735_v13 = vld [vmem:[%s2419_s2 + $0x34] ss:$8 sps:$4 sm:$0xff] (!%p244_p3)   ;;  %v1738_v15 = vld [vmem:[%s2419_s2 + $0x30] ss:$8 sps:$4 sm:$0xff] (!%p244_p3)  }
   0xc   : > { %882 = vmatpush1.bf16.msra.mxu1 (!%p244_p3), %v1725_v6  ;;  %v1739_v16 = vld [vmem:[%s2420_s3 + $0x44] ss:$8 sps:$4 sm:$0xff] (!%p244_p3)   ;;  %v1743_v18 = vld [vmem:[%s2420_s3 + $0x40] ss:$8 sps:$4 sm:$0xff] (!%p244_p3)   ;;  %v1745_v20 = vld [vmem:[%s2420_s3 + $0x54] ss:$8 sps:$4 sm:$0xff] (!%p244_p3)  }
   0xd   : > { %1288 = vmatpush1.bf16.msra.mxu0 (!%p244_p3), %v1726_v7  ;;  %883 = vmatprep.subr.bf16.mxu1 (!%p244_p3), %v1727_v8  ;;  %v1741_v17 = vld [vmem:[%s2419_s2 + $0x44] ss:$8 sps:$4 sm:$0xff] (!%p244_p3)   ;;  %v1744_v19 = vld [vmem:[%s2419_s2 + $0x40] ss:$8 sps:$4 sm:$0xff] (!%p244_p3)   ;;  %v1747_v21 = vld [vmem:[%s2419_s2 + $0x54] ss:$8 sps:$4 sm:$0xff] (!%p244_p3)  }
   0xe   : > { %s2428_s18 = smov (!%p303_p4, %s1931_s18), 1  ;;  %1289 = vmatprep.subr.bf16.mxu0 %v1729_v9  ;;  %v1749_v22 = vld [vmem:[%s2420_s3 + $0x50] ss:$8 sps:$4 sm:$0xff]   ;;  %v1751_v24 = vld [vmem:[%s2420_s3 + $0x64] ss:$8 sps:$4 sm:$0xff]  }
   0xf   : > { %v1750_v23 = vld [vmem:[%s2419_s2 + $0x50] ss:$8 sps:$4 sm:$0xff]   ;;  %v1753_v25 = vld [vmem:[%s2419_s2 + $0x64] ss:$8 sps:$4 sm:$0xff]   ;;  %v1755_v26 = vld [vmem:[%s2420_s3 + $0x60] ss:$8 sps:$4 sm:$0xff]  }
  0x10   : > { %884 = vmatpush1.bf16.msra.mxu1 %v1731_v10  ;;  %v1756_v27 = vld [vmem:[%s2419_s2 + $0x60] ss:$8 sps:$4 sm:$0xff]   ;;  %v1757_v28 = vld [vmem:[%s2420_s3 + $0x74] ss:$8 sps:$4 sm:$0xff]   ;;  %v1761_v30 = vld [vmem:[%s2420_s3 + $0x70] ss:$8 sps:$4 sm:$0xff]  }
  0x11   : > { %1290 = vmatpush1.bf16.msra.mxu0 %v1732_v11  ;;  %885 = vmatprep.subr.bf16.mxu1 %v1733_v12  ;;  %v1759_v29 = vld [vmem:[%s2419_s2 + $0x74] ss:$8 sps:$4 sm:$0xff]   ;;  %v1762_v31 = vld [vmem:[%s2419_s2 + $0x70] ss:$8 sps:$4 sm:$0xff]   ;;  %v1763_v32 = vld [vmem:[%s2420_s3 + $0x84] ss:$8 sps:$4 sm:$0xff]  }
  0x12   : > { %1291 = vmatprep.subr.bf16.mxu0 %v1735_v13  ;;  %v1765_v33 = vld [vmem:[%s2419_s2 + $0x84] ss:$8 sps:$4 sm:$0xff]   ;;  %v1767_v34 = vld [vmem:[%s2420_s3 + $0x80] ss:$8 sps:$4 sm:$0xff]   ;;  %v1769_v36 = vld [vmem:[%s2420_s3 + $0x94] ss:$8 sps:$4 sm:$0xff]  }
  0x13   : > { %v1768_v35 = vld [vmem:[%s2419_s2 + $0x80] ss:$8 sps:$4 sm:$0xff]   ;;  %v1771_v37 = vld [vmem:[%s2419_s2 + $0x94] ss:$8 sps:$4 sm:$0xff]   ;;  %s1688_s10 = smul.u32 48, %s2428_s18 }
  0x14   : > { %886 = vmatpush1.bf16.msra.mxu1 %v1737_v14  ;;  %v1773_v38 = vld [vmem:[%s2420_s3 + $0x90] ss:$8 sps:$4 sm:$0xff]   ;;  %v1775_v40 = vld [vmem:[%s2420_s3 + $0xa4] ss:$8 sps:$4 sm:$0xff]   ;;  %v1779_v42 = vld [vmem:[%s2420_s3 + $0xa0] ss:$8 sps:$4 sm:$0xff]  }
  0x15   : > { %1292 = vmatpush1.bf16.msra.mxu0 %v1738_v15  ;;  %887 = vmatprep.subr.bf16.mxu1 %v1739_v16  ;;  %v1774_v39 = vld [vmem:[%s2419_s2 + $0x90] ss:$8 sps:$4 sm:$0xff]   ;;  %v1777_v41 = vld [vmem:[%s2419_s2 + $0xa4] ss:$8 sps:$4 sm:$0xff]   ;;  %s1672_s23 = sadd.s32 32, %s1688_s10  ;;  %s2130_s7 = scalar_lea.vmem %s2417_s0, %s1688_s10 }
  0x16   : > { %1293 = vmatprep.subr.bf16.mxu0 %v1741_v17  ;;  %v1780_v43 = vld [vmem:[%s2419_s2 + $0xa0] ss:$8 sps:$4 sm:$0xff]   ;;  %v1781_v44 = vld [vmem:[%s2420_s3 + $0xb4] ss:$8 sps:$4 sm:$0xff]   ;;  %s2135_s11 = scalar_lea.vmem %s2418_s1, %s1672_s23  ;;  %v1785_v46 = vld [vmem:[%s2420_s3 + $0xb0] ss:$8 sps:$4 sm:$0xff]  }
  0x17   : > { %v1783_v45 = vld [vmem:[%s2419_s2 + $0xb4] ss:$8 sps:$4 sm:$0xff]   ;;  %v1786_v47 = vld [vmem:[%s2419_s2 + $0xb0] ss:$8 sps:$4 sm:$0xff]   ;;  %v346_v48 = vld [vmem:[%s2135_s11] sm:$0xff]  ;;  %s1673_s23 = sshll.u32 %s2428_s18, 4 }
  0x18   : > { %888 = vmatpush1.bf16.msra.mxu1 %v1743_v18  ;;  %v1811_v49 = vld [vmem:[%s2130_s7 + $0x4] ss:$16 sps:$4 sm:$0xff]   ;;  %v1536_v51 = vcombine.high %v346_v48, %v346_v48  ;;  %v1791_v55 = vld [vmem:[%s2420_s3 + $0xc0] ss:$8 sps:$4 sm:$0xff]   ;;  %vm506_vm0 = vsmask.f32 7424  ;;  %v1535_v4 = vcombine.low %v346_v48, %v346_v48  ;;  %s340_s26 = scalar_lea.vmem %s2422_s5, %s1673_s23 }
  0x19   : > { %1294 = vmatpush1.bf16.msra.mxu0 %v1744_v19  ;;  %889 = vmatprep.subr.bf16.mxu1 %v1745_v20  ;;  %v1787_v50 = vld [vmem:[%s2420_s3 + $0xc4] ss:$8 sps:$4 sm:$0xff]   ;;  %v520_v53 = vshrl.u32 %v1811_v49, 16  ;;  %v522_v54 = vshll.u32 %v1811_v49, 16  ;;  %v1792_v57 = vld [vmem:[%s2419_s2 + $0xc0] ss:$8 sps:$4 sm:$0xff]  }
  0x1a   : > { %1295 = vmatprep.subr.bf16.mxu0 %v1747_v21  ;;  %v1789_v52 = vld [vmem:[%s2419_s2 + $0xc4] ss:$8 sps:$4 sm:$0xff]   ;;  %v527_v56 = vshll.u32 %v1536_v51, 16  ;;  %1317 = vmatprep.mubr.bf16.mxu0 %v1811_v49  ;;  %v1793_v59 = vld [vmem:[%s2420_s3 + $0xd4] ss:$8 sps:$4 sm:$0xff]   ;;  %v515_v12 = vshll.u32 %v1535_v4, 16 }
  0x1b   : > { %v524_v58 = vrot.slane %v522_v54, 1  ;;  %v1820_v61 = vld [vmem:[%s2130_s7] ss:$16 sps:$4 sm:$0xff]   ;;  %v1795_v62 = vld [vmem:[%s2419_s2 + $0xd4] ss:$8 sps:$4 sm:$0xff]  }
  0x1c   : > { %890 = vmatpush1.bf16.msra.mxu1 %v1749_v22  ;;  %v529_v60 = vrot.slane %v527_v56, 1  ;;  %v1797_v0 = vld [vmem:[%s2420_s3 + $0xd0] ss:$8 sps:$4 sm:$0xff]   ;;  %v1799_v3 = vld [vmem:[%s2420_s3 + $0xe4] ss:$8 sps:$4 sm:$0xff]   ;;  %v510_v5 = vshll.u32 %v1820_v61, 16 }
  0x1d   : > { %1296 = vmatpush1.bf16.msra.mxu0 %v1750_v23  ;;  %891 = vmatprep.subr.bf16.mxu1 %v1751_v24  ;;  %v525_v63 = vor.u32 %v524_v58, %v520_v53  ;;  %v1798_v2 = vld [vmem:[%s2419_s2 + $0xd0] ss:$8 sps:$4 sm:$0xff]   ;;  %v1801_v6 = vld [vmem:[%s2419_s2 + $0xe4] ss:$8 sps:$4 sm:$0xff]   ;;  %v1803_v7 = vld [vmem:[%s2420_s3 + $0xe0] ss:$8 sps:$4 sm:$0xff]  }
  0x1e   : > { %1297 = vmatprep.subr.bf16.mxu0 %v1753_v25  ;;  %v1804_v8 = vld [vmem:[%s2419_s2 + $0xe0] ss:$8 sps:$4 sm:$0xff]   ;;  %v1805_v9 = vld [vmem:[%s2420_s3 + $0xf4] ss:$8 sps:$4 sm:$0xff]   ;;  %v508_v10 = vshrl.u32 %v1820_v61, 16  ;;  %v512_v11 = vrot.slane %v510_v5, 1 }
  0x1f   : > { %v530_v1 = vsel %vm506_vm0, %v525_v63, %v529_v60  ;;  %v1807_v13 = vld [vmem:[%s2419_s2 + $0xf4] ss:$8 sps:$4 sm:$0xff]   ;;  %v1809_v14 = vld [vmem:[%s2420_s3 + $0xf0] ss:$8 sps:$4 sm:$0xff]   ;;  %v1816_v16 = vld [vmem:[%s2420_s3 + $0x104] ss:$8 sps:$4 sm:$0xff]  }
  0x20   : > { %892 = vmatpush1.bf16.msra.mxu1 %v1755_v26  ;;  %911 = vmatprep.mubr.bf16.mxu1 %v530_v1  ;;  %v1810_v15 = vld [vmem:[%s2419_s2 + $0xf0] ss:$8 sps:$4 sm:$0xff]   ;;  %v513_v17 = vor.u32 %v512_v11, %v508_v10  ;;  %v517_v18 = vrot.slane %v515_v12, 1  ;;  %v1819_v19 = vld [vmem:[%s2419_s2 + $0x104] ss:$8 sps:$4 sm:$0xff]  }
  0x21   : > { %1298 = vmatpush1.bf16.msra.mxu0 %v1756_v27  ;;  %893 = vmatprep.subr.bf16.mxu1 %v1757_v28  ;;  %v1814_v20 = vld [vmem:[%s2420_s3 + $0x100] ss:$8 sps:$4 sm:$0xff]   ;;  %v1824_v23 = vld [vmem:[%s2420_s3 + $0x114] ss:$8 sps:$4 sm:$0xff]   ;;  %v1822_v25 = vld [vmem:[%s2420_s3 + $0x110] ss:$8 sps:$4 sm:$0xff]  }
  0x22   : > { %1299 = vmatprep.subr.bf16.mxu0 %v1759_v29  ;;  %v1817_v21 = vld [vmem:[%s2419_s2 + $0x100] ss:$8 sps:$4 sm:$0xff]   ;;  %v518_v22 = vsel %vm506_vm0, %v513_v17, %v517_v18  ;;  %v1827_v24 = vld [vmem:[%s2419_s2 + $0x114] ss:$8 sps:$4 sm:$0xff]   ;;  %v1825_v26 = vld [vmem:[%s2419_s2 + $0x110] ss:$8 sps:$4 sm:$0xff]  }
  0x23   : > { %v1830_v27 = vld [vmem:[%s2420_s3 + $0x124] ss:$8 sps:$4 sm:$0xff]   ;;  %v1828_v29 = vld [vmem:[%s2420_s3 + $0x120] ss:$8 sps:$4 sm:$0xff]   ;;  %v1860_v49 = vld [vmem:[%s2420_s3 + $0x174] ss:$8 sps:$4 sm:$0xff]  }
  0x24   : > { %894 = vmatpush1.bf16.msra.mxu1 %v1761_v30  ;;  %v1833_v28 = vld [vmem:[%s2419_s2 + $0x124] ss:$8 sps:$4 sm:$0xff]   ;;  %v1831_v30 = vld [vmem:[%s2419_s2 + $0x120] ss:$8 sps:$4 sm:$0xff]   ;;  %v1858_v56 = vld [vmem:[%s2420_s3 + $0x170] ss:$8 sps:$4 sm:$0xff]  }
  0x25   : > { %1300 = vmatpush1.bf16.msra.mxu0 %v1762_v31  ;;  %895 = vmatprep.subr.bf16.mxu1 %v1763_v32  ;;  %v1836_v31 = vld [vmem:[%s2420_s3 + $0x134] ss:$8 sps:$4 sm:$0xff]   ;;  %v1870_v12 = vld [vmem:[%s2420_s3 + $0x190] ss:$8 sps:$4 sm:$0xff]   ;;  %v1879_v17 = vld [vmem:[%s2419_s2 + $0x1a0] ss:$8 sps:$4 sm:$0xff]  }
  0x26   : > { %1301 = vmatprep.subr.bf16.mxu0 %v1765_v33  ;;  %v1839_v32 = vld [vmem:[%s2419_s2 + $0x134] ss:$8 sps:$4 sm:$0xff]   ;;  %v1834_v33 = vld [vmem:[%s2420_s3 + $0x130] ss:$8 sps:$4 sm:$0xff]  }
  0x27   : > { %v1912_v48 = vld [vmem:[%s2130_s7 + $0xc] ss:$16 sps:$4 sm:$0xff]  }
  0x28   : > { %896 = vmatpush1.bf16.msra.mxu1 %v1767_v34  ;;  %v1837_v34 = vld [vmem:[%s2419_s2 + $0x130] ss:$8 sps:$4 sm:$0xff]   ;;  %v544_v54 = vshrl.u32 %v1912_v48, 16  ;;  %v1875_v10 = vld [vmem:[%s2419_s2 + $0x194] ss:$8 sps:$4 sm:$0xff]  }
  0x29   : > { %1302 = vmatpush1.bf16.msra.mxu0 %v1768_v35  ;;  %897 = vmatprep.subr.bf16.mxu1 %v1769_v36  ;;  %v1842_v35 = vld [vmem:[%s2420_s3 + $0x144] ss:$8 sps:$4 sm:$0xff]   ;;  %v1884_v18 = vld [vmem:[%s2420_s3 + $0x1b4] ss:$8 sps:$4 sm:$0xff]  }
  0x2a   : > { %1303 = vmatprep.subr.bf16.mxu0 %v1771_v37  ;;  %v1845_v36 = vld [vmem:[%s2419_s2 + $0x144] ss:$8 sps:$4 sm:$0xff]   ;;  %v1840_v37 = vld [vmem:[%s2420_s3 + $0x140] ss:$8 sps:$4 sm:$0xff]  }
  0x2c   : > { %898 = vmatpush1.bf16.msra.mxu1 %v1773_v38  ;;  %v1843_v38 = vld [vmem:[%s2419_s2 + $0x140] ss:$8 sps:$4 sm:$0xff]  }
  0x2d   : > { %1304 = vmatpush1.bf16.msra.mxu0 %v1774_v39  ;;  %899 = vmatprep.subr.bf16.mxu1 %v1775_v40  ;;  %v1848_v39 = vld [vmem:[%s2420_s3 + $0x154] ss:$8 sps:$4 sm:$0xff]  }
  0x2e   : > { %1305 = vmatprep.subr.bf16.mxu0 %v1777_v41  ;;  %v1851_v40 = vld [vmem:[%s2419_s2 + $0x154] ss:$8 sps:$4 sm:$0xff]   ;;  %v1846_v41 = vld [vmem:[%s2420_s3 + $0x150] ss:$8 sps:$4 sm:$0xff]  }
  0x30   : > { %900 = vmatpush1.bf16.msra.mxu1 %v1779_v42  ;;  %v1849_v42 = vld [vmem:[%s2419_s2 + $0x150] ss:$8 sps:$4 sm:$0xff]  }
  0x31   : > { %1306 = vmatpush1.bf16.msra.mxu0 %v1780_v43  ;;  %901 = vmatprep.subr.bf16.mxu1 %v1781_v44  ;;  %v1854_v43 = vld [vmem:[%s2420_s3 + $0x164] ss:$8 sps:$4 sm:$0xff]  }
  0x32   : > { %1307 = vmatprep.subr.bf16.mxu0 %v1783_v45  ;;  %v1857_v44 = vld [vmem:[%s2419_s2 + $0x164] ss:$8 sps:$4 sm:$0xff]   ;;  %v1852_v45 = vld [vmem:[%s2420_s3 + $0x160] ss:$8 sps:$4 sm:$0xff]  }
  0x34   : > { %902 = vmatpush1.bf16.msra.mxu1 %v1785_v46  ;;  %v1855_v46 = vld [vmem:[%s2419_s2 + $0x160] ss:$8 sps:$4 sm:$0xff]  }
  0x35   : > { %1308 = vmatpush1.bf16.msra.mxu0 %v1786_v47  ;;  %903 = vmatprep.subr.bf16.mxu1 %v1787_v50  ;;  %v347_v47 = vld [vmem:[%s2135_s11 + $0x8] sm:$0xff]  ;;  %v1863_v50 = vld [vmem:[%s2419_s2 + $0x174] ss:$8 sps:$4 sm:$0xff]  }
  0x36   : > { %1309 = vmatprep.subr.bf16.mxu0 %v1789_v52  ;;  %v1538_v51 = vcombine.high %v347_v47, %v347_v47  ;;  %v2292_v52 = vld [vmem:[%s2130_s7 + $0x8] ss:$16 sps:$4 sm:$0xff]   ;;  %v1537_v53 = vcombine.low %v347_v47, %v347_v47 }
  0x37   : > { %v532_v58 = vshrl.u32 %v2292_v52, 16 }
  0x38   : > { %904 = vmatpush1.bf16.msra.mxu1 %v1791_v55  ;;  %v546_v55 = vshll.u32 %v1912_v48, 16  ;;  %v539_v60 = vshll.u32 %v1537_v53, 16 }
  0x39   : > { %1310 = vmatpush1.bf16.msra.mxu0 %v1792_v57  ;;  %905 = vmatprep.subr.bf16.mxu1 %v1793_v59  ;;  %v551_v57 = vshll.u32 %v1538_v51, 16  ;;  %v534_v59 = vshll.u32 %v2292_v52, 16 }
  0x3a   : > { %1311 = vmatprep.subr.bf16.mxu0 %v1795_v62  ;;  %v1866_v62 = vld [vmem:[%s2420_s3 + $0x184] ss:$8 sps:$4 sm:$0xff]   ;;  %v548_v63 = vrot.slane %v546_v55, 1 }
  0x3b   : > { %v553_v1 = vrot.slane %v551_v57, 1 }
  0x3c   : > { %906 = vmatpush1.bf16.msra.mxu1 %v1797_v0  ;;  %v1869_v0 = vld [vmem:[%s2419_s2 + $0x184] ss:$8 sps:$4 sm:$0xff]   ;;  %v549_v4 = vor.u32 %v548_v63, %v544_v54 }
  0x3d   : > { %1312 = vmatpush1.bf16.msra.mxu0 %v1798_v2  ;;  %907 = vmatprep.subr.bf16.mxu1 %v1799_v3  ;;  %v536_v2 = vrot.slane %v534_v59, 1  ;;  %v541_v3 = vrot.slane %v539_v60, 1 }
  0x3e   : > { %1313 = vmatprep.subr.bf16.mxu0 %v1801_v6  ;;  %v1864_v6 = vld [vmem:[%s2420_s3 + $0x180] ss:$8 sps:$4 sm:$0xff]  }
  0x3f   : > { %v537_v5 = vor.u32 %v536_v2, %v532_v58 }
  0x40   : > { %908 = vmatpush1.bf16.msra.mxu1 %v1803_v7  ;;  %v1867_v7 = vld [vmem:[%s2419_s2 + $0x180] ss:$8 sps:$4 sm:$0xff]  }
  0x41   : > { %1314 = vmatpush1.bf16.msra.mxu0 %v1804_v8  ;;  %909 = vmatprep.subr.bf16.mxu1 %v1805_v9  ;;  %v554_v8 = vsel %vm506_vm0, %v549_v4, %v553_v1  ;;  %v1872_v9 = vld [vmem:[%s2420_s3 + $0x194] ss:$8 sps:$4 sm:$0xff]   ;;  %v542_v11 = vsel %vm506_vm0, %v537_v5, %v541_v3 }
  0x42   : > { %1315 = vmatprep.subr.bf16.mxu0 %v1807_v13  ;;  %v1873_v13 = vld [vmem:[%s2419_s2 + $0x190] ss:$8 sps:$4 sm:$0xff]  }
  0x44   : > { %910 = vmatpush1.bf16.msra.mxu1 %v1809_v14  ;;  %v1878_v14 = vld [vmem:[%s2420_s3 + $0x1a4] ss:$8 sps:$4 sm:$0xff]  }
  0x45   : > { %1316 = vmatpush1.bf16.msra.mxu0 %v1810_v15  ;;  %922 = vmatprep.subr.bf16.mxu1 %v1816_v16  ;;  %v1881_v15 = vld [vmem:[%s2419_s2 + $0x1a4] ss:$8 sps:$4 sm:$0xff]   ;;  %v1876_v16 = vld [vmem:[%s2420_s3 + $0x1a0] ss:$8 sps:$4 sm:$0xff]  }
  0x46   : > { %1328 = vmatprep.subr.bf16.mxu0 %v1819_v19  ;;  %v1887_v19 = vld [vmem:[%s2419_s2 + $0x1b4] ss:$8 sps:$4 sm:$0xff]  }
  0x47   : > { %912 = vmatmul.mubr.bf16.vlgmr.msra.gmra.mrb[0].mxu1 %v518_v22  ;;  %v1890_v22 = vld [vmem:[%s2420_s3 + $0x1c4] ss:$8 sps:$4 sm:$0xff]  }
  0x48   : > { %1318 = vmatmul.mubr.bf16.vlgmr.msra.gmra.mrb[0].mxu0 %v1820_v61  ;;  %923 = vmatpush1.bf16.msra.mxu1 %v1814_v20  ;;  %v1861_v61 = vld [vmem:[%s2419_s2 + $0x170] ss:$8 sps:$4 sm:$0xff]  }
  0x49   : > { %1329 = vmatpush1.bf16.msra.mxu0 %v1817_v21  ;;  %924 = vmatprep.subr.bf16.mxu1 %v1824_v23  ;;  %v1882_v20 = vld [vmem:[%s2420_s3 + $0x1b0] ss:$8 sps:$4 sm:$0xff]   ;;  %v1893_v23 = vld [vmem:[%s2419_s2 + $0x1c4] ss:$8 sps:$4 sm:$0xff]  }
  0x4a   : > { %1330 = vmatprep.subr.bf16.mxu0 %v1827_v24  ;;  %1360 = vmatprep.mubr.bf16.mxu0 %v1912_v48  ;;  %v1885_v21 = vld [vmem:[%s2419_s2 + $0x1b0] ss:$8 sps:$4 sm:$0xff]   ;;  %v1888_v24 = vld [vmem:[%s2420_s3 + $0x1c0] ss:$8 sps:$4 sm:$0xff]  }
  0x4b   : > { %954 = vmatprep.mubr.bf16.mxu1 %v554_v8 }
  0x4c   : > { %925 = vmatpush1.bf16.msra.mxu1 %v1822_v25  ;;  %v1891_v25 = vld [vmem:[%s2419_s2 + $0x1c0] ss:$8 sps:$4 sm:$0xff]  }
  0x4d   : > { %1331 = vmatpush1.bf16.msra.mxu0 %v1825_v26  ;;  %926 = vmatprep.subr.bf16.mxu1 %v1830_v27  ;;  %v1896_v26 = vld [vmem:[%s2420_s3 + $0x1d4] ss:$8 sps:$4 sm:$0xff]  }
  0x4e   : > { %1332 = vmatprep.subr.bf16.mxu0 %v1833_v28  ;;  %v1899_v27 = vld [vmem:[%s2419_s2 + $0x1d4] ss:$8 sps:$4 sm:$0xff]   ;;  %v1894_v28 = vld [vmem:[%s2420_s3 + $0x1d0] ss:$8 sps:$4 sm:$0xff]  }
  0x50   : > { %927 = vmatpush1.bf16.msra.mxu1 %v1828_v29  ;;  %v1897_v29 = vld [vmem:[%s2419_s2 + $0x1d0] ss:$8 sps:$4 sm:$0xff]  }
  0x51   : > { %1333 = vmatpush1.bf16.msra.mxu0 %v1831_v30  ;;  %928 = vmatprep.subr.bf16.mxu1 %v1836_v31  ;;  %v1902_v30 = vld [vmem:[%s2420_s3 + $0x1e4] ss:$8 sps:$4 sm:$0xff]  }
  0x52   : > { %1334 = vmatprep.subr.bf16.mxu0 %v1839_v32  ;;  %v1905_v31 = vld [vmem:[%s2419_s2 + $0x1e4] ss:$8 sps:$4 sm:$0xff]   ;;  %v1900_v32 = vld [vmem:[%s2420_s3 + $0x1e0] ss:$8 sps:$4 sm:$0xff]  }
  0x54   : > { %929 = vmatpush1.bf16.msra.mxu1 %v1834_v33  ;;  %v1903_v33 = vld [vmem:[%s2419_s2 + $0x1e0] ss:$8 sps:$4 sm:$0xff]  }
  0x55   : > { %1335 = vmatpush1.bf16.msra.mxu0 %v1837_v34  ;;  %930 = vmatprep.subr.bf16.mxu1 %v1842_v35  ;;  %v1908_v34 = vld [vmem:[%s2420_s3 + $0x1f4] ss:$8 sps:$4 sm:$0xff]  }
  0x56   : > { %1336 = vmatprep.subr.bf16.mxu0 %v1845_v36  ;;  %v1911_v35 = vld [vmem:[%s2419_s2 + $0x1f4] ss:$8 sps:$4 sm:$0xff]   ;;  %v1906_v36 = vld [vmem:[%s2420_s3 + $0x1f0] ss:$8 sps:$4 sm:$0xff]  }
  0x58   : > { %931 = vmatpush1.bf16.msra.mxu1 %v1840_v37  ;;  %v1909_v37 = vld [vmem:[%s2419_s2 + $0x1f0] ss:$8 sps:$4 sm:$0xff]  }
  0x59   : > { %1337 = vmatpush1.bf16.msra.mxu0 %v1843_v38  ;;  %932 = vmatprep.subr.bf16.mxu1 %v1848_v39  ;;  %v1373_v38 = vlaneseq }
  0x5a   : > { %1338 = vmatprep.subr.bf16.mxu0 %v1851_v40 }
  0x5b   : > { %v1374_v39 = vshrl.u32 %v1373_v38, 7 }
  0x5c   : > { %933 = vmatpush1.bf16.msra.mxu1 %v1846_v41  ;;  %v1371_v41 = vld [vmem:[%s2421_s4] sm:$0x3] }
  0x5d   : > { %1339 = vmatpush1.bf16.msra.mxu0 %v1849_v42  ;;  %934 = vmatprep.subr.bf16.mxu1 %v1854_v43  ;;  %v1375_v40 = vsub.s32 0, %v1374_v39  ;;  %v1379_v42 = vsub.s32 1, %v1374_v39 }
  0x5e   : > { %1340 = vmatprep.subr.bf16.mxu0 %v1857_v44 }
  0x5f   : > { %v1376_v43 = vrot.slane %v1371_v41, %v1375_v40 }
  0x60   : > { %935 = vmatpush1.bf16.msra.mxu1 %v1852_v45 }
  0x61   : > { %1341 = vmatpush1.bf16.msra.mxu0 %v1855_v46  ;;  %936 = vmatprep.subr.bf16.mxu1 %v1860_v49  ;;  %v1380_v46 = vrot.slane %v1371_v41, %v1379_v42 }
  0x62   : > { %1342 = vmatprep.subr.bf16.mxu0 %v1863_v50 }
  0x64   : > { %937 = vmatpush1.bf16.msra.mxu1 %v1858_v56 }
  0x65   : > { %1343 = vmatpush1.bf16.msra.mxu0 %v1861_v61  ;;  %938 = vmatprep.subr.bf16.mxu1 %v1866_v62 }
  0x66   : > { %1344 = vmatprep.subr.bf16.mxu0 %v1869_v0 }
  0x68   : > { %939 = vmatpush1.bf16.msra.mxu1 %v1864_v6 }
  0x69   : > { %1345 = vmatpush1.bf16.msra.mxu0 %v1867_v7  ;;  %940 = vmatprep.subr.bf16.mxu1 %v1872_v9 }
  0x6a   : > { %1346 = vmatprep.subr.bf16.mxu0 %v1875_v10 }
  0x6c   : > { %941 = vmatpush1.bf16.msra.mxu1 %v1870_v12 }
  0x6d   : > { %1347 = vmatpush1.bf16.msra.mxu0 %v1873_v13  ;;  %942 = vmatprep.subr.bf16.mxu1 %v1878_v14 }
  0x6e   : > { %1348 = vmatprep.subr.bf16.mxu0 %v1881_v15 }
  0x70   : > { %943 = vmatpush1.bf16.msra.mxu1 %v1876_v16 }
  0x71   : > { %1349 = vmatpush1.bf16.msra.mxu0 %v1879_v17  ;;  %944 = vmatprep.subr.bf16.mxu1 %v1884_v18 }
  0x72   : > { %1350 = vmatprep.subr.bf16.mxu0 %v1887_v19 }
  0x74   : > { %945 = vmatpush1.bf16.msra.mxu1 %v1882_v20 }
  0x75   : > { %1351 = vmatpush1.bf16.msra.mxu0 %v1885_v21  ;;  %946 = vmatprep.subr.bf16.mxu1 %v1890_v22 }
  0x76   : > { %1352 = vmatprep.subr.bf16.mxu0 %v1893_v23 }
  0x78   : > { %947 = vmatpush1.bf16.msra.mxu1 %v1888_v24 }
  0x79   : > { %1353 = vmatpush1.bf16.msra.mxu0 %v1891_v25  ;;  %948 = vmatprep.subr.bf16.mxu1 %v1896_v26 }
  0x7a   : > { %1354 = vmatprep.subr.bf16.mxu0 %v1899_v27 }
  0x7c   : > { %949 = vmatpush1.bf16.msra.mxu1 %v1894_v28 }
  0x7d   : > { %1355 = vmatpush1.bf16.msra.mxu0 %v1897_v29  ;;  %950 = vmatprep.subr.bf16.mxu1 %v1902_v30 }
  0x7e   : > { %1356 = vmatprep.subr.bf16.mxu0 %v1905_v31 }
  0x80   : > { %951 = vmatpush1.bf16.msra.mxu1 %v1900_v32 }
  0x81   : > { %1357 = vmatpush1.bf16.msra.mxu0 %v1903_v33  ;;  %952 = vmatprep.subr.bf16.mxu1 %v1908_v34 }
  0x82   : > { %1358 = vmatprep.subr.bf16.mxu0 %v1911_v35 }
  0x84   : > { %953 = vmatpush1.bf16.msra.mxu1 %v1906_v36 }
  0x85   : > { %1359 = vmatpush1.bf16.msra.mxu0 %v1909_v37 }
  0x87   : > { %955 = vmatmul.mubr.bf16.vlgmr.msra.gmra.mrb[0].mxu1 %v542_v11 }
  0x88   : > { %1361 = vmatmul.mubr.bf16.vlgmr.msra.gmra.mrb[0].mxu0 %v2292_v52 }
 0x15a   : > { %v956_v44 = vpop.f32.mrb[0].mxu1 }
 0x15b   : > { %v1362_v45 = vpop.f32.mrb[0].mxu0  ;;  %v958_v48 = vpop.f32.mrb[1].mxu1 }
 0x15c   : > { %v1676_v47 = vadd.f32 %v1362_v45, %v956_v44  ;;  %v1364_v49 = vpop.f32.mrb[1].mxu0  ;;  %v960_v51 = vpop.f32.mrb[2].mxu1 }
 0x15d   : > { %v1677_v50 = vadd.f32 %v1364_v49, %v958_v48  ;;  %v1366_v53 = vpop.f32.mrb[2].mxu0  ;;  %v962_v55 = vpop.f32.mrb[3].mxu1 }
 0x15e   : > { %v1383_v52 = vadd.f32 %v1676_v47, %v1376_v43  ;;  %v1678_v54 = vadd.f32 %v1366_v53, %v960_v51  ;;  %v1368_v56 = vpop.f32.mrb[3].mxu0 }
 0x15f   : > { %v1384_v57 = vadd.f32 %v1677_v50, %v1380_v46  ;;  %v1679_v58 = vadd.f32 %v1368_v56, %v962_v55 }
 0x160   : > { %v1387_v59 = vmax.f32 %v1383_v52, 0.0  ;;  %v1385_v60 = vadd.f32 %v1678_v54, %v1376_v43 }
 0x161   : > { %v1388_v61 = vmax.f32 %v1384_v57, 0.0  ;;  %v1386_v62 = vadd.f32 %v1679_v58, %v1380_v46 }
 0x162   : > { %v1389_v63 = vmax.f32 %v1385_v60, 0.0 }
 0x163   : > { %v1674_v0 = vpack.c.bf16 %v1388_v61, %v1387_v59  ;;  %v1390_v1 = vmax.f32 %v1386_v62, 0.0 }
 0x165   : > { %1403 = vst [vmem:[%s340_s26] sm:$0xff] %v1674_v0  ;;  %v1675_v2 = vpack.c.bf16 %v1390_v1, %v1389_v63 }
 0x167   : > { %1404 = vst [vmem:[%s340_s26 + $0x8] sm:$0xff] %v1675_v2 }
 0x168 PF: > { %s15_s20 = sadd.s32 1, %s1939_s20   ;;  %s2423_s18 = smov %s1935_s19 }
 0x169   : > { %p12_p5 = scmp.ge.s32.totalorder %s15_s20, 4   ;;  %s2424_s19 = smov %s2426_s21 }
 0x16b   :  { %14 = sbr.rel (!%p12_p5) target bundleno = 2 (0x2), region = 73 }

// kernel: audio_location_forward.8
= control target key start
LH: loop header
LB: loop body
LE: loop exit
PB: predicated region body
PF: predicated region fallthrough
CT: control target
= control target key end

     0   :  { %s5740_s18 = smov 0   ;;  %s5742_s19 = smov 0   ;;  %s7475_s0 = inlined_call_operand.vmem [shape: bf16[2,16,1024], index: 0, kind: input, shape index: {}, may-alias: {0,1}]   ;;  %s7476_s1 = inlined_call_operand.vmem [shape: bf16[2,16,1024], index: 1, kind: input, shape index: {}, may-alias: {0,1}]   ;;  %s7477_s2 = inlined_call_operand.vmem [shape: bf16[1024,512], index: 2, kind: input, shape index: {}]   ;;  %s7478_s3 = inlined_call_operand.vmem [shape: bf16[1024,512], index: 3, kind: input, shape index: {}]   ;;  %s7479_s4 = inlined_call_operand.vmem [shape: f32[1,512], index: 4, kind: input, shape index: {}]   ;;  %s7480_s5 = inlined_call_operand.vmem [shape: bf16[2,8,512], index: 5, kind: output, shape index: {}]  }
   0x1   :  { %s5744_s20 = smov 0  }
   0x2 LB: > { %s27_s21 = sadd.s32 1, %s5704_s19  ;;  %p4332_p0 = scmp.ge.s32.totalorder %s5708_s20, 1  ;;  %s5708_s20 = sphi %s5744_s20, %s15_s20   ;;  %s5704_s19 = sphi %s5742_s19, %s7482_s19   ;;  %s5700_s18 = sphi %s5740_s18, %s7481_s18  }
   0x3   : > { %p29_p1 = scmp.ge.s32.totalorder %s27_s21, 2  ;;  %p227_p2 = scmp.lt.s32.totalorder %s5708_s20, 3 }
   0x5   : > { %s7484_s21 = smov (%p29_p1, %s27_s21), 0  ;;  %p228_p3 = pnand %p4332_p0, %p227_p2 }
   0x6   : > { %v4902_v0 = vld [vmem:[%s7478_s3 + $0x4] ss:$16 sps:$4 sm:$0xff] (!%p228_p3)   ;;  %v4906_v2 = vld [vmem:[%s7478_s3] ss:$16 sps:$4 sm:$0xff] (!%p228_p3)   ;;  %p273_p4 = scmp.lt.s32.totalorder (!%p228_p3), %s5700_s18, 1  ;;  %vm350_vm0 = vcmask (!%p228_p3), 1043456  }
   0x7   : > { %231 = sbr.rel (%p228_p3) target bundleno = 743 (0x2e7), region = 40  ;;  %v4904_v1 = vld [vmem:[%s7478_s3 + $0x204] ss:$16 sps:$4 sm:$0xff] (!%p228_p3)   ;;  %2231 = vmatprep.subr.bf16.mxu0 (!%p228_p3), %v4902_v0  ;;  %v4907_v3 = vld [vmem:[%s7478_s3 + $0x200] ss:$16 sps:$4 sm:$0xff] (!%p228_p3)  }
   0x8   : > { %2272 = vmatprep.subr.bf16.mxu1 (!%p228_p3), %v4904_v1  ;;  %v4908_v4 = vld [vmem:[%s7478_s3 + $0x24] ss:$16 sps:$4 sm:$0xff] (!%p228_p3)   ;;  %2232 = vmatpush1.bf16.msra.mxu0 (!%p228_p3), %v4906_v2  ;;  %v4912_v6 = vld [vmem:[%s7478_s3 + $0x20] ss:$16 sps:$4 sm:$0xff] (!%p228_p3)  }
   0x9   : > { %2273 = vmatpush1.bf16.msra.mxu1 (!%p228_p3), %v4907_v3  ;;  %v4910_v5 = vld [vmem:[%s7478_s3 + $0x224] ss:$16 sps:$4 sm:$0xff] (!%p228_p3)   ;;  %2233 = vmatprep.subr.bf16.mxu0 (!%p228_p3), %v4908_v4  ;;  %v4913_v7 = vld [vmem:[%s7478_s3 + $0x220] ss:$16 sps:$4 sm:$0xff] (!%p228_p3)  }
   0xa   : > { %2274 = vmatprep.subr.bf16.mxu1 (!%p228_p3), %v4910_v5  ;;  %v4914_v8 = vld [vmem:[%s7478_s3 + $0x44] ss:$16 sps:$4 sm:$0xff] (!%p228_p3)   ;;  %v4918_v10 = vld [vmem:[%s7478_s3 + $0x40] ss:$16 sps:$4 sm:$0xff] (!%p228_p3)  }
   0xb   : > { %v4916_v9 = vld [vmem:[%s7478_s3 + $0x244] ss:$16 sps:$4 sm:$0xff] (!%p228_p3)   ;;  %v4919_v11 = vld [vmem:[%s7478_s3 + $0x240] ss:$16 sps:$4 sm:$0xff] (!%p228_p3)  }
   0xc   : > { %2234 = vmatpush1.bf16.msra.mxu0 (!%p228_p3), %v4912_v6  ;;  %v4920_v12 = vld [vmem:[%s7478_s3 + $0x64] ss:$16 sps:$4 sm:$0xff] (!%p228_p3)   ;;  %v4924_v14 = vld [vmem:[%s7478_s3 + $0x60] ss:$16 sps:$4 sm:$0xff] (!%p228_p3)  }
   0xd   : > { %2275 = vmatpush1.bf16.msra.mxu1 (!%p228_p3), %v4913_v7  ;;  %2235 = vmatprep.subr.bf16.mxu0 (!%p228_p3), %v4914_v8  ;;  %v4922_v13 = vld [vmem:[%s7478_s3 + $0x264] ss:$16 sps:$4 sm:$0xff] (!%p228_p3)   ;;  %v4925_v15 = vld [vmem:[%s7478_s3 + $0x260] ss:$16 sps:$4 sm:$0xff] (!%p228_p3)  }
   0xe   : > { %2276 = vmatprep.subr.bf16.mxu1 %v4916_v9  ;;  %v4926_v16 = vld [vmem:[%s7478_s3 + $0x84] ss:$16 sps:$4 sm:$0xff]   ;;  %v4930_v18 = vld [vmem:[%s7478_s3 + $0x80] ss:$16 sps:$4 sm:$0xff]   ;;  %s7486_s18 = smov (!%p273_p4, %s5700_s18), 1 }
   0xf   : > { %v4928_v17 = vld [vmem:[%s7478_s3 + $0x284] ss:$16 sps:$4 sm:$0xff]   ;;  %v4931_v19 = vld [vmem:[%s7478_s3 + $0x280] ss:$16 sps:$4 sm:$0xff]   ;;  %s4871_s10 = sshll.u32 %s7486_s18, 6 }
  0x10   : > { %2236 = vmatpush1.bf16.msra.mxu0 %v4918_v10  ;;  %v4932_v20 = vld [vmem:[%s7478_s3 + $0xa4] ss:$16 sps:$4 sm:$0xff]   ;;  %v4936_v22 = vld [vmem:[%s7478_s3 + $0xa0] ss:$16 sps:$4 sm:$0xff]   ;;  %s4873_s23 = sadd.s32 32, %s4871_s10  ;;  %s5900_s30 = scalar_lea.vmem %s7475_s0, %s4871_s10 }
  0x11   : > { %2277 = vmatpush1.bf16.msra.mxu1 %v4919_v11  ;;  %2237 = vmatprep.subr.bf16.mxu0 %v4920_v12  ;;  %v4934_v21 = vld [vmem:[%s7478_s3 + $0x2a4] ss:$16 sps:$4 sm:$0xff]   ;;  %v4937_v23 = vld [vmem:[%s7478_s3 + $0x2a0] ss:$16 sps:$4 sm:$0xff]   ;;  %s5908_s11 = scalar_lea.vmem %s7476_s1, %s4873_s23  ;;  %v303_v51 = vld [vmem:[%s5900_s30 + $0x8] sm:$0xff]  ;;  %s4874_s10 = sshll.u32 %s7486_s18, 4 }
  0x12   : > { %2278 = vmatprep.subr.bf16.mxu1 %v4922_v13  ;;  %v4938_v24 = vld [vmem:[%s7478_s3 + $0xc4] ss:$16 sps:$4 sm:$0xff]   ;;  %v4942_v26 = vld [vmem:[%s7478_s3 + $0xc0] ss:$16 sps:$4 sm:$0xff]   ;;  %v307_v52 = vld [vmem:[%s5908_s11 + $0x8] sm:$0xff]  ;;  %v4342_v56 = vcombine.high %v303_v51, %v303_v51  ;;  %v4341_v2 = vcombine.low %v303_v51, %v303_v51 }
  0x13   : > { %v4940_v25 = vld [vmem:[%s7478_s3 + $0x2c4] ss:$16 sps:$4 sm:$0xff]   ;;  %v4943_v27 = vld [vmem:[%s7478_s3 + $0x2c0] ss:$16 sps:$4 sm:$0xff]   ;;  %v4350_v57 = vcombine.high %v307_v52, %v307_v52  ;;  %v4349_v3 = vcombine.low %v307_v52, %v307_v52 }
  0x14   : > { %2238 = vmatpush1.bf16.msra.mxu0 %v4924_v14  ;;  %v4944_v28 = vld [vmem:[%s7478_s3 + $0xe4] ss:$16 sps:$4 sm:$0xff]   ;;  %v4948_v30 = vld [vmem:[%s7478_s3 + $0xe0] ss:$16 sps:$4 sm:$0xff]  }
  0x15   : > { %2279 = vmatpush1.bf16.msra.mxu1 %v4925_v15  ;;  %2239 = vmatprep.subr.bf16.mxu0 %v4926_v16  ;;  %v4946_v29 = vld [vmem:[%s7478_s3 + $0x2e4] ss:$16 sps:$4 sm:$0xff]   ;;  %v4949_v31 = vld [vmem:[%s7478_s3 + $0x2e0] ss:$16 sps:$4 sm:$0xff]   ;;  %v5938_v0 = vsel %vm350_vm0, %v4342_v56, %v4350_v57  ;;  %v5968_v16 = vsel %vm350_vm0, %v4341_v2, %v4349_v3  ;;  %v6099_v2 = vld [vmem:[%s5900_s30 + $0x18] sm:$0xff] }
  0x16   : > { %2280 = vmatprep.subr.bf16.mxu1 %v4928_v17  ;;  %v4950_v32 = vld [vmem:[%s7478_s3 + $0x104] ss:$16 sps:$4 sm:$0xff]   ;;  %v4954_v34 = vld [vmem:[%s7478_s3 + $0x100] ss:$16 sps:$4 sm:$0xff]   ;;  %v913_v4 = vshrl.u32 %v5938_v0, 16  ;;  %v915_v5 = vshll.u32 %v5938_v0, 16 }
  0x17   : > { %v4952_v33 = vld [vmem:[%s7478_s3 + $0x304] ss:$16 sps:$4 sm:$0xff]   ;;  %v4955_v35 = vld [vmem:[%s7478_s3 + $0x300] ss:$16 sps:$4 sm:$0xff]   ;;  %v6102_v3 = vld [vmem:[%s5908_s11 + $0x18] sm:$0xff] }
  0x18   : > { %2240 = vmatpush1.bf16.msra.mxu0 %v4930_v18  ;;  %v4956_v36 = vld [vmem:[%s7478_s3 + $0x124] ss:$16 sps:$4 sm:$0xff]   ;;  %v4960_v38 = vld [vmem:[%s7478_s3 + $0x120] ss:$16 sps:$4 sm:$0xff]   ;;  %v917_v9 = vrot.slane %v915_v5, 1 }
  0x19   : > { %2281 = vmatpush1.bf16.msra.mxu1 %v4931_v19  ;;  %2241 = vmatprep.subr.bf16.mxu0 %v4932_v20  ;;  %v4958_v37 = vld [vmem:[%s7478_s3 + $0x324] ss:$16 sps:$4 sm:$0xff]   ;;  %v4961_v39 = vld [vmem:[%s7478_s3 + $0x320] ss:$16 sps:$4 sm:$0xff]   ;;  %v909_v20 = vshll.u32 %v5968_v16, 16 }
  0x1a   : > { %2282 = vmatprep.subr.bf16.mxu1 %v4934_v21  ;;  %v4962_v40 = vld [vmem:[%s7478_s3 + $0x144] ss:$16 sps:$4 sm:$0xff]   ;;  %v4966_v42 = vld [vmem:[%s7478_s3 + $0x140] ss:$16 sps:$4 sm:$0xff]   ;;  %v5962_v14 = vor.u32 %v917_v9, %v913_v4 }
  0x1b   : > { %v4964_v41 = vld [vmem:[%s7478_s3 + $0x344] ss:$16 sps:$4 sm:$0xff]   ;;  %v4967_v43 = vld [vmem:[%s7478_s3 + $0x340] ss:$16 sps:$4 sm:$0xff]  }
  0x1c   : > { %2242 = vmatpush1.bf16.msra.mxu0 %v4936_v22  ;;  %v4968_v44 = vld [vmem:[%s7478_s3 + $0x164] ss:$16 sps:$4 sm:$0xff]   ;;  %v4972_v46 = vld [vmem:[%s7478_s3 + $0x160] ss:$16 sps:$4 sm:$0xff]   ;;  %2304 = vmatprep.mubr.bf16.mxu1 %v5962_v14 }
  0x1d   : > { %2283 = vmatpush1.bf16.msra.mxu1 %v4937_v23  ;;  %2243 = vmatprep.subr.bf16.mxu0 %v4938_v24  ;;  %v4970_v45 = vld [vmem:[%s7478_s3 + $0x364] ss:$16 sps:$4 sm:$0xff]   ;;  %v4973_v47 = vld [vmem:[%s7478_s3 + $0x360] ss:$16 sps:$4 sm:$0xff]  }
  0x1e   : > { %2284 = vmatprep.subr.bf16.mxu1 %v4940_v25  ;;  %v302_v48 = vld [vmem:[%s5900_s30] sm:$0xff] }
  0x1f   : > { %v306_v49 = vld [vmem:[%s5908_s11] sm:$0xff]  ;;  %v4340_v50 = vcombine.high %v302_v48, %v302_v48  ;;  %v4339_v58 = vcombine.low %v302_v48, %v302_v48 }
  0x20   : > { %2244 = vmatpush1.bf16.msra.mxu0 %v4942_v26  ;;  %v4974_v53 = vld [vmem:[%s7478_s3 + $0x184] ss:$16 sps:$4 sm:$0xff]   ;;  %v4348_v54 = vcombine.high %v306_v49, %v306_v49  ;;  %v4978_v60 = vld [vmem:[%s7478_s3 + $0x180] ss:$16 sps:$4 sm:$0xff]   ;;  %v4347_v61 = vcombine.low %v306_v49, %v306_v49 }
  0x21   : > { %2285 = vmatpush1.bf16.msra.mxu1 %v4943_v27  ;;  %2245 = vmatprep.subr.bf16.mxu0 %v4944_v28  ;;  %v4976_v55 = vld [vmem:[%s7478_s3 + $0x384] ss:$16 sps:$4 sm:$0xff]   ;;  %v4979_v1 = vld [vmem:[%s7478_s3 + $0x380] ss:$16 sps:$4 sm:$0xff]   ;;  %v907_v27 = vshrl.u32 %v5968_v16, 16  ;;  %v911_v28 = vrot.slane %v909_v20, 1 }
  0x22   : > { %2286 = vmatprep.subr.bf16.mxu1 %v4946_v29  ;;  %v5930_v59 = vsel %vm350_vm0, %v4340_v50, %v4348_v54  ;;  %v4980_v6 = vld [vmem:[%s7478_s3 + $0x1a4] ss:$16 sps:$4 sm:$0xff]   ;;  %v4984_v10 = vld [vmem:[%s7478_s3 + $0x1a0] ss:$16 sps:$4 sm:$0xff]   ;;  %v5965_v15 = vsel %vm350_vm0, %v4339_v58, %v4347_v61 }
  0x23   : > { %v901_v62 = vshrl.u32 %v5930_v59, 16  ;;  %v903_v63 = vshll.u32 %v5930_v59, 16  ;;  %v4982_v7 = vld [vmem:[%s7478_s3 + $0x3a4] ss:$16 sps:$4 sm:$0xff]   ;;  %v4985_v12 = vld [vmem:[%s7478_s3 + $0x3a0] ss:$16 sps:$4 sm:$0xff]  }
  0x24   : > { %2246 = vmatpush1.bf16.msra.mxu0 %v4948_v30  ;;  %v4986_v13 = vld [vmem:[%s7478_s3 + $0x1c4] ss:$16 sps:$4 sm:$0xff]   ;;  %v4990_v18 = vld [vmem:[%s7478_s3 + $0x1c0] ss:$16 sps:$4 sm:$0xff]   ;;  %v897_v19 = vshll.u32 %v5965_v15, 16  ;;  %v895_v25 = vshrl.u32 %v5965_v15, 16 }
  0x25   : > { %2287 = vmatpush1.bf16.msra.mxu1 %v4949_v31  ;;  %2247 = vmatprep.subr.bf16.mxu0 %v4950_v32  ;;  %v905_v8 = vrot.slane %v903_v63, 1  ;;  %v4988_v17 = vld [vmem:[%s7478_s3 + $0x3c4] ss:$16 sps:$4 sm:$0xff]   ;;  %v4991_v21 = vld [vmem:[%s7478_s3 + $0x3c0] ss:$16 sps:$4 sm:$0xff]  }
  0x26   : > { %2288 = vmatprep.subr.bf16.mxu1 %v4952_v33  ;;  %v4992_v22 = vld [vmem:[%s7478_s3 + $0x1e4] ss:$16 sps:$4 sm:$0xff]   ;;  %v4996_v24 = vld [vmem:[%s7478_s3 + $0x1e0] ss:$16 sps:$4 sm:$0xff]   ;;  %v899_v26 = vrot.slane %v897_v19, 1  ;;  %v6005_v33 = vor.u32 %v911_v28, %v907_v27 }
  0x27   : > { %v5954_v11 = vor.u32 %v905_v8, %v901_v62  ;;  %v4994_v23 = vld [vmem:[%s7478_s3 + $0x3e4] ss:$16 sps:$4 sm:$0xff]   ;;  %v4997_v29 = vld [vmem:[%s7478_s3 + $0x3e0] ss:$16 sps:$4 sm:$0xff]  }
  0x28   : > { %2248 = vmatpush1.bf16.msra.mxu0 %v4954_v34  ;;  %v5008_v30 = vld [vmem:[%s7478_s3 + $0x404] ss:$16 sps:$4 sm:$0xff]   ;;  %v6003_v32 = vor.u32 %v899_v26, %v895_v25  ;;  %v5006_v34 = vld [vmem:[%s7478_s3 + $0x400] ss:$16 sps:$4 sm:$0xff]  }
  0x29   : > { %2289 = vmatpush1.bf16.msra.mxu1 %v4955_v35  ;;  %2249 = vmatprep.subr.bf16.mxu0 %v4956_v36  ;;  %v5011_v31 = vld [vmem:[%s7478_s3 + $0x604] ss:$16 sps:$4 sm:$0xff]   ;;  %v5009_v35 = vld [vmem:[%s7478_s3 + $0x600] ss:$16 sps:$4 sm:$0xff]  }
  0x2a   : > { %2290 = vmatprep.subr.bf16.mxu1 %v4958_v37  ;;  %2263 = vmatprep.mubr.bf16.mxu0 %v5954_v11  ;;  %v5014_v36 = vld [vmem:[%s7478_s3 + $0x424] ss:$16 sps:$4 sm:$0xff]   ;;  %v5030_v50 = vld [vmem:[%s7478_s3 + $0x480] ss:$16 sps:$4 sm:$0xff]  }
  0x2b   : > { %v5017_v37 = vld [vmem:[%s7478_s3 + $0x624] ss:$16 sps:$4 sm:$0xff]   ;;  %v5033_v51 = vld [vmem:[%s7478_s3 + $0x680] ss:$16 sps:$4 sm:$0xff]  }
  0x2c   : > { %2250 = vmatpush1.bf16.msra.mxu0 %v4960_v38  ;;  %v5012_v38 = vld [vmem:[%s7478_s3 + $0x420] ss:$16 sps:$4 sm:$0xff]   ;;  %v5032_v48 = vld [vmem:[%s7478_s3 + $0x484] ss:$16 sps:$4 sm:$0xff]  }
  0x2d   : > { %2291 = vmatpush1.bf16.msra.mxu1 %v4961_v39  ;;  %2251 = vmatprep.subr.bf16.mxu0 %v4962_v40  ;;  %v5015_v39 = vld [vmem:[%s7478_s3 + $0x620] ss:$16 sps:$4 sm:$0xff]   ;;  %v5020_v40 = vld [vmem:[%s7478_s3 + $0x444] ss:$16 sps:$4 sm:$0xff]  }
  0x2e   : > { %2292 = vmatprep.subr.bf16.mxu1 %v4964_v41  ;;  %v5023_v41 = vld [vmem:[%s7478_s3 + $0x644] ss:$16 sps:$4 sm:$0xff]   ;;  %v5036_v54 = vld [vmem:[%s7478_s3 + $0x4a0] ss:$16 sps:$4 sm:$0xff]  }
  0x2f   : > { %v5035_v49 = vld [vmem:[%s7478_s3 + $0x684] ss:$16 sps:$4 sm:$0xff]   ;;  %v5042_v58 = vld [vmem:[%s7478_s3 + $0x4c0] ss:$16 sps:$4 sm:$0xff]  }
  0x30   : > { %2252 = vmatpush1.bf16.msra.mxu0 %v4966_v42  ;;  %v5018_v42 = vld [vmem:[%s7478_s3 + $0x440] ss:$16 sps:$4 sm:$0xff]   ;;  %v5038_v52 = vld [vmem:[%s7478_s3 + $0x4a4] ss:$16 sps:$4 sm:$0xff]  }
  0x31   : > { %2293 = vmatpush1.bf16.msra.mxu1 %v4967_v43  ;;  %2253 = vmatprep.subr.bf16.mxu0 %v4968_v44  ;;  %v5021_v43 = vld [vmem:[%s7478_s3 + $0x640] ss:$16 sps:$4 sm:$0xff]   ;;  %v5026_v44 = vld [vmem:[%s7478_s3 + $0x464] ss:$16 sps:$4 sm:$0xff]  }
  0x32   : > { %2294 = vmatprep.subr.bf16.mxu1 %v4970_v45  ;;  %v5029_v45 = vld [vmem:[%s7478_s3 + $0x664] ss:$16 sps:$4 sm:$0xff]   ;;  %v5048_v8 = vld [vmem:[%s7478_s3 + $0x4e0] ss:$16 sps:$4 sm:$0xff]  }
  0x33   : > { %v5044_v56 = vld [vmem:[%s7478_s3 + $0x4c4] ss:$16 sps:$4 sm:$0xff]   ;;  %v5051_v9 = vld [vmem:[%s7478_s3 + $0x6e0] ss:$16 sps:$4 sm:$0xff]  }
  0x34   : > { %2254 = vmatpush1.bf16.msra.mxu0 %v4972_v46  ;;  %v5024_v46 = vld [vmem:[%s7478_s3 + $0x460] ss:$16 sps:$4 sm:$0xff]   ;;  %v5047_v57 = vld [vmem:[%s7478_s3 + $0x6c4] ss:$16 sps:$4 sm:$0xff]  }
  0x35   : > { %2295 = vmatpush1.bf16.msra.mxu1 %v4973_v47  ;;  %2255 = vmatprep.subr.bf16.mxu0 %v4974_v53  ;;  %v5027_v47 = vld [vmem:[%s7478_s3 + $0x660] ss:$16 sps:$4 sm:$0xff]   ;;  %v5041_v53 = vld [vmem:[%s7478_s3 + $0x6a4] ss:$16 sps:$4 sm:$0xff]  }
  0x36   : > { %2296 = vmatprep.subr.bf16.mxu1 %v4976_v55  ;;  %v5039_v55 = vld [vmem:[%s7478_s3 + $0x6a0] ss:$16 sps:$4 sm:$0xff]   ;;  %v5050_v61 = vld [vmem:[%s7478_s3 + $0x4e4] ss:$16 sps:$4 sm:$0xff]  }
  0x37   : > { %v6091_v62 = vld [vmem:[%s5900_s30 + $0x10] sm:$0xff]  ;;  %s7460_s30 = scalar_lea.vmem %s7480_s5, %s4874_s10 }
  0x38   : > { %2256 = vmatpush1.bf16.msra.mxu0 %v4978_v60  ;;  %v5045_v60 = vld [vmem:[%s7478_s3 + $0x6c0] ss:$16 sps:$4 sm:$0xff]   ;;  %v5053_v4 = vld [vmem:[%s7478_s3 + $0x6e4] ss:$16 sps:$4 sm:$0xff]  }
  0x39   : > { %2297 = vmatpush1.bf16.msra.mxu1 %v4979_v1  ;;  %2257 = vmatprep.subr.bf16.mxu0 %v4980_v6  ;;  %v6094_v63 = vld [vmem:[%s5908_s11 + $0x10] sm:$0xff]  ;;  %v4344_v1 = vcombine.high %v6091_v62, %v6091_v62  ;;  %v4346_v6 = vcombine.high %v6099_v2, %v6099_v2 }
  0x3a   : > { %2298 = vmatprep.subr.bf16.mxu1 %v4982_v7  ;;  %v4352_v5 = vcombine.high %v6094_v63, %v6094_v63  ;;  %v4354_v7 = vcombine.high %v6102_v3, %v6102_v3  ;;  %v5059_v19 = vld [vmem:[%s7478_s3 + $0x704] ss:$16 sps:$4 sm:$0xff]   ;;  %v5057_v25 = vld [vmem:[%s7478_s3 + $0x700] ss:$16 sps:$4 sm:$0xff]  }
  0x3b   : > { %v5062_v27 = vld [vmem:[%s7478_s3 + $0x524] ss:$16 sps:$4 sm:$0xff]  }
  0x3c   : > { %2258 = vmatpush1.bf16.msra.mxu0 %v4984_v10  ;;  %v6120_v10 = vsel %vm350_vm0, %v4344_v1, %v4352_v5  ;;  %v5065_v28 = vld [vmem:[%s7478_s3 + $0x724] ss:$16 sps:$4 sm:$0xff]  }
  0x3d   : > { %2299 = vmatpush1.bf16.msra.mxu1 %v4985_v12  ;;  %2259 = vmatprep.subr.bf16.mxu0 %v4986_v13  ;;  %v5056_v12 = vld [vmem:[%s7478_s3 + $0x504] ss:$16 sps:$4 sm:$0xff]   ;;  %v925_v13 = vshrl.u32 %v6120_v10, 16 }
  0x3e   : > { %2300 = vmatprep.subr.bf16.mxu1 %v4988_v17  ;;  %v927_v17 = vshll.u32 %v6120_v10, 16  ;;  %v5101_v1 = vld [vmem:[%s7478_s3 + $0x7e4] ss:$16 sps:$4 sm:$0xff]  }
  0x40   : > { %2260 = vmatpush1.bf16.msra.mxu0 %v4990_v18  ;;  %v6128_v18 = vsel %vm350_vm0, %v4346_v6, %v4354_v7  ;;  %v5096_v6 = vld [vmem:[%s7478_s3 + $0x5e0] ss:$16 sps:$4 sm:$0xff]  }
  0x41   : > { %2301 = vmatpush1.bf16.msra.mxu1 %v4991_v21  ;;  %2261 = vmatprep.subr.bf16.mxu0 %v4992_v22  ;;  %v937_v20 = vshrl.u32 %v6128_v18, 16  ;;  %v939_v21 = vshll.u32 %v6128_v18, 16  ;;  %v929_v22 = vrot.slane %v927_v17, 1  ;;  %v5099_v7 = vld [vmem:[%s7478_s3 + $0x7e0] ss:$16 sps:$4 sm:$0xff]  }
  0x42   : > { %2302 = vmatprep.subr.bf16.mxu1 %v4994_v23  ;;  %v5110_v17 = vld [vmem:[%s7478_s3 + $0x8] ss:$16 sps:$4 sm:$0xff]  }
  0x43   : > { %v941_v23 = vrot.slane %v939_v21, 1  ;;  %v6141_v26 = vor.u32 %v929_v22, %v925_v13  ;;  %v5121_v21 = vld [vmem:[%s7478_s3 + $0x22c] ss:$16 sps:$4 sm:$0xff]   ;;  %v5116_v22 = vld [vmem:[%s7478_s3 + $0x28] ss:$16 sps:$4 sm:$0xff]  }
  0x44   : > { %2262 = vmatpush1.bf16.msra.mxu0 %v4996_v24  ;;  %v5054_v24 = vld [vmem:[%s7478_s3 + $0x500] ss:$16 sps:$4 sm:$0xff]  }
  0x45   : > { %2303 = vmatpush1.bf16.msra.mxu1 %v4997_v29  ;;  %2313 = vmatprep.subr.bf16.mxu0 %v5008_v30  ;;  %v6149_v29 = vor.u32 %v941_v23, %v937_v20  ;;  %v5060_v30 = vld [vmem:[%s7478_s3 + $0x520] ss:$16 sps:$4 sm:$0xff]   ;;  %v5118_v20 = vld [vmem:[%s7478_s3 + $0x2c] ss:$16 sps:$4 sm:$0xff]   ;;  %v5119_v23 = vld [vmem:[%s7478_s3 + $0x228] ss:$16 sps:$4 sm:$0xff]  }
  0x46   : > { %2354 = vmatprep.subr.bf16.mxu1 %v5011_v31  ;;  %v5063_v31 = vld [vmem:[%s7478_s3 + $0x720] ss:$16 sps:$4 sm:$0xff]  }
  0x47   : > { %2264 = vmatmul.mubr.bf16.vlgmr.msra.gmra.mrb[0].mxu0 %v6003_v32 }
  0x48   : > { %2305 = vmatmul.mubr.bf16.vlgmr.msra.gmra.mrb[0].mxu1 %v6005_v33  ;;  %2314 = vmatpush1.bf16.msra.mxu0 %v5006_v34  ;;  %v5068_v34 = vld [vmem:[%s7478_s3 + $0x544] ss:$16 sps:$4 sm:$0xff]  }
  0x49   : > { %2355 = vmatpush1.bf16.msra.mxu1 %v5009_v35  ;;  %2315 = vmatprep.subr.bf16.mxu0 %v5014_v36  ;;  %v5071_v35 = vld [vmem:[%s7478_s3 + $0x744] ss:$16 sps:$4 sm:$0xff]   ;;  %v5066_v36 = vld [vmem:[%s7478_s3 + $0x540] ss:$16 sps:$4 sm:$0xff]  }
  0x4a   : > { %2356 = vmatprep.subr.bf16.mxu1 %v5017_v37  ;;  %2345 = vmatprep.mubr.bf16.mxu0 %v6141_v26  ;;  %v5069_v37 = vld [vmem:[%s7478_s3 + $0x740] ss:$16 sps:$4 sm:$0xff]  }
  0x4b   : > { %2386 = vmatprep.mubr.bf16.mxu1 %v6149_v29 }
  0x4c   : > { %2316 = vmatpush1.bf16.msra.mxu0 %v5012_v38  ;;  %v5074_v38 = vld [vmem:[%s7478_s3 + $0x564] ss:$16 sps:$4 sm:$0xff]  }
  0x4d   : > { %2357 = vmatpush1.bf16.msra.mxu1 %v5015_v39  ;;  %2317 = vmatprep.subr.bf16.mxu0 %v5020_v40  ;;  %v5077_v39 = vld [vmem:[%s7478_s3 + $0x764] ss:$16 sps:$4 sm:$0xff]   ;;  %v5072_v40 = vld [vmem:[%s7478_s3 + $0x560] ss:$16 sps:$4 sm:$0xff]  }
  0x4e   : > { %2358 = vmatprep.subr.bf16.mxu1 %v5023_v41  ;;  %v5075_v41 = vld [vmem:[%s7478_s3 + $0x760] ss:$16 sps:$4 sm:$0xff]  }
  0x50   : > { %2318 = vmatpush1.bf16.msra.mxu0 %v5018_v42  ;;  %v5080_v42 = vld [vmem:[%s7478_s3 + $0x584] ss:$16 sps:$4 sm:$0xff]  }
  0x51   : > { %2359 = vmatpush1.bf16.msra.mxu1 %v5021_v43  ;;  %2319 = vmatprep.subr.bf16.mxu0 %v5026_v44  ;;  %v5083_v43 = vld [vmem:[%s7478_s3 + $0x784] ss:$16 sps:$4 sm:$0xff]   ;;  %v4343_v44 = vcombine.low %v6091_v62, %v6091_v62  ;;  %v5093_v62 = vld [vmem:[%s7478_s3 + $0x7c0] ss:$16 sps:$4 sm:$0xff]  }
  0x52   : > { %2360 = vmatprep.subr.bf16.mxu1 %v5029_v45  ;;  %v5078_v45 = vld [vmem:[%s7478_s3 + $0x580] ss:$16 sps:$4 sm:$0xff]  }
  0x54   : > { %2320 = vmatpush1.bf16.msra.mxu0 %v5024_v46  ;;  %v5081_v46 = vld [vmem:[%s7478_s3 + $0x780] ss:$16 sps:$4 sm:$0xff]  }
  0x55   : > { %2361 = vmatpush1.bf16.msra.mxu1 %v5027_v47  ;;  %2321 = vmatprep.subr.bf16.mxu0 %v5032_v48  ;;  %v4351_v47 = vcombine.low %v6094_v63, %v6094_v63  ;;  %v4345_v48 = vcombine.low %v6099_v2, %v6099_v2  ;;  %v5098_v63 = vld [vmem:[%s7478_s3 + $0x5e4] ss:$16 sps:$4 sm:$0xff]  }
  0x56   : > { %2362 = vmatprep.subr.bf16.mxu1 %v5035_v49  ;;  %v4353_v49 = vcombine.low %v6102_v3, %v6102_v3 }
  0x58   : > { %2322 = vmatpush1.bf16.msra.mxu0 %v5030_v50  ;;  %v5086_v50 = vld [vmem:[%s7478_s3 + $0x5a4] ss:$16 sps:$4 sm:$0xff]  }
  0x59   : > { %2363 = vmatpush1.bf16.msra.mxu1 %v5033_v51  ;;  %2323 = vmatprep.subr.bf16.mxu0 %v5038_v52  ;;  %v5089_v51 = vld [vmem:[%s7478_s3 + $0x7a4] ss:$16 sps:$4 sm:$0xff]   ;;  %v5084_v52 = vld [vmem:[%s7478_s3 + $0x5a0] ss:$16 sps:$4 sm:$0xff]  }
  0x5a   : > { %2364 = vmatprep.subr.bf16.mxu1 %v5041_v53  ;;  %v5087_v53 = vld [vmem:[%s7478_s3 + $0x7a0] ss:$16 sps:$4 sm:$0xff]  }
  0x5c   : > { %2324 = vmatpush1.bf16.msra.mxu0 %v5036_v54  ;;  %v6216_v54 = vsel %vm350_vm0, %v4343_v44, %v4351_v47  ;;  %v5146_v44 = vld [vmem:[%s7478_s3 + $0xc8] ss:$16 sps:$4 sm:$0xff]   ;;  %v5157_v47 = vld [vmem:[%s7478_s3 + $0x2ec] ss:$16 sps:$4 sm:$0xff]  }
  0x5d   : > { %2365 = vmatpush1.bf16.msra.mxu1 %v5039_v55  ;;  %2325 = vmatprep.subr.bf16.mxu0 %v5044_v56  ;;  %v6219_v55 = vsel %vm350_vm0, %v4345_v48, %v4353_v49  ;;  %v5092_v56 = vld [vmem:[%s7478_s3 + $0x5c4] ss:$16 sps:$4 sm:$0xff]   ;;  %v919_v2 = vshrl.u32 %v6216_v54, 16  ;;  %v5152_v48 = vld [vmem:[%s7478_s3 + $0xe8] ss:$16 sps:$4 sm:$0xff]  }
  0x5e   : > { %2366 = vmatprep.subr.bf16.mxu1 %v5047_v57  ;;  %v5095_v57 = vld [vmem:[%s7478_s3 + $0x7c4] ss:$16 sps:$4 sm:$0xff]   ;;  %v5155_v49 = vld [vmem:[%s7478_s3 + $0x2e8] ss:$16 sps:$4 sm:$0xff]  }
  0x60   : > { %2326 = vmatpush1.bf16.msra.mxu0 %v5042_v58  ;;  %v921_v58 = vshll.u32 %v6216_v54, 16 }
  0x61   : > { %2367 = vmatpush1.bf16.msra.mxu1 %v5045_v60  ;;  %2327 = vmatprep.subr.bf16.mxu0 %v5050_v61  ;;  %v933_v60 = vshll.u32 %v6219_v55, 16  ;;  %v5090_v61 = vld [vmem:[%s7478_s3 + $0x5c0] ss:$16 sps:$4 sm:$0xff]  }
  0x62   : > { %2368 = vmatprep.subr.bf16.mxu1 %v5053_v4  ;;  %v923_v3 = vrot.slane %v921_v58, 1  ;;  %v931_v4 = vshrl.u32 %v6219_v55, 16  ;;  %v5164_v58 = vld [vmem:[%s7478_s3 + $0x128] ss:$16 sps:$4 sm:$0xff]  }
  0x63   : > { %v935_v5 = vrot.slane %v933_v60, 1  ;;  %v5167_v60 = vld [vmem:[%s7478_s3 + $0x328] ss:$16 sps:$4 sm:$0xff]  }
  0x64   : > { %2328 = vmatpush1.bf16.msra.mxu0 %v5048_v8  ;;  %v5112_v8 = vld [vmem:[%s7478_s3 + $0xc] ss:$16 sps:$4 sm:$0xff]  }
  0x65   : > { %2369 = vmatpush1.bf16.msra.mxu1 %v5051_v9  ;;  %2329 = vmatprep.subr.bf16.mxu0 %v5056_v12  ;;  %v5115_v9 = vld [vmem:[%s7478_s3 + $0x20c] ss:$16 sps:$4 sm:$0xff]   ;;  %v6255_v12 = vor.u32 %v923_v3, %v919_v2  ;;  %v6257_v13 = vor.u32 %v935_v5, %v931_v4  ;;  %v5176_v4 = vld [vmem:[%s7478_s3 + $0x168] ss:$16 sps:$4 sm:$0xff]  }
  0x66   : > { %2370 = vmatprep.subr.bf16.mxu1 %v5059_v19  ;;  %v5113_v19 = vld [vmem:[%s7478_s3 + $0x208] ss:$16 sps:$4 sm:$0xff]   ;;  %v5178_v2 = vld [vmem:[%s7478_s3 + $0x16c] ss:$16 sps:$4 sm:$0xff]  }
  0x67   : > { %v5181_v3 = vld [vmem:[%s7478_s3 + $0x36c] ss:$16 sps:$4 sm:$0xff]   ;;  %v5179_v5 = vld [vmem:[%s7478_s3 + $0x368] ss:$16 sps:$4 sm:$0xff]  }
  0x68   : > { %2330 = vmatpush1.bf16.msra.mxu0 %v5054_v24  ;;  %v5124_v24 = vld [vmem:[%s7478_s3 + $0x4c] ss:$16 sps:$4 sm:$0xff]  }
  0x69   : > { %2371 = vmatpush1.bf16.msra.mxu1 %v5057_v25  ;;  %2331 = vmatprep.subr.bf16.mxu0 %v5062_v27  ;;  %v5127_v25 = vld [vmem:[%s7478_s3 + $0x24c] ss:$16 sps:$4 sm:$0xff]   ;;  %v5122_v27 = vld [vmem:[%s7478_s3 + $0x48] ss:$16 sps:$4 sm:$0xff]  }
  0x6a   : > { %2372 = vmatprep.subr.bf16.mxu1 %v5065_v28  ;;  %v5125_v28 = vld [vmem:[%s7478_s3 + $0x248] ss:$16 sps:$4 sm:$0xff]  }
  0x6c   : > { %2332 = vmatpush1.bf16.msra.mxu0 %v5060_v30  ;;  %v5130_v30 = vld [vmem:[%s7478_s3 + $0x6c] ss:$16 sps:$4 sm:$0xff]  }
  0x6d   : > { %2373 = vmatpush1.bf16.msra.mxu1 %v5063_v31  ;;  %2333 = vmatprep.subr.bf16.mxu0 %v5068_v34  ;;  %v5131_v31 = vld [vmem:[%s7478_s3 + $0x268] ss:$16 sps:$4 sm:$0xff]   ;;  %v5136_v34 = vld [vmem:[%s7478_s3 + $0x8c] ss:$16 sps:$4 sm:$0xff]  }
  0x6e   : > { %2374 = vmatprep.subr.bf16.mxu1 %v5071_v35  ;;  %v5139_v35 = vld [vmem:[%s7478_s3 + $0x28c] ss:$16 sps:$4 sm:$0xff]  }
  0x70   : > { %2334 = vmatpush1.bf16.msra.mxu0 %v5066_v36  ;;  %v5134_v36 = vld [vmem:[%s7478_s3 + $0x88] ss:$16 sps:$4 sm:$0xff]  }
  0x71   : > { %2375 = vmatpush1.bf16.msra.mxu1 %v5069_v37  ;;  %2335 = vmatprep.subr.bf16.mxu0 %v5074_v38  ;;  %v5137_v37 = vld [vmem:[%s7478_s3 + $0x288] ss:$16 sps:$4 sm:$0xff]   ;;  %v5142_v38 = vld [vmem:[%s7478_s3 + $0xac] ss:$16 sps:$4 sm:$0xff]  }
  0x72   : > { %2376 = vmatprep.subr.bf16.mxu1 %v5077_v39  ;;  %v5145_v39 = vld [vmem:[%s7478_s3 + $0x2ac] ss:$16 sps:$4 sm:$0xff]  }
  0x74   : > { %2336 = vmatpush1.bf16.msra.mxu0 %v5072_v40  ;;  %v5140_v40 = vld [vmem:[%s7478_s3 + $0xa8] ss:$16 sps:$4 sm:$0xff]  }
  0x75   : > { %2377 = vmatpush1.bf16.msra.mxu1 %v5075_v41  ;;  %2337 = vmatprep.subr.bf16.mxu0 %v5080_v42  ;;  %v5143_v41 = vld [vmem:[%s7478_s3 + $0x2a8] ss:$16 sps:$4 sm:$0xff]   ;;  %v5148_v42 = vld [vmem:[%s7478_s3 + $0xcc] ss:$16 sps:$4 sm:$0xff]  }
  0x76   : > { %2378 = vmatprep.subr.bf16.mxu1 %v5083_v43  ;;  %v5151_v43 = vld [vmem:[%s7478_s3 + $0x2cc] ss:$16 sps:$4 sm:$0xff]  }
  0x78   : > { %2338 = vmatpush1.bf16.msra.mxu0 %v5078_v45  ;;  %v5149_v45 = vld [vmem:[%s7478_s3 + $0x2c8] ss:$16 sps:$4 sm:$0xff]  }
  0x79   : > { %2379 = vmatpush1.bf16.msra.mxu1 %v5081_v46  ;;  %2339 = vmatprep.subr.bf16.mxu0 %v5086_v50  ;;  %v5154_v46 = vld [vmem:[%s7478_s3 + $0xec] ss:$16 sps:$4 sm:$0xff]  }
  0x7a   : > { %2380 = vmatprep.subr.bf16.mxu1 %v5089_v51  ;;  %v5160_v50 = vld [vmem:[%s7478_s3 + $0x10c] ss:$16 sps:$4 sm:$0xff]  }
  0x7b   : > { %v5163_v51 = vld [vmem:[%s7478_s3 + $0x30c] ss:$16 sps:$4 sm:$0xff]  }
  0x7c   : > { %2340 = vmatpush1.bf16.msra.mxu0 %v5084_v52  ;;  %v5158_v52 = vld [vmem:[%s7478_s3 + $0x108] ss:$16 sps:$4 sm:$0xff]  }
  0x7d   : > { %2381 = vmatpush1.bf16.msra.mxu1 %v5087_v53  ;;  %2341 = vmatprep.subr.bf16.mxu0 %v5092_v56  ;;  %v5161_v53 = vld [vmem:[%s7478_s3 + $0x308] ss:$16 sps:$4 sm:$0xff]   ;;  %v5166_v56 = vld [vmem:[%s7478_s3 + $0x12c] ss:$16 sps:$4 sm:$0xff]  }
  0x7e   : > { %2382 = vmatprep.subr.bf16.mxu1 %v5095_v57  ;;  %v5169_v57 = vld [vmem:[%s7478_s3 + $0x32c] ss:$16 sps:$4 sm:$0xff]  }
  0x80   : > { %2342 = vmatpush1.bf16.msra.mxu0 %v5090_v61  ;;  %v5172_v61 = vld [vmem:[%s7478_s3 + $0x14c] ss:$16 sps:$4 sm:$0xff]  }
  0x81   : > { %2383 = vmatpush1.bf16.msra.mxu1 %v5093_v62  ;;  %2343 = vmatprep.subr.bf16.mxu0 %v5098_v63  ;;  %v5175_v62 = vld [vmem:[%s7478_s3 + $0x34c] ss:$16 sps:$4 sm:$0xff]   ;;  %v5170_v63 = vld [vmem:[%s7478_s3 + $0x148] ss:$16 sps:$4 sm:$0xff]  }
  0x82   : > { %2384 = vmatprep.subr.bf16.mxu1 %v5101_v1  ;;  %v5173_v1 = vld [vmem:[%s7478_s3 + $0x348] ss:$16 sps:$4 sm:$0xff]  }
  0x84   : > { %2344 = vmatpush1.bf16.msra.mxu0 %v5096_v6  ;;  %v5184_v6 = vld [vmem:[%s7478_s3 + $0x18c] ss:$16 sps:$4 sm:$0xff]  }
  0x85   : > { %2385 = vmatpush1.bf16.msra.mxu1 %v5099_v7  ;;  %2395 = vmatprep.subr.bf16.mxu0 %v5112_v8  ;;  %v5187_v7 = vld [vmem:[%s7478_s3 + $0x38c] ss:$16 sps:$4 sm:$0xff]   ;;  %v5182_v8 = vld [vmem:[%s7478_s3 + $0x188] ss:$16 sps:$4 sm:$0xff]  }
  0x86   : > { %2436 = vmatprep.subr.bf16.mxu1 %v5115_v9  ;;  %v5185_v9 = vld [vmem:[%s7478_s3 + $0x388] ss:$16 sps:$4 sm:$0xff]  }
  0x87   : > { %2346 = vmatmul.mubr.bf16.vlgmr.msra.gmra.mrb[4].mxu0 %v6255_v12 }
  0x88   : > { %2387 = vmatmul.mubr.bf16.vlgmr.msra.gmra.mrb[4].mxu1 %v6257_v13  ;;  %2396 = vmatpush1.bf16.msra.mxu0 %v5110_v17  ;;  %v5190_v17 = vld [vmem:[%s7478_s3 + $0x1ac] ss:$16 sps:$4 sm:$0xff]  }
  0x89   : > { %2437 = vmatpush1.bf16.msra.mxu1 %v5113_v19  ;;  %2397 = vmatprep.subr.bf16.mxu0 %v5118_v20  ;;  %v5193_v19 = vld [vmem:[%s7478_s3 + $0x3ac] ss:$16 sps:$4 sm:$0xff]   ;;  %v5188_v20 = vld [vmem:[%s7478_s3 + $0x1a8] ss:$16 sps:$4 sm:$0xff]  }
  0x8a   : > { %2438 = vmatprep.subr.bf16.mxu1 %v5121_v21  ;;  %2427 = vmatprep.mubr.bf16.mxu0 %v5954_v11  ;;  %v5133_v11 = vld [vmem:[%s7478_s3 + $0x26c] ss:$16 sps:$4 sm:$0xff]   ;;  %v5191_v21 = vld [vmem:[%s7478_s3 + $0x3a8] ss:$16 sps:$4 sm:$0xff]  }
  0x8b   : > { %2468 = vmatprep.mubr.bf16.mxu1 %v5962_v14  ;;  %v5128_v14 = vld [vmem:[%s7478_s3 + $0x68] ss:$16 sps:$4 sm:$0xff]  }
  0x8c   : > { %2398 = vmatpush1.bf16.msra.mxu0 %v5116_v22  ;;  %v5196_v22 = vld [vmem:[%s7478_s3 + $0x1cc] ss:$16 sps:$4 sm:$0xff]  }
  0x8d   : > { %2439 = vmatpush1.bf16.msra.mxu1 %v5119_v23  ;;  %2399 = vmatprep.subr.bf16.mxu0 %v5124_v24  ;;  %v5199_v23 = vld [vmem:[%s7478_s3 + $0x3cc] ss:$16 sps:$4 sm:$0xff]   ;;  %v5194_v24 = vld [vmem:[%s7478_s3 + $0x1c8] ss:$16 sps:$4 sm:$0xff]  }
  0x8e   : > { %2440 = vmatprep.subr.bf16.mxu1 %v5127_v25  ;;  %v5197_v25 = vld [vmem:[%s7478_s3 + $0x3c8] ss:$16 sps:$4 sm:$0xff]  }
  0x90   : > { %2400 = vmatpush1.bf16.msra.mxu0 %v5122_v27  ;;  %v5202_v27 = vld [vmem:[%s7478_s3 + $0x1ec] ss:$16 sps:$4 sm:$0xff]  }
  0x91   : > { %2441 = vmatpush1.bf16.msra.mxu1 %v5125_v28  ;;  %2401 = vmatprep.subr.bf16.mxu0 %v5130_v30  ;;  %v5205_v28 = vld [vmem:[%s7478_s3 + $0x3ec] ss:$16 sps:$4 sm:$0xff]   ;;  %v5200_v30 = vld [vmem:[%s7478_s3 + $0x1e8] ss:$16 sps:$4 sm:$0xff]  }
  0x92   : > { %2442 = vmatprep.subr.bf16.mxu1 %v5133_v11  ;;  %v5203_v11 = vld [vmem:[%s7478_s3 + $0x3e8] ss:$16 sps:$4 sm:$0xff]  }
  0x94   : > { %2402 = vmatpush1.bf16.msra.mxu0 %v5128_v14  ;;  %v5208_v14 = vld [vmem:[%s7478_s3 + $0x40c] ss:$16 sps:$4 sm:$0xff]  }
  0x95   : > { %2443 = vmatpush1.bf16.msra.mxu1 %v5131_v31  ;;  %2403 = vmatprep.subr.bf16.mxu0 %v5136_v34  ;;  %v5211_v31 = vld [vmem:[%s7478_s3 + $0x60c] ss:$16 sps:$4 sm:$0xff]   ;;  %v5206_v34 = vld [vmem:[%s7478_s3 + $0x408] ss:$16 sps:$4 sm:$0xff]  }
  0x96   : > { %2444 = vmatprep.subr.bf16.mxu1 %v5139_v35  ;;  %v5209_v35 = vld [vmem:[%s7478_s3 + $0x608] ss:$16 sps:$4 sm:$0xff]  }
  0x98   : > { %2404 = vmatpush1.bf16.msra.mxu0 %v5134_v36  ;;  %v5214_v36 = vld [vmem:[%s7478_s3 + $0x42c] ss:$16 sps:$4 sm:$0xff]  }
  0x99   : > { %2445 = vmatpush1.bf16.msra.mxu1 %v5137_v37  ;;  %2405 = vmatprep.subr.bf16.mxu0 %v5142_v38  ;;  %v5217_v37 = vld [vmem:[%s7478_s3 + $0x62c] ss:$16 sps:$4 sm:$0xff]   ;;  %v5212_v38 = vld [vmem:[%s7478_s3 + $0x428] ss:$16 sps:$4 sm:$0xff]  }
  0x9a   : > { %2446 = vmatprep.subr.bf16.mxu1 %v5145_v39  ;;  %v5215_v39 = vld [vmem:[%s7478_s3 + $0x628] ss:$16 sps:$4 sm:$0xff]  }
  0x9c   : > { %2406 = vmatpush1.bf16.msra.mxu0 %v5140_v40  ;;  %v5220_v40 = vld [vmem:[%s7478_s3 + $0x44c] ss:$16 sps:$4 sm:$0xff]  }
  0x9d   : > { %2447 = vmatpush1.bf16.msra.mxu1 %v5143_v41  ;;  %2407 = vmatprep.subr.bf16.mxu0 %v5148_v42  ;;  %v5221_v41 = vld [vmem:[%s7478_s3 + $0x648] ss:$16 sps:$4 sm:$0xff]   ;;  %v5226_v42 = vld [vmem:[%s7478_s3 + $0x46c] ss:$16 sps:$4 sm:$0xff]  }
  0x9e   : > { %2448 = vmatprep.subr.bf16.mxu1 %v5151_v43  ;;  %v5227_v43 = vld [vmem:[%s7478_s3 + $0x668] ss:$16 sps:$4 sm:$0xff]  }
  0xa0   : > { %2408 = vmatpush1.bf16.msra.mxu0 %v5146_v44  ;;  %v5232_v44 = vld [vmem:[%s7478_s3 + $0x48c] ss:$16 sps:$4 sm:$0xff]  }
  0xa1   : > { %2449 = vmatpush1.bf16.msra.mxu1 %v5149_v45  ;;  %2409 = vmatprep.subr.bf16.mxu0 %v5154_v46  ;;  %v5235_v45 = vld [vmem:[%s7478_s3 + $0x68c] ss:$16 sps:$4 sm:$0xff]   ;;  %v5230_v46 = vld [vmem:[%s7478_s3 + $0x488] ss:$16 sps:$4 sm:$0xff]  }
  0xa2   : > { %2450 = vmatprep.subr.bf16.mxu1 %v5157_v47  ;;  %v5233_v47 = vld [vmem:[%s7478_s3 + $0x688] ss:$16 sps:$4 sm:$0xff]  }
  0xa4   : > { %2410 = vmatpush1.bf16.msra.mxu0 %v5152_v48  ;;  %v5238_v48 = vld [vmem:[%s7478_s3 + $0x4ac] ss:$16 sps:$4 sm:$0xff]  }
  0xa5   : > { %2451 = vmatpush1.bf16.msra.mxu1 %v5155_v49  ;;  %2411 = vmatprep.subr.bf16.mxu0 %v5160_v50  ;;  %v5241_v49 = vld [vmem:[%s7478_s3 + $0x6ac] ss:$16 sps:$4 sm:$0xff]   ;;  %v5236_v50 = vld [vmem:[%s7478_s3 + $0x4a8] ss:$16 sps:$4 sm:$0xff]  }
  0xa6   : > { %2452 = vmatprep.subr.bf16.mxu1 %v5163_v51  ;;  %v5239_v51 = vld [vmem:[%s7478_s3 + $0x6a8] ss:$16 sps:$4 sm:$0xff]  }
  0xa8   : > { %2412 = vmatpush1.bf16.msra.mxu0 %v5158_v52  ;;  %v5244_v52 = vld [vmem:[%s7478_s3 + $0x4cc] ss:$16 sps:$4 sm:$0xff]  }
  0xa9   : > { %2453 = vmatpush1.bf16.msra.mxu1 %v5161_v53  ;;  %2413 = vmatprep.subr.bf16.mxu0 %v5166_v56  ;;  %v5247_v53 = vld [vmem:[%s7478_s3 + $0x6cc] ss:$16 sps:$4 sm:$0xff]   ;;  %v5242_v56 = vld [vmem:[%s7478_s3 + $0x4c8] ss:$16 sps:$4 sm:$0xff]  }
  0xaa   : > { %2454 = vmatprep.subr.bf16.mxu1 %v5169_v57  ;;  %v5245_v57 = vld [vmem:[%s7478_s3 + $0x6c8] ss:$16 sps:$4 sm:$0xff]  }
  0xac   : > { %2414 = vmatpush1.bf16.msra.mxu0 %v5164_v58  ;;  %v5250_v58 = vld [vmem:[%s7478_s3 + $0x4ec] ss:$16 sps:$4 sm:$0xff]  }
  0xad   : > { %2455 = vmatpush1.bf16.msra.mxu1 %v5167_v60  ;;  %2415 = vmatprep.subr.bf16.mxu0 %v5172_v61  ;;  %v5253_v60 = vld [vmem:[%s7478_s3 + $0x6ec] ss:$16 sps:$4 sm:$0xff]   ;;  %v5248_v61 = vld [vmem:[%s7478_s3 + $0x4e8] ss:$16 sps:$4 sm:$0xff]  }
  0xae   : > { %2456 = vmatprep.subr.bf16.mxu1 %v5175_v62  ;;  %v5251_v62 = vld [vmem:[%s7478_s3 + $0x6e8] ss:$16 sps:$4 sm:$0xff]  }
  0xb0   : > { %2416 = vmatpush1.bf16.msra.mxu0 %v5170_v63  ;;  %v5256_v63 = vld [vmem:[%s7478_s3 + $0x50c] ss:$16 sps:$4 sm:$0xff]  }
  0xb1   : > { %2457 = vmatpush1.bf16.msra.mxu1 %v5173_v1  ;;  %2417 = vmatprep.subr.bf16.mxu0 %v5178_v2  ;;  %v5259_v1 = vld [vmem:[%s7478_s3 + $0x70c] ss:$16 sps:$4 sm:$0xff]   ;;  %v5254_v2 = vld [vmem:[%s7478_s3 + $0x508] ss:$16 sps:$4 sm:$0xff]  }
  0xb2   : > { %2458 = vmatprep.subr.bf16.mxu1 %v5181_v3  ;;  %v5257_v3 = vld [vmem:[%s7478_s3 + $0x708] ss:$16 sps:$4 sm:$0xff]  }
  0xb4   : > { %2418 = vmatpush1.bf16.msra.mxu0 %v5176_v4  ;;  %v5262_v4 = vld [vmem:[%s7478_s3 + $0x52c] ss:$16 sps:$4 sm:$0xff]  }
  0xb5   : > { %2459 = vmatpush1.bf16.msra.mxu1 %v5179_v5  ;;  %2419 = vmatprep.subr.bf16.mxu0 %v5184_v6  ;;  %v5265_v5 = vld [vmem:[%s7478_s3 + $0x72c] ss:$16 sps:$4 sm:$0xff]   ;;  %v5260_v6 = vld [vmem:[%s7478_s3 + $0x528] ss:$16 sps:$4 sm:$0xff]  }
  0xb6   : > { %2460 = vmatprep.subr.bf16.mxu1 %v5187_v7  ;;  %v5263_v7 = vld [vmem:[%s7478_s3 + $0x728] ss:$16 sps:$4 sm:$0xff]  }
  0xb8   : > { %2420 = vmatpush1.bf16.msra.mxu0 %v5182_v8  ;;  %v5268_v8 = vld [vmem:[%s7478_s3 + $0x54c] ss:$16 sps:$4 sm:$0xff]  }
  0xb9   : > { %2461 = vmatpush1.bf16.msra.mxu1 %v5185_v9  ;;  %2421 = vmatprep.subr.bf16.mxu0 %v5190_v17  ;;  %v5271_v9 = vld [vmem:[%s7478_s3 + $0x74c] ss:$16 sps:$4 sm:$0xff]   ;;  %v5266_v17 = vld [vmem:[%s7478_s3 + $0x548] ss:$16 sps:$4 sm:$0xff]  }
  0xba   : > { %2462 = vmatprep.subr.bf16.mxu1 %v5193_v19  ;;  %v5269_v19 = vld [vmem:[%s7478_s3 + $0x748] ss:$16 sps:$4 sm:$0xff]  }
  0xbc   : > { %2422 = vmatpush1.bf16.msra.mxu0 %v5188_v20  ;;  %v5274_v20 = vld [vmem:[%s7478_s3 + $0x56c] ss:$16 sps:$4 sm:$0xff]  }
  0xbd   : > { %2463 = vmatpush1.bf16.msra.mxu1 %v5191_v21  ;;  %2423 = vmatprep.subr.bf16.mxu0 %v5196_v22  ;;  %v5277_v21 = vld [vmem:[%s7478_s3 + $0x76c] ss:$16 sps:$4 sm:$0xff]   ;;  %v5272_v22 = vld [vmem:[%s7478_s3 + $0x568] ss:$16 sps:$4 sm:$0xff]  }
  0xbe   : > { %2464 = vmatprep.subr.bf16.mxu1 %v5199_v23  ;;  %v5275_v23 = vld [vmem:[%s7478_s3 + $0x768] ss:$16 sps:$4 sm:$0xff]  }
  0xc0   : > { %2424 = vmatpush1.bf16.msra.mxu0 %v5194_v24  ;;  %v5280_v24 = vld [vmem:[%s7478_s3 + $0x58c] ss:$16 sps:$4 sm:$0xff]  }
  0xc1   : > { %2465 = vmatpush1.bf16.msra.mxu1 %v5197_v25  ;;  %2425 = vmatprep.subr.bf16.mxu0 %v5202_v27  ;;  %v5283_v25 = vld [vmem:[%s7478_s3 + $0x78c] ss:$16 sps:$4 sm:$0xff]   ;;  %v5278_v27 = vld [vmem:[%s7478_s3 + $0x588] ss:$16 sps:$4 sm:$0xff]  }
  0xc2   : > { %2466 = vmatprep.subr.bf16.mxu1 %v5205_v28  ;;  %v5281_v28 = vld [vmem:[%s7478_s3 + $0x788] ss:$16 sps:$4 sm:$0xff]  }
  0xc4   : > { %2426 = vmatpush1.bf16.msra.mxu0 %v5200_v30  ;;  %v5286_v30 = vld [vmem:[%s7478_s3 + $0x5ac] ss:$16 sps:$4 sm:$0xff]  }
  0xc5   : > { %2467 = vmatpush1.bf16.msra.mxu1 %v5203_v11  ;;  %2477 = vmatprep.subr.bf16.mxu0 %v5208_v14  ;;  %v5289_v11 = vld [vmem:[%s7478_s3 + $0x7ac] ss:$16 sps:$4 sm:$0xff]   ;;  %v5284_v14 = vld [vmem:[%s7478_s3 + $0x5a8] ss:$16 sps:$4 sm:$0xff]  }
  0xc6   : > { %2518 = vmatprep.subr.bf16.mxu1 %v5211_v31  ;;  %v5287_v31 = vld [vmem:[%s7478_s3 + $0x7a8] ss:$16 sps:$4 sm:$0xff]  }
  0xc7   : > { %2428 = vmatmul.mubr.bf16.vlgmr.msra.gmra.mrb[8].mxu0 %v6003_v32  ;;  %v5223_v32 = vld [vmem:[%s7478_s3 + $0x64c] ss:$16 sps:$4 sm:$0xff]  }
  0xc8   : > { %2469 = vmatmul.mubr.bf16.vlgmr.msra.gmra.mrb[8].mxu1 %v6005_v33  ;;  %2478 = vmatpush1.bf16.msra.mxu0 %v5206_v34  ;;  %v5218_v33 = vld [vmem:[%s7478_s3 + $0x448] ss:$16 sps:$4 sm:$0xff]   ;;  %v5292_v34 = vld [vmem:[%s7478_s3 + $0x5cc] ss:$16 sps:$4 sm:$0xff]  }
  0xc9   : > { %2519 = vmatpush1.bf16.msra.mxu1 %v5209_v35  ;;  %2479 = vmatprep.subr.bf16.mxu0 %v5214_v36  ;;  %v5295_v35 = vld [vmem:[%s7478_s3 + $0x7cc] ss:$16 sps:$4 sm:$0xff]   ;;  %v5290_v36 = vld [vmem:[%s7478_s3 + $0x5c8] ss:$16 sps:$4 sm:$0xff]  }
  0xca   : > { %2520 = vmatprep.subr.bf16.mxu1 %v5217_v37  ;;  %2509 = vmatprep.mubr.bf16.mxu0 %v6141_v26  ;;  %v5229_v26 = vld [vmem:[%s7478_s3 + $0x66c] ss:$16 sps:$4 sm:$0xff]   ;;  %v5293_v37 = vld [vmem:[%s7478_s3 + $0x7c8] ss:$16 sps:$4 sm:$0xff]  }
  0xcb   : > { %2550 = vmatprep.mubr.bf16.mxu1 %v6149_v29  ;;  %v5224_v29 = vld [vmem:[%s7478_s3 + $0x468] ss:$16 sps:$4 sm:$0xff]  }
  0xcc   : > { %2480 = vmatpush1.bf16.msra.mxu0 %v5212_v38  ;;  %v5298_v38 = vld [vmem:[%s7478_s3 + $0x5ec] ss:$16 sps:$4 sm:$0xff]  }
  0xcd   : > { %2521 = vmatpush1.bf16.msra.mxu1 %v5215_v39  ;;  %2481 = vmatprep.subr.bf16.mxu0 %v5220_v40  ;;  %v5301_v39 = vld [vmem:[%s7478_s3 + $0x7ec] ss:$16 sps:$4 sm:$0xff]   ;;  %v5296_v40 = vld [vmem:[%s7478_s3 + $0x5e8] ss:$16 sps:$4 sm:$0xff]  }
  0xce   : > { %2522 = vmatprep.subr.bf16.mxu1 %v5223_v32  ;;  %v5299_v32 = vld [vmem:[%s7478_s3 + $0x7e8] ss:$16 sps:$4 sm:$0xff]  }
  0xd0   : > { %2482 = vmatpush1.bf16.msra.mxu0 %v5218_v33  ;;  %v5304_v33 = vld [vmem:[%s7477_s2 + $0x4] ss:$16 sps:$4 sm:$0xff]  }
  0xd1   : > { %2523 = vmatpush1.bf16.msra.mxu1 %v5221_v41  ;;  %2483 = vmatprep.subr.bf16.mxu0 %v5226_v42  ;;  %v5307_v41 = vld [vmem:[%s7477_s2 + $0x204] ss:$16 sps:$4 sm:$0xff]   ;;  %v5302_v42 = vld [vmem:[%s7477_s2] ss:$16 sps:$4 sm:$0xff]  }
  0xd2   : > { %2524 = vmatprep.subr.bf16.mxu1 %v5229_v26  ;;  %v5305_v26 = vld [vmem:[%s7477_s2 + $0x200] ss:$16 sps:$4 sm:$0xff]  }
  0xd4   : > { %2484 = vmatpush1.bf16.msra.mxu0 %v5224_v29  ;;  %v5310_v29 = vld [vmem:[%s7477_s2 + $0x24] ss:$16 sps:$4 sm:$0xff]  }
  0xd5   : > { %2525 = vmatpush1.bf16.msra.mxu1 %v5227_v43  ;;  %2485 = vmatprep.subr.bf16.mxu0 %v5232_v44  ;;  %v5313_v43 = vld [vmem:[%s7477_s2 + $0x224] ss:$16 sps:$4 sm:$0xff]   ;;  %v5308_v44 = vld [vmem:[%s7477_s2 + $0x20] ss:$16 sps:$4 sm:$0xff]  }
  0xd6   : > { %2526 = vmatprep.subr.bf16.mxu1 %v5235_v45  ;;  %v5311_v45 = vld [vmem:[%s7477_s2 + $0x220] ss:$16 sps:$4 sm:$0xff]  }
  0xd8   : > { %2486 = vmatpush1.bf16.msra.mxu0 %v5230_v46  ;;  %v5316_v46 = vld [vmem:[%s7477_s2 + $0x44] ss:$16 sps:$4 sm:$0xff]  }
  0xd9   : > { %2527 = vmatpush1.bf16.msra.mxu1 %v5233_v47  ;;  %2487 = vmatprep.subr.bf16.mxu0 %v5238_v48  ;;  %v5317_v47 = vld [vmem:[%s7477_s2 + $0x240] ss:$16 sps:$4 sm:$0xff]   ;;  %v5322_v48 = vld [vmem:[%s7477_s2 + $0x64] ss:$16 sps:$4 sm:$0xff]  }
  0xda   : > { %2528 = vmatprep.subr.bf16.mxu1 %v5241_v49  ;;  %v5325_v49 = vld [vmem:[%s7477_s2 + $0x264] ss:$16 sps:$4 sm:$0xff]  }
  0xdc   : > { %2488 = vmatpush1.bf16.msra.mxu0 %v5236_v50  ;;  %v5320_v50 = vld [vmem:[%s7477_s2 + $0x60] ss:$16 sps:$4 sm:$0xff]  }
  0xdd   : > { %2529 = vmatpush1.bf16.msra.mxu1 %v5239_v51  ;;  %2489 = vmatprep.subr.bf16.mxu0 %v5244_v52  ;;  %v5323_v51 = vld [vmem:[%s7477_s2 + $0x260] ss:$16 sps:$4 sm:$0xff]   ;;  %v5328_v52 = vld [vmem:[%s7477_s2 + $0x84] ss:$16 sps:$4 sm:$0xff]  }
  0xde   : > { %2530 = vmatprep.subr.bf16.mxu1 %v5247_v53  ;;  %v5331_v53 = vld [vmem:[%s7477_s2 + $0x284] ss:$16 sps:$4 sm:$0xff]  }
  0xe0   : > { %2490 = vmatpush1.bf16.msra.mxu0 %v5242_v56  ;;  %v5326_v56 = vld [vmem:[%s7477_s2 + $0x80] ss:$16 sps:$4 sm:$0xff]  }
  0xe1   : > { %2531 = vmatpush1.bf16.msra.mxu1 %v5245_v57  ;;  %2491 = vmatprep.subr.bf16.mxu0 %v5250_v58  ;;  %v5329_v57 = vld [vmem:[%s7477_s2 + $0x280] ss:$16 sps:$4 sm:$0xff]   ;;  %v5334_v58 = vld [vmem:[%s7477_s2 + $0xa4] ss:$16 sps:$4 sm:$0xff]  }
  0xe2   : > { %2532 = vmatprep.subr.bf16.mxu1 %v5253_v60  ;;  %v5337_v60 = vld [vmem:[%s7477_s2 + $0x2a4] ss:$16 sps:$4 sm:$0xff]  }
  0xe4   : > { %2492 = vmatpush1.bf16.msra.mxu0 %v5248_v61  ;;  %v5332_v61 = vld [vmem:[%s7477_s2 + $0xa0] ss:$16 sps:$4 sm:$0xff]  }
  0xe5   : > { %2533 = vmatpush1.bf16.msra.mxu1 %v5251_v62  ;;  %2493 = vmatprep.subr.bf16.mxu0 %v5256_v63  ;;  %v5335_v62 = vld [vmem:[%s7477_s2 + $0x2a0] ss:$16 sps:$4 sm:$0xff]   ;;  %v5340_v63 = vld [vmem:[%s7477_s2 + $0xc4] ss:$16 sps:$4 sm:$0xff]  }
  0xe6   : > { %2534 = vmatprep.subr.bf16.mxu1 %v5259_v1  ;;  %v5343_v1 = vld [vmem:[%s7477_s2 + $0x2c4] ss:$16 sps:$4 sm:$0xff]  }
  0xe8   : > { %2494 = vmatpush1.bf16.msra.mxu0 %v5254_v2 }
  0xe9   : > { %2535 = vmatpush1.bf16.msra.mxu1 %v5257_v3  ;;  %2495 = vmatprep.subr.bf16.mxu0 %v5262_v4  ;;  %v5338_v4 = vld [vmem:[%s7477_s2 + $0xc0] ss:$16 sps:$4 sm:$0xff]  }
  0xea   : > { %2536 = vmatprep.subr.bf16.mxu1 %v5265_v5  ;;  %v5341_v5 = vld [vmem:[%s7477_s2 + $0x2c0] ss:$16 sps:$4 sm:$0xff]  }
  0xec   : > { %2496 = vmatpush1.bf16.msra.mxu0 %v5260_v6 }
  0xed   : > { %2537 = vmatpush1.bf16.msra.mxu1 %v5263_v7  ;;  %2497 = vmatprep.subr.bf16.mxu0 %v5268_v8 }
  0xee   : > { %2538 = vmatprep.subr.bf16.mxu1 %v5271_v9 }
  0xf0   : > { %2498 = vmatpush1.bf16.msra.mxu0 %v5266_v17 }
  0xf1   : > { %2539 = vmatpush1.bf16.msra.mxu1 %v5269_v19  ;;  %2499 = vmatprep.subr.bf16.mxu0 %v5274_v20 }
  0xf2   : > { %2540 = vmatprep.subr.bf16.mxu1 %v5277_v21 }
  0xf4   : > { %2500 = vmatpush1.bf16.msra.mxu0 %v5272_v22  ;;  %v5346_v22 = vld [vmem:[%s7477_s2 + $0xe4] ss:$16 sps:$4 sm:$0xff]  }
  0xf5   : > { %2541 = vmatpush1.bf16.msra.mxu1 %v5275_v23  ;;  %2501 = vmatprep.subr.bf16.mxu0 %v5280_v24  ;;  %v5349_v23 = vld [vmem:[%s7477_s2 + $0x2e4] ss:$16 sps:$4 sm:$0xff]   ;;  %v5344_v24 = vld [vmem:[%s7477_s2 + $0xe0] ss:$16 sps:$4 sm:$0xff]  }
  0xf6   : > { %2542 = vmatprep.subr.bf16.mxu1 %v5283_v25  ;;  %v5347_v25 = vld [vmem:[%s7477_s2 + $0x2e0] ss:$16 sps:$4 sm:$0xff]  }
  0xf8   : > { %2502 = vmatpush1.bf16.msra.mxu0 %v5278_v27  ;;  %v5352_v27 = vld [vmem:[%s7477_s2 + $0x104] ss:$16 sps:$4 sm:$0xff]  }
  0xf9   : > { %2543 = vmatpush1.bf16.msra.mxu1 %v5281_v28  ;;  %2503 = vmatprep.subr.bf16.mxu0 %v5286_v30  ;;  %v5355_v28 = vld [vmem:[%s7477_s2 + $0x304] ss:$16 sps:$4 sm:$0xff]   ;;  %v5350_v30 = vld [vmem:[%s7477_s2 + $0x100] ss:$16 sps:$4 sm:$0xff]  }
  0xfa   : > { %2544 = vmatprep.subr.bf16.mxu1 %v5289_v11  ;;  %v5353_v11 = vld [vmem:[%s7477_s2 + $0x300] ss:$16 sps:$4 sm:$0xff]  }
  0xfc   : > { %2504 = vmatpush1.bf16.msra.mxu0 %v5284_v14  ;;  %v5358_v14 = vld [vmem:[%s7477_s2 + $0x124] ss:$16 sps:$4 sm:$0xff]  }
  0xfd   : > { %2545 = vmatpush1.bf16.msra.mxu1 %v5287_v31  ;;  %2505 = vmatprep.subr.bf16.mxu0 %v5292_v34  ;;  %v5361_v31 = vld [vmem:[%s7477_s2 + $0x324] ss:$16 sps:$4 sm:$0xff]   ;;  %v5356_v34 = vld [vmem:[%s7477_s2 + $0x120] ss:$16 sps:$4 sm:$0xff]  }
  0xfe   : > { %2546 = vmatprep.subr.bf16.mxu1 %v5295_v35  ;;  %v5359_v35 = vld [vmem:[%s7477_s2 + $0x320] ss:$16 sps:$4 sm:$0xff]  }
 0x100   : > { %2506 = vmatpush1.bf16.msra.mxu0 %v5290_v36  ;;  %v5364_v36 = vld [vmem:[%s7477_s2 + $0x144] ss:$16 sps:$4 sm:$0xff]  }
 0x101   : > { %2547 = vmatpush1.bf16.msra.mxu1 %v5293_v37  ;;  %2507 = vmatprep.subr.bf16.mxu0 %v5298_v38  ;;  %v5367_v37 = vld [vmem:[%s7477_s2 + $0x344] ss:$16 sps:$4 sm:$0xff]   ;;  %v5362_v38 = vld [vmem:[%s7477_s2 + $0x140] ss:$16 sps:$4 sm:$0xff]  }
 0x102   : > { %2548 = vmatprep.subr.bf16.mxu1 %v5301_v39  ;;  %v5365_v39 = vld [vmem:[%s7477_s2 + $0x340] ss:$16 sps:$4 sm:$0xff]  }
 0x104   : > { %2508 = vmatpush1.bf16.msra.mxu0 %v5296_v40  ;;  %v5370_v40 = vld [vmem:[%s7477_s2 + $0x164] ss:$16 sps:$4 sm:$0xff]  }
 0x105   : > { %2549 = vmatpush1.bf16.msra.mxu1 %v5299_v32  ;;  %3839 = vmatprep.subr.bf16.mxu0 %v5304_v33  ;;  %v5373_v32 = vld [vmem:[%s7477_s2 + $0x364] ss:$16 sps:$4 sm:$0xff]   ;;  %v5368_v33 = vld [vmem:[%s7477_s2 + $0x160] ss:$16 sps:$4 sm:$0xff]  }
 0x106   : > { %3880 = vmatprep.subr.bf16.mxu1 %v5307_v41  ;;  %v5371_v41 = vld [vmem:[%s7477_s2 + $0x360] ss:$16 sps:$4 sm:$0xff]  }
 0x107   : > { %2510 = vmatmul.mubr.bf16.vlgmr.msra.gmra.mrb[12].mxu0 %v6255_v12  ;;  %v5319_v12 = vld [vmem:[%s7477_s2 + $0x244] ss:$16 sps:$4 sm:$0xff]  }
 0x108   : > { %2551 = vmatmul.mubr.bf16.vlgmr.msra.gmra.mrb[12].mxu1 %v6257_v13  ;;  %3840 = vmatpush1.bf16.msra.mxu0 %v5302_v42  ;;  %v5314_v13 = vld [vmem:[%s7477_s2 + $0x40] ss:$16 sps:$4 sm:$0xff]   ;;  %v5376_v42 = vld [vmem:[%s7477_s2 + $0x184] ss:$16 sps:$4 sm:$0xff]  }
 0x109   : > { %3881 = vmatpush1.bf16.msra.mxu1 %v5305_v26  ;;  %3841 = vmatprep.subr.bf16.mxu0 %v5310_v29  ;;  %v5379_v26 = vld [vmem:[%s7477_s2 + $0x384] ss:$16 sps:$4 sm:$0xff]   ;;  %v5374_v29 = vld [vmem:[%s7477_s2 + $0x180] ss:$16 sps:$4 sm:$0xff]  }
 0x10a   : > { %3882 = vmatprep.subr.bf16.mxu1 %v5313_v43  ;;  %3871 = vmatprep.mubr.bf16.mxu0 %v5930_v59  ;;  %v5377_v43 = vld [vmem:[%s7477_s2 + $0x380] ss:$16 sps:$4 sm:$0xff]  }
 0x10b   : > { %3912 = vmatprep.mubr.bf16.mxu1 %v5938_v0 }
 0x10c   : > { %3842 = vmatpush1.bf16.msra.mxu0 %v5308_v44  ;;  %v5382_v44 = vld [vmem:[%s7477_s2 + $0x1a4] ss:$16 sps:$4 sm:$0xff]  }
 0x10d   : > { %3883 = vmatpush1.bf16.msra.mxu1 %v5311_v45  ;;  %3843 = vmatprep.subr.bf16.mxu0 %v5316_v46  ;;  %v5385_v45 = vld [vmem:[%s7477_s2 + $0x3a4] ss:$16 sps:$4 sm:$0xff]   ;;  %v5380_v46 = vld [vmem:[%s7477_s2 + $0x1a0] ss:$16 sps:$4 sm:$0xff]  }
 0x10e   : > { %3884 = vmatprep.subr.bf16.mxu1 %v5319_v12  ;;  %v5383_v12 = vld [vmem:[%s7477_s2 + $0x3a0] ss:$16 sps:$4 sm:$0xff]  }
 0x110   : > { %3844 = vmatpush1.bf16.msra.mxu0 %v5314_v13  ;;  %v5388_v13 = vld [vmem:[%s7477_s2 + $0x1c4] ss:$16 sps:$4 sm:$0xff]  }
 0x111   : > { %3885 = vmatpush1.bf16.msra.mxu1 %v5317_v47  ;;  %3845 = vmatprep.subr.bf16.mxu0 %v5322_v48  ;;  %v5391_v47 = vld [vmem:[%s7477_s2 + $0x3c4] ss:$16 sps:$4 sm:$0xff]   ;;  %v5386_v48 = vld [vmem:[%s7477_s2 + $0x1c0] ss:$16 sps:$4 sm:$0xff]  }
 0x112   : > { %3886 = vmatprep.subr.bf16.mxu1 %v5325_v49  ;;  %v5389_v49 = vld [vmem:[%s7477_s2 + $0x3c0] ss:$16 sps:$4 sm:$0xff]  }
 0x114   : > { %3846 = vmatpush1.bf16.msra.mxu0 %v5320_v50  ;;  %v5394_v50 = vld [vmem:[%s7477_s2 + $0x1e4] ss:$16 sps:$4 sm:$0xff]  }
 0x115   : > { %3887 = vmatpush1.bf16.msra.mxu1 %v5323_v51  ;;  %3847 = vmatprep.subr.bf16.mxu0 %v5328_v52  ;;  %v5397_v51 = vld [vmem:[%s7477_s2 + $0x3e4] ss:$16 sps:$4 sm:$0xff]   ;;  %v5392_v52 = vld [vmem:[%s7477_s2 + $0x1e0] ss:$16 sps:$4 sm:$0xff]  }
 0x116   : > { %3888 = vmatprep.subr.bf16.mxu1 %v5331_v53  ;;  %v5395_v53 = vld [vmem:[%s7477_s2 + $0x3e0] ss:$16 sps:$4 sm:$0xff]  }
 0x118   : > { %3848 = vmatpush1.bf16.msra.mxu0 %v5326_v56  ;;  %v5400_v56 = vld [vmem:[%s7477_s2 + $0x404] ss:$16 sps:$4 sm:$0xff]  }
 0x119   : > { %3889 = vmatpush1.bf16.msra.mxu1 %v5329_v57  ;;  %3849 = vmatprep.subr.bf16.mxu0 %v5334_v58  ;;  %v5403_v57 = vld [vmem:[%s7477_s2 + $0x604] ss:$16 sps:$4 sm:$0xff]   ;;  %v5398_v58 = vld [vmem:[%s7477_s2 + $0x400] ss:$16 sps:$4 sm:$0xff]  }
 0x11a   : > { %3890 = vmatprep.subr.bf16.mxu1 %v5337_v60  ;;  %v2265_v2 = vpop.f32.mrb[0].mxu0  ;;  %v5401_v60 = vld [vmem:[%s7477_s2 + $0x600] ss:$16 sps:$4 sm:$0xff]  }
 0x11b   : > { %v2306_v3 = vpop.f32.mrb[0].mxu1  ;;  %v2267_v7 = vpop.f32.mrb[1].mxu0 }
 0x11c   : > { %v6733_v6 = vadd.f32 %v2306_v3, %v2265_v2  ;;  %v2308_v8 = vpop.f32.mrb[1].mxu1  ;;  %v2269_v17 = vpop.f32.mrb[2].mxu0  ;;  %3850 = vmatpush1.bf16.msra.mxu0 %v5332_v61  ;;  %v5406_v61 = vld [vmem:[%s7477_s2 + $0x424] ss:$16 sps:$4 sm:$0xff]  }
 0x11d   : > { %v6735_v9 = vadd.f32 %v2308_v8, %v2267_v7  ;;  %v2310_v19 = vpop.f32.mrb[2].mxu1  ;;  %3891 = vmatpush1.bf16.msra.mxu1 %v5335_v62  ;;  %v2270_v20 = vpop.f32.mrb[3].mxu0  ;;  %3851 = vmatprep.subr.bf16.mxu0 %v5340_v63  ;;  %v5409_v62 = vld [vmem:[%s7477_s2 + $0x624] ss:$16 sps:$4 sm:$0xff]   ;;  %v5404_v63 = vld [vmem:[%s7477_s2 + $0x420] ss:$16 sps:$4 sm:$0xff]  }
 0x11e   : > { %v2311_v21 = vpop.f32.mrb[3].mxu1  ;;  %3892 = vmatprep.subr.bf16.mxu1 %v5343_v1  ;;  %v5407_v1 = vld [vmem:[%s7477_s2 + $0x620] ss:$16 sps:$4 sm:$0xff]   ;;  %v5412_v2 = vld [vmem:[%s7477_s2 + $0x444] ss:$16 sps:$4 sm:$0xff]  }
 0x11f   : > { %v5415_v3 = vld [vmem:[%s7477_s2 + $0x644] ss:$16 sps:$4 sm:$0xff]   ;;  %v5416_v17 = vld [vmem:[%s7477_s2 + $0x460] ss:$16 sps:$4 sm:$0xff]  }
 0x120   : > { %3852 = vmatpush1.bf16.msra.mxu0 %v5338_v4  ;;  %v5410_v4 = vld [vmem:[%s7477_s2 + $0x440] ss:$16 sps:$4 sm:$0xff]   ;;  %v5418_v7 = vld [vmem:[%s7477_s2 + $0x464] ss:$16 sps:$4 sm:$0xff]  }
 0x121   : > { %3893 = vmatpush1.bf16.msra.mxu1 %v5341_v5  ;;  %3853 = vmatprep.subr.bf16.mxu0 %v5346_v22  ;;  %v5413_v5 = vld [vmem:[%s7477_s2 + $0x640] ss:$16 sps:$4 sm:$0xff]   ;;  %v5421_v8 = vld [vmem:[%s7477_s2 + $0x664] ss:$16 sps:$4 sm:$0xff]  }
 0x122   : > { %3894 = vmatprep.subr.bf16.mxu1 %v5349_v23  ;;  %v5419_v19 = vld [vmem:[%s7477_s2 + $0x660] ss:$16 sps:$4 sm:$0xff]   ;;  %v5424_v20 = vld [vmem:[%s7477_s2 + $0x484] ss:$16 sps:$4 sm:$0xff]  }
 0x123   : > { %v5427_v21 = vld [vmem:[%s7477_s2 + $0x684] ss:$16 sps:$4 sm:$0xff]   ;;  %v5422_v22 = vld [vmem:[%s7477_s2 + $0x480] ss:$16 sps:$4 sm:$0xff]  }
 0x124   : > { %3854 = vmatpush1.bf16.msra.mxu0 %v5344_v24  ;;  %v5425_v23 = vld [vmem:[%s7477_s2 + $0x680] ss:$16 sps:$4 sm:$0xff]   ;;  %v5430_v24 = vld [vmem:[%s7477_s2 + $0x4a4] ss:$16 sps:$4 sm:$0xff]  }
 0x125   : > { %3895 = vmatpush1.bf16.msra.mxu1 %v5347_v25  ;;  %3855 = vmatprep.subr.bf16.mxu0 %v5352_v27  ;;  %v5433_v25 = vld [vmem:[%s7477_s2 + $0x6a4] ss:$16 sps:$4 sm:$0xff]   ;;  %v5428_v27 = vld [vmem:[%s7477_s2 + $0x4a0] ss:$16 sps:$4 sm:$0xff]  }
 0x126   : > { %3896 = vmatprep.subr.bf16.mxu1 %v5355_v28  ;;  %v5431_v28 = vld [vmem:[%s7477_s2 + $0x6a0] ss:$16 sps:$4 sm:$0xff]  }
 0x128   : > { %3856 = vmatpush1.bf16.msra.mxu0 %v5350_v30  ;;  %v5436_v30 = vld [vmem:[%s7477_s2 + $0x4c4] ss:$16 sps:$4 sm:$0xff]  }
 0x129   : > { %3897 = vmatpush1.bf16.msra.mxu1 %v5353_v11  ;;  %3857 = vmatprep.subr.bf16.mxu0 %v5358_v14  ;;  %v5439_v11 = vld [vmem:[%s7477_s2 + $0x6c4] ss:$16 sps:$4 sm:$0xff]  }
 0x12a   : > { %3898 = vmatprep.subr.bf16.mxu1 %v5361_v31 }
 0x12c   : > { %3858 = vmatpush1.bf16.msra.mxu0 %v5356_v34 }
 0x12d   : > { %3899 = vmatpush1.bf16.msra.mxu1 %v5359_v35  ;;  %3859 = vmatprep.subr.bf16.mxu0 %v5364_v36 }
 0x12e   : > { %3900 = vmatprep.subr.bf16.mxu1 %v5367_v37 }
 0x130   : > { %3860 = vmatpush1.bf16.msra.mxu0 %v5362_v38 }
 0x131   : > { %3901 = vmatpush1.bf16.msra.mxu1 %v5365_v39  ;;  %3861 = vmatprep.subr.bf16.mxu0 %v5370_v40  ;;  %v5434_v40 = vld [vmem:[%s7477_s2 + $0x4c0] ss:$16 sps:$4 sm:$0xff]  }
 0x132   : > { %3902 = vmatprep.subr.bf16.mxu1 %v5373_v32  ;;  %v5437_v32 = vld [vmem:[%s7477_s2 + $0x6c0] ss:$16 sps:$4 sm:$0xff]  }
 0x134   : > { %3862 = vmatpush1.bf16.msra.mxu0 %v5368_v33 }
 0x135   : > { %3903 = vmatpush1.bf16.msra.mxu1 %v5371_v41  ;;  %3863 = vmatprep.subr.bf16.mxu0 %v5376_v42  ;;  %v5445_v42 = vld [vmem:[%s7477_s2 + $0x6e4] ss:$16 sps:$4 sm:$0xff]  }
 0x136   : > { %3904 = vmatprep.subr.bf16.mxu1 %v5379_v26 }
 0x138   : > { %3864 = vmatpush1.bf16.msra.mxu0 %v5374_v29  ;;  %v5440_v29 = vld [vmem:[%s7477_s2 + $0x4e0] ss:$16 sps:$4 sm:$0xff]  }
 0x139   : > { %3905 = vmatpush1.bf16.msra.mxu1 %v5377_v43  ;;  %3865 = vmatprep.subr.bf16.mxu0 %v5382_v44  ;;  %v5443_v43 = vld [vmem:[%s7477_s2 + $0x6e0] ss:$16 sps:$4 sm:$0xff]   ;;  %v5448_v44 = vld [vmem:[%s7477_s2 + $0x504] ss:$16 sps:$4 sm:$0xff]  }
 0x13a   : > { %3906 = vmatprep.subr.bf16.mxu1 %v5385_v45  ;;  %v5451_v45 = vld [vmem:[%s7477_s2 + $0x704] ss:$16 sps:$4 sm:$0xff]  }
 0x13c   : > { %3866 = vmatpush1.bf16.msra.mxu0 %v5380_v46  ;;  %v5446_v46 = vld [vmem:[%s7477_s2 + $0x500] ss:$16 sps:$4 sm:$0xff]  }
 0x13d   : > { %3907 = vmatpush1.bf16.msra.mxu1 %v5383_v12  ;;  %3867 = vmatprep.subr.bf16.mxu0 %v5388_v13  ;;  %v5449_v12 = vld [vmem:[%s7477_s2 + $0x700] ss:$16 sps:$4 sm:$0xff]   ;;  %v5454_v13 = vld [vmem:[%s7477_s2 + $0x524] ss:$16 sps:$4 sm:$0xff]  }
 0x13e   : > { %3908 = vmatprep.subr.bf16.mxu1 %v5391_v47  ;;  %v5457_v47 = vld [vmem:[%s7477_s2 + $0x724] ss:$16 sps:$4 sm:$0xff]  }
 0x140   : > { %3868 = vmatpush1.bf16.msra.mxu0 %v5386_v48  ;;  %v5452_v48 = vld [vmem:[%s7477_s2 + $0x520] ss:$16 sps:$4 sm:$0xff]  }
 0x141   : > { %3909 = vmatpush1.bf16.msra.mxu1 %v5389_v49  ;;  %3869 = vmatprep.subr.bf16.mxu0 %v5394_v50  ;;  %v5455_v49 = vld [vmem:[%s7477_s2 + $0x720] ss:$16 sps:$4 sm:$0xff]   ;;  %v5460_v50 = vld [vmem:[%s7477_s2 + $0x544] ss:$16 sps:$4 sm:$0xff]  }
 0x142   : > { %3910 = vmatprep.subr.bf16.mxu1 %v5397_v51  ;;  %v5463_v51 = vld [vmem:[%s7477_s2 + $0x744] ss:$16 sps:$4 sm:$0xff]  }
 0x144   : > { %3870 = vmatpush1.bf16.msra.mxu0 %v5392_v52  ;;  %v5458_v52 = vld [vmem:[%s7477_s2 + $0x540] ss:$16 sps:$4 sm:$0xff]  }
 0x145   : > { %3911 = vmatpush1.bf16.msra.mxu1 %v5395_v53  ;;  %3921 = vmatprep.subr.bf16.mxu0 %v5400_v56  ;;  %v5461_v53 = vld [vmem:[%s7477_s2 + $0x740] ss:$16 sps:$4 sm:$0xff]   ;;  %v5466_v56 = vld [vmem:[%s7477_s2 + $0x564] ss:$16 sps:$4 sm:$0xff]  }
 0x146   : > { %3962 = vmatprep.subr.bf16.mxu1 %v5403_v57  ;;  %v5469_v57 = vld [vmem:[%s7477_s2 + $0x764] ss:$16 sps:$4 sm:$0xff]  }
 0x147   : > { %3872 = vmatmul.mubr.bf16.vlgmr.msra.gmra.mrb[16].mxu0 %v5965_v15 }
 0x148   : > { %3913 = vmatmul.mubr.bf16.vlgmr.msra.gmra.mrb[16].mxu1 %v5968_v16  ;;  %3922 = vmatpush1.bf16.msra.mxu0 %v5398_v58  ;;  %v5464_v58 = vld [vmem:[%s7477_s2 + $0x560] ss:$16 sps:$4 sm:$0xff]  }
 0x149   : > { %3963 = vmatpush1.bf16.msra.mxu1 %v5401_v60  ;;  %3923 = vmatprep.subr.bf16.mxu0 %v5406_v61  ;;  %v5467_v60 = vld [vmem:[%s7477_s2 + $0x760] ss:$16 sps:$4 sm:$0xff]   ;;  %v5472_v61 = vld [vmem:[%s7477_s2 + $0x584] ss:$16 sps:$4 sm:$0xff]  }
 0x14a   : > { %3964 = vmatprep.subr.bf16.mxu1 %v5409_v62  ;;  %3953 = vmatprep.mubr.bf16.mxu0 %v6120_v10  ;;  %v5475_v62 = vld [vmem:[%s7477_s2 + $0x784] ss:$16 sps:$4 sm:$0xff]  }
 0x14b   : > { %3994 = vmatprep.mubr.bf16.mxu1 %v6128_v18 }
 0x14c   : > { %3924 = vmatpush1.bf16.msra.mxu0 %v5404_v63  ;;  %v5470_v63 = vld [vmem:[%s7477_s2 + $0x580] ss:$16 sps:$4 sm:$0xff]  }
 0x14d   : > { %3965 = vmatpush1.bf16.msra.mxu1 %v5407_v1  ;;  %3925 = vmatprep.subr.bf16.mxu0 %v5412_v2  ;;  %v5473_v1 = vld [vmem:[%s7477_s2 + $0x780] ss:$16 sps:$4 sm:$0xff]   ;;  %v5478_v2 = vld [vmem:[%s7477_s2 + $0x5a4] ss:$16 sps:$4 sm:$0xff]  }
 0x14e   : > { %3966 = vmatprep.subr.bf16.mxu1 %v5415_v3  ;;  %v5481_v3 = vld [vmem:[%s7477_s2 + $0x7a4] ss:$16 sps:$4 sm:$0xff]  }
 0x150   : > { %3926 = vmatpush1.bf16.msra.mxu0 %v5410_v4  ;;  %v5476_v4 = vld [vmem:[%s7477_s2 + $0x5a0] ss:$16 sps:$4 sm:$0xff]  }
 0x151   : > { %3967 = vmatpush1.bf16.msra.mxu1 %v5413_v5  ;;  %3927 = vmatprep.subr.bf16.mxu0 %v5418_v7  ;;  %v5479_v5 = vld [vmem:[%s7477_s2 + $0x7a0] ss:$16 sps:$4 sm:$0xff]   ;;  %v5484_v7 = vld [vmem:[%s7477_s2 + $0x5c4] ss:$16 sps:$4 sm:$0xff]  }
 0x152   : > { %3968 = vmatprep.subr.bf16.mxu1 %v5421_v8  ;;  %v5487_v8 = vld [vmem:[%s7477_s2 + $0x7c4] ss:$16 sps:$4 sm:$0xff]  }
 0x154   : > { %3928 = vmatpush1.bf16.msra.mxu0 %v5416_v17  ;;  %v5482_v17 = vld [vmem:[%s7477_s2 + $0x5c0] ss:$16 sps:$4 sm:$0xff]  }
 0x155   : > { %3969 = vmatpush1.bf16.msra.mxu1 %v5419_v19  ;;  %3929 = vmatprep.subr.bf16.mxu0 %v5424_v20  ;;  %v5485_v19 = vld [vmem:[%s7477_s2 + $0x7c0] ss:$16 sps:$4 sm:$0xff]   ;;  %v5490_v20 = vld [vmem:[%s7477_s2 + $0x5e4] ss:$16 sps:$4 sm:$0xff]  }
 0x156   : > { %3970 = vmatprep.subr.bf16.mxu1 %v5427_v21  ;;  %v5493_v21 = vld [vmem:[%s7477_s2 + $0x7e4] ss:$16 sps:$4 sm:$0xff]  }
 0x158   : > { %3930 = vmatpush1.bf16.msra.mxu0 %v5422_v22  ;;  %v5488_v22 = vld [vmem:[%s7477_s2 + $0x5e0] ss:$16 sps:$4 sm:$0xff]  }
 0x159   : > { %3971 = vmatpush1.bf16.msra.mxu1 %v5425_v23  ;;  %3931 = vmatprep.subr.bf16.mxu0 %v5430_v24  ;;  %v5491_v23 = vld [vmem:[%s7477_s2 + $0x7e0] ss:$16 sps:$4 sm:$0xff]   ;;  %v5496_v24 = vld [vmem:[%s7477_s2 + $0xc] ss:$16 sps:$4 sm:$0xff]  }
 0x15a   : > { %3972 = vmatprep.subr.bf16.mxu1 %v5433_v25  ;;  %v2347_v14 = vpop.f32.mrb[4].mxu0  ;;  %v5499_v25 = vld [vmem:[%s7477_s2 + $0x20c] ss:$16 sps:$4 sm:$0xff]  }
 0x15b   : > { %v2388_v31 = vpop.f32.mrb[4].mxu1  ;;  %v2348_v34 = vadd.f32 %v2347_v14, %v6733_v6  ;;  %v2349_v35 = vpop.f32.mrb[5].mxu0  ;;  %v5500_v14 = vld [vmem:[%s7477_s2 + $0x28] ss:$16 sps:$4 sm:$0xff]  }
 0x15c   : > { %v2390_v36 = vpop.f32.mrb[5].mxu1  ;;  %v2350_v37 = vadd.f32 %v2349_v35, %v6735_v9  ;;  %v2351_v38 = vpop.f32.mrb[6].mxu0  ;;  %3932 = vmatpush1.bf16.msra.mxu0 %v5428_v27  ;;  %v5442_v9 = vld [vmem:[%s7477_s2 + $0x4e4] ss:$16 sps:$4 sm:$0xff]   ;;  %v5494_v27 = vld [vmem:[%s7477_s2 + $0x8] ss:$16 sps:$4 sm:$0xff]  }
 0x15d   : > { %v2392_v39 = vpop.f32.mrb[6].mxu1  ;;  %3973 = vmatpush1.bf16.msra.mxu1 %v5431_v28  ;;  %v6935_v33 = vadd.f32 %v2388_v31, %v2348_v34  ;;  %v2352_v41 = vpop.f32.mrb[7].mxu0  ;;  %3933 = vmatprep.subr.bf16.mxu0 %v5436_v30  ;;  %v5497_v28 = vld [vmem:[%s7477_s2 + $0x208] ss:$16 sps:$4 sm:$0xff]   ;;  %v5502_v30 = vld [vmem:[%s7477_s2 + $0x2c] ss:$16 sps:$4 sm:$0xff]  }
 0x15e   : > { %v2393_v6 = vpop.f32.mrb[7].mxu1  ;;  %3974 = vmatprep.subr.bf16.mxu1 %v5439_v11  ;;  %v6943_v26 = vadd.f32 %v2390_v36, %v2350_v37  ;;  %v5505_v11 = vld [vmem:[%s7477_s2 + $0x22c] ss:$16 sps:$4 sm:$0xff]   ;;  %v5503_v31 = vld [vmem:[%s7477_s2 + $0x228] ss:$16 sps:$4 sm:$0xff]  }
 0x15f   : > { %v5508_v34 = vld [vmem:[%s7477_s2 + $0x4c] ss:$16 sps:$4 sm:$0xff]   ;;  %v5506_v36 = vld [vmem:[%s7477_s2 + $0x48] ss:$16 sps:$4 sm:$0xff]  }
 0x160   : > { %3934 = vmatpush1.bf16.msra.mxu0 %v5434_v40  ;;  %v5511_v35 = vld [vmem:[%s7477_s2 + $0x24c] ss:$16 sps:$4 sm:$0xff]   ;;  %v5509_v37 = vld [vmem:[%s7477_s2 + $0x248] ss:$16 sps:$4 sm:$0xff]  }
 0x161   : > { %3975 = vmatpush1.bf16.msra.mxu1 %v5437_v32  ;;  %3935 = vmatprep.subr.bf16.mxu0 %v5442_v9  ;;  %v5514_v38 = vld [vmem:[%s7477_s2 + $0x6c] ss:$16 sps:$4 sm:$0xff]   ;;  %v5515_v39 = vld [vmem:[%s7477_s2 + $0x268] ss:$16 sps:$4 sm:$0xff]  }
 0x162   : > { %3976 = vmatprep.subr.bf16.mxu1 %v5445_v42  ;;  %v5520_v40 = vld [vmem:[%s7477_s2 + $0x8c] ss:$16 sps:$4 sm:$0xff]   ;;  %v5518_v41 = vld [vmem:[%s7477_s2 + $0x88] ss:$16 sps:$4 sm:$0xff]  }
 0x163   : > { %v5523_v32 = vld [vmem:[%s7477_s2 + $0x28c] ss:$16 sps:$4 sm:$0xff]   ;;  %v5521_v6 = vld [vmem:[%s7477_s2 + $0x288] ss:$16 sps:$4 sm:$0xff]  }
 0x164   : > { %3936 = vmatpush1.bf16.msra.mxu0 %v5440_v29  ;;  %v5526_v9 = vld [vmem:[%s7477_s2 + $0xac] ss:$16 sps:$4 sm:$0xff]   ;;  %v5524_v29 = vld [vmem:[%s7477_s2 + $0xa8] ss:$16 sps:$4 sm:$0xff]  }
 0x165   : > { %3977 = vmatpush1.bf16.msra.mxu1 %v5443_v43  ;;  %3937 = vmatprep.subr.bf16.mxu0 %v5448_v44  ;;  %v5529_v42 = vld [vmem:[%s7477_s2 + $0x2ac] ss:$16 sps:$4 sm:$0xff]   ;;  %v5527_v43 = vld [vmem:[%s7477_s2 + $0x2a8] ss:$16 sps:$4 sm:$0xff]  }
 0x166   : > { %3978 = vmatprep.subr.bf16.mxu1 %v5451_v45  ;;  %v5532_v44 = vld [vmem:[%s7477_s2 + $0xcc] ss:$16 sps:$4 sm:$0xff]  }
 0x167   : > { %v5535_v45 = vld [vmem:[%s7477_s2 + $0x2cc] ss:$16 sps:$4 sm:$0xff]  }
 0x168   : > { %3938 = vmatpush1.bf16.msra.mxu0 %v5446_v46 }
 0x169   : > { %3979 = vmatpush1.bf16.msra.mxu1 %v5449_v12  ;;  %3939 = vmatprep.subr.bf16.mxu0 %v5454_v13 }
 0x16a   : > { %3980 = vmatprep.subr.bf16.mxu1 %v5457_v47 }
 0x16c   : > { %3940 = vmatpush1.bf16.msra.mxu0 %v5452_v48 }
 0x16d   : > { %3981 = vmatpush1.bf16.msra.mxu1 %v5455_v49  ;;  %3941 = vmatprep.subr.bf16.mxu0 %v5460_v50 }
 0x16e   : > { %3982 = vmatprep.subr.bf16.mxu1 %v5463_v51 }
 0x170   : > { %3942 = vmatpush1.bf16.msra.mxu0 %v5458_v52  ;;  %v5530_v52 = vld [vmem:[%s7477_s2 + $0xc8] ss:$16 sps:$4 sm:$0xff]  }
 0x171   : > { %3983 = vmatpush1.bf16.msra.mxu1 %v5461_v53  ;;  %3943 = vmatprep.subr.bf16.mxu0 %v5466_v56  ;;  %v5533_v53 = vld [vmem:[%s7477_s2 + $0x2c8] ss:$16 sps:$4 sm:$0xff]  }
 0x172   : > { %3984 = vmatprep.subr.bf16.mxu1 %v5469_v57 }
 0x174   : > { %3944 = vmatpush1.bf16.msra.mxu0 %v5464_v58  ;;  %v5538_v58 = vld [vmem:[%s7477_s2 + $0xec] ss:$16 sps:$4 sm:$0xff]  }
 0x175   : > { %3985 = vmatpush1.bf16.msra.mxu1 %v5467_v60  ;;  %3945 = vmatprep.subr.bf16.mxu0 %v5472_v61  ;;  %v5541_v60 = vld [vmem:[%s7477_s2 + $0x2ec] ss:$16 sps:$4 sm:$0xff]   ;;  %v5536_v61 = vld [vmem:[%s7477_s2 + $0xe8] ss:$16 sps:$4 sm:$0xff]  }
 0x176   : > { %3986 = vmatprep.subr.bf16.mxu1 %v5475_v62  ;;  %v5539_v62 = vld [vmem:[%s7477_s2 + $0x2e8] ss:$16 sps:$4 sm:$0xff]  }
 0x178   : > { %3946 = vmatpush1.bf16.msra.mxu0 %v5470_v63  ;;  %v5544_v63 = vld [vmem:[%s7477_s2 + $0x10c] ss:$16 sps:$4 sm:$0xff]  }
 0x179   : > { %3987 = vmatpush1.bf16.msra.mxu1 %v5473_v1  ;;  %3947 = vmatprep.subr.bf16.mxu0 %v5478_v2  ;;  %v5547_v1 = vld [vmem:[%s7477_s2 + $0x30c] ss:$16 sps:$4 sm:$0xff]   ;;  %v5542_v2 = vld [vmem:[%s7477_s2 + $0x108] ss:$16 sps:$4 sm:$0xff]  }
 0x17a   : > { %3988 = vmatprep.subr.bf16.mxu1 %v5481_v3  ;;  %v5545_v3 = vld [vmem:[%s7477_s2 + $0x308] ss:$16 sps:$4 sm:$0xff]  }
 0x17c   : > { %3948 = vmatpush1.bf16.msra.mxu0 %v5476_v4  ;;  %v5550_v4 = vld [vmem:[%s7477_s2 + $0x12c] ss:$16 sps:$4 sm:$0xff]  }
 0x17d   : > { %3989 = vmatpush1.bf16.msra.mxu1 %v5479_v5  ;;  %3949 = vmatprep.subr.bf16.mxu0 %v5484_v7  ;;  %v5553_v5 = vld [vmem:[%s7477_s2 + $0x32c] ss:$16 sps:$4 sm:$0xff]   ;;  %v5548_v7 = vld [vmem:[%s7477_s2 + $0x128] ss:$16 sps:$4 sm:$0xff]  }
 0x17e   : > { %3990 = vmatprep.subr.bf16.mxu1 %v5487_v8  ;;  %v5551_v8 = vld [vmem:[%s7477_s2 + $0x328] ss:$16 sps:$4 sm:$0xff]  }
 0x180   : > { %3950 = vmatpush1.bf16.msra.mxu0 %v5482_v17  ;;  %v5556_v17 = vld [vmem:[%s7477_s2 + $0x14c] ss:$16 sps:$4 sm:$0xff]  }
 0x181   : > { %3991 = vmatpush1.bf16.msra.mxu1 %v5485_v19  ;;  %3951 = vmatprep.subr.bf16.mxu0 %v5490_v20  ;;  %v5559_v19 = vld [vmem:[%s7477_s2 + $0x34c] ss:$16 sps:$4 sm:$0xff]   ;;  %v5554_v20 = vld [vmem:[%s7477_s2 + $0x148] ss:$16 sps:$4 sm:$0xff]  }
 0x182   : > { %3992 = vmatprep.subr.bf16.mxu1 %v5493_v21  ;;  %v5557_v21 = vld [vmem:[%s7477_s2 + $0x348] ss:$16 sps:$4 sm:$0xff]  }
 0x184   : > { %3952 = vmatpush1.bf16.msra.mxu0 %v5488_v22  ;;  %v5562_v22 = vld [vmem:[%s7477_s2 + $0x16c] ss:$16 sps:$4 sm:$0xff]  }
 0x185   : > { %3993 = vmatpush1.bf16.msra.mxu1 %v5491_v23  ;;  %4003 = vmatprep.subr.bf16.mxu0 %v5496_v24  ;;  %v5565_v23 = vld [vmem:[%s7477_s2 + $0x36c] ss:$16 sps:$4 sm:$0xff]   ;;  %v5560_v24 = vld [vmem:[%s7477_s2 + $0x168] ss:$16 sps:$4 sm:$0xff]  }
 0x186   : > { %4044 = vmatprep.subr.bf16.mxu1 %v5499_v25  ;;  %v5563_v25 = vld [vmem:[%s7477_s2 + $0x368] ss:$16 sps:$4 sm:$0xff]  }
 0x187   : > { %3954 = vmatmul.mubr.bf16.vlgmr.msra.gmra.mrb[20].mxu0 %v6216_v54 }
 0x188   : > { %3995 = vmatmul.mubr.bf16.vlgmr.msra.gmra.mrb[20].mxu1 %v6219_v55  ;;  %4004 = vmatpush1.bf16.msra.mxu0 %v5494_v27  ;;  %v5568_v27 = vld [vmem:[%s7477_s2 + $0x18c] ss:$16 sps:$4 sm:$0xff]  }
 0x189   : > { %4045 = vmatpush1.bf16.msra.mxu1 %v5497_v28  ;;  %4005 = vmatprep.subr.bf16.mxu0 %v5502_v30  ;;  %v5571_v28 = vld [vmem:[%s7477_s2 + $0x38c] ss:$16 sps:$4 sm:$0xff]   ;;  %v5566_v30 = vld [vmem:[%s7477_s2 + $0x188] ss:$16 sps:$4 sm:$0xff]  }
 0x18a   : > { %4046 = vmatprep.subr.bf16.mxu1 %v5505_v11  ;;  %4035 = vmatprep.mubr.bf16.mxu0 %v5930_v59  ;;  %v5517_v59 = vld [vmem:[%s7477_s2 + $0x26c] ss:$16 sps:$4 sm:$0xff]   ;;  %v5569_v11 = vld [vmem:[%s7477_s2 + $0x388] ss:$16 sps:$4 sm:$0xff]  }
 0x18b   : > { %4076 = vmatprep.mubr.bf16.mxu1 %v5938_v0  ;;  %v5512_v0 = vld [vmem:[%s7477_s2 + $0x68] ss:$16 sps:$4 sm:$0xff]  }
 0x18c   : > { %4006 = vmatpush1.bf16.msra.mxu0 %v5500_v14  ;;  %v5574_v14 = vld [vmem:[%s7477_s2 + $0x1ac] ss:$16 sps:$4 sm:$0xff]  }
 0x18d   : > { %4047 = vmatpush1.bf16.msra.mxu1 %v5503_v31  ;;  %4007 = vmatprep.subr.bf16.mxu0 %v5508_v34  ;;  %v5577_v31 = vld [vmem:[%s7477_s2 + $0x3ac] ss:$16 sps:$4 sm:$0xff]   ;;  %v5572_v34 = vld [vmem:[%s7477_s2 + $0x1a8] ss:$16 sps:$4 sm:$0xff]  }
 0x18e   : > { %4048 = vmatprep.subr.bf16.mxu1 %v5511_v35  ;;  %v5575_v35 = vld [vmem:[%s7477_s2 + $0x3a8] ss:$16 sps:$4 sm:$0xff]  }
 0x190   : > { %4008 = vmatpush1.bf16.msra.mxu0 %v5506_v36  ;;  %v5580_v36 = vld [vmem:[%s7477_s2 + $0x1cc] ss:$16 sps:$4 sm:$0xff]  }
 0x191   : > { %4049 = vmatpush1.bf16.msra.mxu1 %v5509_v37  ;;  %4009 = vmatprep.subr.bf16.mxu0 %v5514_v38  ;;  %v5583_v37 = vld [vmem:[%s7477_s2 + $0x3cc] ss:$16 sps:$4 sm:$0xff]   ;;  %v5578_v38 = vld [vmem:[%s7477_s2 + $0x1c8] ss:$16 sps:$4 sm:$0xff]  }
 0x192   : > { %4050 = vmatprep.subr.bf16.mxu1 %v5517_v59  ;;  %v5581_v59 = vld [vmem:[%s7477_s2 + $0x3c8] ss:$16 sps:$4 sm:$0xff]  }
 0x194   : > { %4010 = vmatpush1.bf16.msra.mxu0 %v5512_v0  ;;  %v5586_v0 = vld [vmem:[%s7477_s2 + $0x1ec] ss:$16 sps:$4 sm:$0xff]  }
 0x195   : > { %4051 = vmatpush1.bf16.msra.mxu1 %v5515_v39  ;;  %4011 = vmatprep.subr.bf16.mxu0 %v5520_v40  ;;  %v5589_v39 = vld [vmem:[%s7477_s2 + $0x3ec] ss:$16 sps:$4 sm:$0xff]   ;;  %v5584_v40 = vld [vmem:[%s7477_s2 + $0x1e8] ss:$16 sps:$4 sm:$0xff]  }
 0x196   : > { %4052 = vmatprep.subr.bf16.mxu1 %v5523_v32  ;;  %v5587_v32 = vld [vmem:[%s7477_s2 + $0x3e8] ss:$16 sps:$4 sm:$0xff]  }
 0x198   : > { %4012 = vmatpush1.bf16.msra.mxu0 %v5518_v41  ;;  %v5592_v41 = vld [vmem:[%s7477_s2 + $0x40c] ss:$16 sps:$4 sm:$0xff]  }
 0x199   : > { %4053 = vmatpush1.bf16.msra.mxu1 %v5521_v6  ;;  %4013 = vmatprep.subr.bf16.mxu0 %v5526_v9  ;;  %v5595_v6 = vld [vmem:[%s7477_s2 + $0x60c] ss:$16 sps:$4 sm:$0xff]   ;;  %v5590_v9 = vld [vmem:[%s7477_s2 + $0x408] ss:$16 sps:$4 sm:$0xff]  }
 0x19a   : > { %4054 = vmatprep.subr.bf16.mxu1 %v5529_v42  ;;  %v2429_v46 = vpop.f32.mrb[8].mxu0  ;;  %v5593_v42 = vld [vmem:[%s7477_s2 + $0x608] ss:$16 sps:$4 sm:$0xff]  }
 0x19b   : > { %v2470_v12 = vpop.f32.mrb[8].mxu1  ;;  %v2431_v47 = vpop.f32.mrb[9].mxu0 }
 0x19c   : > { %v7129_v13 = vadd.f32 %v2470_v12, %v2429_v46  ;;  %v2472_v48 = vpop.f32.mrb[9].mxu1  ;;  %v2433_v50 = vpop.f32.mrb[10].mxu0  ;;  %4014 = vmatpush1.bf16.msra.mxu0 %v5524_v29  ;;  %v5598_v29 = vld [vmem:[%s7477_s2 + $0x42c] ss:$16 sps:$4 sm:$0xff]   ;;  %v5605_v12 = vld [vmem:[%s7477_s2 + $0x648] ss:$16 sps:$4 sm:$0xff]  }
 0x19d   : > { %v7131_v49 = vadd.f32 %v2472_v48, %v2431_v47  ;;  %v2474_v51 = vpop.f32.mrb[10].mxu1  ;;  %4055 = vmatpush1.bf16.msra.mxu1 %v5527_v43  ;;  %v2434_v56 = vpop.f32.mrb[11].mxu0  ;;  %4015 = vmatprep.subr.bf16.mxu0 %v5532_v44  ;;  %v5601_v43 = vld [vmem:[%s7477_s2 + $0x62c] ss:$16 sps:$4 sm:$0xff]   ;;  %v5596_v44 = vld [vmem:[%s7477_s2 + $0x428] ss:$16 sps:$4 sm:$0xff]  }
 0x19e   : > { %v2475_v57 = vpop.f32.mrb[11].mxu1  ;;  %4056 = vmatprep.subr.bf16.mxu1 %v5535_v45  ;;  %v5599_v45 = vld [vmem:[%s7477_s2 + $0x628] ss:$16 sps:$4 sm:$0xff]   ;;  %v5604_v46 = vld [vmem:[%s7477_s2 + $0x44c] ss:$16 sps:$4 sm:$0xff]  }
 0x19f   : > { %v5610_v47 = vld [vmem:[%s7477_s2 + $0x46c] ss:$16 sps:$4 sm:$0xff]   ;;  %v5611_v48 = vld [vmem:[%s7477_s2 + $0x668] ss:$16 sps:$4 sm:$0xff]  }
 0x1a0   : > { %4016 = vmatpush1.bf16.msra.mxu0 %v5530_v52  ;;  %v5616_v50 = vld [vmem:[%s7477_s2 + $0x48c] ss:$16 sps:$4 sm:$0xff]   ;;  %v5614_v52 = vld [vmem:[%s7477_s2 + $0x488] ss:$16 sps:$4 sm:$0xff]  }
 0x1a1   : > { %4057 = vmatpush1.bf16.msra.mxu1 %v5533_v53  ;;  %4017 = vmatprep.subr.bf16.mxu0 %v5538_v58  ;;  %v5619_v51 = vld [vmem:[%s7477_s2 + $0x68c] ss:$16 sps:$4 sm:$0xff]   ;;  %v5617_v53 = vld [vmem:[%s7477_s2 + $0x688] ss:$16 sps:$4 sm:$0xff]  }
 0x1a2   : > { %4058 = vmatprep.subr.bf16.mxu1 %v5541_v60  ;;  %v5622_v56 = vld [vmem:[%s7477_s2 + $0x4ac] ss:$16 sps:$4 sm:$0xff]   ;;  %v5620_v58 = vld [vmem:[%s7477_s2 + $0x4a8] ss:$16 sps:$4 sm:$0xff]  }
 0x1a3   : > { %v5625_v57 = vld [vmem:[%s7477_s2 + $0x6ac] ss:$16 sps:$4 sm:$0xff]   ;;  %v5623_v60 = vld [vmem:[%s7477_s2 + $0x6a8] ss:$16 sps:$4 sm:$0xff]  }
 0x1a4   : > { %4018 = vmatpush1.bf16.msra.mxu0 %v5536_v61  ;;  %v5628_v61 = vld [vmem:[%s7477_s2 + $0x4cc] ss:$16 sps:$4 sm:$0xff]  }
 0x1a5   : > { %4059 = vmatpush1.bf16.msra.mxu1 %v5539_v62  ;;  %4019 = vmatprep.subr.bf16.mxu0 %v5544_v63  ;;  %v5631_v62 = vld [vmem:[%s7477_s2 + $0x6cc] ss:$16 sps:$4 sm:$0xff]  }
 0x1a6   : > { %4060 = vmatprep.subr.bf16.mxu1 %v5547_v1 }
 0x1a8   : > { %4020 = vmatpush1.bf16.msra.mxu0 %v5542_v2 }
 0x1a9   : > { %4061 = vmatpush1.bf16.msra.mxu1 %v5545_v3  ;;  %4021 = vmatprep.subr.bf16.mxu0 %v5550_v4 }
 0x1aa   : > { %4062 = vmatprep.subr.bf16.mxu1 %v5553_v5 }
 0x1ac   : > { %4022 = vmatpush1.bf16.msra.mxu0 %v5548_v7 }
 0x1ad   : > { %4063 = vmatpush1.bf16.msra.mxu1 %v5551_v8  ;;  %4023 = vmatprep.subr.bf16.mxu0 %v5556_v17  ;;  %v5626_v17 = vld [vmem:[%s7477_s2 + $0x4c8] ss:$16 sps:$4 sm:$0xff]  }
 0x1ae   : > { %4064 = vmatprep.subr.bf16.mxu1 %v5559_v19  ;;  %v5629_v19 = vld [vmem:[%s7477_s2 + $0x6c8] ss:$16 sps:$4 sm:$0xff]  }
 0x1b0   : > { %4024 = vmatpush1.bf16.msra.mxu0 %v5554_v20 }
 0x1b1   : > { %4065 = vmatpush1.bf16.msra.mxu1 %v5557_v21  ;;  %4025 = vmatprep.subr.bf16.mxu0 %v5562_v22  ;;  %v5637_v22 = vld [vmem:[%s7477_s2 + $0x6ec] ss:$16 sps:$4 sm:$0xff]  }
 0x1b2   : > { %4066 = vmatprep.subr.bf16.mxu1 %v5565_v23 }
 0x1b4   : > { %4026 = vmatpush1.bf16.msra.mxu0 %v5560_v24  ;;  %v5632_v24 = vld [vmem:[%s7477_s2 + $0x4e8] ss:$16 sps:$4 sm:$0xff]  }
 0x1b5   : > { %4067 = vmatpush1.bf16.msra.mxu1 %v5563_v25  ;;  %4027 = vmatprep.subr.bf16.mxu0 %v5568_v27  ;;  %v5635_v25 = vld [vmem:[%s7477_s2 + $0x6e8] ss:$16 sps:$4 sm:$0xff]   ;;  %v5640_v27 = vld [vmem:[%s7477_s2 + $0x50c] ss:$16 sps:$4 sm:$0xff]  }
 0x1b6   : > { %4068 = vmatprep.subr.bf16.mxu1 %v5571_v28  ;;  %v5643_v28 = vld [vmem:[%s7477_s2 + $0x70c] ss:$16 sps:$4 sm:$0xff]  }
 0x1b8   : > { %4028 = vmatpush1.bf16.msra.mxu0 %v5566_v30  ;;  %v5638_v30 = vld [vmem:[%s7477_s2 + $0x508] ss:$16 sps:$4 sm:$0xff]  }
 0x1b9   : > { %4069 = vmatpush1.bf16.msra.mxu1 %v5569_v11  ;;  %4029 = vmatprep.subr.bf16.mxu0 %v5574_v14  ;;  %v5641_v11 = vld [vmem:[%s7477_s2 + $0x708] ss:$16 sps:$4 sm:$0xff]   ;;  %v5646_v14 = vld [vmem:[%s7477_s2 + $0x52c] ss:$16 sps:$4 sm:$0xff]  }
 0x1ba   : > { %4070 = vmatprep.subr.bf16.mxu1 %v5577_v31  ;;  %v5649_v31 = vld [vmem:[%s7477_s2 + $0x72c] ss:$16 sps:$4 sm:$0xff]  }
 0x1bc   : > { %4030 = vmatpush1.bf16.msra.mxu0 %v5572_v34  ;;  %v5644_v34 = vld [vmem:[%s7477_s2 + $0x528] ss:$16 sps:$4 sm:$0xff]  }
 0x1bd   : > { %4071 = vmatpush1.bf16.msra.mxu1 %v5575_v35  ;;  %4031 = vmatprep.subr.bf16.mxu0 %v5580_v36  ;;  %v5647_v35 = vld [vmem:[%s7477_s2 + $0x728] ss:$16 sps:$4 sm:$0xff]   ;;  %v5652_v36 = vld [vmem:[%s7477_s2 + $0x54c] ss:$16 sps:$4 sm:$0xff]  }
 0x1be   : > { %4072 = vmatprep.subr.bf16.mxu1 %v5583_v37  ;;  %v5655_v37 = vld [vmem:[%s7477_s2 + $0x74c] ss:$16 sps:$4 sm:$0xff]  }
 0x1c0   : > { %4032 = vmatpush1.bf16.msra.mxu0 %v5578_v38  ;;  %v5650_v38 = vld [vmem:[%s7477_s2 + $0x548] ss:$16 sps:$4 sm:$0xff]  }
 0x1c1   : > { %4073 = vmatpush1.bf16.msra.mxu1 %v5581_v59  ;;  %4033 = vmatprep.subr.bf16.mxu0 %v5586_v0  ;;  %v5653_v59 = vld [vmem:[%s7477_s2 + $0x748] ss:$16 sps:$4 sm:$0xff]   ;;  %v5658_v0 = vld [vmem:[%s7477_s2 + $0x56c] ss:$16 sps:$4 sm:$0xff]  }
 0x1c2   : > { %4074 = vmatprep.subr.bf16.mxu1 %v5589_v39  ;;  %v5661_v39 = vld [vmem:[%s7477_s2 + $0x76c] ss:$16 sps:$4 sm:$0xff]  }
 0x1c4   : > { %4034 = vmatpush1.bf16.msra.mxu0 %v5584_v40  ;;  %v5656_v40 = vld [vmem:[%s7477_s2 + $0x568] ss:$16 sps:$4 sm:$0xff]  }
 0x1c5   : > { %4075 = vmatpush1.bf16.msra.mxu1 %v5587_v32  ;;  %4085 = vmatprep.subr.bf16.mxu0 %v5592_v41  ;;  %v5659_v32 = vld [vmem:[%s7477_s2 + $0x768] ss:$16 sps:$4 sm:$0xff]   ;;  %v5664_v41 = vld [vmem:[%s7477_s2 + $0x58c] ss:$16 sps:$4 sm:$0xff]  }
 0x1c6   : > { %4126 = vmatprep.subr.bf16.mxu1 %v5595_v6  ;;  %v5667_v6 = vld [vmem:[%s7477_s2 + $0x78c] ss:$16 sps:$4 sm:$0xff]  }
 0x1c7   : > { %4036 = vmatmul.mubr.bf16.vlgmr.msra.gmra.mrb[24].mxu0 %v5965_v15  ;;  %v5607_v15 = vld [vmem:[%s7477_s2 + $0x64c] ss:$16 sps:$4 sm:$0xff]  }
 0x1c8   : > { %4077 = vmatmul.mubr.bf16.vlgmr.msra.gmra.mrb[24].mxu1 %v5968_v16  ;;  %4086 = vmatpush1.bf16.msra.mxu0 %v5590_v9  ;;  %v5602_v16 = vld [vmem:[%s7477_s2 + $0x448] ss:$16 sps:$4 sm:$0xff]  }
 0x1c9   : > { %4127 = vmatpush1.bf16.msra.mxu1 %v5593_v42  ;;  %4087 = vmatprep.subr.bf16.mxu0 %v5598_v29  ;;  %v5662_v9 = vld [vmem:[%s7477_s2 + $0x588] ss:$16 sps:$4 sm:$0xff]   ;;  %v5670_v29 = vld [vmem:[%s7477_s2 + $0x5ac] ss:$16 sps:$4 sm:$0xff]  }
 0x1ca   : > { %4128 = vmatprep.subr.bf16.mxu1 %v5601_v43  ;;  %4117 = vmatprep.mubr.bf16.mxu0 %v6120_v10  ;;  %v5613_v10 = vld [vmem:[%s7477_s2 + $0x66c] ss:$16 sps:$4 sm:$0xff]   ;;  %v5665_v42 = vld [vmem:[%s7477_s2 + $0x788] ss:$16 sps:$4 sm:$0xff]  }
 0x1cb   : > { %4158 = vmatprep.mubr.bf16.mxu1 %v6128_v18  ;;  %v5608_v18 = vld [vmem:[%s7477_s2 + $0x468] ss:$16 sps:$4 sm:$0xff]   ;;  %v5673_v43 = vld [vmem:[%s7477_s2 + $0x7ac] ss:$16 sps:$4 sm:$0xff]  }
 0x1cc   : > { %4088 = vmatpush1.bf16.msra.mxu0 %v5596_v44  ;;  %v5668_v44 = vld [vmem:[%s7477_s2 + $0x5a8] ss:$16 sps:$4 sm:$0xff]  }
 0x1cd   : > { %4129 = vmatpush1.bf16.msra.mxu1 %v5599_v45  ;;  %4089 = vmatprep.subr.bf16.mxu0 %v5604_v46  ;;  %v5671_v45 = vld [vmem:[%s7477_s2 + $0x7a8] ss:$16 sps:$4 sm:$0xff]   ;;  %v5676_v46 = vld [vmem:[%s7477_s2 + $0x5cc] ss:$16 sps:$4 sm:$0xff]  }
 0x1ce   : > { %4130 = vmatprep.subr.bf16.mxu1 %v5607_v15  ;;  %v5679_v15 = vld [vmem:[%s7477_s2 + $0x7cc] ss:$16 sps:$4 sm:$0xff]  }
 0x1d0   : > { %4090 = vmatpush1.bf16.msra.mxu0 %v5602_v16  ;;  %v5674_v16 = vld [vmem:[%s7477_s2 + $0x5c8] ss:$16 sps:$4 sm:$0xff]  }
 0x1d1   : > { %4131 = vmatpush1.bf16.msra.mxu1 %v5605_v12  ;;  %4091 = vmatprep.subr.bf16.mxu0 %v5610_v47  ;;  %v5677_v12 = vld [vmem:[%s7477_s2 + $0x7c8] ss:$16 sps:$4 sm:$0xff]   ;;  %v5682_v47 = vld [vmem:[%s7477_s2 + $0x5ec] ss:$16 sps:$4 sm:$0xff]  }
 0x1d2   : > { %4132 = vmatprep.subr.bf16.mxu1 %v5613_v10  ;;  %v5685_v10 = vld [vmem:[%s7477_s2 + $0x7ec] ss:$16 sps:$4 sm:$0xff]  }
 0x1d4   : > { %4092 = vmatpush1.bf16.msra.mxu0 %v5608_v18  ;;  %v5680_v18 = vld [vmem:[%s7477_s2 + $0x5e8] ss:$16 sps:$4 sm:$0xff]  }
 0x1d5   : > { %4133 = vmatpush1.bf16.msra.mxu1 %v5611_v48  ;;  %4093 = vmatprep.subr.bf16.mxu0 %v5616_v50  ;;  %v5683_v48 = vld [vmem:[%s7477_s2 + $0x7e8] ss:$16 sps:$4 sm:$0xff]  }
 0x1d6   : > { %4134 = vmatprep.subr.bf16.mxu1 %v5619_v51 }
 0x1d8   : > { %4094 = vmatpush1.bf16.msra.mxu0 %v5614_v52 }
 0x1d9   : > { %4135 = vmatpush1.bf16.msra.mxu1 %v5617_v53  ;;  %4095 = vmatprep.subr.bf16.mxu0 %v5622_v56 }
 0x1da   : > { %4136 = vmatprep.subr.bf16.mxu1 %v5625_v57  ;;  %v2511_v63 = vpop.f32.mrb[12].mxu0 }
 0x1db   : > { %v2552_v1 = vpop.f32.mrb[12].mxu1  ;;  %v2512_v2 = vadd.f32 %v2511_v63, %v7129_v13  ;;  %v2513_v3 = vpop.f32.mrb[13].mxu0 }
 0x1dc   : > { %v2554_v4 = vpop.f32.mrb[13].mxu1  ;;  %v2514_v5 = vadd.f32 %v2513_v3, %v7131_v49  ;;  %v2515_v7 = vpop.f32.mrb[14].mxu0  ;;  %4096 = vmatpush1.bf16.msra.mxu0 %v5620_v58  ;;  %v5634_v49 = vld [vmem:[%s7477_s2 + $0x4ec] ss:$16 sps:$4 sm:$0xff]  }
 0x1dd   : > { %v2556_v8 = vpop.f32.mrb[14].mxu1  ;;  %4137 = vmatpush1.bf16.msra.mxu1 %v5623_v60  ;;  %v7337_v20 = vadd.f32 %v2552_v1, %v2512_v2  ;;  %v2516_v21 = vpop.f32.mrb[15].mxu0  ;;  %4097 = vmatprep.subr.bf16.mxu0 %v5628_v61  ;;  %v4169_v2 = vlaneseq }
 0x1de   : > { %v2557_v13 = vpop.f32.mrb[15].mxu1  ;;  %4138 = vmatprep.subr.bf16.mxu1 %v5631_v62  ;;  %v7345_v23 = vadd.f32 %v2554_v4, %v2514_v5 }
 0x1df   : > { %v4170_v3 = vshrl.u32 %v4169_v2, 7 }
 0x1e0   : > { %4098 = vmatpush1.bf16.msra.mxu0 %v5626_v17 }
 0x1e1   : > { %4139 = vmatpush1.bf16.msra.mxu1 %v5629_v19  ;;  %4099 = vmatprep.subr.bf16.mxu0 %v5634_v49  ;;  %v4171_v4 = vsub.s32 0, %v4170_v3 }
 0x1e2   : > { %4140 = vmatprep.subr.bf16.mxu1 %v5637_v22 }
 0x1e4   : > { %4100 = vmatpush1.bf16.msra.mxu0 %v5632_v24 }
 0x1e5   : > { %4141 = vmatpush1.bf16.msra.mxu1 %v5635_v25  ;;  %4101 = vmatprep.subr.bf16.mxu0 %v5640_v27 }
 0x1e6   : > { %4142 = vmatprep.subr.bf16.mxu1 %v5643_v28 }
 0x1e8   : > { %4102 = vmatpush1.bf16.msra.mxu0 %v5638_v30 }
 0x1e9   : > { %4143 = vmatpush1.bf16.msra.mxu1 %v5641_v11  ;;  %4103 = vmatprep.subr.bf16.mxu0 %v5646_v14 }
 0x1ea   : > { %4144 = vmatprep.subr.bf16.mxu1 %v5649_v31 }
 0x1ec   : > { %4104 = vmatpush1.bf16.msra.mxu0 %v5644_v34 }
 0x1ed   : > { %4145 = vmatpush1.bf16.msra.mxu1 %v5647_v35  ;;  %4105 = vmatprep.subr.bf16.mxu0 %v5652_v36 }
 0x1ee   : > { %4146 = vmatprep.subr.bf16.mxu1 %v5655_v37 }
 0x1f0   : > { %4106 = vmatpush1.bf16.msra.mxu0 %v5650_v38 }
 0x1f1   : > { %4147 = vmatpush1.bf16.msra.mxu1 %v5653_v59  ;;  %4107 = vmatprep.subr.bf16.mxu0 %v5658_v0 }
 0x1f2   : > { %4148 = vmatprep.subr.bf16.mxu1 %v5661_v39 }
 0x1f4   : > { %4108 = vmatpush1.bf16.msra.mxu0 %v5656_v40 }
 0x1f5   : > { %4149 = vmatpush1.bf16.msra.mxu1 %v5659_v32  ;;  %4109 = vmatprep.subr.bf16.mxu0 %v5664_v41 }
 0x1f6   : > { %4150 = vmatprep.subr.bf16.mxu1 %v5667_v6 }
 0x1f8   : > { %4110 = vmatpush1.bf16.msra.mxu0 %v5662_v9  ;;  %v4179_v9 = vsub.s32 2, %v4170_v3 }
 0x1f9   : > { %4151 = vmatpush1.bf16.msra.mxu1 %v5665_v42  ;;  %4111 = vmatprep.subr.bf16.mxu0 %v5670_v29  ;;  %v4183_v42 = vsub.s32 3, %v4170_v3 }
 0x1fa   : > { %4152 = vmatprep.subr.bf16.mxu1 %v5673_v43 }
 0x1fc   : > { %4112 = vmatpush1.bf16.msra.mxu0 %v5668_v44 }
 0x1fd   : > { %4153 = vmatpush1.bf16.msra.mxu1 %v5671_v45  ;;  %4113 = vmatprep.subr.bf16.mxu0 %v5676_v46 }
 0x1fe   : > { %4154 = vmatprep.subr.bf16.mxu1 %v5679_v15 }
 0x200   : > { %4114 = vmatpush1.bf16.msra.mxu0 %v5674_v16 }
 0x201   : > { %4155 = vmatpush1.bf16.msra.mxu1 %v5677_v12  ;;  %4115 = vmatprep.subr.bf16.mxu0 %v5682_v47 }
 0x202   : > { %4156 = vmatprep.subr.bf16.mxu1 %v5685_v10 }
 0x204   : > { %4116 = vmatpush1.bf16.msra.mxu0 %v5680_v18 }
 0x205   : > { %4157 = vmatpush1.bf16.msra.mxu1 %v5683_v48 }
 0x207   : > { %4118 = vmatmul.mubr.bf16.vlgmr.msra.gmra.mrb[28].mxu0 %v6216_v54  ;;  %v4167_v54 = vld [vmem:[%s7479_s4] sm:$0xf] }
 0x208   : > { %4159 = vmatmul.mubr.bf16.vlgmr.msra.gmra.mrb[28].mxu1 %v6219_v55  ;;  %v4175_v55 = vsub.s32 1, %v4170_v3  ;;  %v4172_v8 = vrot.slane %v4167_v54, %v4171_v4  ;;  %v4180_v45 = vrot.slane %v4167_v54, %v4179_v9  ;;  %v4184_v16 = vrot.slane %v4167_v54, %v4183_v42 }
 0x20a   : > { %v4176_v21 = vrot.slane %v4167_v54, %v4175_v55 }
 0x21a   : > { %v3873_v50 = vpop.f32.mrb[16].mxu0 }
 0x21b   : > { %v3914_v51 = vpop.f32.mrb[16].mxu1  ;;  %v3874_v52 = vadd.f32 %v3873_v50, %v6935_v33  ;;  %v3875_v53 = vpop.f32.mrb[17].mxu0 }
 0x21c   : > { %v3916_v56 = vpop.f32.mrb[17].mxu1  ;;  %v3876_v57 = vadd.f32 %v3875_v53, %v6943_v26  ;;  %v3877_v58 = vpop.f32.mrb[18].mxu0 }
 0x21d   : > { %v3918_v60 = vpop.f32.mrb[18].mxu1  ;;  %v3915_v61 = vadd.f32 %v3914_v51, %v3874_v52  ;;  %v3878_v62 = vpop.f32.mrb[19].mxu0 }
 0x21e   : > { %v3919_v63 = vpop.f32.mrb[19].mxu1  ;;  %v3917_v1 = vadd.f32 %v3916_v56, %v3876_v57 }
 0x25a   : > { %v3955_v33 = vpop.f32.mrb[20].mxu0 }
 0x25b   : > { %v3996_v5 = vpop.f32.mrb[20].mxu1  ;;  %v3956_v7 = vadd.f32 %v3955_v33, %v3915_v61  ;;  %v3957_v26 = vpop.f32.mrb[21].mxu0 }
 0x25c   : > { %v3998_v17 = vpop.f32.mrb[21].mxu1  ;;  %v3958_v19 = vadd.f32 %v3957_v26, %v3917_v1  ;;  %v3959_v13 = vpop.f32.mrb[22].mxu0 }
 0x25d   : > { %v4000_v49 = vpop.f32.mrb[22].mxu1  ;;  %v3997_v22 = vadd.f32 %v3996_v5, %v3956_v7  ;;  %v3960_v24 = vpop.f32.mrb[23].mxu0 }
 0x25e   : > { %v4001_v25 = vpop.f32.mrb[23].mxu1  ;;  %v3999_v27 = vadd.f32 %v3998_v17, %v3958_v19 }
 0x25f   : > { %v4189_v28 = vadd.f32 %v4172_v8, %v3997_v22 }
 0x260   : > { %v4190_v30 = vadd.f32 %v4176_v21, %v3999_v27 }
 0x261   : > { %v4193_v11 = vmax.f32 %v4189_v28, 0.0 }
 0x262   : > { %v4194_v14 = vmax.f32 %v4190_v30, 0.0 }
 0x264   : > { %v4875_v31 = vpack.c.bf16 %v4194_v14, %v4193_v11 }
 0x266   : > { %4213 = vst [vmem:[%s7460_s30] sm:$0xff] %v4875_v31 }
 0x29a   : > { %v4037_v34 = vpop.f32.mrb[24].mxu0 }
 0x29b   : > { %v4078_v35 = vpop.f32.mrb[24].mxu1  ;;  %v4038_v36 = vadd.f32 %v4037_v34, %v7337_v20  ;;  %v4039_v37 = vpop.f32.mrb[25].mxu0 }
 0x29c   : > { %v4080_v38 = vpop.f32.mrb[25].mxu1  ;;  %v4040_v59 = vadd.f32 %v4039_v37, %v7345_v23  ;;  %v4041_v0 = vpop.f32.mrb[26].mxu0 }
 0x29d   : > { %v4082_v39 = vpop.f32.mrb[26].mxu1  ;;  %v4079_v40 = vadd.f32 %v4078_v35, %v4038_v36  ;;  %v4042_v32 = vpop.f32.mrb[27].mxu0 }
 0x29e   : > { %v4083_v41 = vpop.f32.mrb[27].mxu1  ;;  %v4081_v6 = vadd.f32 %v4080_v38, %v4040_v59 }
 0x2da   : > { %v4119_v29 = vpop.f32.mrb[28].mxu0 }
 0x2db   : > { %v4160_v43 = vpop.f32.mrb[28].mxu1  ;;  %v4120_v44 = vadd.f32 %v4119_v29, %v4079_v40  ;;  %v4121_v46 = vpop.f32.mrb[29].mxu0 }
 0x2dc   : > { %v4162_v15 = vpop.f32.mrb[29].mxu1  ;;  %v4122_v20 = vadd.f32 %v4121_v46, %v4081_v6  ;;  %v4123_v12 = vpop.f32.mrb[30].mxu0 }
 0x2dd   : > { %v4164_v47 = vpop.f32.mrb[30].mxu1  ;;  %v4161_v23 = vadd.f32 %v4160_v43, %v4120_v44  ;;  %v4124_v10 = vpop.f32.mrb[31].mxu0 }
 0x2de   : > { %v4165_v18 = vpop.f32.mrb[31].mxu1  ;;  %v4163_v48 = vadd.f32 %v4162_v15, %v4122_v20 }
 0x2df   : > { %v4191_v50 = vadd.f32 %v4180_v45, %v4161_v23 }
 0x2e0   : > { %v4192_v51 = vadd.f32 %v4184_v16, %v4163_v48 }
 0x2e1   : > { %v4195_v52 = vmax.f32 %v4191_v50, 0.0 }
 0x2e2   : > { %v4196_v53 = vmax.f32 %v4192_v51, 0.0 }
 0x2e4   : > { %v4876_v56 = vpack.c.bf16 %v4196_v53, %v4195_v52 }
 0x2e6   : > { %4214 = vst [vmem:[%s7460_s30 + $0x8] sm:$0xff] %v4876_v56 }
 0x2e7 PF: > { %s15_s20 = sadd.s32 1, %s5708_s20   ;;  %s7481_s18 = smov %s5704_s19 }
 0x2e8   : > { %p12_p5 = scmp.ge.s32.totalorder %s15_s20, 4   ;;  %s7482_s19 = smov %s7484_s21 }
 0x2ea   :  { %14 = sbr.rel (!%p12_p5) target bundleno = 2 (0x2), region = 73 }

// kernel: audio_location_forward.9
= control target key start
LH: loop header
LB: loop body
LE: loop exit
PB: predicated region body
PF: predicated region fallthrough
CT: control target
= control target key end

     0   :  { %s5760_s15 = smov 0   ;;  %s5762_s16 = smov 0   ;;  %s7062_s0 = inlined_call_operand.vmem [shape: bf16[16,1536], index: 0, kind: input, shape index: {}]   ;;  %s7063_s1 = inlined_call_operand.vmem [shape: bf16[1536,1024], index: 1, kind: input, shape index: {}]   ;;  %s7064_s2 = inlined_call_operand.vmem [shape: f32[1,1024], index: 2, kind: input, shape index: {}]   ;;  %s7065_s3 = inlined_call_operand.vmem [shape: bf16[1024,1], index: 3, kind: input, shape index: {}]   ;;  %s7066_s4 = inlined_call_operand.vmem [shape: f32[2,16,1], index: 4, kind: output, shape index: {}]  }
   0x1   :  { %s5764_s17 = smov 0   ;;  %s5766_s18 = smov 0  }
   0x2   :  { %s5768_s19 = smov 0  }
   0x3 LB: > { %s26_s20 = sadd.s32 1, %s5729_s18  ;;  %p68_p1 = scmp.ne.s32.totalorder %s5721_s16, %s5717_s15  ;;  %s5733_s19 = sphi %s5768_s19, %s14_s19   ;;  %s5729_s18 = sphi %s5766_s18, %s7070_s18   ;;  %s5725_s17 = sphi %s5764_s17, %s7069_s17   ;;  %s5721_s16 = sphi %s5762_s16, %s7068_s16   ;;  %s5717_s15 = sphi %s5760_s15, %s7067_s15  }
   0x4   : > { %p28_p0 = scmp.ge.s32.totalorder %s26_s20, 2  ;;  %p69_p2 = scmp.eq.s32.totalorder %s5733_s19, 0 }
   0x5   : > { %s61_s22 = sadd.s32 1, %s5721_s16  ;;  %p4502_p5 = scmp.ge.s32.totalorder %s5733_s19, 2 }
   0x6   : > { %s7072_s20 = smov (%p28_p0, %s26_s20), 0  ;;  %p70_p3 = por %p69_p2, %p68_p1 }
   0x7   : > { %s57_s21 = ssub.s32 %s5729_s18, %s7072_s20  ;;  %181 = sbr.rel (%p4502_p5) target bundleno = 210 (0xd2), region = 20 }
   0x8   : > { %p59_p4 = scmp.eq.s32.totalorder %s57_s21, 0 }
   0xa   : > { %s5795_s23 = scalar_select %p59_p4, %s5721_s16, %s61_s22  }
   0xe   : > { %184 = sbr.rel (!%p70_p3) target bundleno = 210 (0xd2), region = 24  ;;  %s186_s24 = sand.u32 (%p70_p3), 1, %s5721_s16  }
   0xf   : > { %s4941_s25 = sshll.u32 (%p70_p3), %s5729_s18, 4  ;;  %s5027_s26 = smul.u32 (%p70_p3), 3072, %s186_s24 }
  0x10   : > { %s5803_s29 = scalar_lea.vmem (%p70_p3), %s7063_s1, %s4941_s25 }
  0x11   : > { %v207_v0 = vld [vmem:[%s5803_s29] sm:$0xff] (%p70_p3)  ;;  %v209_v1 = vld [vmem:[%s5803_s29 + $0x8] sm:$0xff] (%p70_p3)  ;;  %s5811_s30 = scalar_lea.vmem (%p70_p3), [#allocation3], %s5027_s26 }
  0x12   : > { %v211_v2 = vld [vmem:[%s5803_s29 + $0x20] sm:$0xff] (%p70_p3)  ;;  %v213_v3 = vld [vmem:[%s5803_s29 + $0x28] sm:$0xff] (%p70_p3)  ;;  %208 = vst [vmem:[%s5811_s30] sm:$0xff] (%p70_p3), %v207_v0  ;;  %210 = vst [vmem:[%s5811_s30 + $0x8] sm:$0xff] (%p70_p3), %v209_v1 }
  0x13   : > { %v215_v4 = vld [vmem:[%s5803_s29 + $0x40] sm:$0xff] (%p70_p3)  ;;  %v217_v5 = vld [vmem:[%s5803_s29 + $0x48] sm:$0xff] (%p70_p3)  ;;  %212 = vst [vmem:[%s5811_s30 + $0x10] sm:$0xff] (%p70_p3), %v211_v2  ;;  %214 = vst [vmem:[%s5811_s30 + $0x18] sm:$0xff] (%p70_p3), %v213_v3 }
  0x14   : > { %216 = vst [vmem:[%s5811_s30 + $0x20] sm:$0xff] (%p70_p3), %v215_v4  ;;  %218 = vst [vmem:[%s5811_s30 + $0x28] sm:$0xff] (%p70_p3), %v217_v5  ;;  %v219_v6 = vld [vmem:[%s5803_s29 + $0x60] sm:$0xff] (%p70_p3)  ;;  %v221_v7 = vld [vmem:[%s5803_s29 + $0x68] sm:$0xff] (%p70_p3) }
  0x15   : > { %v223_v8 = vld [vmem:[%s5803_s29 + $0x80] sm:$0xff]  ;;  %220 = vst [vmem:[%s5811_s30 + $0x30] sm:$0xff] %v219_v6  ;;  %222 = vst [vmem:[%s5811_s30 + $0x38] sm:$0xff] %v221_v7  ;;  %v225_v9 = vld [vmem:[%s5803_s29 + $0x88] sm:$0xff] }
  0x16   : > { %224 = vst [vmem:[%s5811_s30 + $0x40] sm:$0xff] %v223_v8  ;;  %v227_v10 = vld [vmem:[%s5803_s29 + $0xa0] sm:$0xff]  ;;  %v229_v11 = vld [vmem:[%s5803_s29 + $0xa8] sm:$0xff]  ;;  %226 = vst [vmem:[%s5811_s30 + $0x48] sm:$0xff] %v225_v9 }
  0x17   : > { %228 = vst [vmem:[%s5811_s30 + $0x50] sm:$0xff] %v227_v10  ;;  %230 = vst [vmem:[%s5811_s30 + $0x58] sm:$0xff] %v229_v11  ;;  %v231_v12 = vld [vmem:[%s5803_s29 + $0xc0] sm:$0xff]  ;;  %v233_v13 = vld [vmem:[%s5803_s29 + $0xc8] sm:$0xff] }
  0x18   : > { %v235_v14 = vld [vmem:[%s5803_s29 + $0xe0] sm:$0xff]  ;;  %232 = vst [vmem:[%s5811_s30 + $0x60] sm:$0xff] %v231_v12  ;;  %234 = vst [vmem:[%s5811_s30 + $0x68] sm:$0xff] %v233_v13  ;;  %v237_v15 = vld [vmem:[%s5803_s29 + $0xe8] sm:$0xff] }
  0x19   : > { %236 = vst [vmem:[%s5811_s30 + $0x70] sm:$0xff] %v235_v14  ;;  %v239_v16 = vld [vmem:[%s5803_s29 + $0x100] sm:$0xff]  ;;  %v241_v17 = vld [vmem:[%s5803_s29 + $0x108] sm:$0xff]  ;;  %238 = vst [vmem:[%s5811_s30 + $0x78] sm:$0xff] %v237_v15 }
  0x1a   : > { %240 = vst [vmem:[%s5811_s30 + $0x80] sm:$0xff] %v239_v16  ;;  %242 = vst [vmem:[%s5811_s30 + $0x88] sm:$0xff] %v241_v17  ;;  %v243_v18 = vld [vmem:[%s5803_s29 + $0x120] sm:$0xff]  ;;  %v245_v19 = vld [vmem:[%s5803_s29 + $0x128] sm:$0xff] }
  0x1b   : > { %v247_v20 = vld [vmem:[%s5803_s29 + $0x140] sm:$0xff]  ;;  %244 = vst [vmem:[%s5811_s30 + $0x90] sm:$0xff] %v243_v18  ;;  %246 = vst [vmem:[%s5811_s30 + $0x98] sm:$0xff] %v245_v19  ;;  %v249_v21 = vld [vmem:[%s5803_s29 + $0x148] sm:$0xff] }
  0x1c   : > { %248 = vst [vmem:[%s5811_s30 + $0xa0] sm:$0xff] %v247_v20  ;;  %v251_v22 = vld [vmem:[%s5803_s29 + $0x160] sm:$0xff]  ;;  %v253_v23 = vld [vmem:[%s5803_s29 + $0x168] sm:$0xff]  ;;  %250 = vst [vmem:[%s5811_s30 + $0xa8] sm:$0xff] %v249_v21 }
  0x1d   : > { %252 = vst [vmem:[%s5811_s30 + $0xb0] sm:$0xff] %v251_v22  ;;  %254 = vst [vmem:[%s5811_s30 + $0xb8] sm:$0xff] %v253_v23  ;;  %v255_v24 = vld [vmem:[%s5803_s29 + $0x180] sm:$0xff]  ;;  %v257_v25 = vld [vmem:[%s5803_s29 + $0x188] sm:$0xff] }
  0x1e   : > { %v259_v26 = vld [vmem:[%s5803_s29 + $0x1a0] sm:$0xff]  ;;  %256 = vst [vmem:[%s5811_s30 + $0xc0] sm:$0xff] %v255_v24  ;;  %258 = vst [vmem:[%s5811_s30 + $0xc8] sm:$0xff] %v257_v25  ;;  %v261_v27 = vld [vmem:[%s5803_s29 + $0x1a8] sm:$0xff] }
  0x1f   : > { %260 = vst [vmem:[%s5811_s30 + $0xd0] sm:$0xff] %v259_v26  ;;  %v263_v28 = vld [vmem:[%s5803_s29 + $0x1c0] sm:$0xff]  ;;  %v265_v29 = vld [vmem:[%s5803_s29 + $0x1c8] sm:$0xff]  ;;  %262 = vst [vmem:[%s5811_s30 + $0xd8] sm:$0xff] %v261_v27 }
  0x20   : > { %264 = vst [vmem:[%s5811_s30 + $0xe0] sm:$0xff] %v263_v28  ;;  %266 = vst [vmem:[%s5811_s30 + $0xe8] sm:$0xff] %v265_v29  ;;  %v267_v30 = vld [vmem:[%s5803_s29 + $0x1e0] sm:$0xff]  ;;  %v269_v31 = vld [vmem:[%s5803_s29 + $0x1e8] sm:$0xff] }
  0x21   : > { %v271_v32 = vld [vmem:[%s5803_s29 + $0x200] sm:$0xff]  ;;  %268 = vst [vmem:[%s5811_s30 + $0xf0] sm:$0xff] %v267_v30  ;;  %270 = vst [vmem:[%s5811_s30 + $0xf8] sm:$0xff] %v269_v31  ;;  %v273_v33 = vld [vmem:[%s5803_s29 + $0x208] sm:$0xff] }
  0x22   : > { %272 = vst [vmem:[%s5811_s30 + $0x100] sm:$0xff] %v271_v32  ;;  %v275_v34 = vld [vmem:[%s5803_s29 + $0x220] sm:$0xff]  ;;  %v277_v35 = vld [vmem:[%s5803_s29 + $0x228] sm:$0xff]  ;;  %274 = vst [vmem:[%s5811_s30 + $0x108] sm:$0xff] %v273_v33 }
  0x23   : > { %276 = vst [vmem:[%s5811_s30 + $0x110] sm:$0xff] %v275_v34  ;;  %278 = vst [vmem:[%s5811_s30 + $0x118] sm:$0xff] %v277_v35  ;;  %v279_v36 = vld [vmem:[%s5803_s29 + $0x240] sm:$0xff]  ;;  %v281_v37 = vld [vmem:[%s5803_s29 + $0x248] sm:$0xff] }
  0x24   : > { %v283_v38 = vld [vmem:[%s5803_s29 + $0x260] sm:$0xff]  ;;  %280 = vst [vmem:[%s5811_s30 + $0x120] sm:$0xff] %v279_v36  ;;  %282 = vst [vmem:[%s5811_s30 + $0x128] sm:$0xff] %v281_v37  ;;  %v285_v39 = vld [vmem:[%s5803_s29 + $0x268] sm:$0xff] }
  0x25   : > { %284 = vst [vmem:[%s5811_s30 + $0x130] sm:$0xff] %v283_v38  ;;  %v287_v40 = vld [vmem:[%s5803_s29 + $0x280] sm:$0xff]  ;;  %v289_v41 = vld [vmem:[%s5803_s29 + $0x288] sm:$0xff]  ;;  %286 = vst [vmem:[%s5811_s30 + $0x138] sm:$0xff] %v285_v39 }
  0x26   : > { %288 = vst [vmem:[%s5811_s30 + $0x140] sm:$0xff] %v287_v40  ;;  %290 = vst [vmem:[%s5811_s30 + $0x148] sm:$0xff] %v289_v41  ;;  %v291_v42 = vld [vmem:[%s5803_s29 + $0x2a0] sm:$0xff]  ;;  %v293_v43 = vld [vmem:[%s5803_s29 + $0x2a8] sm:$0xff] }
  0x27   : > { %v295_v44 = vld [vmem:[%s5803_s29 + $0x2c0] sm:$0xff]  ;;  %292 = vst [vmem:[%s5811_s30 + $0x150] sm:$0xff] %v291_v42  ;;  %294 = vst [vmem:[%s5811_s30 + $0x158] sm:$0xff] %v293_v43  ;;  %v297_v45 = vld [vmem:[%s5803_s29 + $0x2c8] sm:$0xff] }
  0x28   : > { %296 = vst [vmem:[%s5811_s30 + $0x160] sm:$0xff] %v295_v44  ;;  %v299_v46 = vld [vmem:[%s5803_s29 + $0x2e0] sm:$0xff]  ;;  %v301_v47 = vld [vmem:[%s5803_s29 + $0x2e8] sm:$0xff]  ;;  %298 = vst [vmem:[%s5811_s30 + $0x168] sm:$0xff] %v297_v45 }
  0x29   : > { %300 = vst [vmem:[%s5811_s30 + $0x170] sm:$0xff] %v299_v46  ;;  %302 = vst [vmem:[%s5811_s30 + $0x178] sm:$0xff] %v301_v47  ;;  %v303_v48 = vld [vmem:[%s5803_s29 + $0x300] sm:$0xff]  ;;  %v305_v49 = vld [vmem:[%s5803_s29 + $0x308] sm:$0xff] }
  0x2a   : > { %v307_v50 = vld [vmem:[%s5803_s29 + $0x320] sm:$0xff]  ;;  %304 = vst [vmem:[%s5811_s30 + $0x180] sm:$0xff] %v303_v48  ;;  %306 = vst [vmem:[%s5811_s30 + $0x188] sm:$0xff] %v305_v49  ;;  %v309_v51 = vld [vmem:[%s5803_s29 + $0x328] sm:$0xff] }
  0x2b   : > { %308 = vst [vmem:[%s5811_s30 + $0x190] sm:$0xff] %v307_v50  ;;  %v311_v52 = vld [vmem:[%s5803_s29 + $0x340] sm:$0xff]  ;;  %v313_v53 = vld [vmem:[%s5803_s29 + $0x348] sm:$0xff]  ;;  %310 = vst [vmem:[%s5811_s30 + $0x198] sm:$0xff] %v309_v51 }
  0x2c   : > { %312 = vst [vmem:[%s5811_s30 + $0x1a0] sm:$0xff] %v311_v52  ;;  %314 = vst [vmem:[%s5811_s30 + $0x1a8] sm:$0xff] %v313_v53  ;;  %v315_v54 = vld [vmem:[%s5803_s29 + $0x360] sm:$0xff]  ;;  %v317_v55 = vld [vmem:[%s5803_s29 + $0x368] sm:$0xff] }
  0x2d   : > { %v319_v56 = vld [vmem:[%s5803_s29 + $0x380] sm:$0xff]  ;;  %316 = vst [vmem:[%s5811_s30 + $0x1b0] sm:$0xff] %v315_v54  ;;  %318 = vst [vmem:[%s5811_s30 + $0x1b8] sm:$0xff] %v317_v55  ;;  %v321_v57 = vld [vmem:[%s5803_s29 + $0x388] sm:$0xff] }
  0x2e   : > { %320 = vst [vmem:[%s5811_s30 + $0x1c0] sm:$0xff] %v319_v56  ;;  %v323_v58 = vld [vmem:[%s5803_s29 + $0x3a0] sm:$0xff]  ;;  %v325_v59 = vld [vmem:[%s5803_s29 + $0x3a8] sm:$0xff]  ;;  %322 = vst [vmem:[%s5811_s30 + $0x1c8] sm:$0xff] %v321_v57 }
  0x2f   : > { %324 = vst [vmem:[%s5811_s30 + $0x1d0] sm:$0xff] %v323_v58  ;;  %326 = vst [vmem:[%s5811_s30 + $0x1d8] sm:$0xff] %v325_v59  ;;  %v327_v60 = vld [vmem:[%s5803_s29 + $0x3c0] sm:$0xff]  ;;  %v329_v61 = vld [vmem:[%s5803_s29 + $0x3c8] sm:$0xff] }
  0x30   : > { %v331_v62 = vld [vmem:[%s5803_s29 + $0x3e0] sm:$0xff]  ;;  %328 = vst [vmem:[%s5811_s30 + $0x1e0] sm:$0xff] %v327_v60  ;;  %330 = vst [vmem:[%s5811_s30 + $0x1e8] sm:$0xff] %v329_v61  ;;  %v333_v63 = vld [vmem:[%s5803_s29 + $0x3e8] sm:$0xff] }
  0x31   : > { %332 = vst [vmem:[%s5811_s30 + $0x1f0] sm:$0xff] %v331_v62  ;;  %v335_v0 = vld [vmem:[%s5803_s29 + $0x400] sm:$0xff]  ;;  %v337_v1 = vld [vmem:[%s5803_s29 + $0x408] sm:$0xff]  ;;  %334 = vst [vmem:[%s5811_s30 + $0x1f8] sm:$0xff] %v333_v63 }
  0x32   : > { %336 = vst [vmem:[%s5811_s30 + $0x200] sm:$0xff] %v335_v0  ;;  %338 = vst [vmem:[%s5811_s30 + $0x208] sm:$0xff] %v337_v1  ;;  %v339_v2 = vld [vmem:[%s5803_s29 + $0x420] sm:$0xff]  ;;  %v341_v3 = vld [vmem:[%s5803_s29 + $0x428] sm:$0xff] }
  0x33   : > { %v343_v4 = vld [vmem:[%s5803_s29 + $0x440] sm:$0xff]  ;;  %340 = vst [vmem:[%s5811_s30 + $0x210] sm:$0xff] %v339_v2  ;;  %342 = vst [vmem:[%s5811_s30 + $0x218] sm:$0xff] %v341_v3  ;;  %v345_v5 = vld [vmem:[%s5803_s29 + $0x448] sm:$0xff] }
  0x34   : > { %344 = vst [vmem:[%s5811_s30 + $0x220] sm:$0xff] %v343_v4  ;;  %v347_v6 = vld [vmem:[%s5803_s29 + $0x460] sm:$0xff]  ;;  %v349_v7 = vld [vmem:[%s5803_s29 + $0x468] sm:$0xff]  ;;  %346 = vst [vmem:[%s5811_s30 + $0x228] sm:$0xff] %v345_v5 }
  0x35   : > { %348 = vst [vmem:[%s5811_s30 + $0x230] sm:$0xff] %v347_v6  ;;  %350 = vst [vmem:[%s5811_s30 + $0x238] sm:$0xff] %v349_v7  ;;  %v351_v8 = vld [vmem:[%s5803_s29 + $0x480] sm:$0xff]  ;;  %v353_v9 = vld [vmem:[%s5803_s29 + $0x488] sm:$0xff] }
  0x36   : > { %v355_v10 = vld [vmem:[%s5803_s29 + $0x4a0] sm:$0xff]  ;;  %352 = vst [vmem:[%s5811_s30 + $0x240] sm:$0xff] %v351_v8  ;;  %354 = vst [vmem:[%s5811_s30 + $0x248] sm:$0xff] %v353_v9  ;;  %v357_v11 = vld [vmem:[%s5803_s29 + $0x4a8] sm:$0xff] }
  0x37   : > { %356 = vst [vmem:[%s5811_s30 + $0x250] sm:$0xff] %v355_v10  ;;  %v359_v12 = vld [vmem:[%s5803_s29 + $0x4c0] sm:$0xff]  ;;  %v361_v13 = vld [vmem:[%s5803_s29 + $0x4c8] sm:$0xff]  ;;  %358 = vst [vmem:[%s5811_s30 + $0x258] sm:$0xff] %v357_v11 }
  0x38   : > { %360 = vst [vmem:[%s5811_s30 + $0x260] sm:$0xff] %v359_v12  ;;  %362 = vst [vmem:[%s5811_s30 + $0x268] sm:$0xff] %v361_v13  ;;  %v363_v14 = vld [vmem:[%s5803_s29 + $0x4e0] sm:$0xff]  ;;  %v365_v15 = vld [vmem:[%s5803_s29 + $0x4e8] sm:$0xff] }
  0x39   : > { %v367_v16 = vld [vmem:[%s5803_s29 + $0x500] sm:$0xff]  ;;  %364 = vst [vmem:[%s5811_s30 + $0x270] sm:$0xff] %v363_v14  ;;  %366 = vst [vmem:[%s5811_s30 + $0x278] sm:$0xff] %v365_v15  ;;  %v369_v17 = vld [vmem:[%s5803_s29 + $0x508] sm:$0xff] }
  0x3a   : > { %368 = vst [vmem:[%s5811_s30 + $0x280] sm:$0xff] %v367_v16  ;;  %v371_v18 = vld [vmem:[%s5803_s29 + $0x520] sm:$0xff]  ;;  %v373_v19 = vld [vmem:[%s5803_s29 + $0x528] sm:$0xff]  ;;  %370 = vst [vmem:[%s5811_s30 + $0x288] sm:$0xff] %v369_v17 }
  0x3b   : > { %372 = vst [vmem:[%s5811_s30 + $0x290] sm:$0xff] %v371_v18  ;;  %374 = vst [vmem:[%s5811_s30 + $0x298] sm:$0xff] %v373_v19  ;;  %v375_v20 = vld [vmem:[%s5803_s29 + $0x540] sm:$0xff]  ;;  %v377_v21 = vld [vmem:[%s5803_s29 + $0x548] sm:$0xff] }
  0x3c   : > { %v379_v22 = vld [vmem:[%s5803_s29 + $0x560] sm:$0xff]  ;;  %376 = vst [vmem:[%s5811_s30 + $0x2a0] sm:$0xff] %v375_v20  ;;  %378 = vst [vmem:[%s5811_s30 + $0x2a8] sm:$0xff] %v377_v21  ;;  %v381_v23 = vld [vmem:[%s5803_s29 + $0x568] sm:$0xff] }
  0x3d   : > { %380 = vst [vmem:[%s5811_s30 + $0x2b0] sm:$0xff] %v379_v22  ;;  %v383_v24 = vld [vmem:[%s5803_s29 + $0x580] sm:$0xff]  ;;  %v385_v25 = vld [vmem:[%s5803_s29 + $0x588] sm:$0xff]  ;;  %382 = vst [vmem:[%s5811_s30 + $0x2b8] sm:$0xff] %v381_v23 }
  0x3e   : > { %384 = vst [vmem:[%s5811_s30 + $0x2c0] sm:$0xff] %v383_v24  ;;  %386 = vst [vmem:[%s5811_s30 + $0x2c8] sm:$0xff] %v385_v25  ;;  %v387_v26 = vld [vmem:[%s5803_s29 + $0x5a0] sm:$0xff]  ;;  %v389_v27 = vld [vmem:[%s5803_s29 + $0x5a8] sm:$0xff] }
  0x3f   : > { %v391_v28 = vld [vmem:[%s5803_s29 + $0x5c0] sm:$0xff]  ;;  %388 = vst [vmem:[%s5811_s30 + $0x2d0] sm:$0xff] %v387_v26  ;;  %390 = vst [vmem:[%s5811_s30 + $0x2d8] sm:$0xff] %v389_v27  ;;  %v393_v29 = vld [vmem:[%s5803_s29 + $0x5c8] sm:$0xff] }
  0x40   : > { %392 = vst [vmem:[%s5811_s30 + $0x2e0] sm:$0xff] %v391_v28  ;;  %v395_v30 = vld [vmem:[%s5803_s29 + $0x5e0] sm:$0xff]  ;;  %v397_v31 = vld [vmem:[%s5803_s29 + $0x5e8] sm:$0xff]  ;;  %394 = vst [vmem:[%s5811_s30 + $0x2e8] sm:$0xff] %v393_v29 }
  0x41   : > { %396 = vst [vmem:[%s5811_s30 + $0x2f0] sm:$0xff] %v395_v30  ;;  %398 = vst [vmem:[%s5811_s30 + $0x2f8] sm:$0xff] %v397_v31  ;;  %v399_v32 = vld [vmem:[%s5803_s29 + $0x600] sm:$0xff]  ;;  %v401_v33 = vld [vmem:[%s5803_s29 + $0x608] sm:$0xff] }
  0x42   : > { %v403_v34 = vld [vmem:[%s5803_s29 + $0x620] sm:$0xff]  ;;  %400 = vst [vmem:[%s5811_s30 + $0x300] sm:$0xff] %v399_v32  ;;  %402 = vst [vmem:[%s5811_s30 + $0x308] sm:$0xff] %v401_v33  ;;  %v405_v35 = vld [vmem:[%s5803_s29 + $0x628] sm:$0xff] }
  0x43   : > { %404 = vst [vmem:[%s5811_s30 + $0x310] sm:$0xff] %v403_v34  ;;  %v407_v36 = vld [vmem:[%s5803_s29 + $0x640] sm:$0xff]  ;;  %v409_v37 = vld [vmem:[%s5803_s29 + $0x648] sm:$0xff]  ;;  %406 = vst [vmem:[%s5811_s30 + $0x318] sm:$0xff] %v405_v35 }
  0x44   : > { %408 = vst [vmem:[%s5811_s30 + $0x320] sm:$0xff] %v407_v36  ;;  %410 = vst [vmem:[%s5811_s30 + $0x328] sm:$0xff] %v409_v37  ;;  %v411_v38 = vld [vmem:[%s5803_s29 + $0x660] sm:$0xff]  ;;  %v413_v39 = vld [vmem:[%s5803_s29 + $0x668] sm:$0xff] }
  0x45   : > { %v415_v40 = vld [vmem:[%s5803_s29 + $0x680] sm:$0xff]  ;;  %412 = vst [vmem:[%s5811_s30 + $0x330] sm:$0xff] %v411_v38  ;;  %414 = vst [vmem:[%s5811_s30 + $0x338] sm:$0xff] %v413_v39  ;;  %v417_v41 = vld [vmem:[%s5803_s29 + $0x688] sm:$0xff] }
  0x46   : > { %416 = vst [vmem:[%s5811_s30 + $0x340] sm:$0xff] %v415_v40  ;;  %v419_v42 = vld [vmem:[%s5803_s29 + $0x6a0] sm:$0xff]  ;;  %v421_v43 = vld [vmem:[%s5803_s29 + $0x6a8] sm:$0xff]  ;;  %418 = vst [vmem:[%s5811_s30 + $0x348] sm:$0xff] %v417_v41 }
  0x47   : > { %420 = vst [vmem:[%s5811_s30 + $0x350] sm:$0xff] %v419_v42  ;;  %422 = vst [vmem:[%s5811_s30 + $0x358] sm:$0xff] %v421_v43  ;;  %v423_v44 = vld [vmem:[%s5803_s29 + $0x6c0] sm:$0xff]  ;;  %v425_v45 = vld [vmem:[%s5803_s29 + $0x6c8] sm:$0xff] }
  0x48   : > { %v427_v46 = vld [vmem:[%s5803_s29 + $0x6e0] sm:$0xff]  ;;  %424 = vst [vmem:[%s5811_s30 + $0x360] sm:$0xff] %v423_v44  ;;  %426 = vst [vmem:[%s5811_s30 + $0x368] sm:$0xff] %v425_v45  ;;  %v429_v47 = vld [vmem:[%s5803_s29 + $0x6e8] sm:$0xff] }
  0x49   : > { %428 = vst [vmem:[%s5811_s30 + $0x370] sm:$0xff] %v427_v46  ;;  %v431_v48 = vld [vmem:[%s5803_s29 + $0x700] sm:$0xff]  ;;  %v433_v49 = vld [vmem:[%s5803_s29 + $0x708] sm:$0xff]  ;;  %430 = vst [vmem:[%s5811_s30 + $0x378] sm:$0xff] %v429_v47 }
  0x4a   : > { %432 = vst [vmem:[%s5811_s30 + $0x380] sm:$0xff] %v431_v48  ;;  %434 = vst [vmem:[%s5811_s30 + $0x388] sm:$0xff] %v433_v49  ;;  %v435_v50 = vld [vmem:[%s5803_s29 + $0x720] sm:$0xff]  ;;  %v437_v51 = vld [vmem:[%s5803_s29 + $0x728] sm:$0xff] }
  0x4b   : > { %v439_v52 = vld [vmem:[%s5803_s29 + $0x740] sm:$0xff]  ;;  %436 = vst [vmem:[%s5811_s30 + $0x390] sm:$0xff] %v435_v50  ;;  %438 = vst [vmem:[%s5811_s30 + $0x398] sm:$0xff] %v437_v51  ;;  %v441_v53 = vld [vmem:[%s5803_s29 + $0x748] sm:$0xff] }
  0x4c   : > { %440 = vst [vmem:[%s5811_s30 + $0x3a0] sm:$0xff] %v439_v52  ;;  %v443_v54 = vld [vmem:[%s5803_s29 + $0x760] sm:$0xff]  ;;  %v445_v55 = vld [vmem:[%s5803_s29 + $0x768] sm:$0xff]  ;;  %442 = vst [vmem:[%s5811_s30 + $0x3a8] sm:$0xff] %v441_v53 }
  0x4d   : > { %444 = vst [vmem:[%s5811_s30 + $0x3b0] sm:$0xff] %v443_v54  ;;  %446 = vst [vmem:[%s5811_s30 + $0x3b8] sm:$0xff] %v445_v55  ;;  %v447_v56 = vld [vmem:[%s5803_s29 + $0x780] sm:$0xff]  ;;  %v449_v57 = vld [vmem:[%s5803_s29 + $0x788] sm:$0xff] }
  0x4e   : > { %v451_v58 = vld [vmem:[%s5803_s29 + $0x7a0] sm:$0xff]  ;;  %448 = vst [vmem:[%s5811_s30 + $0x3c0] sm:$0xff] %v447_v56  ;;  %450 = vst [vmem:[%s5811_s30 + $0x3c8] sm:$0xff] %v449_v57  ;;  %v453_v59 = vld [vmem:[%s5803_s29 + $0x7a8] sm:$0xff] }
  0x4f   : > { %452 = vst [vmem:[%s5811_s30 + $0x3d0] sm:$0xff] %v451_v58  ;;  %v455_v60 = vld [vmem:[%s5803_s29 + $0x7c0] sm:$0xff]  ;;  %v457_v61 = vld [vmem:[%s5803_s29 + $0x7c8] sm:$0xff]  ;;  %454 = vst [vmem:[%s5811_s30 + $0x3d8] sm:$0xff] %v453_v59 }
  0x50   : > { %456 = vst [vmem:[%s5811_s30 + $0x3e0] sm:$0xff] %v455_v60  ;;  %458 = vst [vmem:[%s5811_s30 + $0x3e8] sm:$0xff] %v457_v61  ;;  %v459_v62 = vld [vmem:[%s5803_s29 + $0x7e0] sm:$0xff]  ;;  %v461_v63 = vld [vmem:[%s5803_s29 + $0x7e8] sm:$0xff] }
  0x51   : > { %v463_v0 = vld [vmem:[%s5803_s29 + $0x800] sm:$0xff]  ;;  %460 = vst [vmem:[%s5811_s30 + $0x3f0] sm:$0xff] %v459_v62  ;;  %462 = vst [vmem:[%s5811_s30 + $0x3f8] sm:$0xff] %v461_v63  ;;  %v465_v1 = vld [vmem:[%s5803_s29 + $0x808] sm:$0xff] }
  0x52   : > { %464 = vst [vmem:[%s5811_s30 + $0x400] sm:$0xff] %v463_v0  ;;  %v467_v2 = vld [vmem:[%s5803_s29 + $0x820] sm:$0xff]  ;;  %v469_v3 = vld [vmem:[%s5803_s29 + $0x828] sm:$0xff]  ;;  %466 = vst [vmem:[%s5811_s30 + $0x408] sm:$0xff] %v465_v1 }
  0x53   : > { %468 = vst [vmem:[%s5811_s30 + $0x410] sm:$0xff] %v467_v2  ;;  %470 = vst [vmem:[%s5811_s30 + $0x418] sm:$0xff] %v469_v3  ;;  %v471_v4 = vld [vmem:[%s5803_s29 + $0x840] sm:$0xff]  ;;  %v473_v5 = vld [vmem:[%s5803_s29 + $0x848] sm:$0xff] }
  0x54   : > { %v475_v6 = vld [vmem:[%s5803_s29 + $0x860] sm:$0xff]  ;;  %472 = vst [vmem:[%s5811_s30 + $0x420] sm:$0xff] %v471_v4  ;;  %474 = vst [vmem:[%s5811_s30 + $0x428] sm:$0xff] %v473_v5  ;;  %v477_v7 = vld [vmem:[%s5803_s29 + $0x868] sm:$0xff] }
  0x55   : > { %476 = vst [vmem:[%s5811_s30 + $0x430] sm:$0xff] %v475_v6  ;;  %v479_v8 = vld [vmem:[%s5803_s29 + $0x880] sm:$0xff]  ;;  %v481_v9 = vld [vmem:[%s5803_s29 + $0x888] sm:$0xff]  ;;  %478 = vst [vmem:[%s5811_s30 + $0x438] sm:$0xff] %v477_v7 }
  0x56   : > { %480 = vst [vmem:[%s5811_s30 + $0x440] sm:$0xff] %v479_v8  ;;  %482 = vst [vmem:[%s5811_s30 + $0x448] sm:$0xff] %v481_v9  ;;  %v483_v10 = vld [vmem:[%s5803_s29 + $0x8a0] sm:$0xff]  ;;  %v485_v11 = vld [vmem:[%s5803_s29 + $0x8a8] sm:$0xff] }
  0x57   : > { %v487_v12 = vld [vmem:[%s5803_s29 + $0x8c0] sm:$0xff]  ;;  %484 = vst [vmem:[%s5811_s30 + $0x450] sm:$0xff] %v483_v10  ;;  %486 = vst [vmem:[%s5811_s30 + $0x458] sm:$0xff] %v485_v11  ;;  %v489_v13 = vld [vmem:[%s5803_s29 + $0x8c8] sm:$0xff] }
  0x58   : > { %488 = vst [vmem:[%s5811_s30 + $0x460] sm:$0xff] %v487_v12  ;;  %v491_v14 = vld [vmem:[%s5803_s29 + $0x8e0] sm:$0xff]  ;;  %v493_v15 = vld [vmem:[%s5803_s29 + $0x8e8] sm:$0xff]  ;;  %490 = vst [vmem:[%s5811_s30 + $0x468] sm:$0xff] %v489_v13 }
  0x59   : > { %492 = vst [vmem:[%s5811_s30 + $0x470] sm:$0xff] %v491_v14  ;;  %494 = vst [vmem:[%s5811_s30 + $0x478] sm:$0xff] %v493_v15  ;;  %v495_v16 = vld [vmem:[%s5803_s29 + $0x900] sm:$0xff]  ;;  %v497_v17 = vld [vmem:[%s5803_s29 + $0x908] sm:$0xff] }
  0x5a   : > { %v499_v18 = vld [vmem:[%s5803_s29 + $0x920] sm:$0xff]  ;;  %496 = vst [vmem:[%s5811_s30 + $0x480] sm:$0xff] %v495_v16  ;;  %498 = vst [vmem:[%s5811_s30 + $0x488] sm:$0xff] %v497_v17  ;;  %v501_v19 = vld [vmem:[%s5803_s29 + $0x928] sm:$0xff] }
  0x5b   : > { %500 = vst [vmem:[%s5811_s30 + $0x490] sm:$0xff] %v499_v18  ;;  %v503_v20 = vld [vmem:[%s5803_s29 + $0x940] sm:$0xff]  ;;  %v505_v21 = vld [vmem:[%s5803_s29 + $0x948] sm:$0xff]  ;;  %502 = vst [vmem:[%s5811_s30 + $0x498] sm:$0xff] %v501_v19 }
  0x5c   : > { %504 = vst [vmem:[%s5811_s30 + $0x4a0] sm:$0xff] %v503_v20  ;;  %506 = vst [vmem:[%s5811_s30 + $0x4a8] sm:$0xff] %v505_v21  ;;  %v507_v22 = vld [vmem:[%s5803_s29 + $0x960] sm:$0xff]  ;;  %v509_v23 = vld [vmem:[%s5803_s29 + $0x968] sm:$0xff] }
  0x5d   : > { %v511_v24 = vld [vmem:[%s5803_s29 + $0x980] sm:$0xff]  ;;  %508 = vst [vmem:[%s5811_s30 + $0x4b0] sm:$0xff] %v507_v22  ;;  %510 = vst [vmem:[%s5811_s30 + $0x4b8] sm:$0xff] %v509_v23  ;;  %v513_v25 = vld [vmem:[%s5803_s29 + $0x988] sm:$0xff] }
  0x5e   : > { %512 = vst [vmem:[%s5811_s30 + $0x4c0] sm:$0xff] %v511_v24  ;;  %v515_v26 = vld [vmem:[%s5803_s29 + $0x9a0] sm:$0xff]  ;;  %v517_v27 = vld [vmem:[%s5803_s29 + $0x9a8] sm:$0xff]  ;;  %514 = vst [vmem:[%s5811_s30 + $0x4c8] sm:$0xff] %v513_v25 }
  0x5f   : > { %516 = vst [vmem:[%s5811_s30 + $0x4d0] sm:$0xff] %v515_v26  ;;  %518 = vst [vmem:[%s5811_s30 + $0x4d8] sm:$0xff] %v517_v27  ;;  %v519_v28 = vld [vmem:[%s5803_s29 + $0x9c0] sm:$0xff]  ;;  %v521_v29 = vld [vmem:[%s5803_s29 + $0x9c8] sm:$0xff] }
  0x60   : > { %v523_v30 = vld [vmem:[%s5803_s29 + $0x9e0] sm:$0xff]  ;;  %520 = vst [vmem:[%s5811_s30 + $0x4e0] sm:$0xff] %v519_v28  ;;  %522 = vst [vmem:[%s5811_s30 + $0x4e8] sm:$0xff] %v521_v29  ;;  %v525_v31 = vld [vmem:[%s5803_s29 + $0x9e8] sm:$0xff] }
  0x61   : > { %524 = vst [vmem:[%s5811_s30 + $0x4f0] sm:$0xff] %v523_v30  ;;  %v527_v32 = vld [vmem:[%s5803_s29 + $0xa00] sm:$0xff]  ;;  %v529_v33 = vld [vmem:[%s5803_s29 + $0xa08] sm:$0xff]  ;;  %526 = vst [vmem:[%s5811_s30 + $0x4f8] sm:$0xff] %v525_v31 }
  0x62   : > { %528 = vst [vmem:[%s5811_s30 + $0x500] sm:$0xff] %v527_v32  ;;  %530 = vst [vmem:[%s5811_s30 + $0x508] sm:$0xff] %v529_v33  ;;  %v531_v34 = vld [vmem:[%s5803_s29 + $0xa20] sm:$0xff]  ;;  %v533_v35 = vld [vmem:[%s5803_s29 + $0xa28] sm:$0xff] }
  0x63   : > { %v535_v36 = vld [vmem:[%s5803_s29 + $0xa40] sm:$0xff]  ;;  %532 = vst [vmem:[%s5811_s30 + $0x510] sm:$0xff] %v531_v34  ;;  %534 = vst [vmem:[%s5811_s30 + $0x518] sm:$0xff] %v533_v35  ;;  %v537_v37 = vld [vmem:[%s5803_s29 + $0xa48] sm:$0xff] }
  0x64   : > { %536 = vst [vmem:[%s5811_s30 + $0x520] sm:$0xff] %v535_v36  ;;  %v539_v38 = vld [vmem:[%s5803_s29 + $0xa60] sm:$0xff]  ;;  %v541_v39 = vld [vmem:[%s5803_s29 + $0xa68] sm:$0xff]  ;;  %538 = vst [vmem:[%s5811_s30 + $0x528] sm:$0xff] %v537_v37 }
  0x65   : > { %540 = vst [vmem:[%s5811_s30 + $0x530] sm:$0xff] %v539_v38  ;;  %542 = vst [vmem:[%s5811_s30 + $0x538] sm:$0xff] %v541_v39  ;;  %v543_v40 = vld [vmem:[%s5803_s29 + $0xa80] sm:$0xff]  ;;  %v545_v41 = vld [vmem:[%s5803_s29 + $0xa88] sm:$0xff] }
  0x66   : > { %v547_v42 = vld [vmem:[%s5803_s29 + $0xaa0] sm:$0xff]  ;;  %544 = vst [vmem:[%s5811_s30 + $0x540] sm:$0xff] %v543_v40  ;;  %546 = vst [vmem:[%s5811_s30 + $0x548] sm:$0xff] %v545_v41  ;;  %v549_v43 = vld [vmem:[%s5803_s29 + $0xaa8] sm:$0xff] }
  0x67   : > { %548 = vst [vmem:[%s5811_s30 + $0x550] sm:$0xff] %v547_v42  ;;  %v551_v44 = vld [vmem:[%s5803_s29 + $0xac0] sm:$0xff]  ;;  %v553_v45 = vld [vmem:[%s5803_s29 + $0xac8] sm:$0xff]  ;;  %550 = vst [vmem:[%s5811_s30 + $0x558] sm:$0xff] %v549_v43 }
  0x68   : > { %552 = vst [vmem:[%s5811_s30 + $0x560] sm:$0xff] %v551_v44  ;;  %554 = vst [vmem:[%s5811_s30 + $0x568] sm:$0xff] %v553_v45  ;;  %v555_v46 = vld [vmem:[%s5803_s29 + $0xae0] sm:$0xff]  ;;  %v557_v47 = vld [vmem:[%s5803_s29 + $0xae8] sm:$0xff] }
  0x69   : > { %v559_v48 = vld [vmem:[%s5803_s29 + $0xb00] sm:$0xff]  ;;  %556 = vst [vmem:[%s5811_s30 + $0x570] sm:$0xff] %v555_v46  ;;  %558 = vst [vmem:[%s5811_s30 + $0x578] sm:$0xff] %v557_v47  ;;  %v561_v49 = vld [vmem:[%s5803_s29 + $0xb08] sm:$0xff] }
  0x6a   : > { %560 = vst [vmem:[%s5811_s30 + $0x580] sm:$0xff] %v559_v48  ;;  %v563_v50 = vld [vmem:[%s5803_s29 + $0xb20] sm:$0xff]  ;;  %v565_v51 = vld [vmem:[%s5803_s29 + $0xb28] sm:$0xff]  ;;  %562 = vst [vmem:[%s5811_s30 + $0x588] sm:$0xff] %v561_v49 }
  0x6b   : > { %564 = vst [vmem:[%s5811_s30 + $0x590] sm:$0xff] %v563_v50  ;;  %566 = vst [vmem:[%s5811_s30 + $0x598] sm:$0xff] %v565_v51  ;;  %v567_v52 = vld [vmem:[%s5803_s29 + $0xb40] sm:$0xff]  ;;  %v569_v53 = vld [vmem:[%s5803_s29 + $0xb48] sm:$0xff] }
  0x6c   : > { %v571_v54 = vld [vmem:[%s5803_s29 + $0xb60] sm:$0xff]  ;;  %568 = vst [vmem:[%s5811_s30 + $0x5a0] sm:$0xff] %v567_v52  ;;  %570 = vst [vmem:[%s5811_s30 + $0x5a8] sm:$0xff] %v569_v53  ;;  %v573_v55 = vld [vmem:[%s5803_s29 + $0xb68] sm:$0xff] }
  0x6d   : > { %572 = vst [vmem:[%s5811_s30 + $0x5b0] sm:$0xff] %v571_v54  ;;  %v575_v56 = vld [vmem:[%s5803_s29 + $0xb80] sm:$0xff]  ;;  %v577_v57 = vld [vmem:[%s5803_s29 + $0xb88] sm:$0xff]  ;;  %574 = vst [vmem:[%s5811_s30 + $0x5b8] sm:$0xff] %v573_v55 }
  0x6e   : > { %576 = vst [vmem:[%s5811_s30 + $0x5c0] sm:$0xff] %v575_v56  ;;  %578 = vst [vmem:[%s5811_s30 + $0x5c8] sm:$0xff] %v577_v57  ;;  %v579_v58 = vld [vmem:[%s5803_s29 + $0xba0] sm:$0xff]  ;;  %v581_v59 = vld [vmem:[%s5803_s29 + $0xba8] sm:$0xff] }
  0x6f   : > { %v583_v60 = vld [vmem:[%s5803_s29 + $0xbc0] sm:$0xff]  ;;  %580 = vst [vmem:[%s5811_s30 + $0x5d0] sm:$0xff] %v579_v58  ;;  %582 = vst [vmem:[%s5811_s30 + $0x5d8] sm:$0xff] %v581_v59  ;;  %v585_v61 = vld [vmem:[%s5803_s29 + $0xbc8] sm:$0xff] }
  0x70   : > { %584 = vst [vmem:[%s5811_s30 + $0x5e0] sm:$0xff] %v583_v60  ;;  %v587_v62 = vld [vmem:[%s5803_s29 + $0xbe0] sm:$0xff]  ;;  %v589_v63 = vld [vmem:[%s5803_s29 + $0xbe8] sm:$0xff]  ;;  %586 = vst [vmem:[%s5811_s30 + $0x5e8] sm:$0xff] %v585_v61 }
  0x71   : > { %588 = vst [vmem:[%s5811_s30 + $0x5f0] sm:$0xff] %v587_v62  ;;  %590 = vst [vmem:[%s5811_s30 + $0x5f8] sm:$0xff] %v589_v63  ;;  %v591_v0 = vld [vmem:[%s5803_s29 + $0xc00] sm:$0xff]  ;;  %v593_v1 = vld [vmem:[%s5803_s29 + $0xc08] sm:$0xff] }
  0x72   : > { %v595_v2 = vld [vmem:[%s5803_s29 + $0xc20] sm:$0xff]  ;;  %592 = vst [vmem:[%s5811_s30 + $0x600] sm:$0xff] %v591_v0  ;;  %594 = vst [vmem:[%s5811_s30 + $0x608] sm:$0xff] %v593_v1  ;;  %v597_v3 = vld [vmem:[%s5803_s29 + $0xc28] sm:$0xff] }
  0x73   : > { %596 = vst [vmem:[%s5811_s30 + $0x610] sm:$0xff] %v595_v2  ;;  %v599_v4 = vld [vmem:[%s5803_s29 + $0xc40] sm:$0xff]  ;;  %v601_v5 = vld [vmem:[%s5803_s29 + $0xc48] sm:$0xff]  ;;  %598 = vst [vmem:[%s5811_s30 + $0x618] sm:$0xff] %v597_v3 }
  0x74   : > { %600 = vst [vmem:[%s5811_s30 + $0x620] sm:$0xff] %v599_v4  ;;  %602 = vst [vmem:[%s5811_s30 + $0x628] sm:$0xff] %v601_v5  ;;  %v603_v6 = vld [vmem:[%s5803_s29 + $0xc60] sm:$0xff]  ;;  %v605_v7 = vld [vmem:[%s5803_s29 + $0xc68] sm:$0xff] }
  0x75   : > { %v607_v8 = vld [vmem:[%s5803_s29 + $0xc80] sm:$0xff]  ;;  %604 = vst [vmem:[%s5811_s30 + $0x630] sm:$0xff] %v603_v6  ;;  %606 = vst [vmem:[%s5811_s30 + $0x638] sm:$0xff] %v605_v7  ;;  %v609_v9 = vld [vmem:[%s5803_s29 + $0xc88] sm:$0xff] }
  0x76   : > { %608 = vst [vmem:[%s5811_s30 + $0x640] sm:$0xff] %v607_v8  ;;  %v611_v10 = vld [vmem:[%s5803_s29 + $0xca0] sm:$0xff]  ;;  %v613_v11 = vld [vmem:[%s5803_s29 + $0xca8] sm:$0xff]  ;;  %610 = vst [vmem:[%s5811_s30 + $0x648] sm:$0xff] %v609_v9 }
  0x77   : > { %612 = vst [vmem:[%s5811_s30 + $0x650] sm:$0xff] %v611_v10  ;;  %614 = vst [vmem:[%s5811_s30 + $0x658] sm:$0xff] %v613_v11  ;;  %v615_v12 = vld [vmem:[%s5803_s29 + $0xcc0] sm:$0xff]  ;;  %v617_v13 = vld [vmem:[%s5803_s29 + $0xcc8] sm:$0xff] }
  0x78   : > { %v619_v14 = vld [vmem:[%s5803_s29 + $0xce0] sm:$0xff]  ;;  %616 = vst [vmem:[%s5811_s30 + $0x660] sm:$0xff] %v615_v12  ;;  %618 = vst [vmem:[%s5811_s30 + $0x668] sm:$0xff] %v617_v13  ;;  %v621_v15 = vld [vmem:[%s5803_s29 + $0xce8] sm:$0xff] }
  0x79   : > { %620 = vst [vmem:[%s5811_s30 + $0x670] sm:$0xff] %v619_v14  ;;  %v623_v16 = vld [vmem:[%s5803_s29 + $0xd00] sm:$0xff]  ;;  %v625_v17 = vld [vmem:[%s5803_s29 + $0xd08] sm:$0xff]  ;;  %622 = vst [vmem:[%s5811_s30 + $0x678] sm:$0xff] %v621_v15 }
  0x7a   : > { %624 = vst [vmem:[%s5811_s30 + $0x680] sm:$0xff] %v623_v16  ;;  %626 = vst [vmem:[%s5811_s30 + $0x688] sm:$0xff] %v625_v17  ;;  %v627_v18 = vld [vmem:[%s5803_s29 + $0xd20] sm:$0xff]  ;;  %v629_v19 = vld [vmem:[%s5803_s29 + $0xd28] sm:$0xff] }
  0x7b   : > { %v631_v20 = vld [vmem:[%s5803_s29 + $0xd40] sm:$0xff]  ;;  %628 = vst [vmem:[%s5811_s30 + $0x690] sm:$0xff] %v627_v18  ;;  %630 = vst [vmem:[%s5811_s30 + $0x698] sm:$0xff] %v629_v19  ;;  %v633_v21 = vld [vmem:[%s5803_s29 + $0xd48] sm:$0xff] }
  0x7c   : > { %632 = vst [vmem:[%s5811_s30 + $0x6a0] sm:$0xff] %v631_v20  ;;  %v635_v22 = vld [vmem:[%s5803_s29 + $0xd60] sm:$0xff]  ;;  %v637_v23 = vld [vmem:[%s5803_s29 + $0xd68] sm:$0xff]  ;;  %634 = vst [vmem:[%s5811_s30 + $0x6a8] sm:$0xff] %v633_v21 }
  0x7d   : > { %636 = vst [vmem:[%s5811_s30 + $0x6b0] sm:$0xff] %v635_v22  ;;  %638 = vst [vmem:[%s5811_s30 + $0x6b8] sm:$0xff] %v637_v23  ;;  %v639_v24 = vld [vmem:[%s5803_s29 + $0xd80] sm:$0xff]  ;;  %v641_v25 = vld [vmem:[%s5803_s29 + $0xd88] sm:$0xff] }
  0x7e   : > { %v643_v26 = vld [vmem:[%s5803_s29 + $0xda0] sm:$0xff]  ;;  %640 = vst [vmem:[%s5811_s30 + $0x6c0] sm:$0xff] %v639_v24  ;;  %642 = vst [vmem:[%s5811_s30 + $0x6c8] sm:$0xff] %v641_v25  ;;  %v645_v27 = vld [vmem:[%s5803_s29 + $0xda8] sm:$0xff] }
  0x7f   : > { %644 = vst [vmem:[%s5811_s30 + $0x6d0] sm:$0xff] %v643_v26  ;;  %v647_v28 = vld [vmem:[%s5803_s29 + $0xdc0] sm:$0xff]  ;;  %v649_v29 = vld [vmem:[%s5803_s29 + $0xdc8] sm:$0xff]  ;;  %646 = vst [vmem:[%s5811_s30 + $0x6d8] sm:$0xff] %v645_v27 }
  0x80   : > { %648 = vst [vmem:[%s5811_s30 + $0x6e0] sm:$0xff] %v647_v28  ;;  %650 = vst [vmem:[%s5811_s30 + $0x6e8] sm:$0xff] %v649_v29  ;;  %v651_v30 = vld [vmem:[%s5803_s29 + $0xde0] sm:$0xff]  ;;  %v653_v31 = vld [vmem:[%s5803_s29 + $0xde8] sm:$0xff] }
  0x81   : > { %v655_v32 = vld [vmem:[%s5803_s29 + $0xe00] sm:$0xff]  ;;  %652 = vst [vmem:[%s5811_s30 + $0x6f0] sm:$0xff] %v651_v30  ;;  %654 = vst [vmem:[%s5811_s30 + $0x6f8] sm:$0xff] %v653_v31  ;;  %v657_v33 = vld [vmem:[%s5803_s29 + $0xe08] sm:$0xff] }
  0x82   : > { %656 = vst [vmem:[%s5811_s30 + $0x700] sm:$0xff] %v655_v32  ;;  %v659_v34 = vld [vmem:[%s5803_s29 + $0xe20] sm:$0xff]  ;;  %v661_v35 = vld [vmem:[%s5803_s29 + $0xe28] sm:$0xff]  ;;  %658 = vst [vmem:[%s5811_s30 + $0x708] sm:$0xff] %v657_v33 }
  0x83   : > { %660 = vst [vmem:[%s5811_s30 + $0x710] sm:$0xff] %v659_v34  ;;  %662 = vst [vmem:[%s5811_s30 + $0x718] sm:$0xff] %v661_v35  ;;  %v663_v36 = vld [vmem:[%s5803_s29 + $0xe40] sm:$0xff]  ;;  %v665_v37 = vld [vmem:[%s5803_s29 + $0xe48] sm:$0xff] }
  0x84   : > { %v667_v38 = vld [vmem:[%s5803_s29 + $0xe60] sm:$0xff]  ;;  %664 = vst [vmem:[%s5811_s30 + $0x720] sm:$0xff] %v663_v36  ;;  %666 = vst [vmem:[%s5811_s30 + $0x728] sm:$0xff] %v665_v37  ;;  %v669_v39 = vld [vmem:[%s5803_s29 + $0xe68] sm:$0xff] }
  0x85   : > { %668 = vst [vmem:[%s5811_s30 + $0x730] sm:$0xff] %v667_v38  ;;  %v671_v40 = vld [vmem:[%s5803_s29 + $0xe80] sm:$0xff]  ;;  %v673_v41 = vld [vmem:[%s5803_s29 + $0xe88] sm:$0xff]  ;;  %670 = vst [vmem:[%s5811_s30 + $0x738] sm:$0xff] %v669_v39 }
  0x86   : > { %672 = vst [vmem:[%s5811_s30 + $0x740] sm:$0xff] %v671_v40  ;;  %674 = vst [vmem:[%s5811_s30 + $0x748] sm:$0xff] %v673_v41  ;;  %v675_v42 = vld [vmem:[%s5803_s29 + $0xea0] sm:$0xff]  ;;  %v677_v43 = vld [vmem:[%s5803_s29 + $0xea8] sm:$0xff] }
  0x87   : > { %v679_v44 = vld [vmem:[%s5803_s29 + $0xec0] sm:$0xff]  ;;  %676 = vst [vmem:[%s5811_s30 + $0x750] sm:$0xff] %v675_v42  ;;  %678 = vst [vmem:[%s5811_s30 + $0x758] sm:$0xff] %v677_v43  ;;  %v681_v45 = vld [vmem:[%s5803_s29 + $0xec8] sm:$0xff] }
  0x88   : > { %680 = vst [vmem:[%s5811_s30 + $0x760] sm:$0xff] %v679_v44  ;;  %v683_v46 = vld [vmem:[%s5803_s29 + $0xee0] sm:$0xff]  ;;  %v685_v47 = vld [vmem:[%s5803_s29 + $0xee8] sm:$0xff]  ;;  %682 = vst [vmem:[%s5811_s30 + $0x768] sm:$0xff] %v681_v45 }
  0x89   : > { %684 = vst [vmem:[%s5811_s30 + $0x770] sm:$0xff] %v683_v46  ;;  %686 = vst [vmem:[%s5811_s30 + $0x778] sm:$0xff] %v685_v47  ;;  %v687_v48 = vld [vmem:[%s5803_s29 + $0xf00] sm:$0xff]  ;;  %v689_v49 = vld [vmem:[%s5803_s29 + $0xf08] sm:$0xff] }
  0x8a   : > { %v691_v50 = vld [vmem:[%s5803_s29 + $0xf20] sm:$0xff]  ;;  %688 = vst [vmem:[%s5811_s30 + $0x780] sm:$0xff] %v687_v48  ;;  %690 = vst [vmem:[%s5811_s30 + $0x788] sm:$0xff] %v689_v49  ;;  %v693_v51 = vld [vmem:[%s5803_s29 + $0xf28] sm:$0xff] }
  0x8b   : > { %692 = vst [vmem:[%s5811_s30 + $0x790] sm:$0xff] %v691_v50  ;;  %v695_v52 = vld [vmem:[%s5803_s29 + $0xf40] sm:$0xff]  ;;  %v697_v53 = vld [vmem:[%s5803_s29 + $0xf48] sm:$0xff]  ;;  %694 = vst [vmem:[%s5811_s30 + $0x798] sm:$0xff] %v693_v51 }
  0x8c   : > { %696 = vst [vmem:[%s5811_s30 + $0x7a0] sm:$0xff] %v695_v52  ;;  %698 = vst [vmem:[%s5811_s30 + $0x7a8] sm:$0xff] %v697_v53  ;;  %v699_v54 = vld [vmem:[%s5803_s29 + $0xf60] sm:$0xff]  ;;  %v701_v55 = vld [vmem:[%s5803_s29 + $0xf68] sm:$0xff] }
  0x8d   : > { %v703_v56 = vld [vmem:[%s5803_s29 + $0xf80] sm:$0xff]  ;;  %700 = vst [vmem:[%s5811_s30 + $0x7b0] sm:$0xff] %v699_v54  ;;  %702 = vst [vmem:[%s5811_s30 + $0x7b8] sm:$0xff] %v701_v55  ;;  %v705_v57 = vld [vmem:[%s5803_s29 + $0xf88] sm:$0xff] }
  0x8e   : > { %704 = vst [vmem:[%s5811_s30 + $0x7c0] sm:$0xff] %v703_v56  ;;  %v707_v58 = vld [vmem:[%s5803_s29 + $0xfa0] sm:$0xff]  ;;  %v709_v59 = vld [vmem:[%s5803_s29 + $0xfa8] sm:$0xff]  ;;  %706 = vst [vmem:[%s5811_s30 + $0x7c8] sm:$0xff] %v705_v57 }
  0x8f   : > { %708 = vst [vmem:[%s5811_s30 + $0x7d0] sm:$0xff] %v707_v58  ;;  %710 = vst [vmem:[%s5811_s30 + $0x7d8] sm:$0xff] %v709_v59  ;;  %v711_v60 = vld [vmem:[%s5803_s29 + $0xfc0] sm:$0xff]  ;;  %v713_v61 = vld [vmem:[%s5803_s29 + $0xfc8] sm:$0xff] }
  0x90   : > { %v715_v62 = vld [vmem:[%s5803_s29 + $0xfe0] sm:$0xff]  ;;  %712 = vst [vmem:[%s5811_s30 + $0x7e0] sm:$0xff] %v711_v60  ;;  %714 = vst [vmem:[%s5811_s30 + $0x7e8] sm:$0xff] %v713_v61  ;;  %v717_v63 = vld [vmem:[%s5803_s29 + $0xfe8] sm:$0xff] }
  0x91   : > { %716 = vst [vmem:[%s5811_s30 + $0x7f0] sm:$0xff] %v715_v62  ;;  %v719_v0 = vld [vmem:[%s5803_s29 + $0x1000] sm:$0xff]  ;;  %v721_v1 = vld [vmem:[%s5803_s29 + $0x1008] sm:$0xff]  ;;  %718 = vst [vmem:[%s5811_s30 + $0x7f8] sm:$0xff] %v717_v63 }
  0x92   : > { %720 = vst [vmem:[%s5811_s30 + $0x800] sm:$0xff] %v719_v0  ;;  %722 = vst [vmem:[%s5811_s30 + $0x808] sm:$0xff] %v721_v1  ;;  %v723_v2 = vld [vmem:[%s5803_s29 + $0x1020] sm:$0xff]  ;;  %v725_v3 = vld [vmem:[%s5803_s29 + $0x1028] sm:$0xff] }
  0x93   : > { %v727_v4 = vld [vmem:[%s5803_s29 + $0x1040] sm:$0xff]  ;;  %724 = vst [vmem:[%s5811_s30 + $0x810] sm:$0xff] %v723_v2  ;;  %726 = vst [vmem:[%s5811_s30 + $0x818] sm:$0xff] %v725_v3  ;;  %v729_v5 = vld [vmem:[%s5803_s29 + $0x1048] sm:$0xff] }
  0x94   : > { %728 = vst [vmem:[%s5811_s30 + $0x820] sm:$0xff] %v727_v4  ;;  %v731_v6 = vld [vmem:[%s5803_s29 + $0x1060] sm:$0xff]  ;;  %v733_v7 = vld [vmem:[%s5803_s29 + $0x1068] sm:$0xff]  ;;  %730 = vst [vmem:[%s5811_s30 + $0x828] sm:$0xff] %v729_v5 }
  0x95   : > { %732 = vst [vmem:[%s5811_s30 + $0x830] sm:$0xff] %v731_v6  ;;  %734 = vst [vmem:[%s5811_s30 + $0x838] sm:$0xff] %v733_v7  ;;  %v735_v8 = vld [vmem:[%s5803_s29 + $0x1080] sm:$0xff]  ;;  %v737_v9 = vld [vmem:[%s5803_s29 + $0x1088] sm:$0xff] }
  0x96   : > { %v739_v10 = vld [vmem:[%s5803_s29 + $0x10a0] sm:$0xff]  ;;  %736 = vst [vmem:[%s5811_s30 + $0x840] sm:$0xff] %v735_v8  ;;  %738 = vst [vmem:[%s5811_s30 + $0x848] sm:$0xff] %v737_v9  ;;  %v741_v11 = vld [vmem:[%s5803_s29 + $0x10a8] sm:$0xff] }
  0x97   : > { %740 = vst [vmem:[%s5811_s30 + $0x850] sm:$0xff] %v739_v10  ;;  %v743_v12 = vld [vmem:[%s5803_s29 + $0x10c0] sm:$0xff]  ;;  %v745_v13 = vld [vmem:[%s5803_s29 + $0x10c8] sm:$0xff]  ;;  %742 = vst [vmem:[%s5811_s30 + $0x858] sm:$0xff] %v741_v11 }
  0x98   : > { %744 = vst [vmem:[%s5811_s30 + $0x860] sm:$0xff] %v743_v12  ;;  %746 = vst [vmem:[%s5811_s30 + $0x868] sm:$0xff] %v745_v13  ;;  %v747_v14 = vld [vmem:[%s5803_s29 + $0x10e0] sm:$0xff]  ;;  %v749_v15 = vld [vmem:[%s5803_s29 + $0x10e8] sm:$0xff] }
  0x99   : > { %v751_v16 = vld [vmem:[%s5803_s29 + $0x1100] sm:$0xff]  ;;  %748 = vst [vmem:[%s5811_s30 + $0x870] sm:$0xff] %v747_v14  ;;  %750 = vst [vmem:[%s5811_s30 + $0x878] sm:$0xff] %v749_v15  ;;  %v753_v17 = vld [vmem:[%s5803_s29 + $0x1108] sm:$0xff] }
  0x9a   : > { %752 = vst [vmem:[%s5811_s30 + $0x880] sm:$0xff] %v751_v16  ;;  %v755_v18 = vld [vmem:[%s5803_s29 + $0x1120] sm:$0xff]  ;;  %v757_v19 = vld [vmem:[%s5803_s29 + $0x1128] sm:$0xff]  ;;  %754 = vst [vmem:[%s5811_s30 + $0x888] sm:$0xff] %v753_v17 }
  0x9b   : > { %756 = vst [vmem:[%s5811_s30 + $0x890] sm:$0xff] %v755_v18  ;;  %758 = vst [vmem:[%s5811_s30 + $0x898] sm:$0xff] %v757_v19  ;;  %v759_v20 = vld [vmem:[%s5803_s29 + $0x1140] sm:$0xff]  ;;  %v761_v21 = vld [vmem:[%s5803_s29 + $0x1148] sm:$0xff] }
  0x9c   : > { %v763_v22 = vld [vmem:[%s5803_s29 + $0x1160] sm:$0xff]  ;;  %760 = vst [vmem:[%s5811_s30 + $0x8a0] sm:$0xff] %v759_v20  ;;  %762 = vst [vmem:[%s5811_s30 + $0x8a8] sm:$0xff] %v761_v21  ;;  %v765_v23 = vld [vmem:[%s5803_s29 + $0x1168] sm:$0xff] }
  0x9d   : > { %764 = vst [vmem:[%s5811_s30 + $0x8b0] sm:$0xff] %v763_v22  ;;  %v767_v24 = vld [vmem:[%s5803_s29 + $0x1180] sm:$0xff]  ;;  %v769_v25 = vld [vmem:[%s5803_s29 + $0x1188] sm:$0xff]  ;;  %766 = vst [vmem:[%s5811_s30 + $0x8b8] sm:$0xff] %v765_v23 }
  0x9e   : > { %768 = vst [vmem:[%s5811_s30 + $0x8c0] sm:$0xff] %v767_v24  ;;  %770 = vst [vmem:[%s5811_s30 + $0x8c8] sm:$0xff] %v769_v25  ;;  %v771_v26 = vld [vmem:[%s5803_s29 + $0x11a0] sm:$0xff]  ;;  %v773_v27 = vld [vmem:[%s5803_s29 + $0x11a8] sm:$0xff] }
  0x9f   : > { %v775_v28 = vld [vmem:[%s5803_s29 + $0x11c0] sm:$0xff]  ;;  %772 = vst [vmem:[%s5811_s30 + $0x8d0] sm:$0xff] %v771_v26  ;;  %774 = vst [vmem:[%s5811_s30 + $0x8d8] sm:$0xff] %v773_v27  ;;  %v777_v29 = vld [vmem:[%s5803_s29 + $0x11c8] sm:$0xff] }
  0xa0   : > { %776 = vst [vmem:[%s5811_s30 + $0x8e0] sm:$0xff] %v775_v28  ;;  %v779_v30 = vld [vmem:[%s5803_s29 + $0x11e0] sm:$0xff]  ;;  %v781_v31 = vld [vmem:[%s5803_s29 + $0x11e8] sm:$0xff]  ;;  %778 = vst [vmem:[%s5811_s30 + $0x8e8] sm:$0xff] %v777_v29 }
  0xa1   : > { %780 = vst [vmem:[%s5811_s30 + $0x8f0] sm:$0xff] %v779_v30  ;;  %782 = vst [vmem:[%s5811_s30 + $0x8f8] sm:$0xff] %v781_v31  ;;  %v783_v32 = vld [vmem:[%s5803_s29 + $0x1200] sm:$0xff]  ;;  %v785_v33 = vld [vmem:[%s5803_s29 + $0x1208] sm:$0xff] }
  0xa2   : > { %v787_v34 = vld [vmem:[%s5803_s29 + $0x1220] sm:$0xff]  ;;  %784 = vst [vmem:[%s5811_s30 + $0x900] sm:$0xff] %v783_v32  ;;  %786 = vst [vmem:[%s5811_s30 + $0x908] sm:$0xff] %v785_v33  ;;  %v789_v35 = vld [vmem:[%s5803_s29 + $0x1228] sm:$0xff] }
  0xa3   : > { %788 = vst [vmem:[%s5811_s30 + $0x910] sm:$0xff] %v787_v34  ;;  %v791_v36 = vld [vmem:[%s5803_s29 + $0x1240] sm:$0xff]  ;;  %v793_v37 = vld [vmem:[%s5803_s29 + $0x1248] sm:$0xff]  ;;  %790 = vst [vmem:[%s5811_s30 + $0x918] sm:$0xff] %v789_v35 }
  0xa4   : > { %792 = vst [vmem:[%s5811_s30 + $0x920] sm:$0xff] %v791_v36  ;;  %794 = vst [vmem:[%s5811_s30 + $0x928] sm:$0xff] %v793_v37  ;;  %v795_v38 = vld [vmem:[%s5803_s29 + $0x1260] sm:$0xff]  ;;  %v797_v39 = vld [vmem:[%s5803_s29 + $0x1268] sm:$0xff] }
  0xa5   : > { %v799_v40 = vld [vmem:[%s5803_s29 + $0x1280] sm:$0xff]  ;;  %796 = vst [vmem:[%s5811_s30 + $0x930] sm:$0xff] %v795_v38  ;;  %798 = vst [vmem:[%s5811_s30 + $0x938] sm:$0xff] %v797_v39  ;;  %v801_v41 = vld [vmem:[%s5803_s29 + $0x1288] sm:$0xff] }
  0xa6   : > { %800 = vst [vmem:[%s5811_s30 + $0x940] sm:$0xff] %v799_v40  ;;  %v803_v42 = vld [vmem:[%s5803_s29 + $0x12a0] sm:$0xff]  ;;  %v805_v43 = vld [vmem:[%s5803_s29 + $0x12a8] sm:$0xff]  ;;  %802 = vst [vmem:[%s5811_s30 + $0x948] sm:$0xff] %v801_v41 }
  0xa7   : > { %804 = vst [vmem:[%s5811_s30 + $0x950] sm:$0xff] %v803_v42  ;;  %806 = vst [vmem:[%s5811_s30 + $0x958] sm:$0xff] %v805_v43  ;;  %v807_v44 = vld [vmem:[%s5803_s29 + $0x12c0] sm:$0xff]  ;;  %v809_v45 = vld [vmem:[%s5803_s29 + $0x12c8] sm:$0xff] }
  0xa8   : > { %v811_v46 = vld [vmem:[%s5803_s29 + $0x12e0] sm:$0xff]  ;;  %808 = vst [vmem:[%s5811_s30 + $0x960] sm:$0xff] %v807_v44  ;;  %810 = vst [vmem:[%s5811_s30 + $0x968] sm:$0xff] %v809_v45  ;;  %v813_v47 = vld [vmem:[%s5803_s29 + $0x12e8] sm:$0xff] }
  0xa9   : > { %812 = vst [vmem:[%s5811_s30 + $0x970] sm:$0xff] %v811_v46  ;;  %v815_v48 = vld [vmem:[%s5803_s29 + $0x1300] sm:$0xff]  ;;  %v817_v49 = vld [vmem:[%s5803_s29 + $0x1308] sm:$0xff]  ;;  %814 = vst [vmem:[%s5811_s30 + $0x978] sm:$0xff] %v813_v47 }
  0xaa   : > { %816 = vst [vmem:[%s5811_s30 + $0x980] sm:$0xff] %v815_v48  ;;  %818 = vst [vmem:[%s5811_s30 + $0x988] sm:$0xff] %v817_v49  ;;  %v819_v50 = vld [vmem:[%s5803_s29 + $0x1320] sm:$0xff]  ;;  %v821_v51 = vld [vmem:[%s5803_s29 + $0x1328] sm:$0xff] }
  0xab   : > { %v823_v52 = vld [vmem:[%s5803_s29 + $0x1340] sm:$0xff]  ;;  %820 = vst [vmem:[%s5811_s30 + $0x990] sm:$0xff] %v819_v50  ;;  %822 = vst [vmem:[%s5811_s30 + $0x998] sm:$0xff] %v821_v51  ;;  %v825_v53 = vld [vmem:[%s5803_s29 + $0x1348] sm:$0xff] }
  0xac   : > { %824 = vst [vmem:[%s5811_s30 + $0x9a0] sm:$0xff] %v823_v52  ;;  %v827_v54 = vld [vmem:[%s5803_s29 + $0x1360] sm:$0xff]  ;;  %v829_v55 = vld [vmem:[%s5803_s29 + $0x1368] sm:$0xff]  ;;  %826 = vst [vmem:[%s5811_s30 + $0x9a8] sm:$0xff] %v825_v53 }
  0xad   : > { %828 = vst [vmem:[%s5811_s30 + $0x9b0] sm:$0xff] %v827_v54  ;;  %830 = vst [vmem:[%s5811_s30 + $0x9b8] sm:$0xff] %v829_v55  ;;  %v831_v56 = vld [vmem:[%s5803_s29 + $0x1380] sm:$0xff]  ;;  %v833_v57 = vld [vmem:[%s5803_s29 + $0x1388] sm:$0xff] }
  0xae   : > { %v835_v58 = vld [vmem:[%s5803_s29 + $0x13a0] sm:$0xff]  ;;  %832 = vst [vmem:[%s5811_s30 + $0x9c0] sm:$0xff] %v831_v56  ;;  %834 = vst [vmem:[%s5811_s30 + $0x9c8] sm:$0xff] %v833_v57  ;;  %v837_v59 = vld [vmem:[%s5803_s29 + $0x13a8] sm:$0xff] }
  0xaf   : > { %836 = vst [vmem:[%s5811_s30 + $0x9d0] sm:$0xff] %v835_v58  ;;  %v839_v60 = vld [vmem:[%s5803_s29 + $0x13c0] sm:$0xff]  ;;  %v841_v61 = vld [vmem:[%s5803_s29 + $0x13c8] sm:$0xff]  ;;  %838 = vst [vmem:[%s5811_s30 + $0x9d8] sm:$0xff] %v837_v59 }
  0xb0   : > { %840 = vst [vmem:[%s5811_s30 + $0x9e0] sm:$0xff] %v839_v60  ;;  %842 = vst [vmem:[%s5811_s30 + $0x9e8] sm:$0xff] %v841_v61  ;;  %v843_v62 = vld [vmem:[%s5803_s29 + $0x13e0] sm:$0xff]  ;;  %v845_v63 = vld [vmem:[%s5803_s29 + $0x13e8] sm:$0xff] }
  0xb1   : > { %v847_v0 = vld [vmem:[%s5803_s29 + $0x1400] sm:$0xff]  ;;  %844 = vst [vmem:[%s5811_s30 + $0x9f0] sm:$0xff] %v843_v62  ;;  %846 = vst [vmem:[%s5811_s30 + $0x9f8] sm:$0xff] %v845_v63  ;;  %v849_v1 = vld [vmem:[%s5803_s29 + $0x1408] sm:$0xff] }
  0xb2   : > { %848 = vst [vmem:[%s5811_s30 + $0xa00] sm:$0xff] %v847_v0  ;;  %v851_v2 = vld [vmem:[%s5803_s29 + $0x1420] sm:$0xff]  ;;  %v853_v3 = vld [vmem:[%s5803_s29 + $0x1428] sm:$0xff]  ;;  %850 = vst [vmem:[%s5811_s30 + $0xa08] sm:$0xff] %v849_v1 }
  0xb3   : > { %852 = vst [vmem:[%s5811_s30 + $0xa10] sm:$0xff] %v851_v2  ;;  %854 = vst [vmem:[%s5811_s30 + $0xa18] sm:$0xff] %v853_v3  ;;  %v855_v4 = vld [vmem:[%s5803_s29 + $0x1440] sm:$0xff]  ;;  %v857_v5 = vld [vmem:[%s5803_s29 + $0x1448] sm:$0xff] }
  0xb4   : > { %v859_v6 = vld [vmem:[%s5803_s29 + $0x1460] sm:$0xff]  ;;  %856 = vst [vmem:[%s5811_s30 + $0xa20] sm:$0xff] %v855_v4  ;;  %858 = vst [vmem:[%s5811_s30 + $0xa28] sm:$0xff] %v857_v5  ;;  %v861_v7 = vld [vmem:[%s5803_s29 + $0x1468] sm:$0xff] }
  0xb5   : > { %860 = vst [vmem:[%s5811_s30 + $0xa30] sm:$0xff] %v859_v6  ;;  %v863_v8 = vld [vmem:[%s5803_s29 + $0x1480] sm:$0xff]  ;;  %v865_v9 = vld [vmem:[%s5803_s29 + $0x1488] sm:$0xff]  ;;  %862 = vst [vmem:[%s5811_s30 + $0xa38] sm:$0xff] %v861_v7 }
  0xb6   : > { %864 = vst [vmem:[%s5811_s30 + $0xa40] sm:$0xff] %v863_v8  ;;  %866 = vst [vmem:[%s5811_s30 + $0xa48] sm:$0xff] %v865_v9  ;;  %v867_v10 = vld [vmem:[%s5803_s29 + $0x14a0] sm:$0xff]  ;;  %v869_v11 = vld [vmem:[%s5803_s29 + $0x14a8] sm:$0xff] }
  0xb7   : > { %v871_v12 = vld [vmem:[%s5803_s29 + $0x14c0] sm:$0xff]  ;;  %868 = vst [vmem:[%s5811_s30 + $0xa50] sm:$0xff] %v867_v10  ;;  %870 = vst [vmem:[%s5811_s30 + $0xa58] sm:$0xff] %v869_v11  ;;  %v873_v13 = vld [vmem:[%s5803_s29 + $0x14c8] sm:$0xff] }
  0xb8   : > { %872 = vst [vmem:[%s5811_s30 + $0xa60] sm:$0xff] %v871_v12  ;;  %v875_v14 = vld [vmem:[%s5803_s29 + $0x14e0] sm:$0xff]  ;;  %v877_v15 = vld [vmem:[%s5803_s29 + $0x14e8] sm:$0xff]  ;;  %874 = vst [vmem:[%s5811_s30 + $0xa68] sm:$0xff] %v873_v13 }
  0xb9   : > { %876 = vst [vmem:[%s5811_s30 + $0xa70] sm:$0xff] %v875_v14  ;;  %878 = vst [vmem:[%s5811_s30 + $0xa78] sm:$0xff] %v877_v15  ;;  %v879_v16 = vld [vmem:[%s5803_s29 + $0x1500] sm:$0xff]  ;;  %v881_v17 = vld [vmem:[%s5803_s29 + $0x1508] sm:$0xff] }
  0xba   : > { %v883_v18 = vld [vmem:[%s5803_s29 + $0x1520] sm:$0xff]  ;;  %880 = vst [vmem:[%s5811_s30 + $0xa80] sm:$0xff] %v879_v16  ;;  %882 = vst [vmem:[%s5811_s30 + $0xa88] sm:$0xff] %v881_v17  ;;  %v885_v19 = vld [vmem:[%s5803_s29 + $0x1528] sm:$0xff] }
  0xbb   : > { %884 = vst [vmem:[%s5811_s30 + $0xa90] sm:$0xff] %v883_v18  ;;  %v887_v20 = vld [vmem:[%s5803_s29 + $0x1540] sm:$0xff]  ;;  %v889_v21 = vld [vmem:[%s5803_s29 + $0x1548] sm:$0xff]  ;;  %886 = vst [vmem:[%s5811_s30 + $0xa98] sm:$0xff] %v885_v19 }
  0xbc   : > { %888 = vst [vmem:[%s5811_s30 + $0xaa0] sm:$0xff] %v887_v20  ;;  %890 = vst [vmem:[%s5811_s30 + $0xaa8] sm:$0xff] %v889_v21  ;;  %v891_v22 = vld [vmem:[%s5803_s29 + $0x1560] sm:$0xff]  ;;  %v893_v23 = vld [vmem:[%s5803_s29 + $0x1568] sm:$0xff] }
  0xbd   : > { %v895_v24 = vld [vmem:[%s5803_s29 + $0x1580] sm:$0xff]  ;;  %892 = vst [vmem:[%s5811_s30 + $0xab0] sm:$0xff] %v891_v22  ;;  %894 = vst [vmem:[%s5811_s30 + $0xab8] sm:$0xff] %v893_v23  ;;  %v897_v25 = vld [vmem:[%s5803_s29 + $0x1588] sm:$0xff] }
  0xbe   : > { %896 = vst [vmem:[%s5811_s30 + $0xac0] sm:$0xff] %v895_v24  ;;  %v899_v26 = vld [vmem:[%s5803_s29 + $0x15a0] sm:$0xff]  ;;  %v901_v27 = vld [vmem:[%s5803_s29 + $0x15a8] sm:$0xff]  ;;  %898 = vst [vmem:[%s5811_s30 + $0xac8] sm:$0xff] %v897_v25 }
  0xbf   : > { %900 = vst [vmem:[%s5811_s30 + $0xad0] sm:$0xff] %v899_v26  ;;  %902 = vst [vmem:[%s5811_s30 + $0xad8] sm:$0xff] %v901_v27  ;;  %v903_v28 = vld [vmem:[%s5803_s29 + $0x15c0] sm:$0xff]  ;;  %v905_v29 = vld [vmem:[%s5803_s29 + $0x15c8] sm:$0xff] }
  0xc0   : > { %v907_v30 = vld [vmem:[%s5803_s29 + $0x15e0] sm:$0xff]  ;;  %904 = vst [vmem:[%s5811_s30 + $0xae0] sm:$0xff] %v903_v28  ;;  %906 = vst [vmem:[%s5811_s30 + $0xae8] sm:$0xff] %v905_v29  ;;  %v909_v31 = vld [vmem:[%s5803_s29 + $0x15e8] sm:$0xff] }
  0xc1   : > { %908 = vst [vmem:[%s5811_s30 + $0xaf0] sm:$0xff] %v907_v30  ;;  %v911_v32 = vld [vmem:[%s5803_s29 + $0x1600] sm:$0xff]  ;;  %v913_v33 = vld [vmem:[%s5803_s29 + $0x1608] sm:$0xff]  ;;  %910 = vst [vmem:[%s5811_s30 + $0xaf8] sm:$0xff] %v909_v31 }
  0xc2   : > { %912 = vst [vmem:[%s5811_s30 + $0xb00] sm:$0xff] %v911_v32  ;;  %914 = vst [vmem:[%s5811_s30 + $0xb08] sm:$0xff] %v913_v33  ;;  %v915_v34 = vld [vmem:[%s5803_s29 + $0x1620] sm:$0xff]  ;;  %v917_v35 = vld [vmem:[%s5803_s29 + $0x1628] sm:$0xff] }
  0xc3   : > { %v919_v36 = vld [vmem:[%s5803_s29 + $0x1640] sm:$0xff]  ;;  %916 = vst [vmem:[%s5811_s30 + $0xb10] sm:$0xff] %v915_v34  ;;  %918 = vst [vmem:[%s5811_s30 + $0xb18] sm:$0xff] %v917_v35  ;;  %v921_v37 = vld [vmem:[%s5803_s29 + $0x1648] sm:$0xff] }
  0xc4   : > { %920 = vst [vmem:[%s5811_s30 + $0xb20] sm:$0xff] %v919_v36  ;;  %v923_v38 = vld [vmem:[%s5803_s29 + $0x1660] sm:$0xff]  ;;  %v925_v39 = vld [vmem:[%s5803_s29 + $0x1668] sm:$0xff]  ;;  %922 = vst [vmem:[%s5811_s30 + $0xb28] sm:$0xff] %v921_v37 }
  0xc5   : > { %924 = vst [vmem:[%s5811_s30 + $0xb30] sm:$0xff] %v923_v38  ;;  %926 = vst [vmem:[%s5811_s30 + $0xb38] sm:$0xff] %v925_v39  ;;  %v927_v40 = vld [vmem:[%s5803_s29 + $0x1680] sm:$0xff]  ;;  %v929_v41 = vld [vmem:[%s5803_s29 + $0x1688] sm:$0xff] }
  0xc6   : > { %v931_v42 = vld [vmem:[%s5803_s29 + $0x16a0] sm:$0xff]  ;;  %928 = vst [vmem:[%s5811_s30 + $0xb40] sm:$0xff] %v927_v40  ;;  %930 = vst [vmem:[%s5811_s30 + $0xb48] sm:$0xff] %v929_v41  ;;  %v933_v43 = vld [vmem:[%s5803_s29 + $0x16a8] sm:$0xff] }
  0xc7   : > { %932 = vst [vmem:[%s5811_s30 + $0xb50] sm:$0xff] %v931_v42  ;;  %v935_v44 = vld [vmem:[%s5803_s29 + $0x16c0] sm:$0xff]  ;;  %v937_v45 = vld [vmem:[%s5803_s29 + $0x16c8] sm:$0xff]  ;;  %934 = vst [vmem:[%s5811_s30 + $0xb58] sm:$0xff] %v933_v43 }
  0xc8   : > { %936 = vst [vmem:[%s5811_s30 + $0xb60] sm:$0xff] %v935_v44  ;;  %938 = vst [vmem:[%s5811_s30 + $0xb68] sm:$0xff] %v937_v45  ;;  %v939_v46 = vld [vmem:[%s5803_s29 + $0x16e0] sm:$0xff]  ;;  %v941_v47 = vld [vmem:[%s5803_s29 + $0x16e8] sm:$0xff] }
  0xc9   : > { %v943_v48 = vld [vmem:[%s5803_s29 + $0x1700] sm:$0xff]  ;;  %940 = vst [vmem:[%s5811_s30 + $0xb70] sm:$0xff] %v939_v46  ;;  %942 = vst [vmem:[%s5811_s30 + $0xb78] sm:$0xff] %v941_v47  ;;  %v945_v49 = vld [vmem:[%s5803_s29 + $0x1708] sm:$0xff] }
  0xca   : > { %944 = vst [vmem:[%s5811_s30 + $0xb80] sm:$0xff] %v943_v48  ;;  %v947_v50 = vld [vmem:[%s5803_s29 + $0x1720] sm:$0xff]  ;;  %v949_v51 = vld [vmem:[%s5803_s29 + $0x1728] sm:$0xff]  ;;  %946 = vst [vmem:[%s5811_s30 + $0xb88] sm:$0xff] %v945_v49 }
  0xcb   : > { %948 = vst [vmem:[%s5811_s30 + $0xb90] sm:$0xff] %v947_v50  ;;  %950 = vst [vmem:[%s5811_s30 + $0xb98] sm:$0xff] %v949_v51  ;;  %v951_v52 = vld [vmem:[%s5803_s29 + $0x1740] sm:$0xff]  ;;  %v953_v53 = vld [vmem:[%s5803_s29 + $0x1748] sm:$0xff] }
  0xcc   : > { %v955_v54 = vld [vmem:[%s5803_s29 + $0x1760] sm:$0xff]  ;;  %952 = vst [vmem:[%s5811_s30 + $0xba0] sm:$0xff] %v951_v52  ;;  %954 = vst [vmem:[%s5811_s30 + $0xba8] sm:$0xff] %v953_v53  ;;  %v957_v55 = vld [vmem:[%s5803_s29 + $0x1768] sm:$0xff] }
  0xcd   : > { %956 = vst [vmem:[%s5811_s30 + $0xbb0] sm:$0xff] %v955_v54  ;;  %v959_v56 = vld [vmem:[%s5803_s29 + $0x1780] sm:$0xff]  ;;  %v961_v57 = vld [vmem:[%s5803_s29 + $0x1788] sm:$0xff]  ;;  %958 = vst [vmem:[%s5811_s30 + $0xbb8] sm:$0xff] %v957_v55 }
  0xce   : > { %960 = vst [vmem:[%s5811_s30 + $0xbc0] sm:$0xff] %v959_v56  ;;  %962 = vst [vmem:[%s5811_s30 + $0xbc8] sm:$0xff] %v961_v57  ;;  %v963_v58 = vld [vmem:[%s5803_s29 + $0x17a0] sm:$0xff]  ;;  %v965_v59 = vld [vmem:[%s5803_s29 + $0x17a8] sm:$0xff] }
  0xcf   : > { %v967_v60 = vld [vmem:[%s5803_s29 + $0x17c0] sm:$0xff]  ;;  %964 = vst [vmem:[%s5811_s30 + $0xbd0] sm:$0xff] %v963_v58  ;;  %966 = vst [vmem:[%s5811_s30 + $0xbd8] sm:$0xff] %v965_v59  ;;  %v969_v61 = vld [vmem:[%s5803_s29 + $0x17c8] sm:$0xff] }
  0xd0   : > { %968 = vst [vmem:[%s5811_s30 + $0xbe0] sm:$0xff] %v967_v60  ;;  %v971_v62 = vld [vmem:[%s5803_s29 + $0x17e0] sm:$0xff]  ;;  %v973_v63 = vld [vmem:[%s5803_s29 + $0x17e8] sm:$0xff]  ;;  %970 = vst [vmem:[%s5811_s30 + $0xbe8] sm:$0xff] %v969_v61 }
  0xd1   : > { %972 = vst [vmem:[%s5811_s30 + $0xbf0] sm:$0xff] %v971_v62  ;;  %974 = vst [vmem:[%s5811_s30 + $0xbf8] sm:$0xff] %v973_v63 }
  0xd2 PF: > { %p4505_p6 = scmp.ge.s32.totalorder %s5733_s19, 1  ;;  %p996_p7 = scmp.lt.s32.totalorder %s5733_s19, 3 }
  0xd4   : > { %p997_p8 = pnand %p4505_p6, %p996_p7 }
  0xd5   : > { %s1003_s5 = sand.u32 (!%p997_p8), 1, %s5717_s15   ;;  %v5167_v0 = vld [vmem:[%s7062_s0 + $0x4] ss:$48 sps:$4 sm:$0xff] (!%p997_p8)   ;;  %p1061_p11 = scmp.lt.s32.totalorder (!%p997_p8), %s5725_s17, 1  ;;  %vm4386_vm0 = vcmask (!%p997_p8), 7168  }
  0xd6   : > { %1000 = sbr.rel (%p997_p8) target bundleno = 1045 (0x415), region = 55  ;;  %3495 = vmatprep.mubr.bf16.mxu0 (!%p997_p8), %v5167_v0  ;;  %3753 = vmatprep.mubr.bf16.mxu1 (!%p997_p8), %v5167_v0 }
  0xd7   : > { %s5028_s6 = smul.u32 (!%p997_p8), 3072, %s1003_s5 }
  0xd9   : > { %s6581_s9 = scalar_lea.vmem (!%p997_p8), [#allocation3], %s5028_s6  ;;  %s4507_s6 = sshll.u32 (!%p997_p8), %s5725_s17, 6 }
  0xda   : > { %v5069_v1 = vld [vmem:[%s6581_s9 + $0x4] ss:$16 sps:$4 sm:$0xff] (!%p997_p8)   ;;  %v5071_v2 = vld [vmem:[%s6581_s9 + $0xc] ss:$16 sps:$4 sm:$0xff] (!%p997_p8)   ;;  %v5073_v3 = vld [vmem:[%s6581_s9] ss:$16 sps:$4 sm:$0xff] (!%p997_p8)  }
  0xdb   : > { %3463 = vmatprep.subr.bf16.mxu0 (!%p997_p8), %v5069_v1  ;;  %v5074_v4 = vld [vmem:[%s6581_s9 + $0x8] ss:$16 sps:$4 sm:$0xff] (!%p997_p8)   ;;  %3721 = vmatprep.subr.bf16.mxu1 (!%p997_p8), %v5071_v2  ;;  %v5075_v5 = vld [vmem:[%s6581_s9 + $0x24] ss:$16 sps:$4 sm:$0xff] (!%p997_p8)   ;;  %v5077_v6 = vld [vmem:[%s6581_s9 + $0x2c] ss:$16 sps:$4 sm:$0xff] (!%p997_p8)  }
  0xdc   : > { %3464 = vmatpush1.bf16.msra.mxu0 (!%p997_p8), %v5073_v3  ;;  %3722 = vmatpush1.bf16.msra.mxu1 (!%p997_p8), %v5074_v4  ;;  %v5079_v7 = vld [vmem:[%s6581_s9 + $0x20] ss:$16 sps:$4 sm:$0xff] (!%p997_p8)   ;;  %v5080_v8 = vld [vmem:[%s6581_s9 + $0x28] ss:$16 sps:$4 sm:$0xff] (!%p997_p8)   ;;  %v5081_v9 = vld [vmem:[%s6581_s9 + $0x44] ss:$16 sps:$4 sm:$0xff] (!%p997_p8)  }
  0xdd   : > { %3465 = vmatprep.subr.bf16.mxu0 %v5075_v5  ;;  %3723 = vmatprep.subr.bf16.mxu1 %v5077_v6  ;;  %v5083_v10 = vld [vmem:[%s6581_s9 + $0x4c] ss:$16 sps:$4 sm:$0xff]   ;;  %v5085_v11 = vld [vmem:[%s6581_s9 + $0x40] ss:$16 sps:$4 sm:$0xff]   ;;  %v5086_v12 = vld [vmem:[%s6581_s9 + $0x48] ss:$16 sps:$4 sm:$0xff]  }
  0xde   : > { %v5087_v13 = vld [vmem:[%s6581_s9 + $0x64] ss:$16 sps:$4 sm:$0xff]   ;;  %v5089_v14 = vld [vmem:[%s6581_s9 + $0x6c] ss:$16 sps:$4 sm:$0xff]   ;;  %v5091_v15 = vld [vmem:[%s6581_s9 + $0x60] ss:$16 sps:$4 sm:$0xff]  }
  0xdf   : > { %v5092_v16 = vld [vmem:[%s6581_s9 + $0x68] ss:$16 sps:$4 sm:$0xff]   ;;  %v5093_v17 = vld [vmem:[%s6581_s9 + $0x84] ss:$16 sps:$4 sm:$0xff]   ;;  %v5095_v18 = vld [vmem:[%s6581_s9 + $0x8c] ss:$16 sps:$4 sm:$0xff]  }
  0xe0   : > { %3466 = vmatpush1.bf16.msra.mxu0 %v5079_v7  ;;  %3724 = vmatpush1.bf16.msra.mxu1 %v5080_v8  ;;  %v5097_v19 = vld [vmem:[%s6581_s9 + $0x80] ss:$16 sps:$4 sm:$0xff]   ;;  %v5098_v20 = vld [vmem:[%s6581_s9 + $0x88] ss:$16 sps:$4 sm:$0xff]   ;;  %v5099_v21 = vld [vmem:[%s6581_s9 + $0xa4] ss:$16 sps:$4 sm:$0xff]  }
  0xe1   : > { %3467 = vmatprep.subr.bf16.mxu0 %v5081_v9  ;;  %3725 = vmatprep.subr.bf16.mxu1 %v5083_v10  ;;  %v5101_v22 = vld [vmem:[%s6581_s9 + $0xac] ss:$16 sps:$4 sm:$0xff]   ;;  %v5103_v23 = vld [vmem:[%s6581_s9 + $0xa0] ss:$16 sps:$4 sm:$0xff]   ;;  %v5104_v24 = vld [vmem:[%s6581_s9 + $0xa8] ss:$16 sps:$4 sm:$0xff]  }
  0xe2   : > { %v5105_v25 = vld [vmem:[%s6581_s9 + $0xc4] ss:$16 sps:$4 sm:$0xff]   ;;  %v5107_v26 = vld [vmem:[%s6581_s9 + $0xcc] ss:$16 sps:$4 sm:$0xff]   ;;  %v5109_v27 = vld [vmem:[%s6581_s9 + $0xc0] ss:$16 sps:$4 sm:$0xff]  }
  0xe3   : > { %v5110_v28 = vld [vmem:[%s6581_s9 + $0xc8] ss:$16 sps:$4 sm:$0xff]   ;;  %v5111_v29 = vld [vmem:[%s6581_s9 + $0xe4] ss:$16 sps:$4 sm:$0xff]   ;;  %v5113_v30 = vld [vmem:[%s6581_s9 + $0xec] ss:$16 sps:$4 sm:$0xff]  }
  0xe4   : > { %3468 = vmatpush1.bf16.msra.mxu0 %v5085_v11  ;;  %3726 = vmatpush1.bf16.msra.mxu1 %v5086_v12  ;;  %v5115_v31 = vld [vmem:[%s6581_s9 + $0xe0] ss:$16 sps:$4 sm:$0xff]   ;;  %v5116_v32 = vld [vmem:[%s6581_s9 + $0xe8] ss:$16 sps:$4 sm:$0xff]   ;;  %v5117_v33 = vld [vmem:[%s6581_s9 + $0x104] ss:$16 sps:$4 sm:$0xff]  }
  0xe5   : > { %3469 = vmatprep.subr.bf16.mxu0 %v5087_v13  ;;  %3727 = vmatprep.subr.bf16.mxu1 %v5089_v14  ;;  %v5119_v34 = vld [vmem:[%s6581_s9 + $0x10c] ss:$16 sps:$4 sm:$0xff]   ;;  %v5121_v35 = vld [vmem:[%s6581_s9 + $0x100] ss:$16 sps:$4 sm:$0xff]   ;;  %v5122_v36 = vld [vmem:[%s6581_s9 + $0x108] ss:$16 sps:$4 sm:$0xff]  }
  0xe6   : > { %v5123_v37 = vld [vmem:[%s6581_s9 + $0x124] ss:$16 sps:$4 sm:$0xff]   ;;  %v5125_v38 = vld [vmem:[%s6581_s9 + $0x12c] ss:$16 sps:$4 sm:$0xff]   ;;  %v5127_v39 = vld [vmem:[%s6581_s9 + $0x120] ss:$16 sps:$4 sm:$0xff]  }
  0xe7   : > { %v5128_v40 = vld [vmem:[%s6581_s9 + $0x128] ss:$16 sps:$4 sm:$0xff]   ;;  %v5129_v41 = vld [vmem:[%s6581_s9 + $0x144] ss:$16 sps:$4 sm:$0xff]   ;;  %v5131_v42 = vld [vmem:[%s6581_s9 + $0x14c] ss:$16 sps:$4 sm:$0xff]  }
  0xe8   : > { %3470 = vmatpush1.bf16.msra.mxu0 %v5091_v15  ;;  %3728 = vmatpush1.bf16.msra.mxu1 %v5092_v16  ;;  %v5133_v43 = vld [vmem:[%s6581_s9 + $0x140] ss:$16 sps:$4 sm:$0xff]   ;;  %v5134_v44 = vld [vmem:[%s6581_s9 + $0x148] ss:$16 sps:$4 sm:$0xff]   ;;  %v5135_v45 = vld [vmem:[%s6581_s9 + $0x164] ss:$16 sps:$4 sm:$0xff]  }
  0xe9   : > { %3471 = vmatprep.subr.bf16.mxu0 %v5093_v17  ;;  %3729 = vmatprep.subr.bf16.mxu1 %v5095_v18  ;;  %v5137_v46 = vld [vmem:[%s6581_s9 + $0x16c] ss:$16 sps:$4 sm:$0xff]   ;;  %v5139_v47 = vld [vmem:[%s6581_s9 + $0x160] ss:$16 sps:$4 sm:$0xff]   ;;  %v5140_v48 = vld [vmem:[%s6581_s9 + $0x168] ss:$16 sps:$4 sm:$0xff]  }
  0xea   : > { %v5141_v49 = vld [vmem:[%s6581_s9 + $0x184] ss:$16 sps:$4 sm:$0xff]   ;;  %v5143_v50 = vld [vmem:[%s6581_s9 + $0x18c] ss:$16 sps:$4 sm:$0xff]   ;;  %v5145_v51 = vld [vmem:[%s6581_s9 + $0x180] ss:$16 sps:$4 sm:$0xff]  }
  0xeb   : > { %v5146_v52 = vld [vmem:[%s6581_s9 + $0x188] ss:$16 sps:$4 sm:$0xff]   ;;  %v5147_v53 = vld [vmem:[%s6581_s9 + $0x1a4] ss:$16 sps:$4 sm:$0xff]   ;;  %v5149_v54 = vld [vmem:[%s6581_s9 + $0x1ac] ss:$16 sps:$4 sm:$0xff]  }
  0xec   : > { %3472 = vmatpush1.bf16.msra.mxu0 %v5097_v19  ;;  %3730 = vmatpush1.bf16.msra.mxu1 %v5098_v20  ;;  %v5151_v55 = vld [vmem:[%s6581_s9 + $0x1a0] ss:$16 sps:$4 sm:$0xff]   ;;  %v5152_v56 = vld [vmem:[%s6581_s9 + $0x1a8] ss:$16 sps:$4 sm:$0xff]   ;;  %v5153_v57 = vld [vmem:[%s6581_s9 + $0x1c4] ss:$16 sps:$4 sm:$0xff]  }
  0xed   : > { %3473 = vmatprep.subr.bf16.mxu0 %v5099_v21  ;;  %3731 = vmatprep.subr.bf16.mxu1 %v5101_v22  ;;  %v5155_v58 = vld [vmem:[%s6581_s9 + $0x1cc] ss:$16 sps:$4 sm:$0xff]   ;;  %v5157_v59 = vld [vmem:[%s6581_s9 + $0x1c0] ss:$16 sps:$4 sm:$0xff]   ;;  %v5158_v60 = vld [vmem:[%s6581_s9 + $0x1c8] ss:$16 sps:$4 sm:$0xff]  }
  0xee   : > { %v5159_v61 = vld [vmem:[%s6581_s9 + $0x1e4] ss:$16 sps:$4 sm:$0xff]   ;;  %v5161_v62 = vld [vmem:[%s6581_s9 + $0x1ec] ss:$16 sps:$4 sm:$0xff]   ;;  %v5163_v63 = vld [vmem:[%s6581_s9 + $0x1e0] ss:$16 sps:$4 sm:$0xff]  }
  0xef   : > { %v5164_v0 = vld [vmem:[%s6581_s9 + $0x1e8] ss:$16 sps:$4 sm:$0xff]   ;;  %v5170_v1 = vld [vmem:[%s6581_s9 + $0x204] ss:$16 sps:$4 sm:$0xff]   ;;  %v5173_v2 = vld [vmem:[%s6581_s9 + $0x20c] ss:$16 sps:$4 sm:$0xff]  }
  0xf0   : > { %3474 = vmatpush1.bf16.msra.mxu0 %v5103_v23  ;;  %3732 = vmatpush1.bf16.msra.mxu1 %v5104_v24  ;;  %v5165_v3 = vld [vmem:[%s7062_s0] ss:$48 sps:$4 sm:$0xff]   ;;  %v5171_v5 = vld [vmem:[%s6581_s9 + $0x208] ss:$16 sps:$4 sm:$0xff]   ;;  %v5176_v6 = vld [vmem:[%s6581_s9 + $0x224] ss:$16 sps:$4 sm:$0xff]  }
  0xf1   : > { %3475 = vmatprep.subr.bf16.mxu0 %v5105_v25  ;;  %3733 = vmatprep.subr.bf16.mxu1 %v5107_v26  ;;  %v5168_v4 = vld [vmem:[%s6581_s9 + $0x200] ss:$16 sps:$4 sm:$0xff]   ;;  %v5179_v7 = vld [vmem:[%s6581_s9 + $0x22c] ss:$16 sps:$4 sm:$0xff]   ;;  %v5177_v9 = vld [vmem:[%s6581_s9 + $0x228] ss:$16 sps:$4 sm:$0xff]  }
  0xf2   : > { %v5174_v8 = vld [vmem:[%s6581_s9 + $0x220] ss:$16 sps:$4 sm:$0xff]   ;;  %v5182_v10 = vld [vmem:[%s6581_s9 + $0x244] ss:$16 sps:$4 sm:$0xff]   ;;  %v5185_v11 = vld [vmem:[%s6581_s9 + $0x24c] ss:$16 sps:$4 sm:$0xff]  }
  0xf3   : > { %v5180_v12 = vld [vmem:[%s6581_s9 + $0x240] ss:$16 sps:$4 sm:$0xff]   ;;  %v5183_v13 = vld [vmem:[%s6581_s9 + $0x248] ss:$16 sps:$4 sm:$0xff]   ;;  %v5188_v14 = vld [vmem:[%s6581_s9 + $0x264] ss:$16 sps:$4 sm:$0xff]  }
  0xf4   : > { %3476 = vmatpush1.bf16.msra.mxu0 %v5109_v27  ;;  %3734 = vmatpush1.bf16.msra.mxu1 %v5110_v28  ;;  %v5191_v15 = vld [vmem:[%s6581_s9 + $0x26c] ss:$16 sps:$4 sm:$0xff]   ;;  %v5186_v16 = vld [vmem:[%s6581_s9 + $0x260] ss:$16 sps:$4 sm:$0xff]   ;;  %v5189_v17 = vld [vmem:[%s6581_s9 + $0x268] ss:$16 sps:$4 sm:$0xff]  }
  0xf5   : > { %3477 = vmatprep.subr.bf16.mxu0 %v5111_v29  ;;  %3735 = vmatprep.subr.bf16.mxu1 %v5113_v30  ;;  %v5194_v18 = vld [vmem:[%s6581_s9 + $0x284] ss:$16 sps:$4 sm:$0xff]   ;;  %v5197_v19 = vld [vmem:[%s6581_s9 + $0x28c] ss:$16 sps:$4 sm:$0xff]   ;;  %v5192_v20 = vld [vmem:[%s6581_s9 + $0x280] ss:$16 sps:$4 sm:$0xff]  }
  0xf6   : > { %v5195_v21 = vld [vmem:[%s6581_s9 + $0x288] ss:$16 sps:$4 sm:$0xff]   ;;  %v5200_v22 = vld [vmem:[%s6581_s9 + $0x2a4] ss:$16 sps:$4 sm:$0xff]   ;;  %v5203_v23 = vld [vmem:[%s6581_s9 + $0x2ac] ss:$16 sps:$4 sm:$0xff]  }
  0xf7   : > { %v5198_v24 = vld [vmem:[%s6581_s9 + $0x2a0] ss:$16 sps:$4 sm:$0xff]   ;;  %v5201_v25 = vld [vmem:[%s6581_s9 + $0x2a8] ss:$16 sps:$4 sm:$0xff]   ;;  %v5206_v26 = vld [vmem:[%s6581_s9 + $0x2c4] ss:$16 sps:$4 sm:$0xff]  }
  0xf8   : > { %3478 = vmatpush1.bf16.msra.mxu0 %v5115_v31  ;;  %3736 = vmatpush1.bf16.msra.mxu1 %v5116_v32  ;;  %v5209_v27 = vld [vmem:[%s6581_s9 + $0x2cc] ss:$16 sps:$4 sm:$0xff]   ;;  %v5204_v29 = vld [vmem:[%s6581_s9 + $0x2c0] ss:$16 sps:$4 sm:$0xff]   ;;  %v5207_v30 = vld [vmem:[%s6581_s9 + $0x2c8] ss:$16 sps:$4 sm:$0xff]  }
  0xf9   : > { %3479 = vmatprep.subr.bf16.mxu0 %v5117_v33  ;;  %3737 = vmatprep.subr.bf16.mxu1 %v5119_v34  ;;  %v5266_v28 = vld [vmem:[%s7062_s0 + $0xc] ss:$48 sps:$4 sm:$0xff]   ;;  %v5212_v31 = vld [vmem:[%s6581_s9 + $0x2e4] ss:$16 sps:$4 sm:$0xff]   ;;  %v5210_v33 = vld [vmem:[%s6581_s9 + $0x2e0] ss:$16 sps:$4 sm:$0xff]  }
  0xfa   : > { %v5215_v32 = vld [vmem:[%s6581_s9 + $0x2ec] ss:$16 sps:$4 sm:$0xff]   ;;  %v5213_v34 = vld [vmem:[%s6581_s9 + $0x2e8] ss:$16 sps:$4 sm:$0xff]   ;;  %p1056_p9 = scmp.lt.s32.totalorder %s4507_s6, 127 }
  0xfc   : > { %3480 = vmatpush1.bf16.msra.mxu0 %v5121_v35  ;;  %3738 = vmatpush1.bf16.msra.mxu1 %v5122_v36  ;;  %v5218_v35 = vld [vmem:[%s6581_s9 + $0x304] ss:$16 sps:$4 sm:$0xff]   ;;  %v5221_v36 = vld [vmem:[%s6581_s9 + $0x30c] ss:$16 sps:$4 sm:$0xff]   ;;  %s7074_s6 = smov (!%p1056_p9, %s4507_s6), 127 }
  0xfd   : > { %3481 = vmatprep.subr.bf16.mxu0 %v5123_v37  ;;  %3739 = vmatprep.subr.bf16.mxu1 %v5125_v38  ;;  %v5216_v37 = vld [vmem:[%s6581_s9 + $0x300] ss:$16 sps:$4 sm:$0xff]   ;;  %v5219_v38 = vld [vmem:[%s6581_s9 + $0x308] ss:$16 sps:$4 sm:$0xff]   ;;  %s4508_s7 = sshll.u32 %s7074_s6, 2 }
  0xfe   : > { %s6881_s11 = scalar_lea.vmem %s7065_s3, %s4508_s7 }
 0x100   : > { %3482 = vmatpush1.bf16.msra.mxu0 %v5127_v39  ;;  %3740 = vmatpush1.bf16.msra.mxu1 %v5128_v40  ;;  %v5224_v39 = vld [vmem:[%s6581_s9 + $0x324] ss:$16 sps:$4 sm:$0xff]   ;;  %v5227_v40 = vld [vmem:[%s6581_s9 + $0x32c] ss:$16 sps:$4 sm:$0xff]  }
 0x101   : > { %3483 = vmatprep.subr.bf16.mxu0 %v5129_v41  ;;  %3741 = vmatprep.subr.bf16.mxu1 %v5131_v42  ;;  %v5222_v41 = vld [vmem:[%s6581_s9 + $0x320] ss:$16 sps:$4 sm:$0xff]   ;;  %v5225_v42 = vld [vmem:[%s6581_s9 + $0x328] ss:$16 sps:$4 sm:$0xff]  }
 0x104   : > { %3484 = vmatpush1.bf16.msra.mxu0 %v5133_v43  ;;  %3742 = vmatpush1.bf16.msra.mxu1 %v5134_v44  ;;  %v5230_v43 = vld [vmem:[%s6581_s9 + $0x344] ss:$16 sps:$4 sm:$0xff]   ;;  %v5233_v44 = vld [vmem:[%s6581_s9 + $0x34c] ss:$16 sps:$4 sm:$0xff]  }
 0x105   : > { %3485 = vmatprep.subr.bf16.mxu0 %v5135_v45  ;;  %3743 = vmatprep.subr.bf16.mxu1 %v5137_v46  ;;  %v5228_v45 = vld [vmem:[%s6581_s9 + $0x340] ss:$16 sps:$4 sm:$0xff]   ;;  %v5231_v46 = vld [vmem:[%s6581_s9 + $0x348] ss:$16 sps:$4 sm:$0xff]  }
 0x108   : > { %3486 = vmatpush1.bf16.msra.mxu0 %v5139_v47  ;;  %3744 = vmatpush1.bf16.msra.mxu1 %v5140_v48  ;;  %v5236_v47 = vld [vmem:[%s6581_s9 + $0x364] ss:$16 sps:$4 sm:$0xff]   ;;  %v5239_v48 = vld [vmem:[%s6581_s9 + $0x36c] ss:$16 sps:$4 sm:$0xff]  }
 0x109   : > { %3487 = vmatprep.subr.bf16.mxu0 %v5141_v49  ;;  %3745 = vmatprep.subr.bf16.mxu1 %v5143_v50  ;;  %v5234_v49 = vld [vmem:[%s6581_s9 + $0x360] ss:$16 sps:$4 sm:$0xff]   ;;  %v5237_v50 = vld [vmem:[%s6581_s9 + $0x368] ss:$16 sps:$4 sm:$0xff]  }
 0x10c   : > { %3488 = vmatpush1.bf16.msra.mxu0 %v5145_v51  ;;  %3746 = vmatpush1.bf16.msra.mxu1 %v5146_v52  ;;  %v5242_v51 = vld [vmem:[%s6581_s9 + $0x384] ss:$16 sps:$4 sm:$0xff]   ;;  %v5245_v52 = vld [vmem:[%s6581_s9 + $0x38c] ss:$16 sps:$4 sm:$0xff]  }
 0x10d   : > { %3489 = vmatprep.subr.bf16.mxu0 %v5147_v53  ;;  %3747 = vmatprep.subr.bf16.mxu1 %v5149_v54  ;;  %v5240_v53 = vld [vmem:[%s6581_s9 + $0x380] ss:$16 sps:$4 sm:$0xff]   ;;  %v5243_v54 = vld [vmem:[%s6581_s9 + $0x388] ss:$16 sps:$4 sm:$0xff]  }
 0x110   : > { %3490 = vmatpush1.bf16.msra.mxu0 %v5151_v55  ;;  %3748 = vmatpush1.bf16.msra.mxu1 %v5152_v56  ;;  %v5248_v55 = vld [vmem:[%s6581_s9 + $0x3a4] ss:$16 sps:$4 sm:$0xff]   ;;  %v5251_v56 = vld [vmem:[%s6581_s9 + $0x3ac] ss:$16 sps:$4 sm:$0xff]  }
 0x111   : > { %3491 = vmatprep.subr.bf16.mxu0 %v5153_v57  ;;  %3749 = vmatprep.subr.bf16.mxu1 %v5155_v58  ;;  %v5246_v57 = vld [vmem:[%s6581_s9 + $0x3a0] ss:$16 sps:$4 sm:$0xff]   ;;  %v5249_v58 = vld [vmem:[%s6581_s9 + $0x3a8] ss:$16 sps:$4 sm:$0xff]  }
 0x114   : > { %3492 = vmatpush1.bf16.msra.mxu0 %v5157_v59  ;;  %3750 = vmatpush1.bf16.msra.mxu1 %v5158_v60  ;;  %v5254_v59 = vld [vmem:[%s6581_s9 + $0x3c4] ss:$16 sps:$4 sm:$0xff]   ;;  %v5257_v60 = vld [vmem:[%s6581_s9 + $0x3cc] ss:$16 sps:$4 sm:$0xff]  }
 0x115   : > { %3493 = vmatprep.subr.bf16.mxu0 %v5159_v61  ;;  %3751 = vmatprep.subr.bf16.mxu1 %v5161_v62  ;;  %v5252_v61 = vld [vmem:[%s6581_s9 + $0x3c0] ss:$16 sps:$4 sm:$0xff]   ;;  %v5255_v62 = vld [vmem:[%s6581_s9 + $0x3c8] ss:$16 sps:$4 sm:$0xff]  }
 0x118   : > { %3494 = vmatpush1.bf16.msra.mxu0 %v5163_v63  ;;  %3752 = vmatpush1.bf16.msra.mxu1 %v5164_v0  ;;  %v5260_v63 = vld [vmem:[%s6581_s9 + $0x3e4] ss:$16 sps:$4 sm:$0xff]   ;;  %v5263_v0 = vld [vmem:[%s6581_s9 + $0x3ec] ss:$16 sps:$4 sm:$0xff]  }
 0x119   : > { %3506 = vmatprep.subr.bf16.mxu0 %v5170_v1  ;;  %3764 = vmatprep.subr.bf16.mxu1 %v5173_v2  ;;  %v5258_v1 = vld [vmem:[%s6581_s9 + $0x3e0] ss:$16 sps:$4 sm:$0xff]   ;;  %v5261_v2 = vld [vmem:[%s6581_s9 + $0x3e8] ss:$16 sps:$4 sm:$0xff]  }
 0x11b   : > { %3496 = vmatmul.mubr.bf16.vlgmr.msra.gmra.mrb[0].mxu0 %v5165_v3  ;;  %3754 = vmatmul.mubr.bf16.vlgmr.msra.gmra.mrb[0].mxu1 %v5165_v3  ;;  %v5269_v3 = vld [vmem:[%s6581_s9 + $0x404] ss:$16 sps:$4 sm:$0xff]  }
 0x11c   : > { %3507 = vmatpush1.bf16.msra.mxu0 %v5168_v4  ;;  %3765 = vmatpush1.bf16.msra.mxu1 %v5171_v5  ;;  %v5272_v4 = vld [vmem:[%s6581_s9 + $0x40c] ss:$16 sps:$4 sm:$0xff]   ;;  %v5264_v5 = vld [vmem:[%s7062_s0 + $0x8] ss:$48 sps:$4 sm:$0xff]  }
 0x11d   : > { %3508 = vmatprep.subr.bf16.mxu0 %v5176_v6  ;;  %3766 = vmatprep.subr.bf16.mxu1 %v5179_v7  ;;  %v5267_v6 = vld [vmem:[%s6581_s9 + $0x400] ss:$16 sps:$4 sm:$0xff]   ;;  %v5270_v7 = vld [vmem:[%s6581_s9 + $0x408] ss:$16 sps:$4 sm:$0xff]  }
 0x11e   : > { %3538 = vmatprep.mubr.bf16.mxu0 %v5266_v28  ;;  %3796 = vmatprep.mubr.bf16.mxu1 %v5266_v28  ;;  %v5300_v28 = vld [vmem:[%s6581_s9 + $0x4a8] ss:$16 sps:$4 sm:$0xff]  }
 0x120   : > { %3509 = vmatpush1.bf16.msra.mxu0 %v5174_v8  ;;  %3767 = vmatpush1.bf16.msra.mxu1 %v5177_v9  ;;  %v5275_v8 = vld [vmem:[%s6581_s9 + $0x424] ss:$16 sps:$4 sm:$0xff]   ;;  %v5278_v9 = vld [vmem:[%s6581_s9 + $0x42c] ss:$16 sps:$4 sm:$0xff]  }
 0x121   : > { %3510 = vmatprep.subr.bf16.mxu0 %v5182_v10  ;;  %3768 = vmatprep.subr.bf16.mxu1 %v5185_v11  ;;  %v5365_v10 = vld [vmem:[%s7062_s0 + $0x14] ss:$48 sps:$4 sm:$0xff]   ;;  %v5273_v11 = vld [vmem:[%s6581_s9 + $0x420] ss:$16 sps:$4 sm:$0xff]  }
 0x124   : > { %3511 = vmatpush1.bf16.msra.mxu0 %v5180_v12  ;;  %3769 = vmatpush1.bf16.msra.mxu1 %v5183_v13  ;;  %v5276_v12 = vld [vmem:[%s6581_s9 + $0x428] ss:$16 sps:$4 sm:$0xff]   ;;  %v5281_v13 = vld [vmem:[%s6581_s9 + $0x444] ss:$16 sps:$4 sm:$0xff]  }
 0x125   : > { %3512 = vmatprep.subr.bf16.mxu0 %v5188_v14  ;;  %3770 = vmatprep.subr.bf16.mxu1 %v5191_v15  ;;  %v5284_v14 = vld [vmem:[%s6581_s9 + $0x44c] ss:$16 sps:$4 sm:$0xff]   ;;  %v5279_v15 = vld [vmem:[%s6581_s9 + $0x440] ss:$16 sps:$4 sm:$0xff]  }
 0x128   : > { %3513 = vmatpush1.bf16.msra.mxu0 %v5186_v16  ;;  %3771 = vmatpush1.bf16.msra.mxu1 %v5189_v17  ;;  %v5282_v16 = vld [vmem:[%s6581_s9 + $0x448] ss:$16 sps:$4 sm:$0xff]   ;;  %v5287_v17 = vld [vmem:[%s6581_s9 + $0x464] ss:$16 sps:$4 sm:$0xff]  }
 0x129   : > { %3514 = vmatprep.subr.bf16.mxu0 %v5194_v18  ;;  %3772 = vmatprep.subr.bf16.mxu1 %v5197_v19  ;;  %v5290_v18 = vld [vmem:[%s6581_s9 + $0x46c] ss:$16 sps:$4 sm:$0xff]   ;;  %v5285_v19 = vld [vmem:[%s6581_s9 + $0x460] ss:$16 sps:$4 sm:$0xff]  }
 0x12c   : > { %3515 = vmatpush1.bf16.msra.mxu0 %v5192_v20  ;;  %3773 = vmatpush1.bf16.msra.mxu1 %v5195_v21  ;;  %v5288_v20 = vld [vmem:[%s6581_s9 + $0x468] ss:$16 sps:$4 sm:$0xff]   ;;  %v5293_v21 = vld [vmem:[%s6581_s9 + $0x484] ss:$16 sps:$4 sm:$0xff]  }
 0x12d   : > { %3516 = vmatprep.subr.bf16.mxu0 %v5200_v22  ;;  %3774 = vmatprep.subr.bf16.mxu1 %v5203_v23  ;;  %v5296_v22 = vld [vmem:[%s6581_s9 + $0x48c] ss:$16 sps:$4 sm:$0xff]   ;;  %v5291_v23 = vld [vmem:[%s6581_s9 + $0x480] ss:$16 sps:$4 sm:$0xff]  }
 0x130   : > { %3517 = vmatpush1.bf16.msra.mxu0 %v5198_v24  ;;  %3775 = vmatpush1.bf16.msra.mxu1 %v5201_v25  ;;  %v5294_v24 = vld [vmem:[%s6581_s9 + $0x488] ss:$16 sps:$4 sm:$0xff]   ;;  %v5299_v25 = vld [vmem:[%s6581_s9 + $0x4a4] ss:$16 sps:$4 sm:$0xff]  }
 0x131   : > { %3518 = vmatprep.subr.bf16.mxu0 %v5206_v26  ;;  %3776 = vmatprep.subr.bf16.mxu1 %v5209_v27  ;;  %v5302_v26 = vld [vmem:[%s6581_s9 + $0x4ac] ss:$16 sps:$4 sm:$0xff]   ;;  %v5297_v27 = vld [vmem:[%s6581_s9 + $0x4a0] ss:$16 sps:$4 sm:$0xff]  }
 0x134   : > { %3519 = vmatpush1.bf16.msra.mxu0 %v5204_v29  ;;  %3777 = vmatpush1.bf16.msra.mxu1 %v5207_v30  ;;  %v5305_v29 = vld [vmem:[%s6581_s9 + $0x4c4] ss:$16 sps:$4 sm:$0xff]   ;;  %v5308_v30 = vld [vmem:[%s6581_s9 + $0x4cc] ss:$16 sps:$4 sm:$0xff]  }
 0x135   : > { %3520 = vmatprep.subr.bf16.mxu0 %v5212_v31  ;;  %3778 = vmatprep.subr.bf16.mxu1 %v5215_v32  ;;  %v5303_v31 = vld [vmem:[%s6581_s9 + $0x4c0] ss:$16 sps:$4 sm:$0xff]   ;;  %v5306_v32 = vld [vmem:[%s6581_s9 + $0x4c8] ss:$16 sps:$4 sm:$0xff]  }
 0x138   : > { %3521 = vmatpush1.bf16.msra.mxu0 %v5210_v33  ;;  %3779 = vmatpush1.bf16.msra.mxu1 %v5213_v34  ;;  %v5311_v33 = vld [vmem:[%s6581_s9 + $0x4e4] ss:$16 sps:$4 sm:$0xff]   ;;  %v5314_v34 = vld [vmem:[%s6581_s9 + $0x4ec] ss:$16 sps:$4 sm:$0xff]  }
 0x139   : > { %3522 = vmatprep.subr.bf16.mxu0 %v5218_v35  ;;  %3780 = vmatprep.subr.bf16.mxu1 %v5221_v36  ;;  %v5309_v35 = vld [vmem:[%s6581_s9 + $0x4e0] ss:$16 sps:$4 sm:$0xff]   ;;  %v5312_v36 = vld [vmem:[%s6581_s9 + $0x4e8] ss:$16 sps:$4 sm:$0xff]  }
 0x13c   : > { %3523 = vmatpush1.bf16.msra.mxu0 %v5216_v37  ;;  %3781 = vmatpush1.bf16.msra.mxu1 %v5219_v38  ;;  %v5317_v37 = vld [vmem:[%s6581_s9 + $0x504] ss:$16 sps:$4 sm:$0xff]   ;;  %v5320_v38 = vld [vmem:[%s6581_s9 + $0x50c] ss:$16 sps:$4 sm:$0xff]  }
 0x13d   : > { %3524 = vmatprep.subr.bf16.mxu0 %v5224_v39  ;;  %3782 = vmatprep.subr.bf16.mxu1 %v5227_v40  ;;  %v5315_v39 = vld [vmem:[%s6581_s9 + $0x500] ss:$16 sps:$4 sm:$0xff]   ;;  %v5318_v40 = vld [vmem:[%s6581_s9 + $0x508] ss:$16 sps:$4 sm:$0xff]  }
 0x140   : > { %3525 = vmatpush1.bf16.msra.mxu0 %v5222_v41  ;;  %3783 = vmatpush1.bf16.msra.mxu1 %v5225_v42  ;;  %v5323_v41 = vld [vmem:[%s6581_s9 + $0x524] ss:$16 sps:$4 sm:$0xff]   ;;  %v5326_v42 = vld [vmem:[%s6581_s9 + $0x52c] ss:$16 sps:$4 sm:$0xff]  }
 0x141   : > { %3526 = vmatprep.subr.bf16.mxu0 %v5230_v43  ;;  %3784 = vmatprep.subr.bf16.mxu1 %v5233_v44  ;;  %v5321_v43 = vld [vmem:[%s6581_s9 + $0x520] ss:$16 sps:$4 sm:$0xff]   ;;  %v5324_v44 = vld [vmem:[%s6581_s9 + $0x528] ss:$16 sps:$4 sm:$0xff]  }
 0x144   : > { %3527 = vmatpush1.bf16.msra.mxu0 %v5228_v45  ;;  %3785 = vmatpush1.bf16.msra.mxu1 %v5231_v46  ;;  %v5329_v45 = vld [vmem:[%s6581_s9 + $0x544] ss:$16 sps:$4 sm:$0xff]   ;;  %v5332_v46 = vld [vmem:[%s6581_s9 + $0x54c] ss:$16 sps:$4 sm:$0xff]  }
 0x145   : > { %3528 = vmatprep.subr.bf16.mxu0 %v5236_v47  ;;  %3786 = vmatprep.subr.bf16.mxu1 %v5239_v48  ;;  %v5327_v47 = vld [vmem:[%s6581_s9 + $0x540] ss:$16 sps:$4 sm:$0xff]   ;;  %v5330_v48 = vld [vmem:[%s6581_s9 + $0x548] ss:$16 sps:$4 sm:$0xff]  }
 0x148   : > { %3529 = vmatpush1.bf16.msra.mxu0 %v5234_v49  ;;  %3787 = vmatpush1.bf16.msra.mxu1 %v5237_v50  ;;  %v5335_v49 = vld [vmem:[%s6581_s9 + $0x564] ss:$16 sps:$4 sm:$0xff]   ;;  %v5338_v50 = vld [vmem:[%s6581_s9 + $0x56c] ss:$16 sps:$4 sm:$0xff]  }
 0x149   : > { %3530 = vmatprep.subr.bf16.mxu0 %v5242_v51  ;;  %3788 = vmatprep.subr.bf16.mxu1 %v5245_v52  ;;  %v5333_v51 = vld [vmem:[%s6581_s9 + $0x560] ss:$16 sps:$4 sm:$0xff]   ;;  %v5336_v52 = vld [vmem:[%s6581_s9 + $0x568] ss:$16 sps:$4 sm:$0xff]  }
 0x14c   : > { %3531 = vmatpush1.bf16.msra.mxu0 %v5240_v53  ;;  %3789 = vmatpush1.bf16.msra.mxu1 %v5243_v54  ;;  %v5341_v53 = vld [vmem:[%s6581_s9 + $0x584] ss:$16 sps:$4 sm:$0xff]   ;;  %v5344_v54 = vld [vmem:[%s6581_s9 + $0x58c] ss:$16 sps:$4 sm:$0xff]  }
 0x14d   : > { %3532 = vmatprep.subr.bf16.mxu0 %v5248_v55  ;;  %3790 = vmatprep.subr.bf16.mxu1 %v5251_v56  ;;  %v5339_v55 = vld [vmem:[%s6581_s9 + $0x580] ss:$16 sps:$4 sm:$0xff]   ;;  %v5342_v56 = vld [vmem:[%s6581_s9 + $0x588] ss:$16 sps:$4 sm:$0xff]  }
 0x150   : > { %3533 = vmatpush1.bf16.msra.mxu0 %v5246_v57  ;;  %3791 = vmatpush1.bf16.msra.mxu1 %v5249_v58  ;;  %v5347_v57 = vld [vmem:[%s6581_s9 + $0x5a4] ss:$16 sps:$4 sm:$0xff]   ;;  %v5350_v58 = vld [vmem:[%s6581_s9 + $0x5ac] ss:$16 sps:$4 sm:$0xff]  }
 0x151   : > { %3534 = vmatprep.subr.bf16.mxu0 %v5254_v59  ;;  %3792 = vmatprep.subr.bf16.mxu1 %v5257_v60  ;;  %v5345_v59 = vld [vmem:[%s6581_s9 + $0x5a0] ss:$16 sps:$4 sm:$0xff]   ;;  %v5348_v60 = vld [vmem:[%s6581_s9 + $0x5a8] ss:$16 sps:$4 sm:$0xff]  }
 0x154   : > { %3535 = vmatpush1.bf16.msra.mxu0 %v5252_v61  ;;  %3793 = vmatpush1.bf16.msra.mxu1 %v5255_v62  ;;  %v5353_v61 = vld [vmem:[%s6581_s9 + $0x5c4] ss:$16 sps:$4 sm:$0xff]   ;;  %v5356_v62 = vld [vmem:[%s6581_s9 + $0x5cc] ss:$16 sps:$4 sm:$0xff]  }
 0x155   : > { %3536 = vmatprep.subr.bf16.mxu0 %v5260_v63  ;;  %3794 = vmatprep.subr.bf16.mxu1 %v5263_v0  ;;  %v5351_v63 = vld [vmem:[%s6581_s9 + $0x5c0] ss:$16 sps:$4 sm:$0xff]   ;;  %v5354_v0 = vld [vmem:[%s6581_s9 + $0x5c8] ss:$16 sps:$4 sm:$0xff]  }
 0x158   : > { %3537 = vmatpush1.bf16.msra.mxu0 %v5258_v1  ;;  %3795 = vmatpush1.bf16.msra.mxu1 %v5261_v2  ;;  %v5359_v1 = vld [vmem:[%s6581_s9 + $0x5e4] ss:$16 sps:$4 sm:$0xff]   ;;  %v5362_v2 = vld [vmem:[%s6581_s9 + $0x5ec] ss:$16 sps:$4 sm:$0xff]  }
 0x159   : > { %3549 = vmatprep.subr.bf16.mxu0 %v5269_v3  ;;  %3807 = vmatprep.subr.bf16.mxu1 %v5272_v4  ;;  %v5357_v3 = vld [vmem:[%s6581_s9 + $0x5e0] ss:$16 sps:$4 sm:$0xff]   ;;  %v5360_v4 = vld [vmem:[%s6581_s9 + $0x5e8] ss:$16 sps:$4 sm:$0xff]  }
 0x15b   : > { %3539 = vmatmul.mubr.bf16.vlgmr.msra.gmra.mrb[0].mxu0 %v5264_v5  ;;  %3797 = vmatmul.mubr.bf16.vlgmr.msra.gmra.mrb[0].mxu1 %v5264_v5  ;;  %v5368_v5 = vld [vmem:[%s6581_s9 + $0x604] ss:$16 sps:$4 sm:$0xff]  }
 0x15c   : > { %3550 = vmatpush1.bf16.msra.mxu0 %v5267_v6  ;;  %3808 = vmatpush1.bf16.msra.mxu1 %v5270_v7  ;;  %v5371_v6 = vld [vmem:[%s6581_s9 + $0x60c] ss:$16 sps:$4 sm:$0xff]   ;;  %v5363_v7 = vld [vmem:[%s7062_s0 + $0x10] ss:$48 sps:$4 sm:$0xff]  }
 0x15d   : > { %3551 = vmatprep.subr.bf16.mxu0 %v5275_v8  ;;  %3809 = vmatprep.subr.bf16.mxu1 %v5278_v9  ;;  %v5366_v8 = vld [vmem:[%s6581_s9 + $0x600] ss:$16 sps:$4 sm:$0xff]   ;;  %v5369_v9 = vld [vmem:[%s6581_s9 + $0x608] ss:$16 sps:$4 sm:$0xff]  }
 0x15e   : > { %3581 = vmatprep.mubr.bf16.mxu0 %v5365_v10  ;;  %3839 = vmatprep.mubr.bf16.mxu1 %v5365_v10  ;;  %v5374_v10 = vld [vmem:[%s6581_s9 + $0x624] ss:$16 sps:$4 sm:$0xff]  }
 0x160   : > { %3552 = vmatpush1.bf16.msra.mxu0 %v5273_v11  ;;  %3810 = vmatpush1.bf16.msra.mxu1 %v5276_v12  ;;  %v5377_v11 = vld [vmem:[%s6581_s9 + $0x62c] ss:$16 sps:$4 sm:$0xff]  }
 0x161   : > { %3553 = vmatprep.subr.bf16.mxu0 %v5281_v13  ;;  %3811 = vmatprep.subr.bf16.mxu1 %v5284_v14  ;;  %v5464_v12 = vld [vmem:[%s7062_s0 + $0x1c] ss:$48 sps:$4 sm:$0xff]   ;;  %v5372_v13 = vld [vmem:[%s6581_s9 + $0x620] ss:$16 sps:$4 sm:$0xff]   ;;  %v5375_v14 = vld [vmem:[%s6581_s9 + $0x628] ss:$16 sps:$4 sm:$0xff]  }
 0x164   : > { %3554 = vmatpush1.bf16.msra.mxu0 %v5279_v15  ;;  %3812 = vmatpush1.bf16.msra.mxu1 %v5282_v16  ;;  %v5380_v15 = vld [vmem:[%s6581_s9 + $0x644] ss:$16 sps:$4 sm:$0xff]   ;;  %v5383_v16 = vld [vmem:[%s6581_s9 + $0x64c] ss:$16 sps:$4 sm:$0xff]  }
 0x165   : > { %3555 = vmatprep.subr.bf16.mxu0 %v5287_v17  ;;  %3813 = vmatprep.subr.bf16.mxu1 %v5290_v18  ;;  %v5378_v17 = vld [vmem:[%s6581_s9 + $0x640] ss:$16 sps:$4 sm:$0xff]   ;;  %v5381_v18 = vld [vmem:[%s6581_s9 + $0x648] ss:$16 sps:$4 sm:$0xff]  }
 0x168   : > { %3556 = vmatpush1.bf16.msra.mxu0 %v5285_v19  ;;  %3814 = vmatpush1.bf16.msra.mxu1 %v5288_v20  ;;  %v5386_v19 = vld [vmem:[%s6581_s9 + $0x664] ss:$16 sps:$4 sm:$0xff]   ;;  %v5389_v20 = vld [vmem:[%s6581_s9 + $0x66c] ss:$16 sps:$4 sm:$0xff]  }
 0x169   : > { %3557 = vmatprep.subr.bf16.mxu0 %v5293_v21  ;;  %3815 = vmatprep.subr.bf16.mxu1 %v5296_v22  ;;  %v5384_v21 = vld [vmem:[%s6581_s9 + $0x660] ss:$16 sps:$4 sm:$0xff]   ;;  %v5387_v22 = vld [vmem:[%s6581_s9 + $0x668] ss:$16 sps:$4 sm:$0xff]  }
 0x16c   : > { %3558 = vmatpush1.bf16.msra.mxu0 %v5291_v23  ;;  %3816 = vmatpush1.bf16.msra.mxu1 %v5294_v24  ;;  %v5392_v23 = vld [vmem:[%s6581_s9 + $0x684] ss:$16 sps:$4 sm:$0xff]   ;;  %v5395_v24 = vld [vmem:[%s6581_s9 + $0x68c] ss:$16 sps:$4 sm:$0xff]  }
 0x16d   : > { %3559 = vmatprep.subr.bf16.mxu0 %v5299_v25  ;;  %3817 = vmatprep.subr.bf16.mxu1 %v5302_v26  ;;  %v5390_v25 = vld [vmem:[%s6581_s9 + $0x680] ss:$16 sps:$4 sm:$0xff]   ;;  %v5393_v26 = vld [vmem:[%s6581_s9 + $0x688] ss:$16 sps:$4 sm:$0xff]  }
 0x170   : > { %3560 = vmatpush1.bf16.msra.mxu0 %v5297_v27  ;;  %3818 = vmatpush1.bf16.msra.mxu1 %v5300_v28  ;;  %v5398_v27 = vld [vmem:[%s6581_s9 + $0x6a4] ss:$16 sps:$4 sm:$0xff]   ;;  %v5401_v28 = vld [vmem:[%s6581_s9 + $0x6ac] ss:$16 sps:$4 sm:$0xff]  }
 0x171   : > { %3561 = vmatprep.subr.bf16.mxu0 %v5305_v29  ;;  %3819 = vmatprep.subr.bf16.mxu1 %v5308_v30  ;;  %v5396_v29 = vld [vmem:[%s6581_s9 + $0x6a0] ss:$16 sps:$4 sm:$0xff]   ;;  %v5399_v30 = vld [vmem:[%s6581_s9 + $0x6a8] ss:$16 sps:$4 sm:$0xff]  }
 0x174   : > { %3562 = vmatpush1.bf16.msra.mxu0 %v5303_v31  ;;  %3820 = vmatpush1.bf16.msra.mxu1 %v5306_v32  ;;  %v5404_v31 = vld [vmem:[%s6581_s9 + $0x6c4] ss:$16 sps:$4 sm:$0xff]   ;;  %v5407_v32 = vld [vmem:[%s6581_s9 + $0x6cc] ss:$16 sps:$4 sm:$0xff]  }
 0x175   : > { %3563 = vmatprep.subr.bf16.mxu0 %v5311_v33  ;;  %3821 = vmatprep.subr.bf16.mxu1 %v5314_v34  ;;  %v5402_v33 = vld [vmem:[%s6581_s9 + $0x6c0] ss:$16 sps:$4 sm:$0xff]   ;;  %v5405_v34 = vld [vmem:[%s6581_s9 + $0x6c8] ss:$16 sps:$4 sm:$0xff]  }
 0x178   : > { %3564 = vmatpush1.bf16.msra.mxu0 %v5309_v35  ;;  %3822 = vmatpush1.bf16.msra.mxu1 %v5312_v36  ;;  %v5410_v35 = vld [vmem:[%s6581_s9 + $0x6e4] ss:$16 sps:$4 sm:$0xff]   ;;  %v5413_v36 = vld [vmem:[%s6581_s9 + $0x6ec] ss:$16 sps:$4 sm:$0xff]  }
 0x179   : > { %3565 = vmatprep.subr.bf16.mxu0 %v5317_v37  ;;  %3823 = vmatprep.subr.bf16.mxu1 %v5320_v38  ;;  %v5408_v37 = vld [vmem:[%s6581_s9 + $0x6e0] ss:$16 sps:$4 sm:$0xff]   ;;  %v5411_v38 = vld [vmem:[%s6581_s9 + $0x6e8] ss:$16 sps:$4 sm:$0xff]  }
 0x17c   : > { %3566 = vmatpush1.bf16.msra.mxu0 %v5315_v39  ;;  %3824 = vmatpush1.bf16.msra.mxu1 %v5318_v40  ;;  %v5416_v39 = vld [vmem:[%s6581_s9 + $0x704] ss:$16 sps:$4 sm:$0xff]   ;;  %v5419_v40 = vld [vmem:[%s6581_s9 + $0x70c] ss:$16 sps:$4 sm:$0xff]  }
 0x17d   : > { %3567 = vmatprep.subr.bf16.mxu0 %v5323_v41  ;;  %3825 = vmatprep.subr.bf16.mxu1 %v5326_v42  ;;  %v5414_v41 = vld [vmem:[%s6581_s9 + $0x700] ss:$16 sps:$4 sm:$0xff]   ;;  %v5417_v42 = vld [vmem:[%s6581_s9 + $0x708] ss:$16 sps:$4 sm:$0xff]  }
 0x180   : > { %3568 = vmatpush1.bf16.msra.mxu0 %v5321_v43  ;;  %3826 = vmatpush1.bf16.msra.mxu1 %v5324_v44  ;;  %v5422_v43 = vld [vmem:[%s6581_s9 + $0x724] ss:$16 sps:$4 sm:$0xff]   ;;  %v5425_v44 = vld [vmem:[%s6581_s9 + $0x72c] ss:$16 sps:$4 sm:$0xff]  }
 0x181   : > { %3569 = vmatprep.subr.bf16.mxu0 %v5329_v45  ;;  %3827 = vmatprep.subr.bf16.mxu1 %v5332_v46  ;;  %v5420_v45 = vld [vmem:[%s6581_s9 + $0x720] ss:$16 sps:$4 sm:$0xff]   ;;  %v5423_v46 = vld [vmem:[%s6581_s9 + $0x728] ss:$16 sps:$4 sm:$0xff]  }
 0x184   : > { %3570 = vmatpush1.bf16.msra.mxu0 %v5327_v47  ;;  %3828 = vmatpush1.bf16.msra.mxu1 %v5330_v48  ;;  %v5428_v47 = vld [vmem:[%s6581_s9 + $0x744] ss:$16 sps:$4 sm:$0xff]   ;;  %v5431_v48 = vld [vmem:[%s6581_s9 + $0x74c] ss:$16 sps:$4 sm:$0xff]  }
 0x185   : > { %3571 = vmatprep.subr.bf16.mxu0 %v5335_v49  ;;  %3829 = vmatprep.subr.bf16.mxu1 %v5338_v50  ;;  %v5426_v49 = vld [vmem:[%s6581_s9 + $0x740] ss:$16 sps:$4 sm:$0xff]   ;;  %v5429_v50 = vld [vmem:[%s6581_s9 + $0x748] ss:$16 sps:$4 sm:$0xff]  }
 0x188   : > { %3572 = vmatpush1.bf16.msra.mxu0 %v5333_v51  ;;  %3830 = vmatpush1.bf16.msra.mxu1 %v5336_v52  ;;  %v5434_v51 = vld [vmem:[%s6581_s9 + $0x764] ss:$16 sps:$4 sm:$0xff]   ;;  %v5437_v52 = vld [vmem:[%s6581_s9 + $0x76c] ss:$16 sps:$4 sm:$0xff]  }
 0x189   : > { %3573 = vmatprep.subr.bf16.mxu0 %v5341_v53  ;;  %3831 = vmatprep.subr.bf16.mxu1 %v5344_v54  ;;  %v5432_v53 = vld [vmem:[%s6581_s9 + $0x760] ss:$16 sps:$4 sm:$0xff]   ;;  %v5435_v54 = vld [vmem:[%s6581_s9 + $0x768] ss:$16 sps:$4 sm:$0xff]  }
 0x18c   : > { %3574 = vmatpush1.bf16.msra.mxu0 %v5339_v55  ;;  %3832 = vmatpush1.bf16.msra.mxu1 %v5342_v56  ;;  %v5440_v55 = vld [vmem:[%s6581_s9 + $0x784] ss:$16 sps:$4 sm:$0xff]   ;;  %v5443_v56 = vld [vmem:[%s6581_s9 + $0x78c] ss:$16 sps:$4 sm:$0xff]  }
 0x18d   : > { %3575 = vmatprep.subr.bf16.mxu0 %v5347_v57  ;;  %3833 = vmatprep.subr.bf16.mxu1 %v5350_v58  ;;  %v5438_v57 = vld [vmem:[%s6581_s9 + $0x780] ss:$16 sps:$4 sm:$0xff]   ;;  %v5441_v58 = vld [vmem:[%s6581_s9 + $0x788] ss:$16 sps:$4 sm:$0xff]  }
 0x190   : > { %3576 = vmatpush1.bf16.msra.mxu0 %v5345_v59  ;;  %3834 = vmatpush1.bf16.msra.mxu1 %v5348_v60  ;;  %v5446_v59 = vld [vmem:[%s6581_s9 + $0x7a4] ss:$16 sps:$4 sm:$0xff]   ;;  %v5449_v60 = vld [vmem:[%s6581_s9 + $0x7ac] ss:$16 sps:$4 sm:$0xff]  }
 0x191   : > { %3577 = vmatprep.subr.bf16.mxu0 %v5353_v61  ;;  %3835 = vmatprep.subr.bf16.mxu1 %v5356_v62  ;;  %v5444_v61 = vld [vmem:[%s6581_s9 + $0x7a0] ss:$16 sps:$4 sm:$0xff]   ;;  %v5447_v62 = vld [vmem:[%s6581_s9 + $0x7a8] ss:$16 sps:$4 sm:$0xff]  }
 0x194   : > { %3578 = vmatpush1.bf16.msra.mxu0 %v5351_v63  ;;  %3836 = vmatpush1.bf16.msra.mxu1 %v5354_v0  ;;  %v5452_v63 = vld [vmem:[%s6581_s9 + $0x7c4] ss:$16 sps:$4 sm:$0xff]   ;;  %v5455_v0 = vld [vmem:[%s6581_s9 + $0x7cc] ss:$16 sps:$4 sm:$0xff]  }
 0x195   : > { %3579 = vmatprep.subr.bf16.mxu0 %v5359_v1  ;;  %3837 = vmatprep.subr.bf16.mxu1 %v5362_v2  ;;  %v5450_v1 = vld [vmem:[%s6581_s9 + $0x7c0] ss:$16 sps:$4 sm:$0xff]   ;;  %v5453_v2 = vld [vmem:[%s6581_s9 + $0x7c8] ss:$16 sps:$4 sm:$0xff]  }
 0x198   : > { %3580 = vmatpush1.bf16.msra.mxu0 %v5357_v3  ;;  %3838 = vmatpush1.bf16.msra.mxu1 %v5360_v4  ;;  %v5458_v3 = vld [vmem:[%s6581_s9 + $0x7e4] ss:$16 sps:$4 sm:$0xff]   ;;  %v5461_v4 = vld [vmem:[%s6581_s9 + $0x7ec] ss:$16 sps:$4 sm:$0xff]  }
 0x199   : > { %3592 = vmatprep.subr.bf16.mxu0 %v5368_v5  ;;  %3850 = vmatprep.subr.bf16.mxu1 %v5371_v6  ;;  %v5456_v5 = vld [vmem:[%s6581_s9 + $0x7e0] ss:$16 sps:$4 sm:$0xff]   ;;  %v5459_v6 = vld [vmem:[%s6581_s9 + $0x7e8] ss:$16 sps:$4 sm:$0xff]  }
 0x19b   : > { %3582 = vmatmul.mubr.bf16.vlgmr.msra.gmra.mrb[0].mxu0 %v5363_v7  ;;  %3840 = vmatmul.mubr.bf16.vlgmr.msra.gmra.mrb[0].mxu1 %v5363_v7  ;;  %v5467_v7 = vld [vmem:[%s6581_s9 + $0x804] ss:$16 sps:$4 sm:$0xff]  }
 0x19c   : > { %3593 = vmatpush1.bf16.msra.mxu0 %v5366_v8  ;;  %3851 = vmatpush1.bf16.msra.mxu1 %v5369_v9  ;;  %v5470_v8 = vld [vmem:[%s6581_s9 + $0x80c] ss:$16 sps:$4 sm:$0xff]   ;;  %v5462_v9 = vld [vmem:[%s7062_s0 + $0x18] ss:$48 sps:$4 sm:$0xff]  }
 0x19d   : > { %3594 = vmatprep.subr.bf16.mxu0 %v5374_v10  ;;  %3852 = vmatprep.subr.bf16.mxu1 %v5377_v11  ;;  %v5465_v10 = vld [vmem:[%s6581_s9 + $0x800] ss:$16 sps:$4 sm:$0xff]   ;;  %v5468_v11 = vld [vmem:[%s6581_s9 + $0x808] ss:$16 sps:$4 sm:$0xff]  }
 0x19e   : > { %3624 = vmatprep.mubr.bf16.mxu0 %v5464_v12  ;;  %3882 = vmatprep.mubr.bf16.mxu1 %v5464_v12  ;;  %v5473_v12 = vld [vmem:[%s6581_s9 + $0x824] ss:$16 sps:$4 sm:$0xff]  }
 0x1a0   : > { %3595 = vmatpush1.bf16.msra.mxu0 %v5372_v13  ;;  %3853 = vmatpush1.bf16.msra.mxu1 %v5375_v14  ;;  %v5476_v13 = vld [vmem:[%s6581_s9 + $0x82c] ss:$16 sps:$4 sm:$0xff]   ;;  %v5563_v14 = vld [vmem:[%s7062_s0 + $0x24] ss:$48 sps:$4 sm:$0xff]  }
 0x1a1   : > { %3596 = vmatprep.subr.bf16.mxu0 %v5380_v15  ;;  %3854 = vmatprep.subr.bf16.mxu1 %v5383_v16  ;;  %v5471_v15 = vld [vmem:[%s6581_s9 + $0x820] ss:$16 sps:$4 sm:$0xff]   ;;  %v5474_v16 = vld [vmem:[%s6581_s9 + $0x828] ss:$16 sps:$4 sm:$0xff]  }
 0x1a4   : > { %3597 = vmatpush1.bf16.msra.mxu0 %v5378_v17  ;;  %3855 = vmatpush1.bf16.msra.mxu1 %v5381_v18  ;;  %v5479_v17 = vld [vmem:[%s6581_s9 + $0x844] ss:$16 sps:$4 sm:$0xff]   ;;  %v5482_v18 = vld [vmem:[%s6581_s9 + $0x84c] ss:$16 sps:$4 sm:$0xff]  }
 0x1a5   : > { %3598 = vmatprep.subr.bf16.mxu0 %v5386_v19  ;;  %3856 = vmatprep.subr.bf16.mxu1 %v5389_v20  ;;  %v5477_v19 = vld [vmem:[%s6581_s9 + $0x840] ss:$16 sps:$4 sm:$0xff]   ;;  %v5480_v20 = vld [vmem:[%s6581_s9 + $0x848] ss:$16 sps:$4 sm:$0xff]  }
 0x1a8   : > { %3599 = vmatpush1.bf16.msra.mxu0 %v5384_v21  ;;  %3857 = vmatpush1.bf16.msra.mxu1 %v5387_v22  ;;  %v5485_v21 = vld [vmem:[%s6581_s9 + $0x864] ss:$16 sps:$4 sm:$0xff]   ;;  %v5488_v22 = vld [vmem:[%s6581_s9 + $0x86c] ss:$16 sps:$4 sm:$0xff]  }
 0x1a9   : > { %3600 = vmatprep.subr.bf16.mxu0 %v5392_v23  ;;  %3858 = vmatprep.subr.bf16.mxu1 %v5395_v24  ;;  %v5483_v23 = vld [vmem:[%s6581_s9 + $0x860] ss:$16 sps:$4 sm:$0xff]   ;;  %v5486_v24 = vld [vmem:[%s6581_s9 + $0x868] ss:$16 sps:$4 sm:$0xff]  }
 0x1ac   : > { %3601 = vmatpush1.bf16.msra.mxu0 %v5390_v25  ;;  %3859 = vmatpush1.bf16.msra.mxu1 %v5393_v26  ;;  %v5491_v25 = vld [vmem:[%s6581_s9 + $0x884] ss:$16 sps:$4 sm:$0xff]   ;;  %v5494_v26 = vld [vmem:[%s6581_s9 + $0x88c] ss:$16 sps:$4 sm:$0xff]  }
 0x1ad   : > { %3602 = vmatprep.subr.bf16.mxu0 %v5398_v27  ;;  %3860 = vmatprep.subr.bf16.mxu1 %v5401_v28  ;;  %v5489_v27 = vld [vmem:[%s6581_s9 + $0x880] ss:$16 sps:$4 sm:$0xff]   ;;  %v5492_v28 = vld [vmem:[%s6581_s9 + $0x888] ss:$16 sps:$4 sm:$0xff]  }
 0x1b0   : > { %3603 = vmatpush1.bf16.msra.mxu0 %v5396_v29  ;;  %3861 = vmatpush1.bf16.msra.mxu1 %v5399_v30  ;;  %v5497_v29 = vld [vmem:[%s6581_s9 + $0x8a4] ss:$16 sps:$4 sm:$0xff]   ;;  %v5500_v30 = vld [vmem:[%s6581_s9 + $0x8ac] ss:$16 sps:$4 sm:$0xff]  }
 0x1b1   : > { %3604 = vmatprep.subr.bf16.mxu0 %v5404_v31  ;;  %3862 = vmatprep.subr.bf16.mxu1 %v5407_v32  ;;  %v5495_v31 = vld [vmem:[%s6581_s9 + $0x8a0] ss:$16 sps:$4 sm:$0xff]   ;;  %v5498_v32 = vld [vmem:[%s6581_s9 + $0x8a8] ss:$16 sps:$4 sm:$0xff]  }
 0x1b4   : > { %3605 = vmatpush1.bf16.msra.mxu0 %v5402_v33  ;;  %3863 = vmatpush1.bf16.msra.mxu1 %v5405_v34  ;;  %v5503_v33 = vld [vmem:[%s6581_s9 + $0x8c4] ss:$16 sps:$4 sm:$0xff]   ;;  %v5506_v34 = vld [vmem:[%s6581_s9 + $0x8cc] ss:$16 sps:$4 sm:$0xff]  }
 0x1b5   : > { %3606 = vmatprep.subr.bf16.mxu0 %v5410_v35  ;;  %3864 = vmatprep.subr.bf16.mxu1 %v5413_v36  ;;  %v5501_v35 = vld [vmem:[%s6581_s9 + $0x8c0] ss:$16 sps:$4 sm:$0xff]   ;;  %v5504_v36 = vld [vmem:[%s6581_s9 + $0x8c8] ss:$16 sps:$4 sm:$0xff]  }
 0x1b8   : > { %3607 = vmatpush1.bf16.msra.mxu0 %v5408_v37  ;;  %3865 = vmatpush1.bf16.msra.mxu1 %v5411_v38  ;;  %v5509_v37 = vld [vmem:[%s6581_s9 + $0x8e4] ss:$16 sps:$4 sm:$0xff]   ;;  %v5512_v38 = vld [vmem:[%s6581_s9 + $0x8ec] ss:$16 sps:$4 sm:$0xff]  }
 0x1b9   : > { %3608 = vmatprep.subr.bf16.mxu0 %v5416_v39  ;;  %3866 = vmatprep.subr.bf16.mxu1 %v5419_v40  ;;  %v5507_v39 = vld [vmem:[%s6581_s9 + $0x8e0] ss:$16 sps:$4 sm:$0xff]   ;;  %v5510_v40 = vld [vmem:[%s6581_s9 + $0x8e8] ss:$16 sps:$4 sm:$0xff]  }
 0x1bc   : > { %3609 = vmatpush1.bf16.msra.mxu0 %v5414_v41  ;;  %3867 = vmatpush1.bf16.msra.mxu1 %v5417_v42  ;;  %v5515_v41 = vld [vmem:[%s6581_s9 + $0x904] ss:$16 sps:$4 sm:$0xff]   ;;  %v5518_v42 = vld [vmem:[%s6581_s9 + $0x90c] ss:$16 sps:$4 sm:$0xff]  }
 0x1bd   : > { %3610 = vmatprep.subr.bf16.mxu0 %v5422_v43  ;;  %3868 = vmatprep.subr.bf16.mxu1 %v5425_v44  ;;  %v5513_v43 = vld [vmem:[%s6581_s9 + $0x900] ss:$16 sps:$4 sm:$0xff]   ;;  %v5516_v44 = vld [vmem:[%s6581_s9 + $0x908] ss:$16 sps:$4 sm:$0xff]  }
 0x1c0   : > { %3611 = vmatpush1.bf16.msra.mxu0 %v5420_v45  ;;  %3869 = vmatpush1.bf16.msra.mxu1 %v5423_v46  ;;  %v5521_v45 = vld [vmem:[%s6581_s9 + $0x924] ss:$16 sps:$4 sm:$0xff]   ;;  %v5524_v46 = vld [vmem:[%s6581_s9 + $0x92c] ss:$16 sps:$4 sm:$0xff]  }
 0x1c1   : > { %3612 = vmatprep.subr.bf16.mxu0 %v5428_v47  ;;  %3870 = vmatprep.subr.bf16.mxu1 %v5431_v48  ;;  %v5519_v47 = vld [vmem:[%s6581_s9 + $0x920] ss:$16 sps:$4 sm:$0xff]   ;;  %v5522_v48 = vld [vmem:[%s6581_s9 + $0x928] ss:$16 sps:$4 sm:$0xff]  }
 0x1c4   : > { %3613 = vmatpush1.bf16.msra.mxu0 %v5426_v49  ;;  %3871 = vmatpush1.bf16.msra.mxu1 %v5429_v50  ;;  %v5527_v49 = vld [vmem:[%s6581_s9 + $0x944] ss:$16 sps:$4 sm:$0xff]   ;;  %v5530_v50 = vld [vmem:[%s6581_s9 + $0x94c] ss:$16 sps:$4 sm:$0xff]  }
 0x1c5   : > { %3614 = vmatprep.subr.bf16.mxu0 %v5434_v51  ;;  %3872 = vmatprep.subr.bf16.mxu1 %v5437_v52  ;;  %v5525_v51 = vld [vmem:[%s6581_s9 + $0x940] ss:$16 sps:$4 sm:$0xff]   ;;  %v5528_v52 = vld [vmem:[%s6581_s9 + $0x948] ss:$16 sps:$4 sm:$0xff]  }
 0x1c8   : > { %3615 = vmatpush1.bf16.msra.mxu0 %v5432_v53  ;;  %3873 = vmatpush1.bf16.msra.mxu1 %v5435_v54  ;;  %v5533_v53 = vld [vmem:[%s6581_s9 + $0x964] ss:$16 sps:$4 sm:$0xff]   ;;  %v5536_v54 = vld [vmem:[%s6581_s9 + $0x96c] ss:$16 sps:$4 sm:$0xff]  }
 0x1c9   : > { %3616 = vmatprep.subr.bf16.mxu0 %v5440_v55  ;;  %3874 = vmatprep.subr.bf16.mxu1 %v5443_v56  ;;  %v5531_v55 = vld [vmem:[%s6581_s9 + $0x960] ss:$16 sps:$4 sm:$0xff]   ;;  %v5534_v56 = vld [vmem:[%s6581_s9 + $0x968] ss:$16 sps:$4 sm:$0xff]  }
 0x1cc   : > { %3617 = vmatpush1.bf16.msra.mxu0 %v5438_v57  ;;  %3875 = vmatpush1.bf16.msra.mxu1 %v5441_v58  ;;  %v5539_v57 = vld [vmem:[%s6581_s9 + $0x984] ss:$16 sps:$4 sm:$0xff]   ;;  %v5542_v58 = vld [vmem:[%s6581_s9 + $0x98c] ss:$16 sps:$4 sm:$0xff]  }
 0x1cd   : > { %3618 = vmatprep.subr.bf16.mxu0 %v5446_v59  ;;  %3876 = vmatprep.subr.bf16.mxu1 %v5449_v60  ;;  %v5537_v59 = vld [vmem:[%s6581_s9 + $0x980] ss:$16 sps:$4 sm:$0xff]   ;;  %v5540_v60 = vld [vmem:[%s6581_s9 + $0x988] ss:$16 sps:$4 sm:$0xff]  }
 0x1d0   : > { %3619 = vmatpush1.bf16.msra.mxu0 %v5444_v61  ;;  %3877 = vmatpush1.bf16.msra.mxu1 %v5447_v62  ;;  %v5545_v61 = vld [vmem:[%s6581_s9 + $0x9a4] ss:$16 sps:$4 sm:$0xff]   ;;  %v5548_v62 = vld [vmem:[%s6581_s9 + $0x9ac] ss:$16 sps:$4 sm:$0xff]  }
 0x1d1   : > { %3620 = vmatprep.subr.bf16.mxu0 %v5452_v63  ;;  %3878 = vmatprep.subr.bf16.mxu1 %v5455_v0  ;;  %v5543_v63 = vld [vmem:[%s6581_s9 + $0x9a0] ss:$16 sps:$4 sm:$0xff]   ;;  %v5546_v0 = vld [vmem:[%s6581_s9 + $0x9a8] ss:$16 sps:$4 sm:$0xff]  }
 0x1d4   : > { %3621 = vmatpush1.bf16.msra.mxu0 %v5450_v1  ;;  %3879 = vmatpush1.bf16.msra.mxu1 %v5453_v2  ;;  %v5551_v1 = vld [vmem:[%s6581_s9 + $0x9c4] ss:$16 sps:$4 sm:$0xff]   ;;  %v5554_v2 = vld [vmem:[%s6581_s9 + $0x9cc] ss:$16 sps:$4 sm:$0xff]  }
 0x1d5   : > { %3622 = vmatprep.subr.bf16.mxu0 %v5458_v3  ;;  %3880 = vmatprep.subr.bf16.mxu1 %v5461_v4  ;;  %v5549_v3 = vld [vmem:[%s6581_s9 + $0x9c0] ss:$16 sps:$4 sm:$0xff]   ;;  %v5552_v4 = vld [vmem:[%s6581_s9 + $0x9c8] ss:$16 sps:$4 sm:$0xff]  }
 0x1d8   : > { %3623 = vmatpush1.bf16.msra.mxu0 %v5456_v5  ;;  %3881 = vmatpush1.bf16.msra.mxu1 %v5459_v6  ;;  %v5557_v5 = vld [vmem:[%s6581_s9 + $0x9e4] ss:$16 sps:$4 sm:$0xff]   ;;  %v5560_v6 = vld [vmem:[%s6581_s9 + $0x9ec] ss:$16 sps:$4 sm:$0xff]  }
 0x1d9   : > { %3635 = vmatprep.subr.bf16.mxu0 %v5467_v7  ;;  %3893 = vmatprep.subr.bf16.mxu1 %v5470_v8  ;;  %v5555_v7 = vld [vmem:[%s6581_s9 + $0x9e0] ss:$16 sps:$4 sm:$0xff]   ;;  %v5558_v8 = vld [vmem:[%s6581_s9 + $0x9e8] ss:$16 sps:$4 sm:$0xff]  }
 0x1db   : > { %3625 = vmatmul.mubr.bf16.vlgmr.msra.gmra.mrb[0].mxu0 %v5462_v9  ;;  %3883 = vmatmul.mubr.bf16.vlgmr.msra.gmra.mrb[0].mxu1 %v5462_v9  ;;  %v5566_v9 = vld [vmem:[%s6581_s9 + $0xa04] ss:$16 sps:$4 sm:$0xff]  }
 0x1dc   : > { %3636 = vmatpush1.bf16.msra.mxu0 %v5465_v10  ;;  %3894 = vmatpush1.bf16.msra.mxu1 %v5468_v11  ;;  %v5569_v10 = vld [vmem:[%s6581_s9 + $0xa0c] ss:$16 sps:$4 sm:$0xff]   ;;  %v5561_v11 = vld [vmem:[%s7062_s0 + $0x20] ss:$48 sps:$4 sm:$0xff]  }
 0x1dd   : > { %3637 = vmatprep.subr.bf16.mxu0 %v5473_v12  ;;  %3895 = vmatprep.subr.bf16.mxu1 %v5476_v13  ;;  %v5564_v12 = vld [vmem:[%s6581_s9 + $0xa00] ss:$16 sps:$4 sm:$0xff]   ;;  %v5567_v13 = vld [vmem:[%s6581_s9 + $0xa08] ss:$16 sps:$4 sm:$0xff]  }
 0x1de   : > { %3667 = vmatprep.mubr.bf16.mxu0 %v5563_v14  ;;  %3925 = vmatprep.mubr.bf16.mxu1 %v5563_v14  ;;  %v5572_v14 = vld [vmem:[%s6581_s9 + $0xa24] ss:$16 sps:$4 sm:$0xff]  }
 0x1e0   : > { %3638 = vmatpush1.bf16.msra.mxu0 %v5471_v15  ;;  %3896 = vmatpush1.bf16.msra.mxu1 %v5474_v16  ;;  %v5575_v15 = vld [vmem:[%s6581_s9 + $0xa2c] ss:$16 sps:$4 sm:$0xff]  }
 0x1e1   : > { %3639 = vmatprep.subr.bf16.mxu0 %v5479_v17  ;;  %3897 = vmatprep.subr.bf16.mxu1 %v5482_v18  ;;  %v5662_v16 = vld [vmem:[%s7062_s0 + $0x2c] ss:$48 sps:$4 sm:$0xff]   ;;  %v5570_v17 = vld [vmem:[%s6581_s9 + $0xa20] ss:$16 sps:$4 sm:$0xff]   ;;  %v5573_v18 = vld [vmem:[%s6581_s9 + $0xa28] ss:$16 sps:$4 sm:$0xff]  }
 0x1e4   : > { %3640 = vmatpush1.bf16.msra.mxu0 %v5477_v19  ;;  %3898 = vmatpush1.bf16.msra.mxu1 %v5480_v20  ;;  %v5578_v19 = vld [vmem:[%s6581_s9 + $0xa44] ss:$16 sps:$4 sm:$0xff]   ;;  %v5581_v20 = vld [vmem:[%s6581_s9 + $0xa4c] ss:$16 sps:$4 sm:$0xff]  }
 0x1e5   : > { %3641 = vmatprep.subr.bf16.mxu0 %v5485_v21  ;;  %3899 = vmatprep.subr.bf16.mxu1 %v5488_v22  ;;  %v5576_v21 = vld [vmem:[%s6581_s9 + $0xa40] ss:$16 sps:$4 sm:$0xff]   ;;  %v5579_v22 = vld [vmem:[%s6581_s9 + $0xa48] ss:$16 sps:$4 sm:$0xff]  }
 0x1e8   : > { %3642 = vmatpush1.bf16.msra.mxu0 %v5483_v23  ;;  %3900 = vmatpush1.bf16.msra.mxu1 %v5486_v24  ;;  %v5584_v23 = vld [vmem:[%s6581_s9 + $0xa64] ss:$16 sps:$4 sm:$0xff]   ;;  %v5587_v24 = vld [vmem:[%s6581_s9 + $0xa6c] ss:$16 sps:$4 sm:$0xff]  }
 0x1e9   : > { %3643 = vmatprep.subr.bf16.mxu0 %v5491_v25  ;;  %3901 = vmatprep.subr.bf16.mxu1 %v5494_v26  ;;  %v5582_v25 = vld [vmem:[%s6581_s9 + $0xa60] ss:$16 sps:$4 sm:$0xff]   ;;  %v5585_v26 = vld [vmem:[%s6581_s9 + $0xa68] ss:$16 sps:$4 sm:$0xff]  }
 0x1ec   : > { %3644 = vmatpush1.bf16.msra.mxu0 %v5489_v27  ;;  %3902 = vmatpush1.bf16.msra.mxu1 %v5492_v28  ;;  %v5590_v27 = vld [vmem:[%s6581_s9 + $0xa84] ss:$16 sps:$4 sm:$0xff]   ;;  %v5593_v28 = vld [vmem:[%s6581_s9 + $0xa8c] ss:$16 sps:$4 sm:$0xff]  }
 0x1ed   : > { %3645 = vmatprep.subr.bf16.mxu0 %v5497_v29  ;;  %3903 = vmatprep.subr.bf16.mxu1 %v5500_v30  ;;  %v5588_v29 = vld [vmem:[%s6581_s9 + $0xa80] ss:$16 sps:$4 sm:$0xff]   ;;  %v5591_v30 = vld [vmem:[%s6581_s9 + $0xa88] ss:$16 sps:$4 sm:$0xff]  }
 0x1f0   : > { %3646 = vmatpush1.bf16.msra.mxu0 %v5495_v31  ;;  %3904 = vmatpush1.bf16.msra.mxu1 %v5498_v32  ;;  %v5596_v31 = vld [vmem:[%s6581_s9 + $0xaa4] ss:$16 sps:$4 sm:$0xff]   ;;  %v5599_v32 = vld [vmem:[%s6581_s9 + $0xaac] ss:$16 sps:$4 sm:$0xff]  }
 0x1f1   : > { %3647 = vmatprep.subr.bf16.mxu0 %v5503_v33  ;;  %3905 = vmatprep.subr.bf16.mxu1 %v5506_v34  ;;  %v5594_v33 = vld [vmem:[%s6581_s9 + $0xaa0] ss:$16 sps:$4 sm:$0xff]   ;;  %v5597_v34 = vld [vmem:[%s6581_s9 + $0xaa8] ss:$16 sps:$4 sm:$0xff]  }
 0x1f4   : > { %3648 = vmatpush1.bf16.msra.mxu0 %v5501_v35  ;;  %3906 = vmatpush1.bf16.msra.mxu1 %v5504_v36  ;;  %v5602_v35 = vld [vmem:[%s6581_s9 + $0xac4] ss:$16 sps:$4 sm:$0xff]   ;;  %v5605_v36 = vld [vmem:[%s6581_s9 + $0xacc] ss:$16 sps:$4 sm:$0xff]  }
 0x1f5   : > { %3649 = vmatprep.subr.bf16.mxu0 %v5509_v37  ;;  %3907 = vmatprep.subr.bf16.mxu1 %v5512_v38  ;;  %v5600_v37 = vld [vmem:[%s6581_s9 + $0xac0] ss:$16 sps:$4 sm:$0xff]   ;;  %v5603_v38 = vld [vmem:[%s6581_s9 + $0xac8] ss:$16 sps:$4 sm:$0xff]  }
 0x1f8   : > { %3650 = vmatpush1.bf16.msra.mxu0 %v5507_v39  ;;  %3908 = vmatpush1.bf16.msra.mxu1 %v5510_v40  ;;  %v5608_v39 = vld [vmem:[%s6581_s9 + $0xae4] ss:$16 sps:$4 sm:$0xff]   ;;  %v5611_v40 = vld [vmem:[%s6581_s9 + $0xaec] ss:$16 sps:$4 sm:$0xff]  }
 0x1f9   : > { %3651 = vmatprep.subr.bf16.mxu0 %v5515_v41  ;;  %3909 = vmatprep.subr.bf16.mxu1 %v5518_v42  ;;  %v5606_v41 = vld [vmem:[%s6581_s9 + $0xae0] ss:$16 sps:$4 sm:$0xff]   ;;  %v5609_v42 = vld [vmem:[%s6581_s9 + $0xae8] ss:$16 sps:$4 sm:$0xff]  }
 0x1fc   : > { %3652 = vmatpush1.bf16.msra.mxu0 %v5513_v43  ;;  %3910 = vmatpush1.bf16.msra.mxu1 %v5516_v44  ;;  %v5614_v43 = vld [vmem:[%s6581_s9 + $0xb04] ss:$16 sps:$4 sm:$0xff]   ;;  %v5617_v44 = vld [vmem:[%s6581_s9 + $0xb0c] ss:$16 sps:$4 sm:$0xff]  }
 0x1fd   : > { %3653 = vmatprep.subr.bf16.mxu0 %v5521_v45  ;;  %3911 = vmatprep.subr.bf16.mxu1 %v5524_v46  ;;  %v5612_v45 = vld [vmem:[%s6581_s9 + $0xb00] ss:$16 sps:$4 sm:$0xff]   ;;  %v5615_v46 = vld [vmem:[%s6581_s9 + $0xb08] ss:$16 sps:$4 sm:$0xff]  }
 0x200   : > { %3654 = vmatpush1.bf16.msra.mxu0 %v5519_v47  ;;  %3912 = vmatpush1.bf16.msra.mxu1 %v5522_v48  ;;  %v5620_v47 = vld [vmem:[%s6581_s9 + $0xb24] ss:$16 sps:$4 sm:$0xff]   ;;  %v5623_v48 = vld [vmem:[%s6581_s9 + $0xb2c] ss:$16 sps:$4 sm:$0xff]  }
 0x201   : > { %3655 = vmatprep.subr.bf16.mxu0 %v5527_v49  ;;  %3913 = vmatprep.subr.bf16.mxu1 %v5530_v50  ;;  %v5618_v49 = vld [vmem:[%s6581_s9 + $0xb20] ss:$16 sps:$4 sm:$0xff]   ;;  %v5621_v50 = vld [vmem:[%s6581_s9 + $0xb28] ss:$16 sps:$4 sm:$0xff]  }
 0x204   : > { %3656 = vmatpush1.bf16.msra.mxu0 %v5525_v51  ;;  %3914 = vmatpush1.bf16.msra.mxu1 %v5528_v52  ;;  %v5626_v51 = vld [vmem:[%s6581_s9 + $0xb44] ss:$16 sps:$4 sm:$0xff]   ;;  %v5629_v52 = vld [vmem:[%s6581_s9 + $0xb4c] ss:$16 sps:$4 sm:$0xff]  }
 0x205   : > { %3657 = vmatprep.subr.bf16.mxu0 %v5533_v53  ;;  %3915 = vmatprep.subr.bf16.mxu1 %v5536_v54  ;;  %v5624_v53 = vld [vmem:[%s6581_s9 + $0xb40] ss:$16 sps:$4 sm:$0xff]   ;;  %v5627_v54 = vld [vmem:[%s6581_s9 + $0xb48] ss:$16 sps:$4 sm:$0xff]  }
 0x208   : > { %3658 = vmatpush1.bf16.msra.mxu0 %v5531_v55  ;;  %3916 = vmatpush1.bf16.msra.mxu1 %v5534_v56  ;;  %v5632_v55 = vld [vmem:[%s6581_s9 + $0xb64] ss:$16 sps:$4 sm:$0xff]   ;;  %v5635_v56 = vld [vmem:[%s6581_s9 + $0xb6c] ss:$16 sps:$4 sm:$0xff]  }
 0x209   : > { %3659 = vmatprep.subr.bf16.mxu0 %v5539_v57  ;;  %3917 = vmatprep.subr.bf16.mxu1 %v5542_v58  ;;  %v5630_v57 = vld [vmem:[%s6581_s9 + $0xb60] ss:$16 sps:$4 sm:$0xff]   ;;  %v5633_v58 = vld [vmem:[%s6581_s9 + $0xb68] ss:$16 sps:$4 sm:$0xff]  }
 0x20c   : > { %3660 = vmatpush1.bf16.msra.mxu0 %v5537_v59  ;;  %3918 = vmatpush1.bf16.msra.mxu1 %v5540_v60  ;;  %v5638_v59 = vld [vmem:[%s6581_s9 + $0xb84] ss:$16 sps:$4 sm:$0xff]   ;;  %v5641_v60 = vld [vmem:[%s6581_s9 + $0xb8c] ss:$16 sps:$4 sm:$0xff]  }
 0x20d   : > { %3661 = vmatprep.subr.bf16.mxu0 %v5545_v61  ;;  %3919 = vmatprep.subr.bf16.mxu1 %v5548_v62  ;;  %v5636_v61 = vld [vmem:[%s6581_s9 + $0xb80] ss:$16 sps:$4 sm:$0xff]   ;;  %v5639_v62 = vld [vmem:[%s6581_s9 + $0xb88] ss:$16 sps:$4 sm:$0xff]  }
 0x210   : > { %3662 = vmatpush1.bf16.msra.mxu0 %v5543_v63  ;;  %3920 = vmatpush1.bf16.msra.mxu1 %v5546_v0  ;;  %v5644_v63 = vld [vmem:[%s6581_s9 + $0xba4] ss:$16 sps:$4 sm:$0xff]   ;;  %v5647_v0 = vld [vmem:[%s6581_s9 + $0xbac] ss:$16 sps:$4 sm:$0xff]  }
 0x211   : > { %3663 = vmatprep.subr.bf16.mxu0 %v5551_v1  ;;  %3921 = vmatprep.subr.bf16.mxu1 %v5554_v2  ;;  %v5642_v1 = vld [vmem:[%s6581_s9 + $0xba0] ss:$16 sps:$4 sm:$0xff]   ;;  %v5645_v2 = vld [vmem:[%s6581_s9 + $0xba8] ss:$16 sps:$4 sm:$0xff]  }
 0x214   : > { %3664 = vmatpush1.bf16.msra.mxu0 %v5549_v3  ;;  %3922 = vmatpush1.bf16.msra.mxu1 %v5552_v4  ;;  %v5650_v3 = vld [vmem:[%s6581_s9 + $0xbc4] ss:$16 sps:$4 sm:$0xff]   ;;  %v5653_v4 = vld [vmem:[%s6581_s9 + $0xbcc] ss:$16 sps:$4 sm:$0xff]  }
 0x215   : > { %3665 = vmatprep.subr.bf16.mxu0 %v5557_v5  ;;  %3923 = vmatprep.subr.bf16.mxu1 %v5560_v6  ;;  %v5648_v5 = vld [vmem:[%s6581_s9 + $0xbc0] ss:$16 sps:$4 sm:$0xff]   ;;  %v5651_v6 = vld [vmem:[%s6581_s9 + $0xbc8] ss:$16 sps:$4 sm:$0xff]  }
 0x218   : > { %3666 = vmatpush1.bf16.msra.mxu0 %v5555_v7  ;;  %3924 = vmatpush1.bf16.msra.mxu1 %v5558_v8  ;;  %v5656_v7 = vld [vmem:[%s6581_s9 + $0xbe4] ss:$16 sps:$4 sm:$0xff]   ;;  %v5659_v8 = vld [vmem:[%s6581_s9 + $0xbec] ss:$16 sps:$4 sm:$0xff]  }
 0x219   : > { %3678 = vmatprep.subr.bf16.mxu0 %v5566_v9  ;;  %3936 = vmatprep.subr.bf16.mxu1 %v5569_v10  ;;  %v5654_v9 = vld [vmem:[%s6581_s9 + $0xbe0] ss:$16 sps:$4 sm:$0xff]   ;;  %v5657_v10 = vld [vmem:[%s6581_s9 + $0xbe8] ss:$16 sps:$4 sm:$0xff]   ;;  %s4506_s9 = sshll.u32 %s5725_s17, 2  ;;  %s7078_s17 = smov (!%p1061_p11, %s5725_s17), 1 }
 0x21a   : > { %p1051_p10 = scmp.lt.s32.totalorder %s4506_s9, 7  ;;  %s4942_s27 = sshll.u32 %s7078_s17, 4 }
 0x21b   : > { %3668 = vmatmul.mubr.bf16.vlgmr.msra.gmra.mrb[0].mxu0 %v5561_v11  ;;  %3926 = vmatmul.mubr.bf16.vlgmr.msra.gmra.mrb[0].mxu1 %v5561_v11  ;;  %v5663_v11 = vld [vmem:[%s6881_s11 + $0x40] sm:$0xff]   ;;  %s1065_s30 = scalar_lea.vmem %s7066_s4, %s4942_s27 }
 0x21c   : > { %3679 = vmatpush1.bf16.msra.mxu0 %v5564_v12  ;;  %3937 = vmatpush1.bf16.msra.mxu1 %v5567_v13  ;;  %v5664_v12 = vld [vmem:[%s6881_s11 + $0xc0] sm:$0xff]   ;;  %v5660_v13 = vld [vmem:[%s7062_s0 + $0x28] ss:$48 sps:$4 sm:$0xff]   ;;  %s7076_s9 = smov (!%p1051_p10, %s4506_s9), 7 }
 0x21d   : > { %3680 = vmatprep.subr.bf16.mxu0 %v5572_v14  ;;  %3938 = vmatprep.subr.bf16.mxu1 %v5575_v15  ;;  %v5665_v14 = vld [vmem:[%s6881_s11] sm:$0xff]   ;;  %s1053_s26 = scalar_lea.vmem %s7064_s2, %s7076_s9 }
 0x21e   : > { %3710 = vmatprep.mubr.bf16.mxu0 %v5662_v16  ;;  %3968 = vmatprep.mubr.bf16.mxu1 %v5662_v16  ;;  %v5666_v15 = vld [vmem:[%s6881_s11 + $0x80] sm:$0xff]   ;;  %v5667_v16 = vld [vmem:[%s6881_s11 + $0x48] sm:$0xff]  }
 0x220   : > { %3681 = vmatpush1.bf16.msra.mxu0 %v5570_v17  ;;  %3939 = vmatpush1.bf16.msra.mxu1 %v5573_v18  ;;  %v5668_v17 = vld [vmem:[%s6881_s11 + $0xc8] sm:$0xff]  }
 0x221   : > { %3682 = vmatprep.subr.bf16.mxu0 %v5578_v19  ;;  %3940 = vmatprep.subr.bf16.mxu1 %v5581_v20  ;;  %v5669_v18 = vld [vmem:[%s6881_s11 + $0x8] sm:$0xff]   ;;  %v5671_v20 = vld [vmem:[%s6881_s11 + $0x50] sm:$0xff]  }
 0x222   : > { %v5670_v19 = vld [vmem:[%s6881_s11 + $0x88] sm:$0xff]  }
 0x224   : > { %3683 = vmatpush1.bf16.msra.mxu0 %v5576_v21  ;;  %3941 = vmatpush1.bf16.msra.mxu1 %v5579_v22  ;;  %v5672_v21 = vld [vmem:[%s6881_s11 + $0xd0] sm:$0xff]  }
 0x225   : > { %3684 = vmatprep.subr.bf16.mxu0 %v5584_v23  ;;  %3942 = vmatprep.subr.bf16.mxu1 %v5587_v24  ;;  %v5673_v22 = vld [vmem:[%s6881_s11 + $0x10] sm:$0xff]   ;;  %v5675_v24 = vld [vmem:[%s6881_s11 + $0x58] sm:$0xff]  }
 0x226   : > { %v5674_v23 = vld [vmem:[%s6881_s11 + $0x90] sm:$0xff]  }
 0x228   : > { %3685 = vmatpush1.bf16.msra.mxu0 %v5582_v25  ;;  %3943 = vmatpush1.bf16.msra.mxu1 %v5585_v26  ;;  %v5676_v25 = vld [vmem:[%s6881_s11 + $0xd8] sm:$0xff]  }
 0x229   : > { %3686 = vmatprep.subr.bf16.mxu0 %v5590_v27  ;;  %3944 = vmatprep.subr.bf16.mxu1 %v5593_v28  ;;  %v5677_v26 = vld [vmem:[%s6881_s11 + $0x18] sm:$0xff]   ;;  %v5679_v28 = vld [vmem:[%s6881_s11 + $0x60] sm:$0xff]  }
 0x22a   : > { %v5678_v27 = vld [vmem:[%s6881_s11 + $0x98] sm:$0xff]  }
 0x22c   : > { %3687 = vmatpush1.bf16.msra.mxu0 %v5588_v29  ;;  %3945 = vmatpush1.bf16.msra.mxu1 %v5591_v30  ;;  %v5680_v29 = vld [vmem:[%s6881_s11 + $0xe0] sm:$0xff]  }
 0x22d   : > { %3688 = vmatprep.subr.bf16.mxu0 %v5596_v31  ;;  %3946 = vmatprep.subr.bf16.mxu1 %v5599_v32  ;;  %v5681_v30 = vld [vmem:[%s6881_s11 + $0x20] sm:$0xff]   ;;  %v5683_v32 = vld [vmem:[%s6881_s11 + $0x68] sm:$0xff]  }
 0x22e   : > { %v5682_v31 = vld [vmem:[%s6881_s11 + $0xa0] sm:$0xff]  }
 0x230   : > { %3689 = vmatpush1.bf16.msra.mxu0 %v5594_v33  ;;  %3947 = vmatpush1.bf16.msra.mxu1 %v5597_v34  ;;  %v5684_v33 = vld [vmem:[%s6881_s11 + $0xe8] sm:$0xff]  }
 0x231   : > { %3690 = vmatprep.subr.bf16.mxu0 %v5602_v35  ;;  %3948 = vmatprep.subr.bf16.mxu1 %v5605_v36  ;;  %v5685_v34 = vld [vmem:[%s6881_s11 + $0x28] sm:$0xff]   ;;  %v5687_v36 = vld [vmem:[%s6881_s11 + $0x70] sm:$0xff]  }
 0x232   : > { %v5686_v35 = vld [vmem:[%s6881_s11 + $0xa8] sm:$0xff]  }
 0x234   : > { %3691 = vmatpush1.bf16.msra.mxu0 %v5600_v37  ;;  %3949 = vmatpush1.bf16.msra.mxu1 %v5603_v38  ;;  %v5688_v37 = vld [vmem:[%s6881_s11 + $0xf0] sm:$0xff]  }
 0x235   : > { %3692 = vmatprep.subr.bf16.mxu0 %v5608_v39  ;;  %3950 = vmatprep.subr.bf16.mxu1 %v5611_v40  ;;  %v5689_v38 = vld [vmem:[%s6881_s11 + $0x30] sm:$0xff]   ;;  %v5691_v40 = vld [vmem:[%s6881_s11 + $0x78] sm:$0xff]  }
 0x236   : > { %v5690_v39 = vld [vmem:[%s6881_s11 + $0xb0] sm:$0xff]  }
 0x238   : > { %3693 = vmatpush1.bf16.msra.mxu0 %v5606_v41  ;;  %3951 = vmatpush1.bf16.msra.mxu1 %v5609_v42  ;;  %v5692_v41 = vld [vmem:[%s6881_s11 + $0xf8] sm:$0xff]  }
 0x239   : > { %3694 = vmatprep.subr.bf16.mxu0 %v5614_v43  ;;  %3952 = vmatprep.subr.bf16.mxu1 %v5617_v44  ;;  %v5693_v42 = vld [vmem:[%s6881_s11 + $0x38] sm:$0xff]   ;;  %v4008_v44 = vlaneseq }
 0x23a   : > { %v5694_v43 = vld [vmem:[%s6881_s11 + $0xb8] sm:$0xff]  }
 0x23c   : > { %3695 = vmatpush1.bf16.msra.mxu0 %v5612_v45  ;;  %3953 = vmatpush1.bf16.msra.mxu1 %v5615_v46  ;;  %v4009_v45 = vshrl.u32 %v4008_v44, 7 }
 0x23d   : > { %3696 = vmatprep.subr.bf16.mxu0 %v5620_v47  ;;  %3954 = vmatprep.subr.bf16.mxu1 %v5623_v48  ;;  %v4006_v48 = vld [vmem:[%s1053_s26] sm:$0xf] }
 0x23e   : > { %v4010_v46 = vsub.s32 0, %v4009_v45  ;;  %v4018_v47 = vsub.s32 2, %v4009_v45 }
 0x240   : > { %3697 = vmatpush1.bf16.msra.mxu0 %v5618_v49  ;;  %3955 = vmatpush1.bf16.msra.mxu1 %v5621_v50  ;;  %v4014_v49 = vsub.s32 1, %v4009_v45  ;;  %v4022_v50 = vsub.s32 3, %v4009_v45 }
 0x241   : > { %3698 = vmatprep.subr.bf16.mxu0 %v5626_v51  ;;  %3956 = vmatprep.subr.bf16.mxu1 %v5629_v52  ;;  %v4011_v51 = vrot.slane %v4006_v48, %v4010_v46  ;;  %v4019_v52 = vrot.slane %v4006_v48, %v4018_v47 }
 0x244   : > { %3699 = vmatpush1.bf16.msra.mxu0 %v5624_v53  ;;  %3957 = vmatpush1.bf16.msra.mxu1 %v5627_v54  ;;  %v4015_v53 = vrot.slane %v4006_v48, %v4014_v49  ;;  %v4023_v54 = vrot.slane %v4006_v48, %v4022_v50 }
 0x245   : > { %3700 = vmatprep.subr.bf16.mxu0 %v5632_v55  ;;  %3958 = vmatprep.subr.bf16.mxu1 %v5635_v56 }
 0x248   : > { %3701 = vmatpush1.bf16.msra.mxu0 %v5630_v57  ;;  %3959 = vmatpush1.bf16.msra.mxu1 %v5633_v58 }
 0x249   : > { %3702 = vmatprep.subr.bf16.mxu0 %v5638_v59  ;;  %3960 = vmatprep.subr.bf16.mxu1 %v5641_v60 }
 0x24c   : > { %3703 = vmatpush1.bf16.msra.mxu0 %v5636_v61  ;;  %3961 = vmatpush1.bf16.msra.mxu1 %v5639_v62 }
 0x24d   : > { %3704 = vmatprep.subr.bf16.mxu0 %v5644_v63  ;;  %3962 = vmatprep.subr.bf16.mxu1 %v5647_v0 }
 0x250   : > { %3705 = vmatpush1.bf16.msra.mxu0 %v5642_v1  ;;  %3963 = vmatpush1.bf16.msra.mxu1 %v5645_v2 }
 0x251   : > { %3706 = vmatprep.subr.bf16.mxu0 %v5650_v3  ;;  %3964 = vmatprep.subr.bf16.mxu1 %v5653_v4 }
 0x254   : > { %3707 = vmatpush1.bf16.msra.mxu0 %v5648_v5  ;;  %3965 = vmatpush1.bf16.msra.mxu1 %v5651_v6 }
 0x255   : > { %3708 = vmatprep.subr.bf16.mxu0 %v5656_v7  ;;  %3966 = vmatprep.subr.bf16.mxu1 %v5659_v8 }
 0x258   : > { %3709 = vmatpush1.bf16.msra.mxu0 %v5654_v9  ;;  %3967 = vmatpush1.bf16.msra.mxu1 %v5657_v10 }
 0x259   : > { %4943 = vmatprep.subr.bf16.mxu0 %v5663_v11  ;;  %4965 = vmatprep.subr.bf16.mxu1 %v5664_v12 }
 0x25b   : > { %3711 = vmatmul.mubr.bf16.vlgmr.msra.gmra.mrb[0].mxu0 %v5660_v13  ;;  %3969 = vmatmul.mubr.bf16.vlgmr.msra.gmra.mrb[0].mxu1 %v5660_v13 }
 0x25c   : > { %4944 = vmatpush3.bf16.msra.mxu0 %v5665_v14  ;;  %4966 = vmatpush3.bf16.msra.mxu1 %v5666_v15 }
 0x25d   : > { %4945 = vmatprep.subr.bf16.mxu0 %v5667_v16  ;;  %4967 = vmatprep.subr.bf16.mxu1 %v5668_v17 }
 0x260   : > { %4946 = vmatpush3.bf16.msra.mxu0 %v5669_v18  ;;  %4968 = vmatpush3.bf16.msra.mxu1 %v5670_v19 }
 0x261   : > { %4947 = vmatprep.subr.bf16.mxu0 %v5671_v20  ;;  %4969 = vmatprep.subr.bf16.mxu1 %v5672_v21 }
 0x264   : > { %4948 = vmatpush3.bf16.msra.mxu0 %v5673_v22  ;;  %4970 = vmatpush3.bf16.msra.mxu1 %v5674_v23 }
 0x265   : > { %4949 = vmatprep.subr.bf16.mxu0 %v5675_v24  ;;  %4971 = vmatprep.subr.bf16.mxu1 %v5676_v25 }
 0x268   : > { %4950 = vmatpush3.bf16.msra.mxu0 %v5677_v26  ;;  %4972 = vmatpush3.bf16.msra.mxu1 %v5678_v27 }
 0x269   : > { %4951 = vmatprep.subr.bf16.mxu0 %v5679_v28  ;;  %4973 = vmatprep.subr.bf16.mxu1 %v5680_v29 }
 0x26c   : > { %4952 = vmatpush3.bf16.msra.mxu0 %v5681_v30  ;;  %4974 = vmatpush3.bf16.msra.mxu1 %v5682_v31 }
 0x26d   : > { %4953 = vmatprep.subr.bf16.mxu0 %v5683_v32  ;;  %4975 = vmatprep.subr.bf16.mxu1 %v5684_v33 }
 0x270   : > { %4954 = vmatpush3.bf16.msra.mxu0 %v5685_v34  ;;  %4976 = vmatpush3.bf16.msra.mxu1 %v5686_v35 }
 0x271   : > { %4955 = vmatprep.subr.bf16.mxu0 %v5687_v36  ;;  %4977 = vmatprep.subr.bf16.mxu1 %v5688_v37 }
 0x274   : > { %4956 = vmatpush3.bf16.msra.mxu0 %v5689_v38  ;;  %4978 = vmatpush3.bf16.msra.mxu1 %v5690_v39 }
 0x275   : > { %4957 = vmatprep.subr.bf16.mxu0 %v5691_v40  ;;  %4979 = vmatprep.subr.bf16.mxu1 %v5692_v41 }
 0x278   : > { %4958 = vmatpush3.bf16.msra.mxu0 %v5693_v42  ;;  %4980 = vmatpush3.bf16.msra.mxu1 %v5694_v43 }
 0x32e   : > { %v3712_v55 = vpop.f32.mrb[0].mxu0  ;;  %v3970_v56 = vpop.f32.mrb[0].mxu1 }
 0x32f   : > { %v4028_v57 = vadd.f32 %v4011_v51, %v3712_v55  ;;  %v4030_v58 = vadd.f32 %v4019_v52, %v3970_v56  ;;  %v3714_v59 = vpop.f32.mrb[1].mxu0  ;;  %v3972_v60 = vpop.f32.mrb[1].mxu1 }
 0x330   : > { %v4029_v61 = vadd.f32 %v4015_v53, %v3714_v59  ;;  %v4031_v62 = vadd.f32 %v4023_v54, %v3972_v60  ;;  %v3716_v63 = vpop.f32.mrb[2].mxu0  ;;  %v3974_v0 = vpop.f32.mrb[2].mxu1 }
 0x331   : > { %v4032_v1 = vadd.f32 %v4011_v51, %v3716_v63  ;;  %v4034_v2 = vadd.f32 %v4019_v52, %v3974_v0  ;;  %v3718_v3 = vpop.f32.mrb[3].mxu0  ;;  %v3976_v4 = vpop.f32.mrb[3].mxu1  ;;  %v4036_v7 = vmax.f32 %v4028_v57, 0.0  ;;  %v4038_v8 = vmax.f32 %v4030_v58, 0.0 }
 0x332   : > { %v4033_v5 = vadd.f32 %v4015_v53, %v3718_v3  ;;  %v4035_v6 = vadd.f32 %v4023_v54, %v3976_v4  ;;  %v4037_v11 = vmax.f32 %v4029_v61, 0.0  ;;  %v4039_v12 = vmax.f32 %v4031_v62, 0.0 }
 0x333   : > { %v4040_v9 = vmax.f32 %v4032_v1, 0.0  ;;  %v4042_v10 = vmax.f32 %v4034_v2, 0.0 }
 0x334   : > { %v4041_v13 = vmax.f32 %v4033_v5, 0.0  ;;  %v4043_v14 = vmax.f32 %v4035_v6, 0.0 }
 0x335   : > { %v4044_v15 = vpack.c.bf16 %v4040_v9, %v4036_v7  ;;  %v4046_v16 = vpack.c.bf16 %v4042_v10, %v4038_v8 }
 0x336   : > { %v4045_v17 = vpack.c.bf16 %v4041_v13, %v4037_v11  ;;  %v4047_v18 = vpack.c.bf16 %v4043_v14, %v4039_v12 }
 0x338   : > { %4336 = vmatprep.mubr.bf16.mxu0 %v4045_v17  ;;  %4377 = vmatprep.mubr.bf16.mxu1 %v4047_v18 }
 0x339   : > { %4337 = vmatmul.mubr.bf16.vlgmr.msra.gmra.mrb[4].mxu0 %v4044_v15  ;;  %4378 = vmatmul.mubr.bf16.vlgmr.msra.gmra.mrb[4].mxu1 %v4046_v16 }
 0x40c   : > { %v4959_v19 = vpop.f32.mrb[4].mxu0  ;;  %v4981_v20 = vpop.f32.mrb[4].mxu1 }
 0x40d   : > { %v4960_v21 = vpop.f32.mrb[5].mxu0  ;;  %v4982_v22 = vpop.f32.mrb[5].mxu1 }
 0x40e   : > { %v4961_v23 = vadd.f32 %v4960_v21, %v4959_v19  ;;  %v4983_v24 = vadd.f32 %v4982_v22, %v4981_v20  ;;  %v4962_v25 = vpop.f32.mrb[6].mxu0  ;;  %v4984_v26 = vpop.f32.mrb[6].mxu1 }
 0x40f   : > { %v4963_v27 = vpop.f32.mrb[7].mxu0  ;;  %v4985_v28 = vpop.f32.mrb[7].mxu1 }
 0x410   : > { %v4380_v29 = vadd.f32 %v4983_v24, %v4961_v23  ;;  %v4964_v30 = vadd.f32 %v4963_v27, %v4962_v25  ;;  %v4986_v31 = vadd.f32 %v4985_v28, %v4984_v26 }
 0x412   : > { %4387 = vst.msk [vmem:[%s1065_s30] sm:$0xff] %vm4386_vm0, %v4380_v29  ;;  %v4383_v32 = vadd.f32 %v4986_v31, %v4964_v30 }
 0x414   : > { %4388 = vst.msk [vmem:[%s1065_s30 + $0x8] sm:$0xff] %vm4386_vm0, %v4383_v32 }
 0x415 PF: > { %s14_s19 = sadd.s32 1, %s5733_s19   ;;  %s7067_s15 = smov %s5721_s16 }
 0x416   : > { %p11_p12 = scmp.ge.s32.totalorder %s14_s19, 4   ;;  %s7068_s16 = smov %s5795_s23 }
 0x417   : > { %s7069_s17 = smov %s5729_s18  ;;  %s7070_s18 = smov %s7072_s20 }
 0x418   :  { %13 = sbr.rel (!%p11_p12) target bundleno = 3 (0x3), region = 111 }

</bundles_post_ra>
